<compile_context>
chip_gen: v5e
topology: v5e:2x2
jax: 0.10.0
libtpu: 0.0.40
codegen_flags: <defaults>
</compile_context>

<pallas_src>
import functools

import jax
import jax.numpy as jnp
import numpy as np
from jax import lax
from jax.experimental import pallas as pl
from jax.experimental.pallas import tpu as pltpu

LN_EPS = 1e-5                      # PyTorch nn.LayerNorm default
_INV_SQRT2 = 0.7071067811865476


def _round_up(v, m):
    return ((v + m - 1) // m) * m


def _gelu(x, approximate):
    if approximate:
        # tanh-approx GELU: transcendental goes to the EUP slot (free vs VALU).
        return jax.nn.gelu(x, approximate=True)
    # Exact erf-based GELU == PyTorch nn.GELU() default (bit-matching path).
    return 0.5 * x * (1.0 + lax.erf(x * _INV_SQRT2))


def _layernorm_axis0(h, gamma, beta):
    # One-pass stats over the feature axis (axis 0 in the transposed layout):
    # var = E[h^2] - mu^2 drops one full (mid, tile_e) subtract+square pass.
    mu = jnp.mean(h, axis=0, keepdims=True)
    ms = jnp.mean(h * h, axis=0, keepdims=True)
    var = ms - mu * mu
    return (h - mu) * lax.rsqrt(var + LN_EPS) * gamma + beta


def one2one_kernel(edges_ref, x_ref,
                   w1_ref, b1_ref, g1_ref, be1_ref,
                   w2_ref, b2_ref, g2_ref, be2_ref,
                   w3_ref, b3_ref,
                   out_ref, *, c_in, cin_p, cout_p, approx_gelu, mxu_bf16):
    # Explicit matmul precision (review: don't rely on flag-dependent default).
    if mxu_bf16:
        def mm(w_ref, a):
            return jnp.dot(w_ref[...].astype(jnp.bfloat16),
                           a.astype(jnp.bfloat16),
                           preferred_element_type=jnp.float32)
    else:
        def mm(w_ref, a):
            return jnp.dot(w_ref[...], a,
                           preferred_element_type=jnp.float32,
                           precision=lax.Precision.HIGHEST)

    # ---- PairwiseKernel MLP, transposed: (feat, tile_e) slabs, E on lanes ----
    h = mm(w1_ref, edges_ref[...]) + b1_ref[...]
    h = _gelu(_layernorm_axis0(h, g1_ref[...], be1_ref[...]), approx_gelu)
    h = mm(w2_ref, h) + b2_ref[...]
    h = _gelu(_layernorm_axis0(h, g2_ref[...], be2_ref[...]), approx_gelu)
    k = mm(w3_ref, h) + b3_ref[...]
    # k: (cin_p*cout_p, tile_e); row i*cout_p + o == kernels[e, o, i]
    # (padded i/o rows carry zero weights/bias -> zero rows).

    # ---- per-edge (c_out x c_in) @ (c_in x 3): lane-dense slab FMAs ---------
    x = x_ref[...]                                      # (3*cin_p, tE), row d*cin_p + i
    for d in range(3):                                  # static, unrolled
        bx = d * cin_p                                  # sublane-aligned slab base
        acc = k[0:cout_p, :] * x[bx:bx + 1, :]          # i = 0 initializes acc
        for i in range(1, c_in):                        # padded i rows are zero -> skipped
            acc = acc + k[i * cout_p:(i + 1) * cout_p, :] * x[bx + i:bx + i + 1, :]
        out_ref[d * cout_p:(d + 1) * cout_p, :] = acc   # aligned, full-lane store


def one2one_forward(edges, x, params, *, c_in, c_out, tile_e=2048,
                    approximate_gelu=True, mxu_bf16=False):
    """edges: (..., edge_dim), x: (..., c_in, 3) -> (..., c_out, 3)."""
    lead = edges.shape[:-1]
    edge_dim = edges.shape[-1]
    mid = params["w1"].shape[1]
    E = int(np.prod(lead))
    f32 = jnp.float32

    # Sublane-aligned channel padding (review: aligned d-slabs in the tail).
    cin_p = _round_up(c_in, 8)
    cout_p = _round_up(c_out, 8)

    # ---- grid / tile selection ------------------------------------------------
    tile_e = max(128, _round_up(int(tile_e), 128))
    E128 = _round_up(E, 128)
    tile = min(tile_e, E128)
    if tile == E128 and E128 >= 256:
        # Prefer two half tiles over one big tile so both v7x TensorCores get
        # work from the single ("parallel",) grid axis.
        tile = _round_up(E128 // 2, 128)
    n_tiles = int(pl.cdiv(E, tile))
    E_pad = n_tiles * tile

    # ---- transpose so E is the lane axis --------------------------------------
    # TODO(synk): these wrapper-side transposes/pads are separate XLA copies;
    # if profiles show them, have producer/consumer adopt the transposed layout.
    edges_t = edges.reshape(E, edge_dim).astype(f32).T                    # (edge_dim, E)
    x_r = x.reshape(E, c_in, 3).astype(f32).transpose(2, 1, 0)            # (3, c_in, E)
    x_t = jnp.zeros((3, cin_p, E), f32).at[:, :c_in, :].set(x_r)
    x_t = x_t.reshape(3 * cin_p, E)
    if E_pad != E:
        # Zero-padded columns are constant columns: LN sees var=0 and LN_EPS
        # keeps them finite; they are sliced off after the call.
        pad = ((0, 0), (0, E_pad - E))
        edges_t = jnp.pad(edges_t, pad)
        x_t = jnp.pad(x_t, pad)

    # ---- weights, transposed for W^T @ X --------------------------------------
    col = lambda v: v.reshape(-1, 1).astype(f32)
    # Last Linear: columns ordered '(o i)'; re-order to (i, o), pad to (cin_p, cout_p).
    w3_io = params["w3"].reshape(mid, c_out, c_in).transpose(0, 2, 1)     # (mid, i, o)
    w3_pad = jnp.zeros((mid, cin_p, cout_p), f32).at[:, :c_in, :c_out].set(w3_io)
    b3_io = params["b3"].reshape(c_out, c_in).T                            # (i, o)
    b3_pad = jnp.zeros((cin_p, cout_p), f32).at[:c_in, :c_out].set(b3_io)

    weight_args = (
        params["w1"].T.astype(f32), col(params["b1"]),
        col(params["g1"]), col(params["be1"]),
        params["w2"].T.astype(f32), col(params["b2"]),
        col(params["g2"]), col(params["be2"]),
        w3_pad.reshape(mid, cin_p * cout_p).T.astype(f32), col(b3_pad),
    )

    # ---- advisory cost estimate for the XLA scheduler --------------------------
    weight_bytes = 4 * sum(int(np.prod(a.shape)) for a in weight_args)
    cost = pl.CostEstimate(
        flops=int(2 * E_pad * (edge_dim * mid + mid * mid + mid * cin_p * cout_p)
                  + 6 * E_pad * c_in * c_out),
        transcendentals=int(2 * E_pad * mid),
        bytes_accessed=int(4 * E_pad * (edge_dim + 3 * cin_p + 3 * cout_p) + weight_bytes),
    )

    kern = functools.partial(one2one_kernel, c_in=c_in, cin_p=cin_p, cout_p=cout_p,
                             approx_gelu=approximate_gelu, mxu_bf16=mxu_bf16)

    out_t = pl.pallas_call(
        kern,
        out_shape=jax.ShapeDtypeStruct((3 * cout_p, E_pad), jnp.float32),
        grid_spec=pltpu.PrefetchScalarGridSpec(
            num_scalar_prefetch=0,
            grid=(n_tiles,),
            in_specs=[
                pl.BlockSpec((edge_dim, tile), lambda i: (0, i)),
                pl.BlockSpec((3 * cin_p, tile), lambda i: (0, i)),
            ] + [pl.BlockSpec(a.shape, lambda i: (0, 0)) for a in weight_args],
            out_specs=pl.BlockSpec((3 * cout_p, tile), lambda i: (0, i)),
        ),
        compiler_params=pltpu.CompilerParams(
            dimension_semantics=("parallel",)),
        cost_estimate=cost,
    )(edges_t, x_t, *weight_args)

    # out_t rows are d*cout_p + o; drop channel padding, back to (..., c_out, 3).
    out = out_t[:, :E].reshape(3, cout_p, E)[:, :c_out, :].transpose(2, 1, 0)
    return out.reshape(*lead, c_out, 3)


def one2one_reference(edges, x, params, *, c_in, c_out, approximate_gelu=True):
    """Pure-JAX reference matching the PyTorch module (pinned f32 precision)."""
    hi = lax.Precision.HIGHEST

    def ln(h, g, b):
        mu = jnp.mean(h, axis=-1, keepdims=True)
        var = jnp.mean((h - mu) ** 2, axis=-1, keepdims=True)
        return (h - mu) * lax.rsqrt(var + LN_EPS) * g + b

    h = jnp.dot(edges, params["w1"], precision=hi) + params["b1"]
    h = _gelu(ln(h, params["g1"], params["be1"]), approximate_gelu)
    h = jnp.dot(h, params["w2"], precision=hi) + params["b2"]
    h = _gelu(ln(h, params["g2"], params["be2"]), approximate_gelu)
    k = jnp.dot(h, params["w3"], precision=hi) + params["b3"]      # (..., c_out*c_in)
    k = k.reshape(*k.shape[:-1], c_out, c_in)                      # '(o i) -> o i'
    return jnp.matmul(k, x, precision=hi)                          # (..., c_out, 3)


def init_params(key, edge_dim, mid, c_in, c_out):
    ks = jax.random.split(key, 6)
    s1 = 1.0 / np.sqrt(edge_dim)
    s2 = 1.0 / np.sqrt(mid)
    return {
        "w1": jax.random.normal(ks[0], (edge_dim, mid), jnp.float32) * s1,
        "b1": jax.random.normal(ks[1], (mid,), jnp.float32) * 0.1,
        "g1": jnp.ones((mid,), jnp.float32),
        "be1": jnp.zeros((mid,), jnp.float32),
        "w2": jax.random.normal(ks[2], (mid, mid), jnp.float32) * s2,
        "b2": jax.random.normal(ks[3], (mid,), jnp.float32) * 0.1,
        "g2": jnp.ones((mid,), jnp.float32),
        "be2": jnp.zeros((mid,), jnp.float32),
        "w3": jax.random.normal(ks[4], (mid, c_out * c_in), jnp.float32) * s2,
        "b3": jax.random.normal(ks[5], (c_out * c_in,), jnp.float32) * 0.1,
    }


if __name__ == "__main__":
    B, N = 2, 16          # batch, sequence -> pairwise edges (B, N, N, ...)
    c_in, c_out = 4, 8
    edge_dim, mid_dim = 32, 128

    key = jax.random.PRNGKey(0)
    kp, ke, kx = jax.random.split(key, 3)
    params = init_params(kp, edge_dim, mid_dim, c_in, c_out)

    edge_info = jax.random.normal(ke, (B, N, N, edge_dim), jnp.float32)
    x = jax.random.normal(kx, (B, N, N, c_in, 3), jnp.float32)

    # E = 512 here; the tile heuristic splits it into 2 x 256 so both v7x TCs
    # get work.  For production E the default tile_e=2048 amortizes per-step
    # pipeline overhead.
    out = one2one_forward(edge_info, x, params, c_in=c_in, c_out=c_out)
    out = jax.block_until_ready(out)

    ref = jax.block_until_ready(
        one2one_reference(edge_info, x, params, c_in=c_in, c_out=c_out))

    assert out.shape == (B, N, N, c_out, 3), out.shape
    np.testing.assert_allclose(np.asarray(out), np.asarray(ref), rtol=2e-4, atol=2e-4)
    print("KERNEL_OK")
</pallas_src>

<mosaic_0001>
module attributes {stable_mosaic.version = 11 : i64} {
  func.func @one2one_kernel(%arg0: i32, %arg1: memref<32x256xf32, #tpu.memory_space<vmem>>, %arg2: memref<24x256xf32, #tpu.memory_space<vmem>>, %arg3: memref<128x32xf32, #tpu.memory_space<vmem>>, %arg4: memref<128x1xf32, #tpu.memory_space<vmem>>, %arg5: memref<128x1xf32, #tpu.memory_space<vmem>>, %arg6: memref<128x1xf32, #tpu.memory_space<vmem>>, %arg7: memref<128x128xf32, #tpu.memory_space<vmem>>, %arg8: memref<128x1xf32, #tpu.memory_space<vmem>>, %arg9: memref<128x1xf32, #tpu.memory_space<vmem>>, %arg10: memref<128x1xf32, #tpu.memory_space<vmem>>, %arg11: memref<64x128xf32, #tpu.memory_space<vmem>>, %arg12: memref<64x1xf32, #tpu.memory_space<vmem>>, %arg13: memref<24x256xf32, #tpu.memory_space<vmem>>) attributes {dimension_semantics = [#tpu.dimension_semantics<parallel>], iteration_bounds = array<i64: 2>, scalar_prefetch = 0 : i64, scratch_operands = 0 : i64, tpu.core_type = #tpu.core_type<tc>, window_params = [{transform_indices = @transform_0, window_bounds = array<i64: 32, 256>}, {transform_indices = @transform_1, window_bounds = array<i64: 24, 256>}, {pipeline_mode = #tpu.pipeline_mode<synchronous>, transform_indices = @transform_2, window_bounds = array<i64: 128, 32>}, {pipeline_mode = #tpu.pipeline_mode<synchronous>, transform_indices = @transform_3, window_bounds = array<i64: 128, 1>}, {pipeline_mode = #tpu.pipeline_mode<synchronous>, transform_indices = @transform_4, window_bounds = array<i64: 128, 1>}, {pipeline_mode = #tpu.pipeline_mode<synchronous>, transform_indices = @transform_5, window_bounds = array<i64: 128, 1>}, {pipeline_mode = #tpu.pipeline_mode<synchronous>, transform_indices = @transform_6, window_bounds = array<i64: 128, 128>}, {pipeline_mode = #tpu.pipeline_mode<synchronous>, transform_indices = @transform_7, window_bounds = array<i64: 128, 1>}, {pipeline_mode = #tpu.pipeline_mode<synchronous>, transform_indices = @transform_8, window_bounds = array<i64: 128, 1>}, {pipeline_mode = #tpu.pipeline_mode<synchronous>, transform_indices = @transform_9, window_bounds = array<i64: 128, 1>}, {pipeline_mode = #tpu.pipeline_mode<synchronous>, transform_indices = @transform_10, window_bounds = array<i64: 64, 128>}, {pipeline_mode = #tpu.pipeline_mode<synchronous>, transform_indices = @transform_11, window_bounds = array<i64: 64, 1>}, {transform_indices = @transform_12, window_bounds = array<i64: 24, 256>}]} {
    %c0 = arith.constant 0 : index
    %c0_0 = arith.constant 0 : index
    %0 = vector.load %arg1[%c0, %c0_0] : memref<32x256xf32, #tpu.memory_space<vmem>>, vector<32x256xf32>
    %c0_1 = arith.constant 0 : index
    %c0_2 = arith.constant 0 : index
    %1 = vector.load %arg3[%c0_1, %c0_2] : memref<128x32xf32, #tpu.memory_space<vmem>>, vector<128x32xf32>
    %cst = arith.constant dense<0.000000e+00> : vector<128x256xf32>
    %2 = tpu.matmul %1, %0, %cst {dimension_numbers = #tpu.dot_dimension_numbers<[1], [0], [0], [1], [0, 0, 1, 1], [], []>, precision = #tpu.contract_precision<fp32>} : vector<128x32xf32>, vector<32x256xf32>, vector<128x256xf32> -> vector<128x256xf32>
    %c0_3 = arith.constant 0 : index
    %c0_4 = arith.constant 0 : index
    %3 = vector.load %arg4[%c0_3, %c0_4] : memref<128x1xf32, #tpu.memory_space<vmem>>, vector<128x1xf32>
    %4 = vector.broadcast %3 : vector<128x1xf32> to vector<128x256xf32>
    %5 = arith.addf %2, %4 : vector<128x256xf32>
    %c0_5 = arith.constant 0 : index
    %c0_6 = arith.constant 0 : index
    %6 = vector.load %arg5[%c0_5, %c0_6] : memref<128x1xf32, #tpu.memory_space<vmem>>, vector<128x1xf32>
    %c0_7 = arith.constant 0 : index
    %c0_8 = arith.constant 0 : index
    %7 = vector.load %arg6[%c0_7, %c0_8] : memref<128x1xf32, #tpu.memory_space<vmem>>, vector<128x1xf32>
    %cst_9 = arith.constant dense<0.000000e+00> : vector<256xf32>
    %8 = vector.multi_reduction <add>, %5, %cst_9 [0] : vector<128x256xf32> to vector<256xf32>
    %9 = vector.shape_cast %8 : vector<256xf32> to vector<1x256xf32>
    %cst_10 = arith.constant 1.280000e+02 : f32
    %10 = vector.broadcast %cst_10 : f32 to vector<1x256xf32>
    %11 = arith.divf %9, %10 : vector<1x256xf32>
    %12 = arith.mulf %5, %5 : vector<128x256xf32>
    %cst_11 = arith.constant dense<0.000000e+00> : vector<256xf32>
    %13 = vector.multi_reduction <add>, %12, %cst_11 [0] : vector<128x256xf32> to vector<256xf32>
    %14 = vector.shape_cast %13 : vector<256xf32> to vector<1x256xf32>
    %cst_12 = arith.constant 1.280000e+02 : f32
    %15 = vector.broadcast %cst_12 : f32 to vector<1x256xf32>
    %16 = arith.divf %14, %15 : vector<1x256xf32>
    %17 = arith.mulf %11, %11 : vector<1x256xf32>
    %18 = arith.subf %16, %17 : vector<1x256xf32>
    %19 = vector.broadcast %11 : vector<1x256xf32> to vector<128x256xf32>
    %20 = arith.subf %5, %19 : vector<128x256xf32>
    %cst_13 = arith.constant 9.99999974E-6 : f32
    %21 = vector.broadcast %cst_13 : f32 to vector<1x256xf32>
    %22 = arith.addf %18, %21 : vector<1x256xf32>
    %23 = math.rsqrt %22 : vector<1x256xf32>
    %24 = vector.broadcast %23 : vector<1x256xf32> to vector<128x256xf32>
    %25 = arith.mulf %20, %24 : vector<128x256xf32>
    %26 = vector.broadcast %6 : vector<128x1xf32> to vector<128x256xf32>
    %27 = arith.mulf %25, %26 : vector<128x256xf32>
    %28 = vector.broadcast %7 : vector<128x1xf32> to vector<128x256xf32>
    %29 = arith.addf %27, %28 : vector<128x256xf32>
    %30 = arith.mulf %29, %29 : vector<128x256xf32>
    %31 = arith.mulf %29, %30 : vector<128x256xf32>
    %cst_14 = arith.constant 4.471500e-02 : f32
    %32 = vector.broadcast %cst_14 : f32 to vector<128x256xf32>
    %33 = arith.mulf %32, %31 : vector<128x256xf32>
    %34 = arith.addf %29, %33 : vector<128x256xf32>
    %cst_15 = arith.constant 0.797884583 : f32
    %35 = vector.broadcast %cst_15 : f32 to vector<128x256xf32>
    %36 = arith.mulf %35, %34 : vector<128x256xf32>
    %37 = math.tanh %36 : vector<128x256xf32>
    %cst_16 = arith.constant 1.000000e+00 : f32
    %38 = vector.broadcast %cst_16 : f32 to vector<128x256xf32>
    %39 = arith.addf %38, %37 : vector<128x256xf32>
    %cst_17 = arith.constant 5.000000e-01 : f32
    %40 = vector.broadcast %cst_17 : f32 to vector<128x256xf32>
    %41 = arith.mulf %40, %39 : vector<128x256xf32>
    %42 = arith.mulf %29, %41 : vector<128x256xf32>
    %c0_18 = arith.constant 0 : index
    %c0_19 = arith.constant 0 : index
    %43 = vector.load %arg7[%c0_18, %c0_19] : memref<128x128xf32, #tpu.memory_space<vmem>>, vector<128x128xf32>
    %cst_20 = arith.constant dense<0.000000e+00> : vector<128x256xf32>
    %44 = tpu.matmul %43, %42, %cst_20 {dimension_numbers = #tpu.dot_dimension_numbers<[1], [0], [0], [1], [0, 0, 1, 1], [], []>, precision = #tpu.contract_precision<fp32>} : vector<128x128xf32>, vector<128x256xf32>, vector<128x256xf32> -> vector<128x256xf32>
    %c0_21 = arith.constant 0 : index
    %c0_22 = arith.constant 0 : index
    %45 = vector.load %arg8[%c0_21, %c0_22] : memref<128x1xf32, #tpu.memory_space<vmem>>, vector<128x1xf32>
    %46 = vector.broadcast %45 : vector<128x1xf32> to vector<128x256xf32>
    %47 = arith.addf %44, %46 : vector<128x256xf32>
    %c0_23 = arith.constant 0 : index
    %c0_24 = arith.constant 0 : index
    %48 = vector.load %arg9[%c0_23, %c0_24] : memref<128x1xf32, #tpu.memory_space<vmem>>, vector<128x1xf32>
    %c0_25 = arith.constant 0 : index
    %c0_26 = arith.constant 0 : index
    %49 = vector.load %arg10[%c0_25, %c0_26] : memref<128x1xf32, #tpu.memory_space<vmem>>, vector<128x1xf32>
    %cst_27 = arith.constant dense<0.000000e+00> : vector<256xf32>
    %50 = vector.multi_reduction <add>, %47, %cst_27 [0] : vector<128x256xf32> to vector<256xf32>
    %51 = vector.shape_cast %50 : vector<256xf32> to vector<1x256xf32>
    %cst_28 = arith.constant 1.280000e+02 : f32
    %52 = vector.broadcast %cst_28 : f32 to vector<1x256xf32>
    %53 = arith.divf %51, %52 : vector<1x256xf32>
    %54 = arith.mulf %47, %47 : vector<128x256xf32>
    %cst_29 = arith.constant dense<0.000000e+00> : vector<256xf32>
    %55 = vector.multi_reduction <add>, %54, %cst_29 [0] : vector<128x256xf32> to vector<256xf32>
    %56 = vector.shape_cast %55 : vector<256xf32> to vector<1x256xf32>
    %cst_30 = arith.constant 1.280000e+02 : f32
    %57 = vector.broadcast %cst_30 : f32 to vector<1x256xf32>
    %58 = arith.divf %56, %57 : vector<1x256xf32>
    %59 = arith.mulf %53, %53 : vector<1x256xf32>
    %60 = arith.subf %58, %59 : vector<1x256xf32>
    %61 = vector.broadcast %53 : vector<1x256xf32> to vector<128x256xf32>
    %62 = arith.subf %47, %61 : vector<128x256xf32>
    %cst_31 = arith.constant 9.99999974E-6 : f32
    %63 = vector.broadcast %cst_31 : f32 to vector<1x256xf32>
    %64 = arith.addf %60, %63 : vector<1x256xf32>
    %65 = math.rsqrt %64 : vector<1x256xf32>
    %66 = vector.broadcast %65 : vector<1x256xf32> to vector<128x256xf32>
    %67 = arith.mulf %62, %66 : vector<128x256xf32>
    %68 = vector.broadcast %48 : vector<128x1xf32> to vector<128x256xf32>
    %69 = arith.mulf %67, %68 : vector<128x256xf32>
    %70 = vector.broadcast %49 : vector<128x1xf32> to vector<128x256xf32>
    %71 = arith.addf %69, %70 : vector<128x256xf32>
    %72 = arith.mulf %71, %71 : vector<128x256xf32>
    %73 = arith.mulf %71, %72 : vector<128x256xf32>
    %cst_32 = arith.constant 4.471500e-02 : f32
    %74 = vector.broadcast %cst_32 : f32 to vector<128x256xf32>
    %75 = arith.mulf %74, %73 : vector<128x256xf32>
    %76 = arith.addf %71, %75 : vector<128x256xf32>
    %cst_33 = arith.constant 0.797884583 : f32
    %77 = vector.broadcast %cst_33 : f32 to vector<128x256xf32>
    %78 = arith.mulf %77, %76 : vector<128x256xf32>
    %79 = math.tanh %78 : vector<128x256xf32>
    %cst_34 = arith.constant 1.000000e+00 : f32
    %80 = vector.broadcast %cst_34 : f32 to vector<128x256xf32>
    %81 = arith.addf %80, %79 : vector<128x256xf32>
    %cst_35 = arith.constant 5.000000e-01 : f32
    %82 = vector.broadcast %cst_35 : f32 to vector<128x256xf32>
    %83 = arith.mulf %82, %81 : vector<128x256xf32>
    %84 = arith.mulf %71, %83 : vector<128x256xf32>
    %c0_36 = arith.constant 0 : index
    %c0_37 = arith.constant 0 : index
    %85 = vector.load %arg11[%c0_36, %c0_37] : memref<64x128xf32, #tpu.memory_space<vmem>>, vector<64x128xf32>
    %cst_38 = arith.constant dense<0.000000e+00> : vector<64x256xf32>
    %86 = tpu.matmul %85, %84, %cst_38 {dimension_numbers = #tpu.dot_dimension_numbers<[1], [0], [0], [1], [0, 0, 1, 1], [], []>, precision = #tpu.contract_precision<fp32>} : vector<64x128xf32>, vector<128x256xf32>, vector<64x256xf32> -> vector<64x256xf32>
    %c0_39 = arith.constant 0 : index
    %c0_40 = arith.constant 0 : index
    %87 = vector.load %arg12[%c0_39, %c0_40] : memref<64x1xf32, #tpu.memory_space<vmem>>, vector<64x1xf32>
    %88 = vector.broadcast %87 : vector<64x1xf32> to vector<64x256xf32>
    %89 = arith.addf %86, %88 : vector<64x256xf32>
    %c0_41 = arith.constant 0 : index
    %c0_42 = arith.constant 0 : index
    %90 = vector.load %arg2[%c0_41, %c0_42] : memref<24x256xf32, #tpu.memory_space<vmem>>, vector<24x256xf32>
    %91 = vector.extract_strided_slice %89 {offsets = [0, 0], sizes = [8, 256], strides = [1, 1]} : vector<64x256xf32> to vector<8x256xf32>
    %92 = vector.extract_strided_slice %90 {offsets = [0, 0], sizes = [1, 256], strides = [1, 1]} : vector<24x256xf32> to vector<1x256xf32>
    %93 = vector.broadcast %92 : vector<1x256xf32> to vector<8x256xf32>
    %94 = arith.mulf %91, %93 : vector<8x256xf32>
    %95 = vector.extract_strided_slice %89 {offsets = [8, 0], sizes = [8, 256], strides = [1, 1]} : vector<64x256xf32> to vector<8x256xf32>
    %96 = vector.extract_strided_slice %90 {offsets = [1, 0], sizes = [1, 256], strides = [1, 1]} : vector<24x256xf32> to vector<1x256xf32>
    %97 = vector.broadcast %96 : vector<1x256xf32> to vector<8x256xf32>
    %98 = arith.mulf %95, %97 : vector<8x256xf32>
    %99 = arith.addf %94, %98 : vector<8x256xf32>
    %100 = vector.extract_strided_slice %89 {offsets = [16, 0], sizes = [8, 256], strides = [1, 1]} : vector<64x256xf32> to vector<8x256xf32>
    %101 = vector.extract_strided_slice %90 {offsets = [2, 0], sizes = [1, 256], strides = [1, 1]} : vector<24x256xf32> to vector<1x256xf32>
    %102 = vector.broadcast %101 : vector<1x256xf32> to vector<8x256xf32>
    %103 = arith.mulf %100, %102 : vector<8x256xf32>
    %104 = arith.addf %99, %103 : vector<8x256xf32>
    %105 = vector.extract_strided_slice %89 {offsets = [24, 0], sizes = [8, 256], strides = [1, 1]} : vector<64x256xf32> to vector<8x256xf32>
    %106 = vector.extract_strided_slice %90 {offsets = [3, 0], sizes = [1, 256], strides = [1, 1]} : vector<24x256xf32> to vector<1x256xf32>
    %107 = vector.broadcast %106 : vector<1x256xf32> to vector<8x256xf32>
    %108 = arith.mulf %105, %107 : vector<8x256xf32>
    %109 = arith.addf %104, %108 : vector<8x256xf32>
    %c0_43 = arith.constant 0 : index
    %c0_44 = arith.constant 0 : index
    %110 = vector.load %arg13[%c0_43, %c0_44] : memref<24x256xf32, #tpu.memory_space<vmem>>, vector<8x256xf32>
    tpu.vector_store %arg13[%c0_43, %c0_44], %109 {strides = array<i32>} : memref<24x256xf32, #tpu.memory_space<vmem>>, vector<8x256xf32>,
    %111 = vector.extract_strided_slice %89 {offsets = [0, 0], sizes = [8, 256], strides = [1, 1]} : vector<64x256xf32> to vector<8x256xf32>
    %112 = vector.extract_strided_slice %90 {offsets = [8, 0], sizes = [1, 256], strides = [1, 1]} : vector<24x256xf32> to vector<1x256xf32>
    %113 = vector.broadcast %112 : vector<1x256xf32> to vector<8x256xf32>
    %114 = arith.mulf %111, %113 : vector<8x256xf32>
    %115 = vector.extract_strided_slice %89 {offsets = [8, 0], sizes = [8, 256], strides = [1, 1]} : vector<64x256xf32> to vector<8x256xf32>
    %116 = vector.extract_strided_slice %90 {offsets = [9, 0], sizes = [1, 256], strides = [1, 1]} : vector<24x256xf32> to vector<1x256xf32>
    %117 = vector.broadcast %116 : vector<1x256xf32> to vector<8x256xf32>
    %118 = arith.mulf %115, %117 : vector<8x256xf32>
    %119 = arith.addf %114, %118 : vector<8x256xf32>
    %120 = vector.extract_strided_slice %89 {offsets = [16, 0], sizes = [8, 256], strides = [1, 1]} : vector<64x256xf32> to vector<8x256xf32>
    %121 = vector.extract_strided_slice %90 {offsets = [10, 0], sizes = [1, 256], strides = [1, 1]} : vector<24x256xf32> to vector<1x256xf32>
    %122 = vector.broadcast %121 : vector<1x256xf32> to vector<8x256xf32>
    %123 = arith.mulf %120, %122 : vector<8x256xf32>
    %124 = arith.addf %119, %123 : vector<8x256xf32>
    %125 = vector.extract_strided_slice %89 {offsets = [24, 0], sizes = [8, 256], strides = [1, 1]} : vector<64x256xf32> to vector<8x256xf32>
    %126 = vector.extract_strided_slice %90 {offsets = [11, 0], sizes = [1, 256], strides = [1, 1]} : vector<24x256xf32> to vector<1x256xf32>
    %127 = vector.broadcast %126 : vector<1x256xf32> to vector<8x256xf32>
    %128 = arith.mulf %125, %127 : vector<8x256xf32>
    %129 = arith.addf %124, %128 : vector<8x256xf32>
    %c8 = arith.constant 8 : index
    %c0_45 = arith.constant 0 : index
    %130 = vector.load %arg13[%c8, %c0_45] : memref<24x256xf32, #tpu.memory_space<vmem>>, vector<8x256xf32>
    tpu.vector_store %arg13[%c8, %c0_45], %129 {strides = array<i32>} : memref<24x256xf32, #tpu.memory_space<vmem>>, vector<8x256xf32>,
    %131 = vector.extract_strided_slice %89 {offsets = [0, 0], sizes = [8, 256], strides = [1, 1]} : vector<64x256xf32> to vector<8x256xf32>
    %132 = vector.extract_strided_slice %90 {offsets = [16, 0], sizes = [1, 256], strides = [1, 1]} : vector<24x256xf32> to vector<1x256xf32>
    %133 = vector.broadcast %132 : vector<1x256xf32> to vector<8x256xf32>
    %134 = arith.mulf %131, %133 : vector<8x256xf32>
    %135 = vector.extract_strided_slice %89 {offsets = [8, 0], sizes = [8, 256], strides = [1, 1]} : vector<64x256xf32> to vector<8x256xf32>
    %136 = vector.extract_strided_slice %90 {offsets = [17, 0], sizes = [1, 256], strides = [1, 1]} : vector<24x256xf32> to vector<1x256xf32>
    %137 = vector.broadcast %136 : vector<1x256xf32> to vector<8x256xf32>
    %138 = arith.mulf %135, %137 : vector<8x256xf32>
    %139 = arith.addf %134, %138 : vector<8x256xf32>
    %140 = vector.extract_strided_slice %89 {offsets = [16, 0], sizes = [8, 256], strides = [1, 1]} : vector<64x256xf32> to vector<8x256xf32>
    %141 = vector.extract_strided_slice %90 {offsets = [18, 0], sizes = [1, 256], strides = [1, 1]} : vector<24x256xf32> to vector<1x256xf32>
    %142 = vector.broadcast %141 : vector<1x256xf32> to vector<8x256xf32>
    %143 = arith.mulf %140, %142 : vector<8x256xf32>
    %144 = arith.addf %139, %143 : vector<8x256xf32>
    %145 = vector.extract_strided_slice %89 {offsets = [24, 0], sizes = [8, 256], strides = [1, 1]} : vector<64x256xf32> to vector<8x256xf32>
    %146 = vector.extract_strided_slice %90 {offsets = [19, 0], sizes = [1, 256], strides = [1, 1]} : vector<24x256xf32> to vector<1x256xf32>
    %147 = vector.broadcast %146 : vector<1x256xf32> to vector<8x256xf32>
    %148 = arith.mulf %145, %147 : vector<8x256xf32>
    %149 = arith.addf %144, %148 : vector<8x256xf32>
    %c16 = arith.constant 16 : index
    %c0_46 = arith.constant 0 : index
    %150 = vector.load %arg13[%c16, %c0_46] : memref<24x256xf32, #tpu.memory_space<vmem>>, vector<8x256xf32>
    tpu.vector_store %arg13[%c16, %c0_46], %149 {strides = array<i32>} : memref<24x256xf32, #tpu.memory_space<vmem>>, vector<8x256xf32>,
    return
  }
  func.func @transform_0(%arg0: i32) -> (i32, i32) {
    %c0_i32 = arith.constant 0 : i32
    %c0_i32_0 = arith.constant 0 : i32
    return %c0_i32, %arg0 : i32, i32
  }
  func.func @transform_1(%arg0: i32) -> (i32, i32) {
    %c0_i32 = arith.constant 0 : i32
    %c0_i32_0 = arith.constant 0 : i32
    return %c0_i32, %arg0 : i32, i32
  }
  func.func @transform_2(%arg0: i32) -> (i32, i32) {
    %c0_i32 = arith.constant 0 : i32
    %c0_i32_0 = arith.constant 0 : i32
    %c0_i32_1 = arith.constant 0 : i32
    return %c0_i32, %c0_i32_0 : i32, i32
  }
  func.func @transform_3(%arg0: i32) -> (i32, i32) {
    %c0_i32 = arith.constant 0 : i32
    %c0_i32_0 = arith.constant 0 : i32
    %c0_i32_1 = arith.constant 0 : i32
    return %c0_i32, %c0_i32_0 : i32, i32
  }
  func.func @transform_4(%arg0: i32) -> (i32, i32) {
    %c0_i32 = arith.constant 0 : i32
    %c0_i32_0 = arith.constant 0 : i32
    %c0_i32_1 = arith.constant 0 : i32
    return %c0_i32, %c0_i32_0 : i32, i32
  }
  func.func @transform_5(%arg0: i32) -> (i32, i32) {
    %c0_i32 = arith.constant 0 : i32
    %c0_i32_0 = arith.constant 0 : i32
    %c0_i32_1 = arith.constant 0 : i32
    return %c0_i32, %c0_i32_0 : i32, i32
  }
  func.func @transform_6(%arg0: i32) -> (i32, i32) {
    %c0_i32 = arith.constant 0 : i32
    %c0_i32_0 = arith.constant 0 : i32
    %c0_i32_1 = arith.constant 0 : i32
    return %c0_i32, %c0_i32_0 : i32, i32
  }
  func.func @transform_7(%arg0: i32) -> (i32, i32) {
    %c0_i32 = arith.constant 0 : i32
    %c0_i32_0 = arith.constant 0 : i32
    %c0_i32_1 = arith.constant 0 : i32
    return %c0_i32, %c0_i32_0 : i32, i32
  }
  func.func @transform_8(%arg0: i32) -> (i32, i32) {
    %c0_i32 = arith.constant 0 : i32
    %c0_i32_0 = arith.constant 0 : i32
    %c0_i32_1 = arith.constant 0 : i32
    return %c0_i32, %c0_i32_0 : i32, i32
  }
  func.func @transform_9(%arg0: i32) -> (i32, i32) {
    %c0_i32 = arith.constant 0 : i32
    %c0_i32_0 = arith.constant 0 : i32
    %c0_i32_1 = arith.constant 0 : i32
    return %c0_i32, %c0_i32_0 : i32, i32
  }
  func.func @transform_10(%arg0: i32) -> (i32, i32) {
    %c0_i32 = arith.constant 0 : i32
    %c0_i32_0 = arith.constant 0 : i32
    %c0_i32_1 = arith.constant 0 : i32
    return %c0_i32, %c0_i32_0 : i32, i32
  }
  func.func @transform_11(%arg0: i32) -> (i32, i32) {
    %c0_i32 = arith.constant 0 : i32
    %c0_i32_0 = arith.constant 0 : i32
    %c0_i32_1 = arith.constant 0 : i32
    return %c0_i32, %c0_i32_0 : i32, i32
  }
  func.func @transform_12(%arg0: i32) -> (i32, i32) {
    %c0_i32 = arith.constant 0 : i32
    %c0_i32_0 = arith.constant 0 : i32
    return %c0_i32, %arg0 : i32, i32
  }
}

</mosaic_0001>

<bundles_post_ra>
// kernel: tpu_custom_call.1
= control target key start
LH: loop header
LB: loop body
LE: loop exit
PB: predicated region body
PF: predicated region fallthrough
CT: control target
= control target key end

     0   :  { %s11766_s0 = inlined_call_operand.vmem [shape: f32[32,512], index: 0, kind: input, shape index: {}]   ;;  %s11767_s1 = inlined_call_operand.vmem [shape: f32[24,512], index: 1, kind: input, shape index: {}]   ;;  %s11768_s2 = inlined_call_operand.vmem [shape: f32[128,32], index: 2, kind: input, shape index: {}]   ;;  %s11769_s3 = inlined_call_operand.vmem [shape: f32[128,1], index: 3, kind: input, shape index: {}]   ;;  %s11770_s4 = inlined_call_operand.vmem [shape: f32[128,1], index: 4, kind: input, shape index: {}]   ;;  %s11771_s5 = inlined_call_operand.vmem [shape: f32[128,1], index: 5, kind: input, shape index: {}]   ;;  %s11772_s6 = inlined_call_operand.vmem [shape: f32[128,128], index: 6, kind: input, shape index: {}]   ;;  %s11773_s7 = inlined_call_operand.vmem [shape: f32[128,1], index: 7, kind: input, shape index: {}]   ;;  %s11774_s8 = inlined_call_operand.vmem [shape: f32[128,1], index: 8, kind: input, shape index: {}]   ;;  %s11775_s9 = inlined_call_operand.vmem [shape: f32[128,1], index: 9, kind: input, shape index: {}]   ;;  %s11776_s10 = inlined_call_operand.vmem [shape: f32[64,128], index: 10, kind: input, shape index: {}]   ;;  %s11777_s11 = inlined_call_operand.vmem [shape: f32[64,1], index: 11, kind: input, shape index: {}]   ;;  %s11778_s12 = inlined_call_operand.hbm [shape: f32[24,512], index: 12, kind: output, shape index: {}]  }
   0x1   :  { %12069 = sst [smem:[#allocation80_spill]] %s11766_s0 }
   0x2   :  { %12070 = sst [smem:[#allocation81_spill]] %s11767_s1 }
   0x3   :  { %12071 = sst [smem:[#allocation82_spill]] %s11768_s2 }
   0x4   :  { %17 = vsyncpa [#allocation5], 0 }
   0x5   :  { %19 = vsyncpa [#allocation5 + $0x1], 0  ;;  %s6845_s21 = smov 0   ;;  %s6847_s22 = smov 0  }
   0x6   :  { %s6849_s23 = smov 0   ;;  %s6851_s24 = smov 0  }
   0x7 LB: > { %s6506_s25 = sadd.s32 4294967295, %s6773_s24   ;;  %s6507_s26 = sadd.s32 4294967294, %s6773_s24   ;;  %s6773_s24 = sphi %s6851_s24, %s12707_s24   ;;  %s6769_s23 = sphi %s6849_s23, %s12706_s23   ;;  %s6765_s22 = sphi %s6847_s22, %s12705_s22   ;;  %s6761_s21 = sphi %s6845_s21, %s12704_s21  }
   0x8   : > { %s6868_s27 = sadd.s32 1, %s6773_s24   ;;  %s32_s28 = sadd.s32 1, %s6769_s23 }
   0x9   : > { %s29_s29 = ssub.s32 %s6773_s24, %s6868_s27  ;;  %p39_p0 = scmp.ne.s32.totalorder %s6769_s23, %s6765_s22 }
   0xa   : > { %p30_p1 = scmp.eq.s32.totalorder %s29_s29, 0  ;;  %p40_p2 = scmp.eq.s32.totalorder %s6773_s24, 0 }
   0xb   : > { %p305_p3 = scmp.eq.s32.totalorder %s6506_s25, 1  ;;  %p310_p4 = scmp.ne.s32.totalorder %s6765_s22, %s6761_s21 }
   0xc   : > { %s6881_s30 = scalar_select %p30_p1, %s6769_s23, %s32_s28  }
   0xd   : > { %p6883_p5 = por %p40_p2, %p39_p0  ;;  %p6887_p6 = por %p305_p3, %p39_p0 }
   0xe   : > { %p311_p7 = scmp.eq.s32.totalorder %s6507_s26, 1  ;;  %p6509_p9 = scmp.ge.s32.totalorder %s6773_s24, 2 }
  0x10   : > { %p6891_p8 = por %p311_p7, %p310_p4  ;;  %357 = sbr.rel (%p6509_p9) target bundleno = 55 (0x37), region = 56 }
  0x15   : > { %360 = sbr.rel (!%p6883_p5) target bundleno = 39 (0x27), region = 60  ;;  %s362_s16 = sand.u32 (%p6883_p5), 1, %s6769_s23  }
  0x16   : > { %s6521_s17 = sshll.u32 (%p6883_p5), %s6773_s24, 4  ;;  %s6510_s18 = sshll.u32 (%p6883_p5), %s362_s16, 6 }
  0x17   : > { %s12075_s0 = sld [smem:[#allocation80_spill]] (%p6883_p5)  ;;  %s364_s28 = scalar_lea.vmem (%p6883_p5), [#allocation2], %s6510_s18 }
  0x1d   : > { %s367_s26 = scalar_lea.vmem %s12075_s0, %s6521_s17 }
  0x1e   : > { %v380_v0 = vld [vmem:[%s367_s26] sm:$0xff]  ;;  %v382_v1 = vld [vmem:[%s367_s26 + $0x8] sm:$0xff] }
  0x1f   : > { %v384_v2 = vld [vmem:[%s367_s26 + $0x20] sm:$0xff]  ;;  %381 = vst [vmem:[%s364_s28] sm:$0xff] %v380_v0  ;;  %v386_v3 = vld [vmem:[%s367_s26 + $0x28] sm:$0xff] }
  0x20   : > { %383 = vst [vmem:[%s364_s28 + $0x8] sm:$0xff] %v382_v1  ;;  %v388_v4 = vld [vmem:[%s367_s26 + $0x40] sm:$0xff]  ;;  %v390_v5 = vld [vmem:[%s367_s26 + $0x48] sm:$0xff] }
  0x21   : > { %385 = vst [vmem:[%s364_s28 + $0x10] sm:$0xff] %v384_v2  ;;  %v392_v6 = vld [vmem:[%s367_s26 + $0x60] sm:$0xff]  ;;  %v394_v7 = vld [vmem:[%s367_s26 + $0x68] sm:$0xff] }
  0x22   : > { %387 = vst [vmem:[%s364_s28 + $0x18] sm:$0xff] %v386_v3 }
  0x23   : > { %389 = vst [vmem:[%s364_s28 + $0x20] sm:$0xff] %v388_v4 }
  0x24   : > { %391 = vst [vmem:[%s364_s28 + $0x28] sm:$0xff] %v390_v5 }
  0x25   : > { %393 = vst [vmem:[%s364_s28 + $0x30] sm:$0xff] %v392_v6 }
  0x26   : > { %395 = vst [vmem:[%s364_s28 + $0x38] sm:$0xff] %v394_v7 }
  0x27 PF: > { %401 = sbr.rel (!%p6883_p5) target bundleno = 55 (0x37), region = 83  ;;  %s403_s29 = sand.u32 (%p6883_p5), 1, %s6769_s23  }
  0x28   : > { %s6522_s16 = sshll.u32 (%p6883_p5), %s6773_s24, 4  ;;  %s6524_s17 = smul.u32 (%p6883_p5), 48, %s403_s29 }
  0x29   : > { %s12076_s1 = sld [smem:[#allocation81_spill]] (%p6883_p5) }
  0x2a   : > { %s405_s26 = scalar_lea.vmem (%p6883_p5), [#allocation3], %s6524_s17 }
  0x2f   : > { %s408_s20 = scalar_lea.vmem %s12076_s1, %s6522_s16 }
  0x30   : > { %v421_v8 = vld [vmem:[%s408_s20] sm:$0xff]  ;;  %v423_v9 = vld [vmem:[%s408_s20 + $0x8] sm:$0xff] }
  0x31   : > { %v425_v10 = vld [vmem:[%s408_s20 + $0x20] sm:$0xff]  ;;  %422 = vst [vmem:[%s405_s26] sm:$0xff] %v421_v8  ;;  %v427_v11 = vld [vmem:[%s408_s20 + $0x28] sm:$0xff] }
  0x32   : > { %424 = vst [vmem:[%s405_s26 + $0x8] sm:$0xff] %v423_v9  ;;  %v429_v12 = vld [vmem:[%s408_s20 + $0x40] sm:$0xff]  ;;  %v431_v13 = vld [vmem:[%s408_s20 + $0x48] sm:$0xff] }
  0x33   : > { %426 = vst [vmem:[%s405_s26 + $0x10] sm:$0xff] %v425_v10 }
  0x34   : > { %428 = vst [vmem:[%s405_s26 + $0x18] sm:$0xff] %v427_v11 }
  0x35   : > { %430 = vst [vmem:[%s405_s26 + $0x20] sm:$0xff] %v429_v12 }
  0x36   : > { %432 = vst [vmem:[%s405_s26 + $0x28] sm:$0xff] %v431_v13 }
  0x37 PF: > { %p6515_p10 = scmp.ge.s32.totalorder %s6773_s24, 1  ;;  %p437_p11 = scmp.lt.s32.totalorder %s6773_s24, 3 }
  0x39   : > { %p438_p12 = pnand %p6515_p10, %p437_p11 }
  0x3b   : > { %441 = sbr.rel (%p438_p12) target bundleno = 1535 (0x5ff), region = 106 }
  0x40   : > { %v525_v14 = vld [vmem:[%s11769_s3 + $0x10] sm:$0xff]  ;;  %v523_v15 = vld [vmem:[%s11769_s3] sm:$0xff]  ;;  %s6921_s17 = sand.u32 1, %s6765_s22   ;;  %vm619_vm0 = vcmask 261120   ;;  %v6775_v16 = vmov 0   ;;  %s12077_s2 = sld [smem:[#allocation82_spill]] }
  0x41   : > { %6571 = vset.pattern.permute.xlu1 %v6775_v16  ;;  %6570 = vset.pattern.permute.xlu0 %v6775_v16  ;;  %s6516_s18 = sshll.u32 %s6921_s17, 6  ;;  %v527_v17 = vld [vmem:[%s11769_s3 + $0x20] sm:$0xff]  ;;  %v526_v37 = vld [vmem:[%s11769_s3 + $0x18] sm:$0xff]  ;;  %v524_v38 = vld [vmem:[%s11769_s3 + $0x8] sm:$0xff]  ;;  %s6523_s16 = sshll.u32 %s6506_s25, 4 }
  0x42   : > { %551 = vperm.xlu1 %6571, %v525_v14   ;;  %541 = vperm.xlu0 %6570, %v523_v15   ;;  %s6931_s28 = scalar_lea.vmem [#allocation2], %s6516_s18  ;;  %v528_v47 = vld [vmem:[%s11769_s3 + $0x28] sm:$0xff]  ;;  %v530_v61 = vld [vmem:[%s11769_s3 + $0x38] sm:$0xff]  ;;  %v529_v62 = vld [vmem:[%s11769_s3 + $0x30] sm:$0xff]  ;;  %s6417_s20 = scalar_lea.hbm %s11778_s12, %s6523_s16 }
  0x43   : > { %v505_v20 = vld [vmem:[%s6931_s28 + $0x30] sm:$0xff]  ;;  %v503_v21 = vld [vmem:[%s6931_s28 + $0x20] sm:$0xff]  ;;  %6572 = vset.pattern.permute.xlu2 %v6775_v16  ;;  %v532_v10 = vld [vmem:[%s11769_s3 + $0x48] sm:$0xff]  ;;  %s11728_s25 = sshll.u32 %s6417_s20, 4  ;;  %s6731_s20 = scalar_lea.hbm %s11778_s12, 96  ;;  %s6421_s25 = int_to_ptr.hbm [resolvable:$true] %s11728_s25 }
  0x44   : > { %v501_v22 = vld [vmem:[%s6931_s28 + $0x10] sm:$0xff]  ;;  %v6938_v24 = vand.u32 4294901760, %v505_v20  ;;  %v6940_v25 = vand.u32 4294901760, %v503_v21  ;;  %561 = vperm.xlu2 %6572, %v527_v17   ;;  %v499_v27 = vld [vmem:[%s6931_s28] sm:$0xff]  ;;  %v534_v12 = vld [vmem:[%s11769_s3 + $0x58] sm:$0xff] }
  0x45   : > { %v6942_v26 = vand.u32 4294901760, %v501_v22  ;;  %v6948_v29 = vand.u32 4294901760, %v499_v27  ;;  %v531_v2 = vld [vmem:[%s11769_s3 + $0x40] sm:$0xff]  ;;  %v533_v9 = vld [vmem:[%s11769_s3 + $0x50] sm:$0xff] }
  0x46   : > { %v507_v18 = vld [vmem:[%s12077_s2] sm:$0xff]  ;;  %v508_v28 = vld [vmem:[%s12077_s2 + $0x8] sm:$0xff]  ;;  %v509_v32 = vld [vmem:[%s12077_s2 + $0x10] sm:$0xff]  ;;  %681 = vmatpush.msra.mxu0 %v6938_v24  ;;  %v830_v33 = vsub.f32 %v505_v20, %v6938_v24  ;;  %v836_v34 = vsub.f32 %v503_v21, %v6940_v25  ;;  %1036 = vmatpush.msra.mxu3 %v6938_v24 }
  0x47   : > { %v621_v19 = vsel %vm619_vm0, %v507_v18, 0  ;;  %v624_v31 = vsel %vm619_vm0, %v508_v28, 0  ;;  %v842_v35 = vsub.f32 %v501_v22, %v6942_v26  ;;  %v6974_v40 = vsub.f32 %v499_v27, %v6948_v29  ;;  %v510_v57 = vld [vmem:[%s12077_s2 + $0x18] sm:$0xff]  ;;  %v511_v6 = vld [vmem:[%s12077_s2 + $0x20] sm:$0xff]  ;;  %v512_v16 = vld [vmem:[%s12077_s2 + $0x28] sm:$0xff] }
  0x48   : > { %v6936_v23 = vand.u32 4294901760, %v621_v19  ;;  %v6962_v36 = vand.u32 4294901760, %v624_v31  ;;  %v627_v41 = vsel %vm619_vm0, %v509_v32, 0  ;;  %683 = vmatpush.msra.mxu0 %v6940_v25  ;;  %932 = vmatpush.msra.mxu2 %v830_v33  ;;  %v831_v42 = vand.u32 4294901760, %v830_v33  ;;  %v535_v20 = vld [vmem:[%s11769_s3 + $0x60] sm:$0xff]  ;;  %v537_v22 = vld [vmem:[%s11769_s3 + $0x70] sm:$0xff] }
  0x49   : > { %v837_v43 = vand.u32 4294901760, %v836_v34  ;;  %v843_v44 = vand.u32 4294901760, %v842_v35  ;;  %1038 = vmatpush.msra.mxu3 %v6940_v25  ;;  %v849_v48 = vand.u32 4294901760, %v6974_v40  ;;  %v6991_v52 = vand.u32 4294901760, %v627_v41  ;;  %v513_v27 = vld [vmem:[%s12077_s2 + $0x30] sm:$0xff]  ;;  %v538_v32 = vld [vmem:[%s11769_s3 + $0x78] sm:$0xff] }
  0x4a   : > { %v6951_v30 = vsub.f32 %v621_v19, %v6936_v23  ;;  %v6979_v45 = vsub.f32 %v624_v31, %v6962_v36  ;;  %556 = vperm.xlu1 %6571, %v526_v37   ;;  %546 = vperm.xlu0 %6570, %v524_v38   ;;  %v832_v49 = vsub.f32 %v830_v33, %v831_v42  ;;  %v630_v0 = vsel %vm619_vm0, %v510_v57, 0  ;;  %v536_v19 = vld [vmem:[%s11769_s3 + $0x68] sm:$0xff]  ;;  %v1983_v31 = vld [vmem:[%s11770_s4 + $0x78] sm:$0xff] }
  0x4b   : > { %v838_v50 = vsub.f32 %v836_v34, %v837_v43  ;;  %685 = vmatpush.msra.mxu0 %v6942_v26  ;;  %935 = vmatpush.msra.mxu2 %v836_v34  ;;  %v844_v54 = vsub.f32 %v842_v35, %v843_v44  ;;  %v850_v58 = vsub.f32 %v6974_v40, %v849_v48  ;;  %v7027_v5 = vand.u32 4294901760, %v630_v0  ;;  %v1982_v34 = vld [vmem:[%s11770_s4 + $0x70] sm:$0xff]  ;;  %v1997_v57 = vld [vmem:[%s11771_s5 + $0x68] sm:$0xff] }
  0x4c   : > { %v6971_v39 = vand.u32 4294901760, %v6951_v30  ;;  %v6989_v51 = vand.u32 4294901760, %v6979_v45  ;;  %v833_v55 = vand.u32 4294901760, %v832_v49  ;;  %1040 = vmatpush.msra.mxu3 %v6942_v26  ;;  %566 = vperm.xlu2 %6572, %v528_v47   ;;  %v7006_v60 = vsub.f32 %v627_v41, %v6991_v52  ;;  %v1998_v47 = vld [vmem:[%s11771_s5 + $0x70] sm:$0xff] }
  0x4d   : > { %v839_v56 = vand.u32 4294901760, %v838_v50  ;;  %687 = vmatpush.msra.mxu0 %v6948_v29  ;;  %938 = vmatpush.msra.mxu2 %v842_v35  ;;  %v845_v63 = vand.u32 4294901760, %v844_v54  ;;  %v851_v1 = vand.u32 4294901760, %v850_v58  ;;  %v7037_v8 = vsub.f32 %v630_v0, %v7027_v5  ;;  %v515_v54 = vld [vmem:[%s12077_s2 + $0x40] sm:$0xff] }
  0x4e   : > { %v691_v46 = vsub.f32 %v6951_v30, %v6971_v39  ;;  %834 = vmatpush.msra.mxu1 %v833_v55  ;;  %v699_v59 = vsub.f32 %v6979_v45, %v6989_v51  ;;  %1042 = vmatpush.msra.mxu3 %v6948_v29  ;;  %v7025_v4 = vand.u32 4294901760, %v7006_v60  ;;  %v633_v11 = vsel %vm619_vm0, %v511_v6, 0  ;;  %v1980_v58 = vld [vmem:[%s11770_s4 + $0x60] sm:$0xff] }
  0x4f   : > { %941 = vmatpush.msra.mxu2 %v6974_v40  ;;  %1046 = vmatmul.f32.vlgmr.msra.gmra.mxu3 %v6971_v39  ;;  %v7056_v14 = vand.u32 4294901760, %v7037_v8  ;;  %v7058_v15 = vand.u32 4294901760, %v633_v11  ;;  %v636_v21 = vsel %vm619_vm0, %v512_v16, 0  ;;  %v639_v33 = vsel %vm619_vm0, %v513_v27, 0  ;;  %v514_v40 = vld [vmem:[%s12077_s2 + $0x38] sm:$0xff]  ;;  %v1977_v27 = vld [vmem:[%s11770_s4 + $0x48] sm:$0xff] }
  0x50   : > { %v6994_v53 = vand.u32 4294901760, %v691_v46  ;;  %944 = vmatmul.f32.vlgmr.msra.gmra.mxu2 %v6951_v30  ;;  %840 = vmatpush.msra.mxu1 %v839_v56  ;;  %v7022_v3 = vand.u32 4294901760, %v699_v59  ;;  %v707_v7 = vsub.f32 %v7006_v60, %v7025_v4  ;;  %v7118_v38 = vand.u32 4294901760, %v639_v33 }
  0x51   : > { %1155 = vmatpush.msrb.mxu0 %v831_v42  ;;  %v715_v17 = vsub.f32 %v7037_v8, %v7056_v14  ;;  %v7070_v18 = vsub.f32 %v633_v11, %v7058_v15  ;;  %v642_v46 = vsel %vm619_vm0, %v514_v40, 0  ;;  %v645_v59 = vsel %vm619_vm0, %v515_v54, 0  ;;  %v1995_v11 = vld [vmem:[%s11771_s5 + $0x58] sm:$0xff]  ;;  %v1992_v54 = vld [vmem:[%s11771_s5 + $0x40] sm:$0xff] }
  0x52   : > { %693 = vmatmul.f32.vlgmr.msra.gmra.mxu0 %v6994_v53  ;;  %576 = vperm.xlu1 %6571, %v530_v61   ;;  %v7053_v13 = vand.u32 4294901760, %v707_v7  ;;  %v7128_v42 = vsub.f32 %v639_v33, %v7118_v38  ;;  %v7147_v50 = vand.u32 4294901760, %v642_v46  ;;  %v1979_v61 = vld [vmem:[%s11770_s4 + $0x58] sm:$0xff]  ;;  %v7176_v0 = vand.u32 4294901760, %v645_v59  ;;  %v1978_v7 = vld [vmem:[%s11770_s4 + $0x50] sm:$0xff] }
  0x53   : > { %571 = vperm.xlu0 %6570, %v529_v62   ;;  %846 = vmatpush.msra.mxu1 %v845_v63  ;;  %v518_v40 = vld [vmem:[%s12077_s2 + $0x58] sm:$0xff] }
  0x54   : > { %1159 = vmatpush.msrb.mxu0 %v837_v43  ;;  %581 = vperm.xlu2 %6572, %v531_v2   ;;  %12079 = vst [vmem:[#allocation8_spill] sm:$0xff] %v7128_v42  ;;  %v1981_v43 = vld [vmem:[%s11770_s4 + $0x68] sm:$0xff]  ;;  %v7145_v49 = vand.u32 4294901760, %v7128_v42  ;;  %v7157_v56 = vsub.f32 %v642_v46, %v7147_v50  ;;  %v7186_v6 = vsub.f32 %v645_v59, %v7176_v0  ;;  %v506_v59 = vld [vmem:[%s6931_s28 + $0x38] sm:$0xff] }
  0x55   : > { %852 = vmatpush.msra.mxu1 %v851_v1  ;;  %v516_v1 = vld [vmem:[%s12077_s2 + $0x48] sm:$0xff] }
  0x56   : > { %1163 = vmatpush.msrb.mxu0 %v843_v44  ;;  %854 = vmatmul.f32.vlgmr.msra.gmra.mxu1 %v6936_v23  ;;  %v1999_v44 = vld [vmem:[%s11771_s5 + $0x78] sm:$0xff]  ;;  %12080 = vst [vmem:[#allocation9_spill] sm:$0xff] %v7145_v49  ;;  %v739_v55 = vsub.f32 %v7128_v42, %v7145_v49  ;;  %v7174_v63 = vand.u32 4294901760, %v7157_v56  ;;  %v7203_v16 = vand.u32 4294901760, %v7186_v6  ;;  %v1993_v46 = vld [vmem:[%s11771_s5 + $0x48] sm:$0xff] }
  0x57   : > { %1246 = vmatpush.msrb.mxu1 %v6938_v24  ;;  %1052 = vmatmul.f32.gmra.mxu3 %v6989_v51  ;;  %v7084_v24 = vand.u32 4294901760, %v715_v17  ;;  %12081 = vst [vmem:[#allocation10_spill] sm:$0xff] %v7157_v56 }
  0x58   : > { %1167 = vmatpush.msrb.mxu0 %v849_v48  ;;  %949 = vmatmul.f32.gmra.mxu2 %v6979_v45  ;;  %v7171_v62 = vand.u32 4294901760, %v739_v55  ;;  %12082 = vst [vmem:[#allocation11_spill] sm:$0xff] %v7174_v63  ;;  %v747_v2 = vsub.f32 %v7157_v56, %v7174_v63 }
  0x59   : > { %1248 = vmatpush.msrb.mxu1 %v6940_v25  ;;  %v7087_v25 = vand.u32 4294901760, %v7070_v18  ;;  %12083 = vst [vmem:[#allocation12_spill] sm:$0xff] %v7186_v6 }
  0x5a   : > { %701 = vmatmul.f32.gmra.mxu0 %v7022_v3  ;;  %591 = vperm.xlu1 %6571, %v533_v9   ;;  %v1996_v9 = vld [vmem:[%s11771_s5 + $0x60] sm:$0xff]  ;;  %12084 = vst [vmem:[#allocation13_spill] sm:$0xff] %v7203_v16 }
  0x5b   : > { %586 = vperm.xlu0 %6570, %v532_v10   ;;  %1250 = vmatpush.msrb.mxu1 %v6942_v26  ;;  %v7089_v26 = vand.u32 4294901760, %v636_v21  ;;  %v723_v28 = vsub.f32 %v7070_v18, %v7087_v25  ;;  %v648_v10 = vsel %vm619_vm0, %v516_v1, 0  ;;  %v519_v1 = vld [vmem:[%s12077_s2 + $0x60] sm:$0xff] }
  0x5c   : > { %596 = vperm.xlu2 %6572, %v534_v12   ;;  %v7200_v12 = vand.u32 4294901760, %v747_v2  ;;  %v7205_v17 = vand.u32 4294901760, %v648_v10 }
  0x5d   : > { %1252 = vmatpush.msrb.mxu1 %v6948_v29  ;;  %v7099_v29 = vsub.f32 %v636_v21, %v7089_v26  ;;  %v7113_v35 = vand.u32 4294901760, %v723_v28 }
  0x5e   : > { %858 = vmatmul.f32.gmra.mxu1 %v6962_v36  ;;  %v7215_v21 = vsub.f32 %v648_v10, %v7205_v17  ;;  %v1991_v10 = vld [vmem:[%s11771_s5 + $0x38] sm:$0xff] }
  0x5f   : > { %1058 = vmatmul.f32.gmra.mxu3 %v7025_v4  ;;  %v7116_v37 = vand.u32 4294901760, %v7099_v29 }
  0x60   : > { %954 = vmatmul.f32.gmra.mxu2 %v7006_v60  ;;  %12085 = vst [vmem:[#allocation14_spill] sm:$0xff] %v7215_v21  ;;  %v7232_v33 = vand.u32 4294901760, %v7215_v21 }
  0x61   : > { %12078 = vst [vmem:[#allocation7_spill] sm:$0xff] %v7116_v37  ;;  %v731_v41 = vsub.f32 %v7099_v29, %v7116_v37 }
  0x62   : > { %709 = vmatmul.f32.gmra.mxu0 %v7053_v13  ;;  %606 = vperm.xlu1 %6571, %v536_v19   ;;  %v517_v19 = vld [vmem:[%s12077_s2 + $0x50] sm:$0xff]  ;;  %12086 = vst [vmem:[#allocation15_spill] sm:$0xff] %v7232_v33 }
  0x63   : > { %601 = vperm.xlu0 %6570, %v535_v20   ;;  %v7142_v48 = vand.u32 4294901760, %v731_v41  ;;  %v755_v20 = vsub.f32 %v7186_v6, %v7203_v16  ;;  %v651_v28 = vsel %vm619_vm0, %v517_v19, 0  ;;  %v763_v41 = vsub.f32 %v7215_v21, %v7232_v33 }
  0x64   : > { %611 = vperm.xlu2 %6572, %v537_v22   ;;  %v1994_v22 = vld [vmem:[%s11771_s5 + $0x50] sm:$0xff]  ;;  %v657_v19 = vsel %vm619_vm0, %v519_v1, 0 }
  0x65   : > { %v7258_v55 = vand.u32 4294901760, %v763_v41 }
  0x66   : > { %862 = vmatmul.f32.gmra.mxu1 %v6991_v52 }
  0x67   : > { %1064 = vmatmul.f32.gmra.mxu3 %v7056_v14 }
  0x68   : > { %959 = vmatmul.f32.gmra.mxu2 %v7037_v8 }
  0x6a   : > { %717 = vmatmul.f32.gmra.mxu0 %v7084_v24  ;;  %2294 = vperm.xlu1 %6571, %v1983_v31   ;;  %v1976_v31 = vld [vmem:[%s11770_s4 + $0x40] sm:$0xff] }
  0x6b   : > { %616 = vperm.xlu0 %6570, %v538_v32   ;;  %v7229_v32 = vand.u32 4294901760, %v755_v20 }
  0x6c   : > { %2289 = vperm.xlu2 %6572, %v1982_v34   ;;  %v7234_v34 = vand.u32 4294901760, %v651_v28 }
  0x6e   : > { %866 = vmatmul.f32.gmra.mxu1 %v7027_v5 }
  0x6f   : > { %1070 = vmatmul.f32.gmra.mxu3 %v7087_v25 }
  0x70   : > { %964 = vmatmul.f32.gmra.mxu2 %v7070_v18 }
  0x72   : > { %725 = vmatmul.f32.gmra.mxu0 %v7113_v35  ;;  %2284 = vperm.xlu1 %6571, %v1981_v43   ;;  %v7244_v43 = vsub.f32 %v651_v28, %v7234_v34 }
  0x73   : > { %2406 = vperm.xlu0 %6570, %v1999_v44   ;;  %v1975_v44 = vld [vmem:[%s11770_s4 + $0x38] sm:$0xff] }
  0x74   : > { %2401 = vperm.xlu2 %6572, %v1998_v47   ;;  %12087 = vst [vmem:[#allocation16_spill] sm:$0xff] %v7244_v43  ;;  %v654_v47 = vsel %vm619_vm0, %v518_v40, 0  ;;  %v7305_v40 = vand.u32 4294901760, %v657_v19 }
  0x76   : > { %870 = vmatmul.f32.gmra.mxu1 %v7058_v15 }
  0x77   : > { %1076 = vmatmul.f32.gmra.mxu3 %v7116_v37 }
  0x78   : > { %969 = vmatmul.f32.gmra.mxu2 %v7099_v29 }
  0x7a   : > { %733 = vmatmul.f32.gmra.mxu0 %v7142_v48  ;;  %2396 = vperm.xlu1 %6571, %v1997_v57   ;;  %v7261_v57 = vand.u32 4294901760, %v7244_v43 }
  0x7b   : > { %2279 = vperm.xlu0 %6570, %v1980_v58   ;;  %v7263_v58 = vand.u32 4294901760, %v654_v47 }
  0x7c   : > { %2274 = vperm.xlu2 %6572, %v1979_v61   ;;  %12088 = vst [vmem:[#allocation17_spill] sm:$0xff] %v7261_v57  ;;  %v7266_v61 = vand.u32 4294901760, %v506_v59 }
  0x7e   : > { %874 = vmatmul.f32.gmra.mxu1 %v7089_v26  ;;  %1331 = vmatpush.msrb.mxu2 %v7266_v61  ;;  %v7273_v2 = vsub.f32 %v506_v59, %v7266_v61  ;;  %v1990_v59 = vld [vmem:[%s11771_s5 + $0x30] sm:$0xff] }
  0x7f   : > { %1082 = vmatmul.f32.gmra.mxu3 %v7145_v49  ;;  %1686 = vmatpush.msra.mxu1 %v7266_v61 }
  0x80   : > { %974 = vmatmul.f32.gmra.mxu2 %v7128_v42  ;;  %v11779_v20 = vand.u32 4294901760, %v7273_v2  ;;  %1582 = vmatpush.msra.mxu0 %v7273_v2  ;;  %v12095_v42 = vand.u32 4294901760, %v7273_v2 }
  0x82   : > { %741 = vmatmul.f32.gmra.mxu0 %v7171_v62  ;;  %2269 = vperm.xlu1 %6571, %v1978_v7   ;;  %v771_v7 = vsub.f32 %v7244_v43, %v7261_v57 }
  0x83   : > { %2391 = vperm.xlu0 %6570, %v1996_v9   ;;  %v7281_v9 = vsub.f32 %v654_v47, %v7263_v58  ;;  %v7315_v47 = vsub.f32 %v657_v19, %v7305_v40 }
  0x84   : > { %2386 = vperm.xlu2 %6572, %v1995_v11   ;;  %v1974_v11 = vld [vmem:[%s11770_s4 + $0x30] sm:$0xff]  ;;  %v7300_v28 = vand.u32 4294901760, %v771_v7  ;;  %v1989_v7 = vld [vmem:[%s11771_s5 + $0x28] sm:$0xff] }
  0x85   : > { %12089 = vst [vmem:[#allocation18_spill] sm:$0xff] %v7281_v9 }
  0x86   : > { %878 = vmatmul.f32.gmra.mxu1 %v7118_v38  ;;  %12091 = vst [vmem:[#allocation20_spill] sm:$0xff] %v7315_v47 }
  0x87   : > { %1088 = vmatmul.f32.gmra.mxu3 %v7174_v63 }
  0x88   : > { %979 = vmatmul.f32.gmra.mxu2 %v7157_v56 }
  0x8a   : > { %749 = vmatmul.f32.gmra.mxu0 %v7200_v12  ;;  %2381 = vperm.xlu1 %6571, %v1994_v22   ;;  %v1973_v22 = vld [vmem:[%s11770_s4 + $0x28] sm:$0xff] }
  0x8b   : > { %2264 = vperm.xlu0 %6570, %v1977_v27   ;;  %v1482_v27 = vsub.f32 %v7273_v2, %v11779_v20  ;;  %v500_v20 = vld [vmem:[%s6931_s28 + $0x8] sm:$0xff] }
  0x8c   : > { %2259 = vperm.xlu2 %6572, %v1976_v31   ;;  %v7303_v31 = vand.u32 4294901760, %v7281_v9 }
  0x8d   : > { %v1483_v41 = vand.u32 4294901760, %v1482_v27 }
  0x8e   : > { %882 = vmatmul.f32.gmra.mxu1 %v7147_v50  ;;  %12090 = vst [vmem:[#allocation19_spill] sm:$0xff] %v7303_v31 }
  0x8f   : > { %1094 = vmatmul.f32.gmra.mxu3 %v7203_v16  ;;  %v7364_v16 = vand.u32 4294901760, %v500_v20 }
  0x90   : > { %984 = vmatmul.f32.gmra.mxu2 %v7186_v6  ;;  %1484 = vmatpush.msrb.mxu3 %v1483_v41  ;;  %v521_v41 = vld [vmem:[%s12077_s2 + $0x70] sm:$0xff] }
  0x91   : > { %v1498_v6 = vsub.f32 %v500_v20, %v7364_v16 }
  0x92   : > { %757 = vmatmul.f32.gmra.mxu0 %v7229_v32  ;;  %2254 = vperm.xlu1 %6571, %v1975_v44   ;;  %v520_v44 = vld [vmem:[%s12077_s2 + $0x68] sm:$0xff] }
  0x93   : > { %2376 = vperm.xlu0 %6570, %v1993_v46   ;;  %v779_v46 = vsub.f32 %v7281_v9, %v7303_v31  ;;  %v660_v1 = vsel %vm619_vm0, %v520_v44, 0  ;;  %v502_v44 = vld [vmem:[%s6931_s28 + $0x18] sm:$0xff]  ;;  %v1499_v37 = vand.u32 4294901760, %v1498_v6 }
  0x94   : > { %2371 = vperm.xlu2 %6572, %v1992_v54   ;;  %v1972_v54 = vld [vmem:[%s11770_s4 + $0x20] sm:$0xff]  ;;  %v7334_v19 = vand.u32 4294901760, %v660_v1 }
  0x96   : > { %886 = vmatmul.f32.gmra.mxu1 %v7176_v0 }
  0x97   : > { %1100 = vmatmul.f32.gmra.mxu3 %v7232_v33  ;;  %v663_v33 = vsel %vm619_vm0, %v521_v41, 0 }
  0x98   : > { %989 = vmatmul.f32.gmra.mxu2 %v7215_v21  ;;  %v7380_v49 = vand.u32 4294901760, %v663_v33 }
  0x9a   : > { %765 = vmatmul.f32.gmra.mxu0 %v7258_v55  ;;  %2366 = vperm.xlu1 %6571, %v1991_v10   ;;  %v7329_v10 = vand.u32 4294901760, %v779_v46 }
  0x9b   : > { %2249 = vperm.xlu0 %6570, %v1974_v11   ;;  %v7332_v11 = vand.u32 4294901760, %v7315_v47 }
  0x9c   : > { %2244 = vperm.xlu2 %6572, %v1973_v22   ;;  %v504_v22 = vld [vmem:[%s6931_s28 + $0x28] sm:$0xff]  ;;  %s6525_s28 = smul.u32 48, %s6921_s17 }
  0x9d   : > { %12092 = vst [vmem:[#allocation21_spill] sm:$0xff] %v7332_v11  ;;  %v7337_v27 = vand.u32 4294901760, %v504_v22 }
  0x9e   : > { %890 = vmatmul.f32.gmra.mxu1 %v7205_v17  ;;  %s11672_s13 = scalar_lea.vmem [#allocation3], %s6525_s28  ;;  %s11699_s29 = scalar_lea.vmem [#allocation4], %s6525_s28 }
  0x9f   : > { %1106 = vmatmul.f32.gmra.mxu3 %v7261_v57  ;;  %1333 = vmatpush.msrb.mxu2 %v7337_v27  ;;  %v1486_v46 = vsub.f32 %v504_v22, %v7337_v27  ;;  %v1988_v57 = vld [vmem:[%s11771_s5 + $0x20] sm:$0xff]  ;;  %v1971_v22 = vld [vmem:[%s11770_s4 + $0x18] sm:$0xff]  ;;  %s6418_s26 = sshll.u32 %s11699_s29, 4  ;;  %s6406_s28 = scalar_lea.sflag [#allocation5], %s6921_s17  ;;  %s11730_s26 = int_to_ptr.vmem [resolvable:$true] %s6418_s26 }
  0xa0   : > { %994 = vmatmul.f32.gmra.mxu2 %v7244_v43  ;;  %1688 = vmatpush.msra.mxu1 %v7337_v27 }
  0xa1   : > { %v1487_v43 = vand.u32 4294901760, %v1486_v46  ;;  %1585 = vmatpush.msra.mxu0 %v1486_v46 }
  0xa2   : > { %773 = vmatmul.f32.gmra.mxu0 %v7300_v28  ;;  %2239 = vperm.xlu1 %6571, %v1972_v54   ;;  %v7344_v54 = vand.u32 4294901760, %v502_v44 }
  0xa3   : > { %2361 = vperm.xlu0 %6570, %v1990_v59   ;;  %v787_v59 = vsub.f32 %v7315_v47, %v7332_v11  ;;  %v1488_v63 = vsub.f32 %v1486_v46, %v1487_v43  ;;  %v1500_v46 = vsub.f32 %v1498_v6, %v1499_v37 }
  0xa4   : > { %2356 = vperm.xlu2 %6572, %v1989_v7   ;;  %v7353_v7 = vsub.f32 %v660_v1, %v7334_v19  ;;  %1335 = vmatpush.msrb.mxu2 %v7344_v54  ;;  %v1492_v21 = vsub.f32 %v502_v44, %v7344_v54  ;;  %v1970_v1 = vld [vmem:[%s11770_s4 + $0x10] sm:$0xff] }
  0xa5   : > { %1690 = vmatpush.msra.mxu1 %v7344_v54  ;;  %v7375_v44 = vand.u32 4294901760, %v787_v59  ;;  %v1501_v2 = vand.u32 4294901760, %v1500_v46  ;;  %v2746_v46 = vld [vmem:[%s11773_s7 + $0x8] sm:$0xff] }
  0xa6   : > { %894 = vmatmul.f32.gmra.mxu1 %v7234_v34  ;;  %12093 = vst [vmem:[#allocation22_spill] sm:$0xff] %v7353_v7  ;;  %1337 = vmatpush.msrb.mxu2 %v7364_v16  ;;  %v1493_v41 = vand.u32 4294901760, %v1492_v21 }
  0xa7   : > { %1112 = vmatmul.f32.gmra.mxu3 %v7303_v31  ;;  %v1489_v31 = vand.u32 4294901760, %v1488_v63  ;;  %1588 = vmatpush.msra.mxu0 %v1492_v21 }
  0xa8   : > { %999 = vmatmul.f32.gmra.mxu2 %v7281_v9  ;;  %v7378_v9 = vand.u32 4294901760, %v7353_v7  ;;  %v1494_v56 = vsub.f32 %v1492_v21, %v1493_v41  ;;  %1692 = vmatpush.msra.mxu1 %v7364_v16  ;;  %v1969_v21 = vld [vmem:[%s11770_s4 + $0x8] sm:$0xff] }
  0xa9   : > { %1805 = vmatpush.msra.mxu2 %v12095_v42  ;;  %1490 = vmatpush.msrb.mxu3 %v1489_v31  ;;  %v7393_v42 = vsub.f32 %v663_v33, %v7380_v49  ;;  %v1986_v33 = vld [vmem:[%s11771_s5 + $0x10] sm:$0xff] }
  0xaa   : > { %781 = vmatmul.f32.gmra.mxu0 %v7329_v10  ;;  %2351 = vperm.xlu1 %6571, %v1988_v57   ;;  %12094 = vst [vmem:[#allocation23_spill] sm:$0xff] %v7378_v9  ;;  %v522_v57 = vld [vmem:[%s12077_s2 + $0x78] sm:$0xff]  ;;  %v1495_v20 = vand.u32 4294901760, %v1494_v56  ;;  %v795_v63 = vsub.f32 %v7353_v7, %v7378_v9 }
  0xab   : > { %2234 = vperm.xlu0 %6570, %v1971_v22   ;;  %1591 = vmatpush.msra.mxu0 %v1498_v6  ;;  %12096 = vst [vmem:[#allocation24_spill] sm:$0xff] %v7393_v42  ;;  %v1987_v56 = vld [vmem:[%s11771_s5 + $0x18] sm:$0xff]  ;;  %v666_v6 = vsel %vm619_vm0, %v522_v57, 0  ;;  %v7410_v59 = vand.u32 4294901760, %v7393_v42 }
  0xac   : > { %2229 = vperm.xlu2 %6572, %v1970_v1   ;;  %1496 = vmatpush.msrb.mxu3 %v1495_v20  ;;  %v7407_v31 = vand.u32 4294901760, %v795_v63  ;;  %v7412_v22 = vand.u32 4294901760, %v666_v6  ;;  %v2745_v63 = vld [vmem:[%s11773_s7] sm:$0xff] }
  0xad   : > { %1809 = vmatpush.msra.mxu2 %v1487_v43  ;;  %12097 = vst [vmem:[#allocation25_spill] sm:$0xff] %v7410_v59  ;;  %v803_v43 = vsub.f32 %v7393_v42, %v7410_v59 }
  0xae   : > { %898 = vmatmul.f32.gmra.mxu1 %v7263_v58  ;;  %1502 = vmatpush.msrb.mxu3 %v1501_v2  ;;  %v7420_v1 = vsub.f32 %v666_v6, %v7412_v22  ;;  %v2750_v6 = vld [vmem:[%s11773_s7 + $0x28] sm:$0xff] }
  0xaf   : > { %1118 = vmatmul.f32.gmra.mxu3 %v7332_v11  ;;  %1813 = vmatpush.msra.mxu2 %v1493_v41  ;;  %v1985_v41 = vld [vmem:[%s11771_s5 + $0x8] sm:$0xff]  ;;  %v7434_v57 = vand.u32 4294901760, %v803_v43  ;;  %v2752_v43 = vld [vmem:[%s11773_s7 + $0x38] sm:$0xff] }
  0xb0   : > { %1004 = vmatmul.f32.gmra.mxu2 %v7315_v47  ;;  %1896 = vmatpush.msra.mxu3 %v7266_v61  ;;  %12098 = vst [vmem:[#allocation26_spill] sm:$0xff] %v7420_v1  ;;  %v1984_v61 = vld [vmem:[%s11771_s5] sm:$0xff]  ;;  %v7437_v20 = vand.u32 4294901760, %v7420_v1 }
  0xb1   : > { %1817 = vmatpush.msra.mxu2 %v1499_v37  ;;  %v1968_v37 = vld [vmem:[%s11770_s4] sm:$0xff] }
  0xb2   : > { %789 = vmatmul.f32.gmra.mxu0 %v7375_v44  ;;  %2224 = vperm.xlu1 %6571, %v1969_v21   ;;  %12099 = vst [vmem:[#allocation27_spill] sm:$0xff] %v7437_v20  ;;  %v2749_v21 = vld [vmem:[%s11773_s7 + $0x20] sm:$0xff] }
  0xb3   : > { %2346 = vperm.xlu0 %6570, %v1987_v56   ;;  %1898 = vmatpush.msra.mxu3 %v7337_v27  ;;  %v811_v27 = vsub.f32 %v7420_v1, %v7437_v20  ;;  %v2748_v56 = vld [vmem:[%s11773_s7 + $0x18] sm:$0xff] }
  0xb4   : > { %2341 = vperm.xlu2 %6572, %v1986_v33   ;;  %v7471_v33 = vpop.permute.xlu0 %541 }
  0xb5   : > { %1900 = vmatpush.msra.mxu3 %v7344_v54  ;;  %v7456_v54 = vand.u32 4294901760, %v811_v27 }
  0xb6   : > { %902 = vmatmul.f32.gmra.mxu1 %v7305_v40 }
  0xb7   : > { %1124 = vmatmul.f32.gmra.mxu3 %v7378_v9 }
  0xb8   : > { %1009 = vmatmul.f32.gmra.mxu2 %v7353_v7  ;;  %1902 = vmatpush.msra.mxu3 %v7364_v16  ;;  %v2747_v16 = vld [vmem:[%s11773_s7 + $0x10] sm:$0xff] }
  0xba   : > { %797 = vmatmul.f32.gmra.mxu0 %v7407_v31  ;;  %2336 = vperm.xlu1 %6571, %v1985_v41   ;;  %v2751_v41 = vld [vmem:[%s11773_s7 + $0x30] sm:$0xff] }
  0xbb   : > { %2219 = vperm.xlu0 %6570, %v1968_v37  }
  0xbc   : > { %2331 = vperm.xlu2 %6572, %v1984_v61   ;;  %v2753_v61 = vld [vmem:[%s11773_s7 + $0x40] sm:$0xff] }
  0xbe   : > { %906 = vmatmul.f32.gmra.mxu1 %v7334_v19 }
  0xbf   : > { %1130 = vmatmul.f32.gmra.mxu3 %v7410_v59 }
  0xc0   : > { %1014 = vmatmul.f32.gmra.mxu2 %v7393_v42 }
  0xc2   : > { %805 = vmatmul.f32.gmra.mxu0 %v7434_v57  ;;  %2768 = vperm.xlu1 %6571, %v2746_v46  }
  0xc3   : > { %2763 = vperm.xlu0 %6570, %v2745_v63  }
  0xc4   : > { %2773 = vperm.xlu2 %6572, %v2747_v16  }
  0xc6   : > { %910 = vmatmul.f32.gmra.mxu1 %v7380_v49 }
  0xc7   : > { %1136 = vmatmul.f32.gmra.mxu3 %v7437_v20  ;;  %v7505_v20 = vpop.permute.xlu1 %551 }
  0xc8   : > { %1019 = vmatmul.f32.gmra.mxu2 %v7420_v1 }
  0xca   : > { %813 = vmatmul.f32.gmra.mxu0 %v7456_v54  ;;  %2783 = vperm.xlu1 %6571, %v2749_v21  }
  0xcb   : > { %2778 = vperm.xlu0 %6570, %v2748_v56  }
  0xcc   : > { %2788 = vperm.xlu2 %6572, %v2750_v6   ;;  %v2755_v6 = vld [vmem:[%s11773_s7 + $0x50] sm:$0xff] }
  0xce   : > { %914 = vmatmul.f32.gmra.mxu1 %v7412_v22 }
  0xcf   : > { %v694_v2 = vpop.f32.mrf.mxu0  ;;  %1504 = vmatmul.f32.vlgmr.msrb.gmra.mxu3 %v6936_v23 }
  0xd0   : > { %v695_v37 = vadd.f32 %v694_v2, %v7471_v33  ;;  %1343 = vmatmul.f32.vlgmr.msrb.gmra.mxu2 %v6994_v53  ;;  %v7489_v53 = vpop.permute.xlu0 %546  ;;  %v2754_v2 = vld [vmem:[%s11773_s7 + $0x48] sm:$0xff] }
  0xd2   : > { %1169 = vmatmul.f32.vlgmr.msrb.gmra.mxu0 %v6936_v23  ;;  %2798 = vperm.xlu1 %6571, %v2752_v43   ;;  %v1047_v21 = vpop.f32.mrf.mxu3 }
  0xd3   : > { %2793 = vperm.xlu0 %6570, %v2751_v41   ;;  %v855_v46 = vpop.f32.mrf.mxu1  ;;  %v945_v16 = vpop.f32.mrf.mxu2 }
  0xd4   : > { %v856_v63 = vadd.f32 %v855_v46, %v695_v37  ;;  %2803 = vperm.xlu2 %6572, %v2753_v61   ;;  %v2756_v37 = vld [vmem:[%s11773_s7 + $0x58] sm:$0xff] }
  0xd6   : > { %v946_v56 = vadd.f32 %v945_v16, %v856_v63  ;;  %1254 = vmatmul.f32.vlgmr.msrb.gmra.mxu1 %v6936_v23 }
  0xd7   : > { %v702_v27 = vpop.f32.mrf.mxu0  ;;  %1508 = vmatmul.f32.gmra.mxu3 %v6962_v36 }
  0xd8   : > { %v703_v43 = vadd.f32 %v702_v27, %v7489_v53  ;;  %v7498_v41 = vadd.f32 %v1047_v21, %v946_v56  ;;  %1351 = vmatmul.f32.gmra.mxu2 %v7022_v3  ;;  %v2758_v3 = vld [vmem:[%s11773_s7 + $0x68] sm:$0xff]  ;;  %v2757_v56 = vld [vmem:[%s11773_s7 + $0x60] sm:$0xff] }
  0xda   : > { %1173 = vmatmul.f32.gmra.mxu0 %v6962_v36  ;;  %2813 = vperm.xlu1 %6571, %v2755_v6   ;;  %v1053_v27 = vpop.f32.mrf.mxu3 }
  0xdb   : > { %2808 = vperm.xlu0 %6570, %v2754_v2   ;;  %v859_v46 = vpop.f32.mrf.mxu1  ;;  %v950_v16 = vpop.f32.mrf.mxu2 }
  0xdc   : > { %v860_v63 = vadd.f32 %v859_v46, %v703_v43  ;;  %2818 = vperm.xlu2 %6572, %v2756_v37   ;;  %v2759_v43 = vld [vmem:[%s11773_s7 + $0x70] sm:$0xff] }
  0xde   : > { %v951_v21 = vadd.f32 %v950_v16, %v860_v63  ;;  %1258 = vmatmul.f32.gmra.mxu1 %v6962_v36 }
  0xdf   : > { %v710_v61 = vpop.f32.mrf.mxu0  ;;  %1512 = vmatmul.f32.gmra.mxu3 %v6991_v52 }
  0xe0   : > { %v711_v6 = vadd.f32 %v710_v61, %v7505_v20  ;;  %v7516_v2 = vadd.f32 %v1053_v27, %v951_v21  ;;  %1359 = vmatmul.f32.gmra.mxu2 %v7053_v13  ;;  %v7525_v13 = vpop.permute.xlu1 %556  ;;  %v4468_v61 = vld [vmem:[%s11774_s8 + $0x78] sm:$0xff] }
  0xe1   : > { %v2760_v27 = vld [vmem:[%s11773_s7 + $0x78] sm:$0xff] }
  0xe2   : > { %1177 = vmatmul.f32.gmra.mxu0 %v6991_v52  ;;  %2828 = vperm.xlu1 %6571, %v2758_v3   ;;  %v1059_v59 = vpop.f32.mrf.mxu3 }
  0xe3   : > { %2823 = vperm.xlu0 %6570, %v2757_v56   ;;  %v863_v46 = vpop.f32.mrf.mxu1  ;;  %v955_v16 = vpop.f32.mrf.mxu2  ;;  %v4467_v56 = vld [vmem:[%s11774_s8 + $0x70] sm:$0xff] }
  0xe4   : > { %v864_v63 = vadd.f32 %v863_v46, %v711_v6  ;;  %2833 = vperm.xlu2 %6572, %v2759_v43  }
  0xe6   : > { %v956_v1 = vadd.f32 %v955_v16, %v864_v63  ;;  %1262 = vmatmul.f32.gmra.mxu1 %v6991_v52  ;;  %v7541_v16 = vpop.permute.xlu2 %561 }
  0xe7   : > { %v718_v37 = vpop.f32.mrf.mxu0  ;;  %1516 = vmatmul.f32.gmra.mxu3 %v7027_v5 }
  0xe8   : > { %v719_v21 = vadd.f32 %v718_v37, %v7525_v13  ;;  %v7534_v3 = vadd.f32 %v1059_v59, %v956_v1  ;;  %1367 = vmatmul.f32.gmra.mxu2 %v7084_v24  ;;  %v4466_v24 = vld [vmem:[%s11774_s8 + $0x68] sm:$0xff]  ;;  %v4484_v1 = vld [vmem:[%s11775_s9 + $0x78] sm:$0xff] }
  0xea   : > { %1181 = vmatmul.f32.gmra.mxu0 %v7027_v5  ;;  %4772 = vperm.xlu1 %6571, %v4468_v61   ;;  %v1065_v37 = vpop.f32.mrf.mxu3 }
  0xeb   : > { %2838 = vperm.xlu0 %6570, %v2760_v27   ;;  %v867_v43 = vpop.f32.mrf.mxu1  ;;  %v960_v63 = vpop.f32.mrf.mxu2 }
  0xec   : > { %v868_v46 = vadd.f32 %v867_v43, %v719_v21  ;;  %4767 = vperm.xlu2 %6572, %v4467_v56   ;;  %v4483_v21 = vld [vmem:[%s11775_s9 + $0x70] sm:$0xff] }
  0xee   : > { %v961_v59 = vadd.f32 %v960_v63, %v868_v46  ;;  %1266 = vmatmul.f32.gmra.mxu1 %v7027_v5 }
  0xef   : > { %v726_v6 = vpop.f32.mrf.mxu0  ;;  %1520 = vmatmul.f32.gmra.mxu3 %v7058_v15 }
  0xf0   : > { %v727_v61 = vadd.f32 %v726_v6, %v7541_v16  ;;  %v7552_v27 = vadd.f32 %v1065_v37, %v961_v59  ;;  %1375 = vmatmul.f32.gmra.mxu2 %v7113_v35  ;;  %v7561_v35 = vpop.permute.xlu2 %566  ;;  %v4482_v6 = vld [vmem:[%s11775_s9 + $0x68] sm:$0xff]  ;;  %v4465_v37 = vld [vmem:[%s11774_s8 + $0x60] sm:$0xff] }
  0xf2   : > { %1185 = vmatmul.f32.gmra.mxu0 %v7058_v15  ;;  %4762 = vperm.xlu1 %6571, %v4466_v24   ;;  %v1071_v9 = vpop.f32.mrf.mxu3 }
  0xf3   : > { %4884 = vperm.xlu0 %6570, %v4484_v1   ;;  %v871_v43 = vpop.f32.mrf.mxu1  ;;  %v965_v63 = vpop.f32.mrf.mxu2  ;;  %v4464_v1 = vld [vmem:[%s11774_s8 + $0x58] sm:$0xff] }
  0xf4   : > { %v872_v46 = vadd.f32 %v871_v43, %v727_v61  ;;  %4879 = vperm.xlu2 %6572, %v4483_v21  }
  0xf6   : > { %v966_v42 = vadd.f32 %v965_v63, %v872_v46  ;;  %1270 = vmatmul.f32.gmra.mxu1 %v7058_v15 }
  0xf7   : > { %v734_v56 = vpop.f32.mrf.mxu0  ;;  %1524 = vmatmul.f32.gmra.mxu3 %v7089_v26 }
  0xf8   : > { %v735_v59 = vadd.f32 %v734_v56, %v7561_v35  ;;  %v7570_v24 = vadd.f32 %v1071_v9, %v966_v42  ;;  %1383 = vmatmul.f32.gmra.mxu2 %v7142_v48  ;;  %v7579_v48 = vpop.permute.xlu0 %571  ;;  %v4463_v9 = vld [vmem:[%s11774_s8 + $0x50] sm:$0xff]  ;;  %v4481_v42 = vld [vmem:[%s11775_s9 + $0x60] sm:$0xff] }
  0xfa   : > { %1189 = vmatmul.f32.gmra.mxu0 %v7089_v26  ;;  %4874 = vperm.xlu1 %6571, %v4482_v6   ;;  %v1077_v63 = vpop.f32.mrf.mxu3 }
  0xfb   : > { %4757 = vperm.xlu0 %6570, %v4465_v37   ;;  %v875_v21 = vpop.f32.mrf.mxu1  ;;  %v970_v46 = vpop.f32.mrf.mxu2  ;;  %v4480_v37 = vld [vmem:[%s11775_s9 + $0x58] sm:$0xff] }
  0xfc   : > { %v876_v43 = vadd.f32 %v875_v21, %v735_v59  ;;  %4752 = vperm.xlu2 %6572, %v4464_v1  }
  0xfe   : > { %v971_v11 = vadd.f32 %v970_v46, %v876_v43  ;;  %1274 = vmatmul.f32.gmra.mxu1 %v7089_v26 }
  0xff   : > { %v742_v61 = vpop.f32.mrf.mxu0  ;;  %1528 = vmatmul.f32.gmra.mxu3 %v7118_v38 }
 0x100   : > { %v743_v56 = vadd.f32 %v742_v61, %v7579_v48  ;;  %v7588_v6 = vadd.f32 %v1077_v63, %v971_v11  ;;  %1391 = vmatmul.f32.gmra.mxu2 %v7171_v62  ;;  %v7597_v62 = vpop.permute.xlu1 %576  ;;  %v4479_v11 = vld [vmem:[%s11775_s9 + $0x50] sm:$0xff]  ;;  %v4462_v61 = vld [vmem:[%s11774_s8 + $0x48] sm:$0xff] }
 0x102   : > { %1193 = vmatmul.f32.gmra.mxu0 %v7118_v38  ;;  %4747 = vperm.xlu1 %6571, %v4463_v9   ;;  %v1083_v46 = vpop.f32.mrf.mxu3 }
 0x103   : > { %4869 = vperm.xlu0 %6570, %v4481_v42   ;;  %v879_v1 = vpop.f32.mrf.mxu1  ;;  %v975_v43 = vpop.f32.mrf.mxu2  ;;  %v4461_v42 = vld [vmem:[%s11774_s8 + $0x40] sm:$0xff] }
 0x104   : > { %v880_v21 = vadd.f32 %v879_v1, %v743_v56  ;;  %4864 = vperm.xlu2 %6572, %v4480_v37  }
 0x106   : > { %v976_v7 = vadd.f32 %v975_v43, %v880_v21  ;;  %1278 = vmatmul.f32.gmra.mxu1 %v7118_v38 }
 0x107   : > { %v750_v59 = vpop.f32.mrf.mxu0  ;;  %1532 = vmatmul.f32.gmra.mxu3 %v7147_v50 }
 0x108   : > { %v751_v63 = vadd.f32 %v750_v59, %v7597_v62  ;;  %v7606_v9 = vadd.f32 %v1083_v46, %v976_v7  ;;  %1399 = vmatmul.f32.gmra.mxu2 %v7200_v12  ;;  %v7615_v12 = vpop.permute.xlu2 %581  ;;  %v4460_v7 = vld [vmem:[%s11774_s8 + $0x38] sm:$0xff]  ;;  %v4478_v59 = vld [vmem:[%s11775_s9 + $0x48] sm:$0xff] }
 0x109   : > { %12101 = vst [vmem:[#allocation29_spill] sm:$0xff] %v7615_v12 }
 0x10a   : > { %1197 = vmatmul.f32.gmra.mxu0 %v7147_v50  ;;  %12100 = vst [vmem:[#allocation28_spill] sm:$0xff] %v7606_v9  ;;  %4859 = vperm.xlu1 %6571, %v4479_v11   ;;  %v1089_v43 = vpop.f32.mrf.mxu3 }
 0x10b   : > { %4742 = vperm.xlu0 %6570, %v4462_v61   ;;  %v883_v37 = vpop.f32.mrf.mxu1  ;;  %v980_v21 = vpop.f32.mrf.mxu2  ;;  %v4477_v61 = vld [vmem:[%s11775_s9 + $0x40] sm:$0xff] }
 0x10c   : > { %v884_v1 = vadd.f32 %v883_v37, %v751_v63  ;;  %4737 = vperm.xlu2 %6572, %v4461_v42  }
 0x10e   : > { %v981_v47 = vadd.f32 %v980_v21, %v884_v1  ;;  %1282 = vmatmul.f32.gmra.mxu1 %v7147_v50 }
 0x10f   : > { %v758_v56 = vpop.f32.mrf.mxu0  ;;  %1536 = vmatmul.f32.gmra.mxu3 %v7176_v0 }
 0x110   : > { %v759_v46 = vadd.f32 %v758_v56, %v7615_v12  ;;  %v7624_v11 = vadd.f32 %v1089_v43, %v981_v47  ;;  %1407 = vmatmul.f32.gmra.mxu2 %v7229_v32  ;;  %v7633_v32 = vpop.permute.xlu0 %586  ;;  %v4476_v47 = vld [vmem:[%s11775_s9 + $0x38] sm:$0xff]  ;;  %v4459_v56 = vld [vmem:[%s11774_s8 + $0x30] sm:$0xff] }
 0x111   : > { %12102 = vst [vmem:[#allocation30_spill] sm:$0xff] %v7633_v32 }
 0x112   : > { %1201 = vmatmul.f32.gmra.mxu0 %v7176_v0  ;;  %4732 = vperm.xlu1 %6571, %v4460_v7   ;;  %v1095_v21 = vpop.f32.mrf.mxu3 }
 0x113   : > { %4854 = vperm.xlu0 %6570, %v4478_v59   ;;  %v887_v42 = vpop.f32.mrf.mxu1  ;;  %v985_v1 = vpop.f32.mrf.mxu2  ;;  %v4458_v59 = vld [vmem:[%s11774_s8 + $0x28] sm:$0xff] }
 0x114   : > { %v888_v37 = vadd.f32 %v887_v42, %v759_v46  ;;  %4849 = vperm.xlu2 %6572, %v4477_v61  }
 0x116   : > { %v986_v9 = vadd.f32 %v985_v1, %v888_v37  ;;  %1286 = vmatmul.f32.gmra.mxu1 %v7176_v0 }
 0x117   : > { %v766_v63 = vpop.f32.mrf.mxu0  ;;  %1540 = vmatmul.f32.gmra.mxu3 %v7205_v17 }
 0x118   : > { %v767_v43 = vadd.f32 %v766_v63, %v7633_v32  ;;  %v7642_v7 = vadd.f32 %v1095_v21, %v986_v9  ;;  %1415 = vmatmul.f32.gmra.mxu2 %v7258_v55  ;;  %v7651_v55 = vpop.permute.xlu1 %591  ;;  %v4457_v9 = vld [vmem:[%s11774_s8 + $0x20] sm:$0xff]  ;;  %v4475_v63 = vld [vmem:[%s11775_s9 + $0x30] sm:$0xff] }
 0x119   : > { %12103 = vst [vmem:[#allocation31_spill] sm:$0xff] %v7651_v55 }
 0x11a   : > { %1205 = vmatmul.f32.gmra.mxu0 %v7205_v17  ;;  %4844 = vperm.xlu1 %6571, %v4476_v47   ;;  %v1101_v1 = vpop.f32.mrf.mxu3 }
 0x11b   : > { %4727 = vperm.xlu0 %6570, %v4459_v56   ;;  %v891_v61 = vpop.f32.mrf.mxu1  ;;  %v990_v37 = vpop.f32.mrf.mxu2  ;;  %v4474_v56 = vld [vmem:[%s11775_s9 + $0x28] sm:$0xff] }
 0x11c   : > { %v892_v42 = vadd.f32 %v891_v61, %v767_v43  ;;  %4722 = vperm.xlu2 %6572, %v4458_v59  }
 0x11e   : > { %v991_v12 = vadd.f32 %v990_v37, %v892_v42  ;;  %1290 = vmatmul.f32.gmra.mxu1 %v7205_v17 }
 0x11f   : > { %v774_v46 = vpop.f32.mrf.mxu0  ;;  %1544 = vmatmul.f32.gmra.mxu3 %v7234_v34 }
 0x120   : > { %v775_v21 = vadd.f32 %v774_v46, %v7651_v55  ;;  %v7660_v47 = vadd.f32 %v1101_v1, %v991_v12  ;;  %1423 = vmatmul.f32.gmra.mxu2 %v7300_v28  ;;  %v7669_v28 = vpop.permute.xlu2 %596  ;;  %v4473_v12 = vld [vmem:[%s11775_s9 + $0x20] sm:$0xff]  ;;  %v4456_v46 = vld [vmem:[%s11774_s8 + $0x18] sm:$0xff] }
 0x121   : > { %12104 = vst [vmem:[#allocation32_spill] sm:$0xff] %v7669_v28 }
 0x122   : > { %1209 = vmatmul.f32.gmra.mxu0 %v7234_v34  ;;  %4717 = vperm.xlu1 %6571, %v4457_v9   ;;  %v1107_v37 = vpop.f32.mrf.mxu3 }
 0x123   : > { %4839 = vperm.xlu0 %6570, %v4475_v63   ;;  %v895_v59 = vpop.f32.mrf.mxu1  ;;  %v995_v42 = vpop.f32.mrf.mxu2  ;;  %v4455_v63 = vld [vmem:[%s11774_s8 + $0x10] sm:$0xff] }
 0x124   : > { %v896_v61 = vadd.f32 %v895_v59, %v775_v21  ;;  %4834 = vperm.xlu2 %6572, %v4474_v56  }
 0x126   : > { %v996_v32 = vadd.f32 %v995_v42, %v896_v61  ;;  %1294 = vmatmul.f32.gmra.mxu1 %v7234_v34 }
 0x127   : > { %v782_v43 = vpop.f32.mrf.mxu0  ;;  %1548 = vmatmul.f32.gmra.mxu3 %v7263_v58 }
 0x128   : > { %v783_v1 = vadd.f32 %v782_v43, %v7669_v28  ;;  %v7678_v9 = vadd.f32 %v1107_v37, %v996_v32  ;;  %1431 = vmatmul.f32.gmra.mxu2 %v7329_v10  ;;  %v7687_v10 = vpop.permute.xlu0 %601  ;;  %v4454_v32 = vld [vmem:[%s11774_s8 + $0x8] sm:$0xff]  ;;  %v4472_v43 = vld [vmem:[%s11775_s9 + $0x18] sm:$0xff] }
 0x129   : > { %12105 = vst [vmem:[#allocation33_spill] sm:$0xff] %v7687_v10 }
 0x12a   : > { %1213 = vmatmul.f32.gmra.mxu0 %v7263_v58  ;;  %4829 = vperm.xlu1 %6571, %v4473_v12   ;;  %v1113_v42 = vpop.f32.mrf.mxu3 }
 0x12b   : > { %4712 = vperm.xlu0 %6570, %v4456_v46   ;;  %v899_v56 = vpop.f32.mrf.mxu1  ;;  %v1000_v61 = vpop.f32.mrf.mxu2  ;;  %v4471_v46 = vld [vmem:[%s11775_s9 + $0x10] sm:$0xff] }
 0x12c   : > { %v900_v59 = vadd.f32 %v899_v56, %v783_v1  ;;  %4707 = vperm.xlu2 %6572, %v4455_v63  }
 0x12e   : > { %v1001_v55 = vadd.f32 %v1000_v61, %v900_v59  ;;  %1298 = vmatmul.f32.gmra.mxu1 %v7263_v58 }
 0x12f   : > { %v790_v21 = vpop.f32.mrf.mxu0  ;;  %1552 = vmatmul.f32.gmra.mxu3 %v7305_v40 }
 0x130   : > { %v791_v37 = vadd.f32 %v790_v21, %v7687_v10  ;;  %v7696_v12 = vadd.f32 %v1113_v42, %v1001_v55  ;;  %1439 = vmatmul.f32.gmra.mxu2 %v7375_v44  ;;  %v7705_v44 = vpop.permute.xlu1 %606  ;;  %v4470_v55 = vld [vmem:[%s11775_s9 + $0x8] sm:$0xff]  ;;  %v4453_v21 = vld [vmem:[%s11774_s8] sm:$0xff] }
 0x131   : > { %12106 = vst [vmem:[#allocation34_spill] sm:$0xff] %v7705_v44 }
 0x132   : > { %1217 = vmatmul.f32.gmra.mxu0 %v7305_v40  ;;  %4702 = vperm.xlu1 %6571, %v4454_v32   ;;  %v1119_v61 = vpop.f32.mrf.mxu3 }
 0x133   : > { %4824 = vperm.xlu0 %6570, %v4472_v43   ;;  %v903_v63 = vpop.f32.mrf.mxu1  ;;  %v1005_v59 = vpop.f32.mrf.mxu2  ;;  %v4469_v43 = vld [vmem:[%s11775_s9] sm:$0xff] }
 0x134   : > { %v904_v56 = vadd.f32 %v903_v63, %v791_v37  ;;  %4819 = vperm.xlu2 %6572, %v4471_v46  }
 0x136   : > { %v1006_v28 = vadd.f32 %v1005_v59, %v904_v56  ;;  %1302 = vmatmul.f32.gmra.mxu1 %v7305_v40 }
 0x137   : > { %v798_v1 = vpop.f32.mrf.mxu0  ;;  %1556 = vmatmul.f32.gmra.mxu3 %v7334_v19 }
 0x138   : > { %v799_v42 = vadd.f32 %v798_v1, %v7705_v44  ;;  %v7714_v32 = vadd.f32 %v1119_v61, %v1006_v28  ;;  %1447 = vmatmul.f32.gmra.mxu2 %v7407_v31  ;;  %v7723_v31 = vpop.permute.xlu2 %611  ;;  %v5216_v28 = vld [vmem:[%s11777_s11 + $0x8] sm:$0xff]  ;;  %v5215_v1 = vld [vmem:[%s11777_s11] sm:$0xff] }
 0x13a   : > { %1221 = vmatmul.f32.gmra.mxu0 %v7334_v19  ;;  %4814 = vperm.xlu1 %6571, %v4470_v55   ;;  %v1125_v59 = vpop.f32.mrf.mxu3 }
 0x13b   : > { %4697 = vperm.xlu0 %6570, %v4453_v21   ;;  %v907_v46 = vpop.f32.mrf.mxu1  ;;  %v1010_v56 = vpop.f32.mrf.mxu2  ;;  %v5217_v21 = vld [vmem:[%s11777_s11 + $0x10] sm:$0xff] }
 0x13c   : > { %v908_v63 = vadd.f32 %v907_v46, %v799_v42  ;;  %4809 = vperm.xlu2 %6572, %v4469_v43  }
 0x13e   : > { %v1011_v10 = vadd.f32 %v1010_v56, %v908_v63  ;;  %1306 = vmatmul.f32.gmra.mxu1 %v7334_v19 }
 0x13f   : > { %v806_v37 = vpop.f32.mrf.mxu0  ;;  %1560 = vmatmul.f32.gmra.mxu3 %v7380_v49 }
 0x140   : > { %v807_v61 = vadd.f32 %v806_v37, %v7723_v31  ;;  %v7732_v55 = vadd.f32 %v1125_v59, %v1011_v10  ;;  %1455 = vmatmul.f32.gmra.mxu2 %v7434_v57  ;;  %v7741_v57 = vpop.permute.xlu0 %616  ;;  %v5218_v10 = vld [vmem:[%s11777_s11 + $0x18] sm:$0xff] }
 0x142   : > { %1225 = vmatmul.f32.gmra.mxu0 %v7380_v49  ;;  %5230 = vperm.xlu1 %6571, %v5216_v28   ;;  %v1131_v56 = vpop.f32.mrf.mxu3 }
 0x143   : > { %5225 = vperm.xlu0 %6570, %v5215_v1   ;;  %v911_v43 = vpop.f32.mrf.mxu1  ;;  %v1015_v63 = vpop.f32.mrf.mxu2 }
 0x144   : > { %v912_v46 = vadd.f32 %v911_v43, %v807_v61  ;;  %5235 = vperm.xlu2 %6572, %v5217_v21  }
 0x146   : > { %v1016_v44 = vadd.f32 %v1015_v63, %v912_v46  ;;  %1310 = vmatmul.f32.gmra.mxu1 %v7380_v49 }
 0x147   : > { %v814_v42 = vpop.f32.mrf.mxu0  ;;  %1564 = vmatmul.f32.gmra.mxu3 %v7412_v22 }
 0x148   : > { %v815_v37 = vadd.f32 %v814_v42, %v7741_v57  ;;  %v7747_v59 = vadd.f32 %v1131_v56, %v1016_v44  ;;  %1463 = vmatmul.f32.gmra.mxu2 %v7456_v54 }
 0x14a   : > { %1229 = vmatmul.f32.gmra.mxu0 %v7412_v22  ;;  %v1137_v43 = vpop.f32.mrf.mxu3 }
 0x14b   : > { %5240 = vperm.xlu0 %6570, %v5218_v10   ;;  %v915_v28 = vpop.f32.mrf.mxu1  ;;  %v1020_v21 = vpop.f32.mrf.mxu2 }
 0x14c   : > { %v916_v61 = vadd.f32 %v915_v28, %v815_v37 }
 0x14e   : > { %v1021_v46 = vadd.f32 %v1020_v21, %v916_v61  ;;  %1314 = vmatmul.f32.gmra.mxu1 %v7412_v22 }
 0x14f   : > { %v7751_v1 = vpop.f32.mrf.mxu0  ;;  %1904 = vmatmul.f32.vlgmr.msra.gmra.mxu3 %v6936_v23 }
 0x150   : > { %v7755_v63 = vadd.f32 %v1137_v43, %v1021_v46  ;;  %1819 = vmatmul.f32.vlgmr.msra.gmra.mxu2 %v6936_v23 }
 0x152   : > { %1594 = vmatmul.f32.vlgmr.msra.gmra.mxu0 %v6951_v30  ;;  %v1505_v10 = vpop.f32.mrf.mxu3 }
 0x153   : > { %v7761_v44 = vpop.f32.mrf.mxu1  ;;  %v1344_v42 = vpop.f32.mrf.mxu2 }
 0x154   : > { %v1345_v56 = vadd.f32 %v1344_v42, %v7471_v33 }
 0x156   : > { %1696 = vmatmul.f32.vlgmr.msra.gmra.mxu1 %v6971_v39  ;;  %v7766_v37 = vadd.f32 %v1505_v10, %v1345_v56 }
 0x157   : > { %v7759_v54 = vpop.f32.mrf.mxu0  ;;  %1908 = vmatmul.f32.gmra.mxu3 %v6962_v36 }
 0x158   : > { %1823 = vmatmul.f32.gmra.mxu2 %v6962_v36 }
 0x15a   : > { %1599 = vmatmul.f32.gmra.mxu0 %v6979_v45  ;;  %v1509_v21 = vpop.f32.mrf.mxu3 }
 0x15b   : > { %v7772_v23 = vpop.f32.mrf.mxu1  ;;  %v1352_v28 = vpop.f32.mrf.mxu2 }
 0x15c   : > { %v1353_v61 = vadd.f32 %v1352_v28, %v7489_v53 }
 0x15e   : > { %1702 = vmatmul.f32.gmra.mxu1 %v6989_v51  ;;  %v7777_v45 = vadd.f32 %v1509_v21, %v1353_v61 }
 0x15f   : > { %v7770_v30 = vpop.f32.mrf.mxu0  ;;  %1912 = vmatmul.f32.gmra.mxu3 %v6991_v52 }
 0x160   : > { %1827 = vmatmul.f32.gmra.mxu2 %v6991_v52 }
 0x162   : > { %1604 = vmatmul.f32.gmra.mxu0 %v7006_v60  ;;  %v1513_v46 = vpop.f32.mrf.mxu3 }
 0x163   : > { %v7783_v36 = vpop.f32.mrf.mxu1  ;;  %v1360_v33 = vpop.f32.mrf.mxu2 }
 0x164   : > { %v1361_v43 = vadd.f32 %v1360_v33, %v7505_v20 }
 0x166   : > { %1708 = vmatmul.f32.gmra.mxu1 %v7025_v4  ;;  %v7788_v60 = vadd.f32 %v1513_v46, %v1361_v43  ;;  %v12110_v43 = vld [vmem:[#allocation8_spill] sm:$0xff] }
 0x167   : > { %v7781_v39 = vpop.f32.mrf.mxu0  ;;  %1916 = vmatmul.f32.gmra.mxu3 %v7027_v5 }
 0x168   : > { %1831 = vmatmul.f32.gmra.mxu2 %v7027_v5 }
 0x16a   : > { %1609 = vmatmul.f32.gmra.mxu0 %v7037_v8  ;;  %v1517_v10 = vpop.f32.mrf.mxu3 }
 0x16b   : > { %v1267_v52 = vpop.f32.mrf.mxu1  ;;  %v1368_v42 = vpop.f32.mrf.mxu2 }
 0x16c   : > { %v1369_v56 = vadd.f32 %v1368_v42, %v7525_v13  ;;  %v12113_v42 = vld [vmem:[#allocation10_spill] sm:$0xff] }
 0x16e   : > { %1714 = vmatmul.f32.gmra.mxu1 %v7056_v14  ;;  %v7796_v8 = vadd.f32 %v1517_v10, %v1369_v56  ;;  %v1175_v10 = vadd.f32 %v7759_v54, %v7516_v2  ;;  %v1183_v54 = vadd.f32 %v7781_v39, %v7552_v27 }
 0x16f   : > { %v1186_v51 = vpop.f32.mrf.mxu0  ;;  %1920 = vmatmul.f32.gmra.mxu3 %v7058_v15 }
 0x170   : > { %v1187_v53 = vadd.f32 %v1186_v51, %v7570_v24  ;;  %12107 = vst [vmem:[#allocation35_spill] sm:$0xff] %v7796_v8  ;;  %1835 = vmatmul.f32.gmra.mxu2 %v7058_v15 }
 0x172   : > { %1614 = vmatmul.f32.gmra.mxu0 %v7070_v18  ;;  %v1521_v61 = vpop.f32.mrf.mxu3 }
 0x173   : > { %v1271_v5 = vpop.f32.mrf.mxu1  ;;  %v1376_v28 = vpop.f32.mrf.mxu2 }
 0x174   : > { %v7800_v20 = vadd.f32 %v1271_v5, %v1187_v53  ;;  %v1377_v24 = vadd.f32 %v1376_v28, %v7541_v16  ;;  %v12111_v16 = vld [vmem:[#allocation7_spill] sm:$0xff] }
 0x176   : > { %12108 = vst [vmem:[#allocation36_spill] sm:$0xff] %v7800_v20  ;;  %1720 = vmatmul.f32.gmra.mxu1 %v7087_v25  ;;  %v7805_v18 = vadd.f32 %v1521_v61, %v1377_v24  ;;  %v1179_v24 = vadd.f32 %v7770_v30, %v7534_v3  ;;  %v7830_v61 = vadd.f32 %v7772_v23, %v1175_v10 }
 0x177   : > { %v1190_v4 = vpop.f32.mrf.mxu0  ;;  %1924 = vmatmul.f32.gmra.mxu3 %v7089_v26  ;;  %v2059_v10 = vmul.f32 %v7800_v20, %v7800_v20 }
 0x178   : > { %12109 = vst [vmem:[#allocation37_spill] sm:$0xff] %v7805_v18  ;;  %1839 = vmatmul.f32.gmra.mxu2 %v7089_v26  ;;  %v1191_v30 = vadd.f32 %v1190_v4, %v7588_v6  ;;  %v12124_v6 = vld [vmem:[#allocation14_spill] sm:$0xff]  ;;  %v12125_v4 = vld [vmem:[#allocation13_spill] sm:$0xff] }
 0x179   : > { %12116 = vst [vmem:[#allocation10_spill] sm:$0xff] %v7830_v61 }
 0x17a   : > { %1619 = vmatmul.f32.gmra.mxu0 %v7099_v29  ;;  %v1525_v33 = vpop.f32.mrf.mxu3 }
 0x17b   : > { %v1275_v15 = vpop.f32.mrf.mxu1  ;;  %v1384_v13 = vpop.f32.mrf.mxu2 }
 0x17c   : > { %v1385_v21 = vadd.f32 %v1384_v13, %v7561_v35  ;;  %v12114_v35 = vld [vmem:[#allocation9_spill] sm:$0xff] }
 0x17e   : > { %1726 = vmatmul.f32.gmra.mxu1 %v12111_v16  ;;  %v7812_v46 = vadd.f32 %v1525_v33, %v1385_v21  ;;  %v12117_v33 = vld [vmem:[#allocation12_spill] sm:$0xff] }
 0x17f   : > { %v1194_v14 = vpop.f32.mrf.mxu0  ;;  %1928 = vmatmul.f32.gmra.mxu3 %v7118_v38 }
 0x180   : > { %12112 = vst [vmem:[#allocation8_spill] sm:$0xff] %v7812_v46  ;;  %1843 = vmatmul.f32.gmra.mxu2 %v7118_v38 }
 0x182   : > { %1624 = vmatmul.f32.gmra.mxu0 %v12110_v43  ;;  %v1529_v53 = vpop.f32.mrf.mxu3 }
 0x183   : > { %v1279_v29 = vpop.f32.mrf.mxu1  ;;  %v1392_v51 = vpop.f32.mrf.mxu2 }
 0x184   : > { %v1393_v26 = vadd.f32 %v1392_v51, %v7579_v48  ;;  %v1171_v48 = vadd.f32 %v7751_v1, %v7498_v41  ;;  %v7841_v41 = vadd.f32 %v7783_v36, %v1179_v24  ;;  %v7848_v1 = vadd.f32 %v1267_v52, %v1183_v54 }
 0x186   : > { %1732 = vmatmul.f32.gmra.mxu1 %v12114_v35  ;;  %v7819_v56 = vadd.f32 %v1529_v53, %v1393_v26  ;;  %v7836_v2 = vadd.f32 %v7761_v44, %v1171_v48  ;;  %12120 = vst [vmem:[#allocation12_spill] sm:$0xff] %v7841_v41  ;;  %v2055_v27 = vmul.f32 %v7841_v41, %v7841_v41  ;;  %v12123_v53 = vld [vmem:[#allocation28_spill] sm:$0xff] }
 0x187   : > { %v1198_v25 = vpop.f32.mrf.mxu0  ;;  %1932 = vmatmul.f32.gmra.mxu3 %v7147_v50  ;;  %12122 = vst [vmem:[#allocation38_spill] sm:$0xff] %v7848_v1  ;;  %v2057_v52 = vmul.f32 %v7848_v1, %v7848_v1 }
 0x188   : > { %12115 = vst [vmem:[#allocation7_spill] sm:$0xff] %v7819_v56  ;;  %1847 = vmatmul.f32.gmra.mxu2 %v7147_v50  ;;  %v12118_v50 = vld [vmem:[#allocation11_spill] sm:$0xff]  ;;  %v2051_v44 = vmul.f32 %v7836_v2, %v7836_v2  ;;  %v2000_v36 = vadd.f32 %v7830_v61, %v7836_v2  ;;  %v1199_v48 = vadd.f32 %v1198_v25, %v7624_v11 }
 0x189   : > { %12119 = vst [vmem:[#allocation9_spill] sm:$0xff] %v7836_v2 }
 0x18a   : > { %1629 = vmatmul.f32.gmra.mxu0 %v12113_v42  ;;  %v1533_v21 = vpop.f32.mrf.mxu3  ;;  %v2001_v26 = vadd.f32 %v2000_v36, %v7841_v41  ;;  %v1195_v42 = vadd.f32 %v1194_v14, %v12123_v53  ;;  %v12126_v36 = vld [vmem:[#allocation16_spill] sm:$0xff] }
 0x18b   : > { %v1283_v5 = vpop.f32.mrf.mxu1  ;;  %v1400_v28 = vpop.f32.mrf.mxu2 }
 0x18c   : > { %v1401_v13 = vadd.f32 %v1400_v28, %v7597_v62  ;;  %v2053_v62 = vmul.f32 %v7830_v61, %v7830_v61  ;;  %v2002_v28 = vadd.f32 %v2001_v26, %v7848_v1 }
 0x18e   : > { %1738 = vmatmul.f32.gmra.mxu1 %v12118_v50  ;;  %v7843_v3 = vadd.f32 %v1533_v21, %v1401_v13  ;;  %v2083_v16 = vadd.f32 %v2053_v62, %v2051_v44  ;;  %v2003_v13 = vadd.f32 %v2002_v28, %v7800_v20 }
 0x18f   : > { %v1202_v38 = vpop.f32.mrf.mxu0  ;;  %1936 = vmatmul.f32.gmra.mxu3 %v7176_v0 }
 0x190   : > { %12121 = vst [vmem:[#allocation11_spill] sm:$0xff] %v7843_v3  ;;  %1851 = vmatmul.f32.gmra.mxu2 %v7176_v0  ;;  %v7862_v0 = vadd.f32 %v1275_v15, %v1191_v30  ;;  %v2084_v35 = vadd.f32 %v2083_v16, %v2055_v27  ;;  %v7874_v15 = vadd.f32 %v1279_v29, %v1195_v42  ;;  %v12127_v16 = vld [vmem:[#allocation15_spill] sm:$0xff] }
 0x191   : > { %v1203_v21 = vadd.f32 %v1202_v38, %v7642_v7 }
 0x192   : > { %1634 = vmatmul.f32.gmra.mxu0 %v12117_v33  ;;  %v7864_v51 = vpop.f32.mrf.mxu3  ;;  %v2085_v24 = vadd.f32 %v2084_v35, %v2057_v52  ;;  %v2061_v14 = vmul.f32 %v7862_v0, %v7862_v0  ;;  %v7882_v33 = vadd.f32 %v1283_v5, %v1199_v48  ;;  %v2004_v11 = vadd.f32 %v2003_v13, %v7862_v0  ;;  %v12128_v13 = vld [vmem:[#allocation18_spill] sm:$0xff] }
 0x193   : > { %v1287_v39 = vpop.f32.mrf.mxu1  ;;  %v7858_v43 = vpop.f32.mrf.mxu2  ;;  %v2063_v25 = vmul.f32 %v7874_v15, %v7874_v15 }
 0x194   : > { %v2086_v50 = vadd.f32 %v2085_v24, %v2059_v10  ;;  %v7888_v44 = vadd.f32 %v1287_v39, %v1203_v21  ;;  %v2005_v7 = vadd.f32 %v2004_v11, %v7874_v15  ;;  %v2065_v38 = vmul.f32 %v7882_v33, %v7882_v33  ;;  %v12129_v21 = vld [vmem:[#allocation17_spill] sm:$0xff] }
 0x196   : > { %1744 = vmatmul.f32.gmra.mxu1 %v12125_v4 }
 0x197   : > { %v1206_v23 = vpop.f32.mrf.mxu0  ;;  %1940 = vmatmul.f32.gmra.mxu3 %v7205_v17 }
 0x198   : > { %1855 = vmatmul.f32.gmra.mxu2 %v7205_v17  ;;  %v1207_v29 = vadd.f32 %v1206_v23, %v7660_v47  ;;  %v2087_v17 = vadd.f32 %v2086_v50, %v2061_v14  ;;  %v2006_v47 = vadd.f32 %v2005_v7, %v7882_v33  ;;  %v2067_v23 = vmul.f32 %v7888_v44, %v7888_v44 }
 0x19a   : > { %1639 = vmatmul.f32.gmra.mxu0 %v12124_v6  ;;  %v7892_v30 = vpop.f32.mrf.mxu3  ;;  %v2088_v52 = vadd.f32 %v2087_v17, %v2063_v25  ;;  %v2007_v26 = vadd.f32 %v2006_v47, %v7888_v44 }
 0x19b   : > { %v1291_v62 = vpop.f32.mrf.mxu1  ;;  %v7890_v27 = vpop.f32.mrf.mxu2 }
 0x19c   : > { %v7897_v5 = vadd.f32 %v1291_v62, %v1207_v29  ;;  %v2089_v39 = vadd.f32 %v2088_v52, %v2065_v38 }
 0x19e   : > { %1750 = vmatmul.f32.gmra.mxu1 %v12127_v16  ;;  %v2069_v42 = vmul.f32 %v7897_v5, %v7897_v5  ;;  %v2090_v35 = vadd.f32 %v2089_v39, %v2067_v23  ;;  %v2008_v10 = vadd.f32 %v2007_v26, %v7897_v5  ;;  %v12131_v16 = vld [vmem:[#allocation19_spill] sm:$0xff] }
 0x19f   : > { %v1210_v54 = vpop.f32.mrf.mxu0  ;;  %1944 = vmatmul.f32.gmra.mxu3 %v7234_v34 }
 0x1a0   : > { %1859 = vmatmul.f32.gmra.mxu2 %v7234_v34  ;;  %v1211_v53 = vadd.f32 %v1210_v54, %v7678_v9  ;;  %v2091_v34 = vadd.f32 %v2090_v35, %v2069_v42 }
 0x1a2   : > { %1644 = vmatmul.f32.gmra.mxu0 %v12126_v36  ;;  %v7915_v24 = vpop.f32.mrf.mxu3  ;;  %v12130_v36 = vld [vmem:[#allocation20_spill] sm:$0xff] }
 0x1a3   : > { %v1295_v4 = vpop.f32.mrf.mxu1  ;;  %v7913_v48 = vpop.f32.mrf.mxu2 }
 0x1a4   : > { %v7911_v28 = vadd.f32 %v1295_v4, %v1211_v53  ;;  %v12133_v4 = vld [vmem:[#allocation21_spill] sm:$0xff] }
 0x1a6   : > { %v2009_v14 = vadd.f32 %v2008_v10, %v7911_v28  ;;  %v2071_v9 = vmul.f32 %v7911_v28, %v7911_v28  ;;  %1756 = vmatmul.f32.gmra.mxu1 %v12129_v21 }
 0x1a7   : > { %v1214_v6 = vpop.f32.mrf.mxu0  ;;  %1948 = vmatmul.f32.gmra.mxu3 %v7263_v58 }
 0x1a8   : > { %v2092_v50 = vadd.f32 %v2091_v34, %v2071_v9  ;;  %1863 = vmatmul.f32.gmra.mxu2 %v7263_v58  ;;  %v1215_v54 = vadd.f32 %v1214_v6, %v7696_v12  ;;  %v12132_v6 = vld [vmem:[#allocation22_spill] sm:$0xff] }
 0x1aa   : > { %1649 = vmatmul.f32.gmra.mxu0 %v12128_v13  ;;  %v7929_v17 = vpop.f32.mrf.mxu3 }
 0x1ab   : > { %v1299_v11 = vpop.f32.mrf.mxu1  ;;  %v7927_v29 = vpop.f32.mrf.mxu2 }
 0x1ac   : > { %v7925_v25 = vadd.f32 %v1299_v11, %v1215_v54  ;;  %v12135_v54 = vld [vmem:[#allocation23_spill] sm:$0xff] }
 0x1ae   : > { %v2010_v7 = vadd.f32 %v2009_v14, %v7925_v25  ;;  %v2073_v38 = vmul.f32 %v7925_v25, %v7925_v25  ;;  %1762 = vmatmul.f32.gmra.mxu1 %v12131_v16 }
 0x1af   : > { %v1218_v62 = vpop.f32.mrf.mxu0  ;;  %1952 = vmatmul.f32.gmra.mxu3 %v7305_v40 }
 0x1b0   : > { %v2093_v58 = vadd.f32 %v2092_v50, %v2073_v38  ;;  %1867 = vmatmul.f32.gmra.mxu2 %v7305_v40  ;;  %v1219_v12 = vadd.f32 %v1218_v62, %v7714_v32  ;;  %v12134_v50 = vld [vmem:[#allocation24_spill] sm:$0xff] }
 0x1b2   : > { %1654 = vmatmul.f32.gmra.mxu0 %v12130_v36  ;;  %v7943_v26 = vpop.f32.mrf.mxu3 }
 0x1b3   : > { %v1303_v47 = vpop.f32.mrf.mxu1  ;;  %v7941_v39 = vpop.f32.mrf.mxu2 }
 0x1b4   : > { %v7939_v23 = vadd.f32 %v1303_v47, %v1219_v12  ;;  %v12136_v47 = vld [vmem:[#allocation26_spill] sm:$0xff] }
 0x1b6   : > { %v2011_v53 = vadd.f32 %v2010_v7, %v7939_v23  ;;  %v2075_v42 = vmul.f32 %v7939_v23, %v7939_v23  ;;  %1768 = vmatmul.f32.gmra.mxu1 %v12133_v4 }
 0x1b7   : > { %v1222_v52 = vpop.f32.mrf.mxu0  ;;  %1956 = vmatmul.f32.gmra.mxu3 %v7334_v19 }
 0x1b8   : > { %v2094_v40 = vadd.f32 %v2093_v58, %v2075_v42  ;;  %1871 = vmatmul.f32.gmra.mxu2 %v7334_v19  ;;  %v1223_v32 = vadd.f32 %v1222_v52, %v7732_v55  ;;  %v6776_v55 = vmov 128.0  }
 0x1b9   : > { %6573 = vrcp.f32 %v6776_v55 }
 0x1ba   : > { %1659 = vmatmul.f32.gmra.mxu0 %v12132_v6  ;;  %v7957_v9 = vpop.f32.mrf.mxu3 }
 0x1bb   : > { %v1307_v10 = vpop.f32.mrf.mxu1  ;;  %v7955_v14 = vpop.f32.mrf.mxu2 }
 0x1bc   : > { %v7953_v34 = vadd.f32 %v1307_v10, %v1223_v32 }
 0x1be   : > { %v2012_v13 = vadd.f32 %v2011_v53, %v7953_v34  ;;  %v2077_v21 = vmul.f32 %v7953_v34, %v7953_v34  ;;  %1774 = vmatmul.f32.gmra.mxu1 %v12135_v54  ;;  %v12137_v53 = vld [vmem:[#allocation25_spill] sm:$0xff]  ;;  %v12140_v54 = vld [vmem:[#allocation27_spill] sm:$0xff] }
 0x1bf   : > { %v1226_v35 = vpop.f32.mrf.mxu0  ;;  %1960 = vmatmul.f32.gmra.mxu3 %v7380_v49  ;;  %v6574_v58 = vpop.eup %6573 }
 0x1c0   : > { %v2095_v19 = vadd.f32 %v2094_v40, %v2077_v21  ;;  %1875 = vmatmul.f32.gmra.mxu2 %v7380_v49  ;;  %v1227_v62 = vadd.f32 %v1226_v35, %v7747_v59  ;;  %v7978_v49 = vpop.permute.xlu1 %2294  ;;  %v2043_v42 = vmul.f32 128.0, %v6574_v58  ;;  %vm2047_vm1 = vweird.f32 %v6574_v58 }
 0x1c1   : > { %12138 = vst [vmem:[#allocation28_spill] sm:$0xff] %v7978_v49 }
 0x1c2   : > { %1664 = vmatmul.f32.gmra.mxu0 %v12134_v50  ;;  %v7971_v16 = vpop.f32.mrf.mxu3  ;;  %v2044_v10 = vsub.f32 1.0, %v2043_v42 }
 0x1c3   : > { %v1311_v7 = vpop.f32.mrf.mxu1  ;;  %v7969_v36 = vpop.f32.mrf.mxu2 }
 0x1c4   : > { %v7967_v38 = vadd.f32 %v1311_v7, %v1227_v62  ;;  %v2045_v55 = vmul.f32 %v6574_v58, %v2044_v10 }
 0x1c6   : > { %v2013_v12 = vadd.f32 %v2012_v13, %v7967_v38  ;;  %v2079_v52 = vmul.f32 %v7967_v38, %v7967_v38  ;;  %1780 = vmatmul.f32.gmra.mxu1 %v12137_v53  ;;  %v7997_v53 = vpop.permute.xlu0 %2406 }
 0x1c7   : > { %v1230_v11 = vpop.f32.mrf.mxu0  ;;  %1964 = vmatmul.f32.gmra.mxu3 %v7412_v22  ;;  %12143 = vst [vmem:[#allocation15_spill] sm:$0xff] %v7997_v53 }
 0x1c8   : > { %v2096_v59 = vadd.f32 %v2095_v19, %v2079_v52  ;;  %1879 = vmatmul.f32.gmra.mxu2 %v7412_v22  ;;  %v1231_v6 = vadd.f32 %v1230_v11, %v7755_v63  ;;  %v7993_v19 = vpop.permute.xlu2 %2289  ;;  %v7995_v62 = vpop.permute.xlu1 %2284 }
 0x1c9   : > { %12141 = vst [vmem:[#allocation13_spill] sm:$0xff] %v7993_v19 }
 0x1ca   : > { %1669 = vmatmul.f32.gmra.mxu0 %v12136_v47  ;;  %v7987_v13 = vpop.f32.mrf.mxu3  ;;  %12142 = vst [vmem:[#allocation16_spill] sm:$0xff] %v7995_v62 }
 0x1cb   : > { %v1315_v4 = vpop.f32.mrf.mxu1  ;;  %v7985_v35 = vpop.f32.mrf.mxu2  ;;  %12139 = vst [vmem:[#allocation14_spill] sm:$0xff] %v7987_v13 }
 0x1cc   : > { %v7983_v32 = vadd.f32 %v1315_v4, %v1231_v6  ;;  %v2046_v4 = vadd.f32 %v6574_v58, %v2045_v55 }
 0x1ce   : > { %v2014_v21 = vadd.f32 %v2013_v12, %v7983_v32  ;;  %v2081_v50 = vmul.f32 %v7983_v32, %v7983_v32  ;;  %1786 = vmatmul.f32.gmra.mxu1 %v12140_v54 }
 0x1cf   : > { %v1595_v40 = vpop.f32.mrf.mxu0 }
 0x1d0   : > { %v2015_v22 = vrot.slane %v2014_v21, 4  ;;  %v2097_v63 = vadd.f32 %v2096_v59, %v2081_v50  ;;  %v7999_v59 = vsel %vm2047_vm1, %v6574_v58, %v2046_v4  ;;  %v8001_v10 = vpop.permute.xlu2 %2401 }
 0x1d1   : > { %12144 = vst [vmem:[#allocation18_spill] sm:$0xff] %v7999_v59 }
 0x1d2   : > { %v2016_v11 = vadd.f32 %v2015_v22, %v2014_v21  ;;  %v2098_v7 = vrot.slane %v2097_v63, 4  ;;  %v1905_v13 = vpop.f32.mrf.mxu3  ;;  %12145 = vst [vmem:[#allocation17_spill] sm:$0xff] %v8001_v10 }
 0x1d3   : > { %v1697_v47 = vpop.f32.mrf.mxu1  ;;  %v1820_v6 = vpop.f32.mrf.mxu2 }
 0x1d4   : > { %v2017_v42 = vrot.slane %v2016_v11, 2  ;;  %v2099_v12 = vadd.f32 %v2098_v7, %v2097_v63 }
 0x1d6   : > { %v2018_v2 = vadd.f32 %v2017_v42, %v2016_v11  ;;  %v2100_v54 = vrot.slane %v2099_v12, 2  ;;  %v8008_v11 = vpop.permute.xlu1 %2396  ;;  %v8010_v42 = vpop.permute.xlu0 %2279 }
 0x1d7   : > { %v1600_v52 = vpop.f32.mrf.mxu0  ;;  %12146 = vst [vmem:[#allocation20_spill] sm:$0xff] %v8008_v11 }
 0x1d8   : > { %v2019_v3 = vrot.slane %v2018_v2, 1  ;;  %v2101_v56 = vadd.f32 %v2100_v54, %v2099_v12  ;;  %12147 = vst [vmem:[#allocation19_spill] sm:$0xff] %v8010_v42  ;;  %v8033_v1 = vpop.permute.xlu2 %2274 }
 0x1d9   : > { %12149 = vst [vmem:[#allocation21_spill] sm:$0xff] %v8033_v1 }
 0x1da   : > { %v2020_v21 = vadd.f32 %v2019_v3, %v2018_v2  ;;  %v2102_v50 = vrot.slane %v2101_v56, 1  ;;  %v1909_v7 = vpop.f32.mrf.mxu3 }
 0x1db   : > { %v1703_v61 = vpop.f32.mrf.mxu1  ;;  %v1824_v55 = vpop.f32.mrf.mxu2 }
 0x1dc   : > { %v8006_v41 = vmul.f32 %v7999_v59, %v2020_v21  ;;  %v2103_v63 = vadd.f32 %v2102_v50, %v2101_v56 }
 0x1de   : > { %v2125_v58 = vmul.f32 %v2103_v63, %v7999_v59  ;;  %v2127_v12 = vmul.f32 %v8006_v41, %v8006_v41  ;;  %v8042_v50 = vpop.permute.xlu0 %2391  ;;  %v1601_v63 = vadd.f32 %v1600_v52, %v7777_v45 }
 0x1df   : > { %v8003_v22 = vpop.f32.mrf.mxu0  ;;  %12153 = vst [vmem:[#allocation25_spill] sm:$0xff] %v8042_v50 }
 0x1e0   : > { %v2129_v21 = vsub.f32 %v2125_v58, %v2127_v12  ;;  %v1596_v58 = vadd.f32 %v1595_v40, %v7766_v37  ;;  %v8040_v12 = vpop.permute.xlu1 %2269  ;;  %v1704_v46 = vadd.f32 %v1703_v61, %v1601_v63  ;;  %v12156_v40 = vld [vmem:[#allocation30_spill] sm:$0xff]  ;;  %v8057_v45 = vpop.permute.xlu2 %2386  ;;  %v12158_v61 = vld [vmem:[#allocation31_spill] sm:$0xff] }
 0x1e1   : > { %12152 = vst [vmem:[#allocation26_spill] sm:$0xff] %v8040_v12  ;;  %v1425_v52 = vadd.f32 %v7913_v48, %v12158_v61 }
 0x1e2   : > { %v2163_v2 = vadd.f32 1e-05, %v2129_v21  ;;  %v8037_v4 = vpop.f32.mrf.mxu3  ;;  %v1698_v21 = vadd.f32 %v1697_v47, %v1596_v58  ;;  %v12159_v47 = vld [vmem:[#allocation32_spill] sm:$0xff] }
 0x1e3   : > { %v8031_v3 = vpop.f32.mrf.mxu1  ;;  %v8035_v56 = vpop.f32.mrf.mxu2  ;;  %12151 = vst [vmem:[#allocation23_spill] sm:$0xff] %v8037_v4  ;;  %v12155_v4 = vld [vmem:[#allocation29_spill] sm:$0xff]  ;;  %v1433_v63 = vadd.f32 %v7927_v29, %v12159_v47  ;;  %v12169_v47 = vsub.f32 %v7939_v23, %v8006_v41 }
 0x1e4   : > { %6575 = vrsqrt.f32 %v2163_v2  ;;  %12150 = vst [vmem:[#allocation24_spill] sm:$0xff] %v8035_v56  ;;  %v1821_v10 = vadd.f32 %v1820_v6, %v1698_v21  ;;  %v1409_v37 = vadd.f32 %v7858_v43, %v12155_v4  ;;  %v12160_v6 = vld [vmem:[#allocation33_spill] sm:$0xff]  ;;  %v1825_v21 = vadd.f32 %v1824_v55, %v1704_v46 }
 0x1e5   : > { %12157 = vst [vmem:[#allocation29_spill] sm:$0xff] %v8057_v45  ;;  %v1441_v58 = vadd.f32 %v7941_v39, %v12160_v6  ;;  %v8082_v39 = vadd.f32 %v7915_v24, %v1425_v52  ;;  %vm2171_vm3 = vweird.f32 %v2163_v2 }
 0x1e6   : > { %v8069_v4 = vadd.f32 %v1905_v13, %v1821_v10  ;;  %v8079_v46 = vpop.permute.xlu0 %2264 }
 0x1e7   : > { %v8029_v59 = vpop.f32.mrf.mxu0  ;;  %12164 = vst [vmem:[#allocation32_spill] sm:$0xff] %v8079_v46 }
 0x1e8   : > { %12148 = vst [vmem:[#allocation22_spill] sm:$0xff] %v8029_v59  ;;  %v1417_v59 = vadd.f32 %v7890_v27, %v12156_v40  ;;  %v8072_v40 = vadd.f32 %v7864_v51, %v1409_v37  ;;  %v8077_v61 = vpop.permute.xlu1 %2381  ;;  %v8090_v51 = vadd.f32 %v1909_v7, %v1825_v21  ;;  %v12168_v37 = vsub.f32 %v7953_v34, %v8006_v41 }
 0x1e9   : > { %12162 = vst [vmem:[#allocation30_spill] sm:$0xff] %v8069_v4  ;;  %v12172_v34 = vsub.f32 %v7897_v5, %v8006_v41 }
 0x1ea   : > { %v6576_v54 = vpop.eup %6575  ;;  %v8055_v8 = vpop.f32.mrf.mxu3  ;;  %v8075_v48 = vadd.f32 %v7892_v30, %v1417_v59  ;;  %12163 = vst [vmem:[#allocation31_spill] sm:$0xff] %v8077_v61 }
 0x1eb   : > { %v2166_v18 = vmul.f32 %v6576_v54, %v2163_v2  ;;  %v8047_v11 = vpop.f32.mrf.mxu1  ;;  %v8049_v56 = vpop.f32.mrf.mxu2  ;;  %vm2172_vm2 = vweird.f32 %v6576_v54  ;;  %12165 = vst [vmem:[#allocation33_spill] sm:$0xff] %v8090_v51 }
 0x1ec   : > { %12154 = vst [vmem:[#allocation27_spill] sm:$0xff] %v8049_v56  ;;  %v12161_v56 = vld [vmem:[#allocation34_spill] sm:$0xff]  ;;  %vm2173_vm4 = vmor %vm2171_vm3, %vm2172_vm2 }
 0x1ed   : > { %v2167_v50 = vmul.f32 %v6576_v54, %v2166_v18  ;;  %v1449_v43 = vadd.f32 %v7955_v14, %v12161_v56  ;;  %v1457_v18 = vadd.f32 %v7969_v36, %v7723_v31  ;;  %v8085_v31 = vadd.f32 %v7929_v17, %v1433_v63 }
 0x1ee   : > { %v8088_v14 = vadd.f32 %v7943_v26, %v1441_v58  ;;  %v8104_v17 = vadd.f32 %v7985_v35, %v7741_v57  ;;  %v2052_v26 = vmul.f32 %v8069_v4, %v8069_v4  ;;  %v2054_v56 = vmul.f32 %v8090_v51, %v8090_v51 }
 0x1ef   : > { %v8045_v20 = vpop.f32.mrf.mxu0  ;;  %v2168_v27 = vmul.f32 0.5, %v2167_v50  ;;  %v8093_v30 = vadd.f32 %v7957_v9, %v1449_v43  ;;  %v8096_v36 = vadd.f32 %v7971_v16, %v1457_v18  ;;  %v1606_v9 = vadd.f32 %v8003_v22, %v7788_v60  ;;  %v8154_v43 = vpop.permute.xlu2 %2259 }
 0x1f0   : > { %v12166_v60 = vsub.f32 %v7983_v32, %v8006_v41  ;;  %v12170_v63 = vsub.f32 %v7925_v25, %v8006_v41  ;;  %12173 = vst [vmem:[#allocation34_spill] sm:$0xff] %v8154_v43 }
 0x1f1   : > { %v2169_v29 = vsub.f32 1.5, %v2168_v27  ;;  %v1710_v18 = vadd.f32 %v8031_v3, %v1606_v9  ;;  %v12176_v3 = vld [vmem:[#allocation17_spill] sm:$0xff] }
 0x1f2   : > { %v8116_v7 = vpop.f32.mrf.mxu3 }
 0x1f3   : > { %v2170_v13 = vmul.f32 %v6576_v54, %v2169_v29  ;;  %v8100_v24 = vpop.f32.mrf.mxu1  ;;  %v8110_v10 = vpop.f32.mrf.mxu2 }
 0x1f5   : > { %v8114_v55 = vsel %vm2173_vm4, %v6576_v54, %v2170_v13  ;;  %v12167_v54 = vsub.f32 %v7967_v38, %v8006_v41  ;;  %v12171_v38 = vsub.f32 %v7911_v28, %v8006_v41  ;;  %v2021_v28 = vadd.f32 %v8090_v51, %v8069_v4 }
 0x1f6   : > { %v2215_v22 = vmul.f32 %v8114_v55, %v12166_v60  ;;  %v2211_v52 = vmul.f32 %v8114_v55, %v12168_v37  ;;  %v2209_v32 = vmul.f32 %v8114_v55, %v12169_v47  ;;  %v2207_v6 = vmul.f32 %v8114_v55, %v12170_v63 }
 0x1f7   : > { %v8098_v59 = vpop.f32.mrf.mxu0  ;;  %v2213_v50 = vmul.f32 %v8114_v55, %v12167_v54  ;;  %v2205_v58 = vmul.f32 %v8114_v55, %v12171_v38  ;;  %v2203_v21 = vmul.f32 %v8114_v55, %v12172_v34  ;;  %v12174_v54 = vld [vmem:[#allocation35_spill] sm:$0xff] }
 0x1f8   : > { %v2327_v23 = vmul.f32 %v7978_v49, %v2215_v22  ;;  %v2323_v27 = vmul.f32 %v7995_v62, %v2211_v52  ;;  %v2321_v29 = vmul.f32 %v8010_v42, %v2209_v32  ;;  %v2319_v13 = vmul.f32 %v8033_v1, %v2207_v6  ;;  %v12175_v22 = vld [vmem:[#allocation22_spill] sm:$0xff]  ;;  %v12177_v32 = vld [vmem:[#allocation20_spill] sm:$0xff]  ;;  %v12178_v6 = vld [vmem:[#allocation25_spill] sm:$0xff] }
 0x1f9   : > { %v2325_v25 = vmul.f32 %v7993_v19, %v2213_v50  ;;  %v2317_v5 = vmul.f32 %v8040_v12, %v2205_v58  ;;  %v1611_v37 = vadd.f32 %v12175_v22, %v12174_v54  ;;  %v2315_v50 = vmul.f32 %v8079_v46, %v2203_v21  ;;  %v12180_v21 = vld [vmem:[#allocation24_spill] sm:$0xff] }
 0x1fa   : > { %v8166_v60 = vadd.f32 %v7997_v53, %v2327_v23  ;;  %v8179_v63 = vadd.f32 %v12177_v32, %v2323_v27  ;;  %v8182_v38 = vadd.f32 %v12178_v6, %v2321_v29  ;;  %v8185_v58 = vadd.f32 %v8057_v45, %v2319_v13  ;;  %v8190_v23 = vpop.permute.xlu1 %2254  ;;  %v8198_v29 = vpop.permute.xlu0 %2376  ;;  %v12183_v32 = vld [vmem:[#allocation23_spill] sm:$0xff] }
 0x1fb   : > { %v8171_v9 = vadd.f32 %v12176_v3, %v2325_v25  ;;  %v8176_v47 = vpop.f32.mrf.mxu1  ;;  %v8188_v34 = vadd.f32 %v8077_v61, %v2317_v5  ;;  %12179 = vst [vmem:[#allocation35_spill] sm:$0xff] %v8190_v23  ;;  %v2104_v25 = vadd.f32 %v2054_v56, %v2052_v26  ;;  %v1829_v54 = vadd.f32 %v12180_v21, %v1710_v18  ;;  %v8194_v35 = vpop.f32.mrf.mxu2  ;;  %v12182_v21 = vld [vmem:[#allocation36_spill] sm:$0xff] }
 0x1fc   : > { %v1716_v22 = vadd.f32 %v8047_v11, %v1611_v37  ;;  %v2471_v27 = vmul.f32 %v8166_v60, %v8166_v60  ;;  %12181 = vst [vmem:[#allocation22_spill] sm:$0xff] %v8198_v29  ;;  %v8200_v57 = vpop.f32.mrf.mxu3  ;;  %v2467_v5 = vmul.f32 %v8179_v63, %v8179_v63  ;;  %v2465_v26 = vmul.f32 %v8182_v38, %v8182_v38  ;;  %v8229_v3 = vpop.permute.xlu2 %2371 }
 0x1fd   : > { %v2469_v13 = vmul.f32 %v8171_v9, %v8171_v9  ;;  %v2463_v11 = vmul.f32 %v8185_v58, %v8185_v58  ;;  %v2461_v18 = vmul.f32 %v8188_v34, %v8188_v34  ;;  %v8214_v37 = vadd.f32 %v8198_v29, %v2315_v50  ;;  %v12186_v29 = vld [vmem:[#allocation27_spill] sm:$0xff]  ;;  %12187 = vst [vmem:[#allocation36_spill] sm:$0xff] %v8229_v3 }
 0x1fe   : > { %v2503_v56 = vmul.f32 %v2471_v27, %v8166_v60  ;;  %v2499_v61 = vmul.f32 %v2467_v5, %v8179_v63  ;;  %v2497_v45 = vmul.f32 %v2465_v26, %v8182_v38  ;;  %v8223_v46 = vadd.f32 %v12183_v32, %v1829_v54  ;;  %v12185_v27 = vld [vmem:[#allocation37_spill] sm:$0xff] }
 0x1ff   : > { %v8174_v52 = vpop.f32.mrf.mxu0  ;;  %v2501_v16 = vmul.f32 %v2469_v13, %v8171_v9  ;;  %v2495_v6 = vmul.f32 %v2463_v11, %v8185_v58  ;;  %v1616_v12 = vadd.f32 %v8045_v20, %v12185_v27  ;;  %v2493_v50 = vmul.f32 %v2461_v18, %v8188_v34 }
 0x200   : > { %12184 = vst [vmem:[#allocation24_spill] sm:$0xff] %v8223_v46  ;;  %v2535_v1 = vmul.f32 0.044715, %v2503_v56  ;;  %v1833_v42 = vadd.f32 %v12186_v29, %v1716_v22  ;;  %v2531_v62 = vmul.f32 0.044715, %v2499_v61  ;;  %v2459_v32 = vmul.f32 %v8214_v37, %v8214_v37 }
 0x201   : > { %v2533_v2 = vmul.f32 0.044715, %v2501_v16  ;;  %v2529_v13 = vmul.f32 0.044715, %v2497_v45  ;;  %v2527_v26 = vmul.f32 0.044715, %v2495_v6  ;;  %v12188_v54 = vsub.f32 %v7888_v44, %v8006_v41 }
 0x202   : > { %v2567_v5 = vadd.f32 %v2535_v1, %v8166_v60  ;;  %v2563_v45 = vadd.f32 %v2531_v62, %v8179_v63  ;;  %v2525_v1 = vmul.f32 0.044715, %v2493_v50  ;;  %v2022_v6 = vadd.f32 %v2021_v28, %v8223_v46  ;;  %v8254_v4 = vpop.permute.xlu1 %2366 }
 0x203   : > { %v2201_v20 = vmul.f32 %v8114_v55, %v12188_v54  ;;  %v8240_v56 = vpop.f32.mrf.mxu1  ;;  %v2565_v61 = vadd.f32 %v2533_v2, %v8171_v9  ;;  %v2561_v16 = vadd.f32 %v2529_v13, %v8182_v38  ;;  %v2056_v22 = vmul.f32 %v8223_v46, %v8223_v46  ;;  %v8249_v29 = vpop.f32.mrf.mxu2  ;;  %12189 = vst [vmem:[#allocation23_spill] sm:$0xff] %v8254_v4 }
 0x204   : > { %v1722_v44 = vadd.f32 %v8100_v24, %v1616_v12  ;;  %v2599_v18 = vmul.f32 0.7978846, %v2567_v5  ;;  %v8251_v27 = vpop.f32.mrf.mxu3  ;;  %v2595_v19 = vmul.f32 0.7978846, %v2563_v45  ;;  %v2559_v62 = vadd.f32 %v2527_v26, %v8185_v58  ;;  %v12191_v24 = vld [vmem:[#allocation8_spill] sm:$0xff]  ;;  %v8264_v45 = vpop.permute.xlu0 %2249 }
 0x205   : > { %v2597_v54 = vmul.f32 0.7978846, %v2565_v61  ;;  %v2593_v2 = vmul.f32 0.7978846, %v2561_v16  ;;  %v8257_v50 = vadd.f32 %v8055_v8, %v1833_v42  ;;  %v2557_v28 = vadd.f32 %v2525_v1, %v8188_v34  ;;  %12192 = vst [vmem:[#allocation27_spill] sm:$0xff] %v8264_v45 }
 0x206   : > { %6577 = vtanh.f32 %v2599_v18  ;;  %v2491_v12 = vmul.f32 %v2459_v32, %v8214_v37  ;;  %v1621_v13 = vadd.f32 %v8098_v59, %v12191_v24  ;;  %v2591_v5 = vmul.f32 0.7978846, %v2559_v62 }
 0x207   : > { %v8238_v11 = vpop.f32.mrf.mxu0  ;;  %12190 = vst [vmem:[#allocation37_spill] sm:$0xff] %v8257_v50  ;;  %6579 = vtanh.f32 %v2597_v54  ;;  %v2313_v61 = vmul.f32 %v8154_v43, %v2201_v20  ;;  %v2589_v26 = vmul.f32 0.7978846, %v2557_v28  ;;  %v12193_v8 = vsub.f32 %v7882_v33, %v8006_v41  ;;  %v12200_v54 = vld [vmem:[#allocation7_spill] sm:$0xff] }
 0x208   : > { %6581 = vtanh.f32 %v2595_v19  ;;  %v2523_v16 = vmul.f32 0.044715, %v2491_v12  ;;  %v2105_v1 = vadd.f32 %v2104_v25, %v2056_v22  ;;  %v1837_v32 = vadd.f32 %v8110_v10, %v1722_v44  ;;  %v12194_v19 = vld [vmem:[#allocation38_spill] sm:$0xff]  ;;  %v12195_v22 = vld [vmem:[#allocation12_spill] sm:$0xff] }
 0x209   : > { %v2199_v42 = vmul.f32 %v8114_v55, %v12193_v8  ;;  %6583 = vtanh.f32 %v2593_v2  ;;  %v8272_v59 = vadd.f32 %v8229_v3, %v2313_v61  ;;  %v1728_v18 = vadd.f32 %v8176_v47, %v1621_v13  ;;  %v8288_v2 = vpop.permute.xlu2 %2244  ;;  %v12198_v61 = vld [vmem:[#allocation10_spill] sm:$0xff] }
 0x20a   : > { %6585 = vtanh.f32 %v2591_v5  ;;  %v2555_v20 = vadd.f32 %v2523_v16, %v8214_v37  ;;  %v2058_v33 = vmul.f32 %v8257_v50, %v8257_v50  ;;  %12196 = vst [vmem:[#allocation8_spill] sm:$0xff] %v8288_v2  ;;  %v12197_v13 = vsub.f32 %v7874_v15, %v8006_v41 }
 0x20b   : > { %v8282_v25 = vpop.f32.mrf.mxu1  ;;  %6587 = vtanh.f32 %v2589_v26  ;;  %v2457_v10 = vmul.f32 %v8272_v59, %v8272_v59  ;;  %v8290_v28 = vpop.f32.mrf.mxu2  ;;  %v2311_v24 = vmul.f32 %v8190_v23, %v2199_v42  ;;  %v8300_v8 = vadd.f32 %v2022_v6, %v8257_v50 }
 0x20c   : > { %v6578_v44 = vpop.eup %6577  ;;  %v2587_v12 = vmul.f32 0.7978846, %v2555_v20  ;;  %v2197_v5 = vmul.f32 %v8114_v55, %v12197_v13  ;;  %v8303_v47 = vadd.f32 %v8116_v7, %v1837_v32  ;;  %v1626_v20 = vadd.f32 %v8174_v52, %v12200_v54  ;;  %v8307_v3 = vpop.f32.mrf.mxu3 }
 0x20d   : > { %v6580_v16 = vpop.eup %6579  ;;  %v2663_v42 = vadd.f32 1.0, %v6578_v44  ;;  %v1841_v15 = vadd.f32 %v8194_v35, %v1728_v18  ;;  %v2489_v26 = vmul.f32 %v2457_v10, %v8272_v59  ;;  %v8311_v51 = vadd.f32 %v2105_v1, %v2058_v33  ;;  %v8314_v50 = vpop.permute.xlu1 %2239 }
 0x20e   : > { %12199 = vst [vmem:[#allocation38_spill] sm:$0xff] %v8303_v47  ;;  %v6582_v23 = vpop.eup %6581  ;;  %v2661_v13 = vadd.f32 1.0, %v6580_v16  ;;  %6589 = vtanh.f32 %v2587_v12  ;;  %v1734_v6 = vadd.f32 %v8240_v56, %v1626_v20  ;;  %v8317_v44 = vadd.f32 %v8254_v4, %v2311_v24 }
 0x20f   : > { %v8280_v62 = vpop.f32.mrf.mxu0  ;;  %v6584_v43 = vpop.eup %6583  ;;  %v2695_v7 = vmul.f32 0.5, %v2663_v42  ;;  %v2659_v32 = vadd.f32 1.0, %v6582_v23  ;;  %v2309_v35 = vmul.f32 %v8264_v45, %v2197_v5  ;;  %v8322_v10 = vmul.f32 %v8303_v47, %v8303_v47 }
 0x210   : > { %v6586_v46 = vpop.eup %6585  ;;  %v2693_v52 = vmul.f32 0.5, %v2661_v13  ;;  %v2657_v54 = vadd.f32 1.0, %v6584_v43  ;;  %v8325_v23 = vpop.permute.xlu0 %2361  ;;  %v8328_v12 = vadd.f32 %v8200_v57, %v1841_v15  ;;  %v2521_v16 = vmul.f32 0.044715, %v2489_v26 }
 0x211   : > { %v6588_v18 = vpop.eup %6587  ;;  %v2727_v1 = vmul.f32 %v2695_v7, %v8166_v60  ;;  %v2691_v56 = vmul.f32 0.5, %v2659_v32  ;;  %v2655_v33 = vadd.f32 1.0, %v6586_v46  ;;  %12201 = vst [vmem:[#allocation12_spill] sm:$0xff] %v8325_v23  ;;  %v1845_v32 = vadd.f32 %v8249_v29, %v1734_v6 }
 0x212   : > { %12202 = vst [vmem:[#allocation10_spill] sm:$0xff] %v8328_v12  ;;  %v2725_v43 = vmul.f32 %v2693_v52, %v8171_v9  ;;  %v2689_v24 = vmul.f32 0.5, %v2657_v54  ;;  %v2653_v7 = vadd.f32 1.0, %v6588_v18  ;;  %v2455_v9 = vmul.f32 %v8317_v44, %v8317_v44  ;;  %v8359_v54 = vpop.permute.xlu2 %2356 }
 0x213   : > { %v8333_v5 = vpop.f32.mrf.mxu1  ;;  %v8335_v42 = vand.u32 4294901760, %v2727_v1  ;;  %v2723_v13 = vmul.f32 %v2691_v56, %v8179_v63  ;;  %v2687_v60 = vmul.f32 0.5, %v2655_v33  ;;  %v8339_v4 = vpop.f32.mrf.mxu2  ;;  %v8346_v26 = vadd.f32 %v8325_v23, %v2309_v35  ;;  %12207 = vst [vmem:[#allocation42_spill] sm:$0xff] %v8359_v54 }
 0x214   : > { %v6590_v46 = vpop.eup %6589  ;;  %v8341_v57 = vand.u32 4294901760, %v2725_v43  ;;  %v8350_v63 = vpop.f32.mrf.mxu3  ;;  %v2721_v6 = vmul.f32 %v2689_v24, %v8182_v38  ;;  %v2685_v18 = vmul.f32 0.5, %v2653_v7  ;;  %v2553_v33 = vadd.f32 %v2521_v16, %v8272_v59 }
 0x215   : > { %12203 = vst [vmem:[#allocation7_spill] sm:$0xff] %v8335_v42  ;;  %2842 = vmatpush.msrb.mxu0 %v8335_v42  ;;  %3293 = vmatpush.msrb.mxu3 %v8335_v42  ;;  %v8353_v15 = vsub.f32 %v2727_v1, %v8335_v42  ;;  %v8355_v29 = vand.u32 4294901760, %v2723_v13  ;;  %v2719_v52 = vmul.f32 %v2687_v60, %v8185_v58  ;;  %v2651_v56 = vadd.f32 1.0, %v6590_v46 }
 0x216   : > { %12204 = vst [vmem:[#allocation39_spill] sm:$0xff] %v8341_v57  ;;  %v8362_v35 = vsub.f32 %v2725_v43, %v8341_v57  ;;  %v8367_v1 = vand.u32 4294901760, %v2721_v6  ;;  %v2717_v43 = vmul.f32 %v2685_v18, %v8188_v34  ;;  %v12210_v60 = vsub.f32 %v7862_v0, %v8006_v41 }
 0x217   : > { %v8331_v20 = vpop.f32.mrf.mxu0  ;;  %12205 = vst [vmem:[#allocation40_spill] sm:$0xff] %v8353_v15  ;;  %2844 = vmatpush.msrb.mxu0 %v8341_v57  ;;  %3165 = vmatpush.msrb.mxu2 %v8353_v15  ;;  %v8370_v23 = vsub.f32 %v2723_v13, %v8355_v29  ;;  %v8372_v38 = vand.u32 4294901760, %v2719_v52  ;;  %v11844_v58 = vand.u32 4294901760, %v8353_v15  ;;  %v2683_v16 = vmul.f32 0.5, %v2651_v56  ;;  %v8391_v56 = vpop.permute.xlu1 %2351 }
 0x218   : > { %12206 = vst [vmem:[#allocation41_spill] sm:$0xff] %v8355_v29  ;;  %3295 = vmatpush.msrb.mxu3 %v8341_v57  ;;  %v11850_v24 = vand.u32 4294901760, %v8362_v35  ;;  %v2195_v7 = vmul.f32 %v8114_v55, %v12210_v60  ;;  %v2487_v34 = vmul.f32 %v2455_v9, %v8317_v44  ;;  %v2453_v18 = vmul.f32 %v8346_v26, %v8346_v26 }
 0x219   : > { %12208 = vst [vmem:[#allocation43_spill] sm:$0xff] %v8362_v35  ;;  %2846 = vmatpush.msrb.mxu0 %v8355_v29  ;;  %3168 = vmatpush.msrb.mxu2 %v8362_v35  ;;  %v3005_v13 = vsub.f32 %v8353_v15, %v11844_v58  ;;  %v8395_v0 = vsub.f32 %v2721_v6, %v8367_v1  ;;  %v8397_v60 = vand.u32 4294901760, %v2717_v43  ;;  %v12212_v49 = vand.u32 4294901760, %v8370_v23 }
 0x21a   : > { %12209 = vst [vmem:[#allocation44_spill] sm:$0xff] %v8372_v38  ;;  %3297 = vmatpush.msrb.mxu3 %v8355_v29  ;;  %v3011_v58 = vsub.f32 %v8362_v35, %v11850_v24  ;;  %v8403_v46 = vsub.f32 %v2719_v52, %v8372_v38  ;;  %v2715_v6 = vmul.f32 %v2683_v16, %v8214_v37  ;;  %v2585_v57 = vmul.f32 0.7978846, %v2553_v33  ;;  %v12213_v35 = vld [vmem:[#allocation11_spill] sm:$0xff]  ;;  %v8447_v16 = vpop.permute.xlu0 %2234 }
 0x21b   : > { %12211 = vst [vmem:[#allocation45_spill] sm:$0xff] %v8397_v60  ;;  %v8407_v45 = vpop.f32.mrf.mxu1  ;;  %2848 = vmatpush.msrb.mxu0 %v8367_v1  ;;  %3171 = vmatpush.msrb.mxu2 %v8370_v23  ;;  %v3006_v53 = vand.u32 4294901760, %v3005_v13  ;;  %v3017_v29 = vsub.f32 %v8370_v23, %v12212_v49  ;;  %v2024_v52 = vadd.f32 %v8300_v8, %v8303_v47  ;;  %v8424_v37 = vpop.f32.mrf.mxu2 }
 0x21c   : > { %v2107_v24 = vadd.f32 %v8311_v51, %v8322_v10  ;;  %v2062_v42 = vmul.f32 %v8328_v12, %v8328_v12  ;;  %v1631_v15 = vadd.f32 %v8238_v11, %v12213_v35  ;;  %3299 = vmatpush.msrb.mxu3 %v8367_v1  ;;  %v3012_v49 = vand.u32 4294901760, %v3011_v58  ;;  %v8437_v11 = vpop.f32.mrf.mxu3 }
 0x21d   : > { %2850 = vmatpush.msrb.mxu0 %v8372_v38  ;;  %3007 = vmatpush.msrb.mxu1 %v3006_v53  ;;  %v8427_v33 = vand.u32 4294901760, %v2715_v6  ;;  %v8430_v8 = vsub.f32 %v2717_v43, %v8397_v60  ;;  %6591 = vtanh.f32 %v2585_v57  ;;  %v8433_v51 = vadd.f32 %v8251_v27, %v1845_v32  ;;  %v8445_v43 = vpop.permute.xlu2 %2229 }
 0x21e   : > { %3174 = vmatpush.msrb.mxu2 %v8395_v0  ;;  %3301 = vmatpush.msrb.mxu3 %v8372_v38  ;;  %v11854_v10 = vand.u32 4294901760, %v8395_v0  ;;  %v2519_v35 = vmul.f32 0.044715, %v2487_v34  ;;  %v11856_v53 = vand.u32 4294901760, %v8403_v46  ;;  %v3018_v58 = vand.u32 4294901760, %v3017_v29  ;;  %12215 = vst [vmem:[#allocation46_spill] sm:$0xff] %v8445_v43 }
 0x21f   : > { %v8405_v9 = vpop.f32.mrf.mxu0  ;;  %12214 = vst [vmem:[#allocation11_spill] sm:$0xff] %v8427_v33  ;;  %2852 = vmatpush.msrb.mxu0 %v8397_v60  ;;  %3013 = vmatpush.msrb.mxu1 %v3012_v49  ;;  %v2485_v57 = vmul.f32 %v2453_v18, %v8346_v26  ;;  %v11860_v27 = vand.u32 4294901760, %v8430_v8  ;;  %v2307_v32 = vmul.f32 %v8288_v2, %v2195_v7 }
 0x220   : > { %v1740_v13 = vadd.f32 %v8282_v25, %v1631_v15  ;;  %3177 = vmatpush.msrb.mxu2 %v8403_v46  ;;  %3303 = vmatpush.msrb.mxu3 %v8397_v60  ;;  %v3023_v29 = vsub.f32 %v8395_v0, %v11854_v10  ;;  %v2551_v34 = vadd.f32 %v2519_v35, %v8317_v44 }
 0x221   : > { %2854 = vmatpush.msrb.mxu0 %v8427_v33  ;;  %3019 = vmatpush.msrb.mxu1 %v3018_v58  ;;  %v8458_v7 = vsub.f32 %v2715_v6, %v8427_v33  ;;  %v3029_v25 = vsub.f32 %v8403_v46, %v11856_v53  ;;  %v2517_v15 = vmul.f32 0.044715, %v2485_v57  ;;  %v8464_v18 = vadd.f32 %v8359_v54, %v2307_v32  ;;  %v12216_v6 = vld [vmem:[#allocation9_spill] sm:$0xff] }
 0x222   : > { %3180 = vmatpush.msrb.mxu2 %v8430_v8  ;;  %3305 = vmatpush.msrb.mxu3 %v8427_v33  ;;  %v3024_v49 = vand.u32 4294901760, %v3023_v29  ;;  %v2583_v35 = vmul.f32 0.7978846, %v2551_v34  ;;  %v3035_v58 = vsub.f32 %v8430_v8, %v11860_v27  ;;  %v2025_v53 = vadd.f32 %v2024_v52, %v8328_v12  ;;  %v8479_v29 = vpop.permute.xlu1 %2224 }
 0x223   : > { %v6592_v2 = vpop.eup %6591  ;;  %v2108_v57 = vadd.f32 %v2107_v24, %v2062_v42  ;;  %v8474_v47 = vpop.f32.mrf.mxu1  ;;  %v2549_v32 = vadd.f32 %v2517_v15, %v8346_v26  ;;  %v2451_v54 = vmul.f32 %v8464_v18, %v8464_v18  ;;  %12217 = vst [vmem:[#allocation9_spill] sm:$0xff] %v8479_v29  ;;  %v2064_v34 = vmul.f32 %v8433_v51, %v8433_v51 }
 0x224   : > { %v1849_v27 = vadd.f32 %v8290_v28, %v1740_v13  ;;  %v2649_v10 = vadd.f32 1.0, %v6592_v2  ;;  %3025 = vmatpush.msrb.mxu1 %v3024_v49  ;;  %3183 = vmatpush.msrb.mxu2 %v8458_v7  ;;  %v3030_v42 = vand.u32 4294901760, %v3029_v25  ;;  %6593 = vtanh.f32 %v2583_v35  ;;  %v8489_v60 = vpop.f32.mrf.mxu2 }
 0x225   : > { %v2581_v24 = vmul.f32 0.7978846, %v2549_v32  ;;  %v2483_v52 = vmul.f32 %v2451_v54, %v8464_v18  ;;  %v11866_v15 = vand.u32 4294901760, %v8458_v7  ;;  %v3036_v38 = vand.u32 4294901760, %v3035_v58  ;;  %v8510_v32 = vpop.f32.mrf.mxu3 }
 0x226   : > { %v2681_v12 = vmul.f32 0.5, %v2649_v10  ;;  %3031 = vmatpush.msrb.mxu1 %v3030_v42  ;;  %v12218_v28 = vsub.f32 %v12182_v21, %v8006_v41  ;;  %v12219_v13 = vsub.f32 %v12194_v19, %v8006_v41  ;;  %v12220_v10 = vsub.f32 %v12195_v22, %v8006_v41 }
 0x227   : > { %v8484_v33 = vpop.f32.mrf.mxu0  ;;  %6595 = vtanh.f32 %v2581_v24  ;;  %v2515_v49 = vmul.f32 0.044715, %v2483_v52  ;;  %v3041_v54 = vsub.f32 %v8458_v7, %v11866_v15  ;;  %v8507_v21 = vadd.f32 %v8307_v3, %v1849_v27  ;;  %v8520_v27 = vpop.permute.xlu2 %2341 }
 0x228   : > { %v2193_v2 = vmul.f32 %v8114_v55, %v12218_v28  ;;  %v2191_v25 = vmul.f32 %v8114_v55, %v12219_v13  ;;  %v2189_v35 = vmul.f32 %v8114_v55, %v12220_v10  ;;  %v2713_v58 = vmul.f32 %v2681_v12, %v8272_v59  ;;  %3037 = vmatpush.msrb.mxu1 %v3036_v38  ;;  %v8522_v59 = vpop.permute.xlu0 %2346 }
 0x229   : > { %v2547_v24 = vadd.f32 %v2515_v49, %v8464_v18  ;;  %v3042_v52 = vand.u32 4294901760, %v3041_v54  ;;  %v12221_v22 = vsub.f32 %v12198_v61, %v8006_v41  ;;  %12222 = vst [vmem:[#allocation47_spill] sm:$0xff] %v8520_v27  ;;  %v2026_v12 = vadd.f32 %v2025_v53, %v8433_v51 }
 0x22a   : > { %v2305_v19 = vmul.f32 %v8314_v50, %v2193_v2  ;;  %v2303_v42 = vmul.f32 %v8447_v16, %v2191_v25  ;;  %v2301_v28 = vmul.f32 %v8445_v43, %v2189_v35  ;;  %v1636_v38 = vadd.f32 %v8280_v62, %v8072_v40  ;;  %v6594_v25 = vpop.eup %6593 }
 0x22b   : > { %v2187_v3 = vmul.f32 %v8114_v55, %v12221_v22  ;;  %v8527_v2 = vand.u32 4294901760, %v2713_v58  ;;  %v2579_v49 = vmul.f32 0.7978846, %v2547_v24  ;;  %3043 = vmatpush.msrb.mxu1 %v3042_v52  ;;  %v8539_v53 = vadd.f32 %v2108_v57, %v2064_v34  ;;  %v8556_v52 = vpop.permute.xlu1 %2336 }
 0x22c   : > { %v8530_v13 = vadd.f32 %v8391_v56, %v2305_v19  ;;  %v8533_v61 = vadd.f32 %v8522_v59, %v2303_v42  ;;  %v8536_v54 = vadd.f32 %v8520_v27, %v2301_v28  ;;  %v8542_v40 = vadd.f32 %v2026_v12, %v8507_v21  ;;  %v8549_v19 = vpop.f32.mrf.mxu1  ;;  %12223 = vst [vmem:[#allocation48_spill] sm:$0xff] %v8556_v52  ;;  %v8575_v27 = vpop.f32.mrf.mxu2 }
 0x22d   : > { %v2299_v10 = vmul.f32 %v8479_v29, %v2187_v3  ;;  %2856 = vmatpush.msrb.mxu0 %v8527_v2  ;;  %3307 = vmatpush.msrb.mxu3 %v8527_v2  ;;  %v2647_v62 = vadd.f32 1.0, %v6594_v25  ;;  %v8547_v35 = vsub.f32 %v2713_v58, %v8527_v2  ;;  %v6596_v42 = vpop.eup %6595  ;;  %v1746_v24 = vadd.f32 %v8333_v5, %v1636_v38 }
 0x22e   : > { %6597 = vtanh.f32 %v2579_v49  ;;  %v2449_v57 = vmul.f32 %v8530_v13, %v8530_v13  ;;  %v2447_v34 = vmul.f32 %v8533_v61, %v8533_v61  ;;  %v2645_v22 = vadd.f32 1.0, %v6596_v42 }
 0x22f   : > { %v2679_v28 = vmul.f32 0.5, %v2647_v62  ;;  %3186 = vmatpush.msrb.mxu2 %v8547_v35  ;;  %v8559_v58 = vpop.f32.mrf.mxu0  ;;  %v11869_v3 = vand.u32 4294901760, %v8547_v35  ;;  %v2445_v5 = vmul.f32 %v8536_v54, %v8536_v54  ;;  %v1641_v12 = vadd.f32 %v8331_v20, %v8075_v48 }
 0x230   : > { %v2481_v38 = vmul.f32 %v2449_v57, %v8530_v13  ;;  %v2479_v25 = vmul.f32 %v2447_v34, %v8533_v61  ;;  %v8569_v49 = vadd.f32 %v8556_v52, %v2299_v10  ;;  %v2677_v42 = vmul.f32 0.5, %v2645_v22  ;;  %v8586_v22 = vpop.f32.mrf.mxu3 }
 0x231   : > { %v2711_v62 = vmul.f32 %v2679_v28, %v8317_v44  ;;  %v3047_v15 = vsub.f32 %v8547_v35, %v11869_v3  ;;  %v2477_v29 = vmul.f32 %v2445_v5, %v8536_v54  ;;  %v1853_v48 = vadd.f32 %v8339_v4, %v1746_v24 }
 0x232   : > { %v2513_v20 = vmul.f32 0.044715, %v2481_v38  ;;  %v2511_v57 = vmul.f32 0.044715, %v2479_v25  ;;  %v2443_v34 = vmul.f32 %v8569_v49, %v8569_v49  ;;  %v2066_v10 = vmul.f32 %v8507_v21, %v8507_v21 }
 0x233   : > { %v8583_v44 = vand.u32 4294901760, %v2711_v62  ;;  %v2709_v28 = vmul.f32 %v2677_v42, %v8346_v26  ;;  %v2509_v3 = vmul.f32 0.044715, %v2477_v29  ;;  %v1752_v5 = vadd.f32 %v8407_v45, %v1641_v12 }
 0x234   : > { %v6598_v52 = vpop.eup %6597  ;;  %v2545_v4 = vadd.f32 %v2513_v20, %v8530_v13  ;;  %v3048_v24 = vand.u32 4294901760, %v3047_v15  ;;  %v2543_v38 = vadd.f32 %v2511_v57, %v8533_v61  ;;  %v8600_v42 = vadd.f32 %v8350_v63, %v1853_v48 }
 0x235   : > { %2858 = vmatpush.msrb.mxu0 %v8583_v44  ;;  %3309 = vmatpush.msrb.mxu3 %v8583_v44  ;;  %v8593_v25 = vand.u32 4294901760, %v2709_v28  ;;  %v8596_v43 = vsub.f32 %v2711_v62, %v8583_v44  ;;  %v2643_v26 = vadd.f32 1.0, %v6598_v52  ;;  %v2541_v29 = vadd.f32 %v2509_v3, %v8536_v54  ;;  %v8609_v3 = vpop.f32.mrf.mxu1 }
 0x236   : > { %v2577_v45 = vmul.f32 0.7978846, %v2545_v4  ;;  %3049 = vmatpush.msrb.mxu1 %v3048_v24  ;;  %v2575_v15 = vmul.f32 0.7978846, %v2543_v38  ;;  %v2475_v12 = vmul.f32 %v2443_v34, %v8569_v49  ;;  %v1646_v63 = vadd.f32 %v8405_v9, %v8082_v39 }
 0x237   : > { %2860 = vmatpush.msrb.mxu0 %v8593_v25  ;;  %3189 = vmatpush.msrb.mxu2 %v8596_v43  ;;  %v2675_v20 = vmul.f32 0.5, %v2643_v26  ;;  %v8606_v57 = vsub.f32 %v2709_v28, %v8593_v25  ;;  %v11874_v52 = vand.u32 4294901760, %v8596_v43  ;;  %v2573_v62 = vmul.f32 0.7978846, %v2541_v29  ;;  %v1660_v38 = vpop.f32.mrf.mxu0 }
 0x238   : > { %v1857_v48 = vadd.f32 %v8424_v37, %v1752_v5  ;;  %3311 = vmatpush.msrb.mxu3 %v8593_v25  ;;  %6599 = vtanh.f32 %v2577_v45  ;;  %v2507_v34 = vmul.f32 0.044715, %v2475_v12  ;;  %v1758_v39 = vadd.f32 %v8474_v47, %v1646_v63  ;;  %v8627_v5 = vpop.permute.xlu0 %2219 }
 0x239   : > { %v2707_v4 = vmul.f32 %v2675_v20, %v8464_v18  ;;  %3192 = vmatpush.msrb.mxu2 %v8606_v57  ;;  %6601 = vtanh.f32 %v2575_v15  ;;  %v3053_v28 = vsub.f32 %v8596_v43, %v11874_v52  ;;  %v11873_v24 = vand.u32 4294901760, %v8606_v57  ;;  %12225 = vst [vmem:[#allocation49_spill] sm:$0xff] %v8627_v5  ;;  %v8637_v15 = vpop.f32.mrf.mxu2  ;;  %v8643_v20 = vpop.permute.xlu2 %2331 }
 0x23a   : > { %6603 = vtanh.f32 %v2573_v62  ;;  %v2539_v9 = vadd.f32 %v2507_v34, %v8569_v49  ;;  %v12224_v37 = vsub.f32 %v12216_v6, %v8006_v41  ;;  %v2110_v26 = vadd.f32 %v8539_v53, %v2066_v10  ;;  %12226 = vst [vmem:[#allocation50_spill] sm:$0xff] %v8643_v20 }
 0x23b   : > { %v2068_v29 = vmul.f32 %v8600_v42, %v8600_v42  ;;  %v8632_v45 = vand.u32 4294901760, %v2707_v4  ;;  %v3059_v47 = vsub.f32 %v8606_v57, %v11873_v24  ;;  %v8640_v12 = vadd.f32 %v8437_v11, %v1857_v48  ;;  %v8654_v11 = vpop.f32.mrf.mxu3 }
 0x23c   : > { %v2185_v18 = vmul.f32 %v8114_v55, %v12224_v37  ;;  %v3054_v41 = vand.u32 4294901760, %v3053_v28  ;;  %v2571_v55 = vmul.f32 0.7978846, %v2539_v9  ;;  %v2028_v53 = vadd.f32 %v8542_v40, %v8600_v42 }
 0x23d   : > { %v1651_v10 = vadd.f32 %v8484_v33, %v8085_v31  ;;  %2862 = vmatpush.msrb.mxu0 %v8632_v45  ;;  %3313 = vmatpush.msrb.mxu3 %v8632_v45  ;;  %v8652_v62 = vsub.f32 %v2707_v4, %v8632_v45  ;;  %v1861_v48 = vadd.f32 %v8489_v60, %v1758_v39  ;;  %v3060_v34 = vand.u32 4294901760, %v3059_v47  ;;  %v12227_v31 = vld [vmem:[#allocation14_spill] sm:$0xff] }
 0x23e   : > { %v2297_v6 = vmul.f32 %v8627_v5, %v2185_v18  ;;  %v6600_v63 = vpop.eup %6599  ;;  %3055 = vmatpush.msrb.mxu1 %v3054_v41  ;;  %6605 = vtanh.f32 %v2571_v55  ;;  %v8662_v33 = vadd.f32 %v12227_v31, %v8104_v17  ;;  %v2111_v60 = vadd.f32 %v2110_v26, %v2068_v29 }
 0x23f   : > { %v6602_v28 = vpop.eup %6601  ;;  %v1764_v9 = vadd.f32 %v8549_v19, %v1651_v10  ;;  %v2641_v4 = vadd.f32 1.0, %v6600_v63  ;;  %3195 = vmatpush.msrb.mxu2 %v8652_v62  ;;  %v11872_v37 = vand.u32 4294901760, %v8652_v62  ;;  %v2029_v39 = vadd.f32 %v2028_v53, %v8640_v12  ;;  %v1775_v10 = vpop.f32.mrf.mxu1 }
 0x240   : > { %v8658_v40 = vadd.f32 %v8643_v20, %v2297_v6  ;;  %v6604_v18 = vpop.eup %6603  ;;  %v2639_v47 = vadd.f32 1.0, %v6602_v28  ;;  %3061 = vmatpush.msrb.mxu1 %v3060_v34  ;;  %v2070_v17 = vmul.f32 %v8640_v12, %v8640_v12  ;;  %v8676_v63 = vadd.f32 %v8510_v32, %v1861_v48  ;;  %v2729_v34 = vld [vmem:[%s11772_s6] sm:$0xff] }
 0x241   : > { %v2673_v55 = vmul.f32 0.5, %v2641_v4  ;;  %v2637_v6 = vadd.f32 1.0, %v6604_v18  ;;  %v3065_v19 = vsub.f32 %v8652_v62, %v11872_v37  ;;  %v1656_v26 = vadd.f32 %v8559_v58, %v8088_v14  ;;  %v1665_v37 = vpop.f32.mrf.mxu0  ;;  %v1872_v24 = vpop.f32.mrf.mxu2 }
 0x242   : > { %v2441_v41 = vmul.f32 %v8658_v40, %v8658_v40  ;;  %v2671_v29 = vmul.f32 0.5, %v2639_v47  ;;  %v1865_v31 = vadd.f32 %v8575_v27, %v1764_v9  ;;  %v1661_v14 = vadd.f32 %v1660_v38, %v8093_v30 }
 0x243   : > { %v2705_v28 = vmul.f32 %v2673_v55, %v8530_v13  ;;  %v2669_v4 = vmul.f32 0.5, %v2637_v6  ;;  %v3066_v18 = vand.u32 4294901760, %v3065_v19  ;;  %v1770_v58 = vadd.f32 %v8609_v3, %v1656_v26  ;;  %v1957_v27 = vpop.f32.mrf.mxu3 }
 0x244   : > { %v2473_v53 = vmul.f32 %v2441_v41, %v8658_v40  ;;  %v6606_v32 = vpop.eup %6605  ;;  %v2703_v48 = vmul.f32 %v2671_v29, %v8533_v61  ;;  %v8692_v13 = vand.u32 4294901760, %v2729_v34  ;;  %v2112_v9 = vadd.f32 %v2111_v60, %v2070_v17 }
 0x245   : > { %v8689_v41 = vand.u32 4294901760, %v2705_v28  ;;  %v2701_v52 = vmul.f32 %v2669_v4, %v8536_v54  ;;  %v2635_v20 = vadd.f32 1.0, %v6606_v32  ;;  %3067 = vmatpush.msrb.mxu1 %v3066_v18  ;;  %v1776_v61 = vadd.f32 %v1775_v10, %v1661_v14  ;;  %v2730_v18 = vld [vmem:[%s11772_s6 + $0x8] sm:$0xff] }
 0x246   : > { %v2505_v47 = vmul.f32 0.044715, %v2473_v53  ;;  %v8694_v55 = vand.u32 4294901760, %v2703_v48  ;;  %v2072_v30 = vmul.f32 %v8676_v63, %v8676_v63  ;;  %v8707_v60 = vadd.f32 %v8586_v22, %v1865_v31 }
 0x247   : > { %2864 = vmatpush.msrb.mxu0 %v8689_v41  ;;  %3315 = vmatpush.msrb.mxu3 %v8689_v41  ;;  %v8702_v54 = vsub.f32 %v2705_v28, %v8689_v41  ;;  %v8704_v3 = vand.u32 4294901760, %v2701_v52  ;;  %v2667_v38 = vmul.f32 0.5, %v2635_v20  ;;  %v1869_v10 = vadd.f32 %v8637_v15, %v1770_v58  ;;  %v1781_v53 = vpop.f32.mrf.mxu1 }
 0x248   : > { %v2537_v6 = vadd.f32 %v2505_v47, %v8658_v40  ;;  %v8710_v17 = vsub.f32 %v2703_v48, %v8694_v55  ;;  %v8721_v22 = vsub.f32 %v2729_v34, %v8692_v13  ;;  %v1666_v28 = vadd.f32 %v1665_v37, %v8096_v36 }
 0x249   : > { %2866 = vmatpush.msrb.mxu0 %v8694_v55  ;;  %3198 = vmatpush.msrb.mxu2 %v8702_v54  ;;  %v2699_v26 = vmul.f32 %v2667_v38, %v8569_v49  ;;  %v8717_v29 = vsub.f32 %v2701_v52, %v8704_v3  ;;  %v11879_v20 = vand.u32 4294901760, %v8702_v54  ;;  %v1873_v31 = vadd.f32 %v1872_v24, %v1776_v61  ;;  %v1876_v36 = vpop.f32.mrf.mxu2 }
 0x24a   : > { %v2569_v19 = vmul.f32 0.7978846, %v2537_v6  ;;  %12228 = vst [vmem:[#allocation14_spill] sm:$0xff] %v8721_v22  ;;  %3317 = vmatpush.msrb.mxu3 %v8694_v55  ;;  %v11877_v15 = vand.u32 4294901760, %v8710_v17  ;;  %v2030_v4 = vadd.f32 %v2029_v39, %v8676_v63  ;;  %v2074_v24 = vmul.f32 %v8707_v60, %v8707_v60  ;;  %v1670_v6 = vpop.f32.mrf.mxu0 }
 0x24b   : > { %2868 = vmatpush.msrb.mxu0 %v8704_v3  ;;  %3201 = vmatpush.msrb.mxu2 %v8710_v17  ;;  %v8729_v49 = vand.u32 4294901760, %v2699_v26  ;;  %v3071_v52 = vsub.f32 %v8702_v54, %v11879_v20  ;;  %v11876_v34 = vand.u32 4294901760, %v8717_v29  ;;  %v8745_v39 = vadd.f32 %v8654_v11, %v1869_v10  ;;  %v1961_v61 = vpop.f32.mrf.mxu3 }
 0x24c   : > { %6607 = vtanh.f32 %v2569_v19  ;;  %3319 = vmatpush.msrb.mxu3 %v8704_v3  ;;  %v3077_v37 = vsub.f32 %v8710_v17, %v11877_v15  ;;  %v1782_v32 = vadd.f32 %v1781_v53, %v1666_v28  ;;  %v8753_v58 = vand.u32 4294901760, %v8721_v22 }
 0x24d   : > { %2870 = vmatpush.msrb.mxu0 %v8729_v49  ;;  %3204 = vmatpush.msrb.mxu2 %v8717_v29  ;;  %v3072_v48 = vand.u32 4294901760, %v3071_v52  ;;  %v8750_v14 = vsub.f32 %v2699_v26, %v8729_v49  ;;  %v3083_v47 = vsub.f32 %v8717_v29, %v11876_v34  ;;  %v2113_v11 = vadd.f32 %v2112_v9, %v2072_v30 }
 0x24e   : > { %12229 = vst [vmem:[#allocation51_spill] sm:$0xff] %v8753_v58  ;;  %3321 = vmatpush.msrb.mxu3 %v8729_v49  ;;  %v8759_v38 = vand.u32 4294901760, %v2730_v18  ;;  %v8761_v19 = vadd.f32 %v1957_v27, %v1873_v31  ;;  %v1877_v10 = vadd.f32 %v1876_v36, %v1782_v32  ;;  %v2031_v26 = vadd.f32 %v2030_v4, %v8707_v60 }
 0x24f   : > { %3073 = vmatpush.msrb.mxu1 %v3072_v48  ;;  %3207 = vmatpush.msrb.mxu2 %v8750_v14  ;;  %v3078_v53 = vand.u32 4294901760, %v3077_v37  ;;  %v11878_v28 = vand.u32 4294901760, %v8750_v14  ;;  %v2114_v34 = vadd.f32 %v2113_v11, %v2074_v24  ;;  %v2076_v9 = vmul.f32 %v8745_v39, %v8745_v39  ;;  %v1787_v37 = vpop.f32.mrf.mxu1  ;;  %v2731_v48 = vld [vmem:[%s11772_s6 + $0x10] sm:$0xff] }
 0x250   : > { %v1671_v30 = vadd.f32 %v1670_v6, %v8662_v33  ;;  %v8769_v15 = vadd.f32 %v1961_v61, %v1877_v10  ;;  %v2876_v31 = vsub.f32 %v8721_v22, %v8753_v58  ;;  %v3084_v4 = vand.u32 4294901760, %v3083_v47 }
 0x251   : > { %3079 = vmatpush.msrb.mxu1 %v3078_v53  ;;  %v3089_v36 = vsub.f32 %v8750_v14, %v11878_v28  ;;  %v2032_v24 = vadd.f32 %v2031_v26, %v8745_v39  ;;  %v8778_v32 = vsub.f32 %v2730_v18, %v8759_v38  ;;  %v2078_v33 = vmul.f32 %v8761_v19, %v8761_v19  ;;  %v1880_v11 = vpop.f32.mrf.mxu2 }
 0x252   : > { %v6608_v52 = vpop.eup %6607  ;;  %v1788_v6 = vadd.f32 %v1787_v37, %v1671_v30  ;;  %v2115_v10 = vadd.f32 %v2114_v34, %v2076_v9  ;;  %v2080_v26 = vmul.f32 %v8769_v15, %v8769_v15  ;;  %v8789_v28 = vand.u32 4294901760, %v2876_v31 }
 0x253   : > { %v2633_v27 = vadd.f32 1.0, %v6608_v52  ;;  %12230 = vst [vmem:[#allocation52_spill] sm:$0xff] %v8778_v32  ;;  %3085 = vmatpush.msrb.mxu1 %v3084_v4  ;;  %v3090_v47 = vand.u32 4294901760, %v3089_v36  ;;  %v2033_v53 = vadd.f32 %v2032_v24, %v8761_v19  ;;  %v8791_v20 = vand.u32 4294901760, %v2731_v48  ;;  %v1965_v5 = vpop.f32.mrf.mxu3 }
 0x254   : > { %v1881_v18 = vadd.f32 %v1880_v11, %v1788_v6  ;;  %v8794_v30 = vand.u32 4294901760, %v8778_v32 }
 0x255   : > { %v2665_v61 = vmul.f32 0.5, %v2633_v27  ;;  %3091 = vmatpush.msrb.mxu1 %v3090_v47  ;;  %v2116_v27 = vadd.f32 %v2115_v10, %v2078_v33  ;;  %v2034_v34 = vadd.f32 %v2033_v53, %v8769_v15  ;;  %v8810_v24 = vsub.f32 %v2731_v48, %v8791_v20  ;;  %v2732_v48 = vld [vmem:[%s11772_s6 + $0x18] sm:$0xff] }
 0x256   : > { %12231 = vst [vmem:[#allocation53_spill] sm:$0xff] %v8794_v30  ;;  %v8797_v9 = vadd.f32 %v1965_v5, %v1881_v18  ;;  %v2884_v5 = vsub.f32 %v8778_v32, %v8794_v30 }
 0x257   : > { %v2697_v52 = vmul.f32 %v2665_v61, %v8658_v40  ;;  %v2117_v36 = vadd.f32 %v2116_v27, %v2080_v26  ;;  %12232 = vst [vmem:[#allocation54_spill] sm:$0xff] %v8810_v24  ;;  %v12233_v61 = vld [vmem:[#allocation40_spill] sm:$0xff]  ;;  %v12235_v26 = vld [vmem:[#allocation43_spill] sm:$0xff]  ;;  %v8830_v27 = vand.u32 4294901760, %v8810_v24 }
 0x258   : > { %v2035_v37 = vadd.f32 %v2034_v34, %v8797_v9  ;;  %v2082_v40 = vmul.f32 %v8797_v9, %v8797_v9  ;;  %v12234_v47 = vand.u32 4294901760, %v12233_v61  ;;  %v12236_v18 = vand.u32 4294901760, %v12235_v26 }
 0x259   : > { %v8799_v4 = vand.u32 4294901760, %v2697_v52  ;;  %12237 = vst [vmem:[#allocation40_spill] sm:$0xff] %v8830_v27  ;;  %v8832_v34 = vand.u32 4294901760, %v2884_v5 }
 0x25a   : > { %v2036_v33 = vrot.slane %v2035_v37, 4  ;;  %v2118_v6 = vadd.f32 %v2117_v36, %v2082_v40  ;;  %v8834_v36 = vand.u32 4294901760, %v2732_v48 }
 0x25b   : > { %2872 = vmatpush.msrb.mxu0 %v8799_v4  ;;  %3323 = vmatpush.msrb.mxu3 %v8799_v4  ;;  %v8807_v31 = vsub.f32 %v2697_v52, %v8799_v4 }
 0x25c   : > { %2878 = vmatmul.f32.vlgmr.msrb.gmra.mxu0 %v8789_v28  ;;  %3327 = vmatmul.f32.vlgmr.msrb.gmra.mxu3 %v8753_v58  ;;  %v2037_v10 = vadd.f32 %v2036_v33, %v2035_v37  ;;  %v2119_v53 = vrot.slane %v2118_v6, 4  ;;  %v8845_v5 = vsub.f32 %v2732_v48, %v8834_v36  ;;  %v12243_v48 = vand.u32 4294901760, %v8430_v8 }
 0x25d   : > { %3424 = vmatpush.msra.mxu0 %v12234_v47  ;;  %3210 = vmatpush.msrb.mxu2 %v8807_v31  ;;  %v11881_v11 = vand.u32 4294901760, %v8807_v31  ;;  %v12238_v47 = vand.u32 4294901760, %v8370_v23 }
 0x25e   : > { %3213 = vmatmul.f32.vlgmr.msrb.gmra.mxu2 %v8721_v22  ;;  %v2038_v40 = vrot.slane %v2037_v10, 2  ;;  %v2120_v61 = vadd.f32 %v2119_v53, %v2118_v6  ;;  %12240 = vst [vmem:[#allocation43_spill] sm:$0xff] %v8845_v5  ;;  %v12241_v53 = vand.u32 4294901760, %v8403_v46  ;;  %v8861_v46 = vand.u32 4294901760, %v8845_v5 }
 0x25f   : > { %3428 = vmatpush.msra.mxu0 %v12236_v18  ;;  %v3095_v52 = vsub.f32 %v8807_v31, %v11881_v11  ;;  %v12239_v18 = vand.u32 4294901760, %v8395_v0  ;;  %v2892_v11 = vsub.f32 %v8810_v24, %v8830_v27 }
 0x260   : > { %v2039_v33 = vadd.f32 %v2038_v40, %v2037_v10  ;;  %v2121_v26 = vrot.slane %v2120_v61, 2  ;;  %v12242_v10 = vld [vmem:[#allocation7_spill] sm:$0xff] }
 0x261   : > { %3432 = vmatpush.msra.mxu0 %v12238_v47  ;;  %v3096_v37 = vand.u32 4294901760, %v3095_v52  ;;  %v2733_v40 = vld [vmem:[%s11772_s6 + $0x20] sm:$0xff] }
 0x262   : > { %v2040_v6 = vrot.slane %v2039_v33, 1  ;;  %v2122_v23 = vadd.f32 %v2121_v26, %v2120_v61  ;;  %v12244_v47 = vld [vmem:[#allocation39_spill] sm:$0xff]  ;;  %v8858_v61 = vand.u32 4294901760, %v2892_v11 }
 0x263   : > { %3436 = vmatpush.msra.mxu0 %v12239_v18  ;;  %3097 = vmatpush.msrb.mxu1 %v3096_v37  ;;  %12246 = vst [vmem:[#allocation39_spill] sm:$0xff] %v8861_v46  ;;  %v12247_v37 = vld [vmem:[#allocation18_spill] sm:$0xff] }
 0x264   : > { %2886 = vmatmul.f32.gmra.mxu0 %v8832_v34  ;;  %3099 = vmatmul.f32.vlgmr.msrb.gmra.mxu1 %v8692_v13  ;;  %v2041_v0 = vadd.f32 %v2040_v6, %v2039_v33  ;;  %v2123_v52 = vrot.slane %v2122_v23, 1  ;;  %12245 = vst [vmem:[#allocation7_spill] sm:$0xff] %v8858_v61  ;;  %v8866_v33 = vand.u32 4294901760, %v2733_v40  ;;  %v12248_v6 = vand.u32 4294901760, %v8458_v7 }
 0x265   : > { %3440 = vmatpush.msra.mxu0 %v12241_v53  ;;  %3551 = vmatpush.msra.mxu1 %v12242_v10  ;;  %v12249_v53 = vld [vmem:[#allocation41_spill] sm:$0xff]  ;;  %v12250_v10 = vand.u32 4294901760, %v8547_v35  ;;  %v2900_v7 = vsub.f32 %v8845_v5, %v8861_v46 }
 0x266   : > { %3218 = vmatmul.f32.gmra.mxu2 %v8778_v32  ;;  %3333 = vmatmul.f32.gmra.mxu3 %v8794_v30  ;;  %v8864_v26 = vmul.f32 %v12247_v37, %v2041_v0  ;;  %v2124_v18 = vadd.f32 %v2123_v52, %v2122_v23  ;;  %v8882_v0 = vsub.f32 %v2733_v40, %v8866_v33  ;;  %v12252_v52 = vand.u32 4294901760, %v8596_v43  ;;  %v12255_v40 = vld [vmem:[#allocation45_spill] sm:$0xff]  ;;  %v12299_v30 = vld [vmem:[#allocation24_spill] sm:$0xff] }
 0x267   : > { %3444 = vmatpush.msra.mxu0 %v12243_v48  ;;  %3553 = vmatpush.msra.mxu1 %v12244_v47  ;;  %v12253_v48 = vld [vmem:[#allocation44_spill] sm:$0xff]  ;;  %v12254_v47 = vand.u32 4294901760, %v8606_v57  ;;  %v12302_v32 = vld [vmem:[#allocation13_spill] sm:$0xff] }
 0x268   : > { %v2126_v8 = vmul.f32 %v2124_v18, %v12247_v37  ;;  %v2128_v11 = vmul.f32 %v8864_v26, %v8864_v26  ;;  %12251 = vst [vmem:[#allocation41_spill] sm:$0xff] %v8882_v0  ;;  %v8897_v18 = vand.u32 4294901760, %v2900_v7  ;;  %v8900_v43 = vand.u32 4294901760, %v8882_v0 }
 0x269   : > { %3448 = vmatpush.msra.mxu0 %v12248_v6  ;;  %3555 = vmatpush.msra.mxu1 %v12249_v53  ;;  %v12259_v53 = vand.u32 4294901760, %v8652_v62  ;;  %v12263_v62 = vand.u32 4294901760, %v8710_v17 }
 0x26a   : > { %v2130_v23 = vsub.f32 %v2126_v8, %v2128_v11  ;;  %12256 = vst [vmem:[#allocation44_spill] sm:$0xff] %v8897_v18  ;;  %v12260_v8 = vld [vmem:[#allocation11_spill] sm:$0xff]  ;;  %v12261_v11 = vand.u32 4294901760, %v8702_v54  ;;  %v2908_v57 = vsub.f32 %v8882_v0, %v8900_v43  ;;  %v2735_v54 = vld [vmem:[%s11772_s6 + $0x30] sm:$0xff] }
 0x26b   : > { %3452 = vmatpush.msra.mxu0 %v12250_v10  ;;  %3557 = vmatpush.msra.mxu1 %v8367_v1  ;;  %v2734_v1 = vld [vmem:[%s11772_s6 + $0x28] sm:$0xff]  ;;  %12257 = vst [vmem:[#allocation45_spill] sm:$0xff] %v8900_v43 }
 0x26c   : > { %2894 = vmatmul.f32.gmra.mxu0 %v8858_v61  ;;  %3103 = vmatmul.f32.gmra.mxu1 %v8759_v38  ;;  %v8892_v35 = vadd.f32 1e-05, %v2130_v23  ;;  %v8902_v6 = vand.u32 4294901760, %v2734_v1  ;;  %v8929_v23 = vand.u32 4294901760, %v2908_v57  ;;  %v2738_v57 = vld [vmem:[%s11772_s6 + $0x48] sm:$0xff] }
 0x26d   : > { %3456 = vmatpush.msra.mxu0 %v12252_v52  ;;  %3559 = vmatpush.msra.mxu1 %v12253_v48  ;;  %v12268_v52 = vand.u32 4294901760, %v8750_v14  ;;  %v12309_v61 = vld [vmem:[#allocation32_spill] sm:$0xff] }
 0x26e   : > { %3223 = vmatmul.f32.gmra.mxu2 %v8810_v24  ;;  %3339 = vmatmul.f32.gmra.mxu3 %v8830_v27  ;;  %12258 = vst [vmem:[#allocation55_spill] sm:$0xff] %v8902_v6  ;;  %6609 = vrsqrt.f32 %v8892_v35  ;;  %v8916_v10 = vsub.f32 %v2734_v1, %v8902_v6  ;;  %vm2181_vm6 = vweird.f32 %v8892_v35 }
 0x26f   : > { %3460 = vmatpush.msra.mxu0 %v12254_v47  ;;  %3561 = vmatpush.msra.mxu1 %v12255_v40  ;;  %12265 = vst [vmem:[#allocation56_spill] sm:$0xff] %v8929_v23 }
 0x270   : > { %12262 = vst [vmem:[#allocation11_spill] sm:$0xff] %v8916_v10  ;;  %v8932_v17 = vand.u32 4294901760, %v8916_v10 }
 0x271   : > { %3464 = vmatpush.msra.mxu0 %v12259_v53  ;;  %3563 = vmatpush.msra.mxu1 %v12260_v8  ;;  %v2737_v53 = vld [vmem:[%s11772_s6 + $0x40] sm:$0xff] }
 0x272   : > { %12266 = vst [vmem:[#allocation57_spill] sm:$0xff] %v8932_v17 }
 0x273   : > { %3468 = vmatpush.msra.mxu0 %v12261_v11  ;;  %3565 = vmatpush.msra.mxu1 %v8527_v2  ;;  %v12264_v2 = vand.u32 4294901760, %v8717_v29  ;;  %v12269_v29 = vand.u32 4294901760, %v8807_v31  ;;  %v8983_v11 = vand.u32 4294901760, %v2737_v53 }
 0x274   : > { %2902 = vmatmul.f32.gmra.mxu0 %v8897_v18  ;;  %3107 = vmatmul.f32.gmra.mxu1 %v8791_v20  ;;  %v6610_v7 = vpop.eup %6609  ;;  %v12308_v18 = vld [vmem:[#allocation26_spill] sm:$0xff] }
 0x275   : > { %3472 = vmatpush.msra.mxu0 %v12263_v62  ;;  %3567 = vmatpush.msra.mxu1 %v8583_v44  ;;  %v8934_v44 = vand.u32 4294901760, %v2735_v54  ;;  %v2176_v48 = vmul.f32 %v6610_v7, %v8892_v35  ;;  %vm2182_vm5 = vweird.f32 %v6610_v7  ;;  %v2740_v35 = vld [vmem:[%s11772_s6 + $0x58] sm:$0xff] }
 0x276   : > { %3228 = vmatmul.f32.gmra.mxu2 %v8845_v5  ;;  %3345 = vmatmul.f32.gmra.mxu3 %v8861_v46  ;;  %vm2183_vm7 = vmor %vm2181_vm6, %vm2182_vm5  ;;  %v12295_v46 = vld [vmem:[#allocation10_spill] sm:$0xff]  ;;  %v12298_v5 = vld [vmem:[#allocation37_spill] sm:$0xff] }
 0x277   : > { %3476 = vmatpush.msra.mxu0 %v12264_v2  ;;  %3569 = vmatpush.msra.mxu1 %v8593_v25  ;;  %12267 = vst [vmem:[#allocation58_spill] sm:$0xff] %v8934_v44  ;;  %v2916_v25 = vsub.f32 %v8916_v10, %v8932_v17  ;;  %v8948_v1 = vsub.f32 %v2735_v54, %v8934_v44  ;;  %v2739_v54 = vld [vmem:[%s11772_s6 + $0x50] sm:$0xff] }
 0x279   : > { %3480 = vmatpush.msra.mxu0 %v12268_v52  ;;  %3571 = vmatpush.msra.mxu1 %v8632_v45  ;;  %12270 = vst [vmem:[#allocation59_spill] sm:$0xff] %v8948_v1  ;;  %v2736_v45 = vld [vmem:[%s11772_s6 + $0x38] sm:$0xff]  ;;  %v8957_v14 = vand.u32 4294901760, %v2916_v25  ;;  %v8960_v31 = vand.u32 4294901760, %v8948_v1  ;;  %v8996_v52 = vsub.f32 %v2737_v53, %v8983_v11 }
 0x27a   : > { %v8962_v47 = vand.u32 4294901760, %v2736_v45 }
 0x27b   : > { %3484 = vmatpush.msra.mxu0 %v12269_v29  ;;  %3573 = vmatpush.msra.mxu1 %v8689_v41  ;;  %v2177_v41 = vmul.f32 %v6610_v7, %v2176_v48  ;;  %12271 = vst [vmem:[#allocation60_spill] sm:$0xff] %v8957_v14  ;;  %v2924_v40 = vsub.f32 %v8948_v1, %v8960_v31  ;;  %v8998_v48 = vand.u32 4294901760, %v2738_v57  ;;  %v9003_v29 = vand.u32 4294901760, %v2739_v54 }
 0x27c   : > { %2910 = vmatmul.f32.gmra.mxu0 %v8929_v23  ;;  %3111 = vmatmul.f32.gmra.mxu1 %v8834_v36  ;;  %12272 = vst [vmem:[#allocation61_spill] sm:$0xff] %v8960_v31 }
 0x27d   : > { %3575 = vmatpush.msra.mxu1 %v8694_v55  ;;  %12273 = vst [vmem:[#allocation62_spill] sm:$0xff] %v8962_v47  ;;  %v2178_v55 = vmul.f32 0.5, %v2177_v41 }
 0x27e   : > { %3233 = vmatmul.f32.gmra.mxu2 %v8882_v0  ;;  %3351 = vmatmul.f32.gmra.mxu3 %v8900_v43  ;;  %12277 = vst [vmem:[#allocation66_spill] sm:$0xff] %v8996_v52  ;;  %v2158_v43 = vsub.f32 %v8761_v19, %v8864_v26  ;;  %v2150_v19 = vsub.f32 %v8640_v12, %v8864_v26 }
 0x27f   : > { %3577 = vmatpush.msra.mxu1 %v8704_v3  ;;  %v8971_v3 = vsub.f32 %v2736_v45, %v8962_v47  ;;  %12278 = vst [vmem:[#allocation67_spill] sm:$0xff] %v9003_v29  ;;  %v2162_v45 = vsub.f32 %v8797_v9, %v8864_v26 }
 0x281   : > { %3579 = vmatpush.msra.mxu1 %v8729_v49  ;;  %12274 = vst [vmem:[#allocation63_spill] sm:$0xff] %v8971_v3  ;;  %v2179_v49 = vsub.f32 1.5, %v2178_v55  ;;  %v8981_v8 = vand.u32 4294901760, %v8971_v3  ;;  %v9012_v55 = vand.u32 4294901760, %v8996_v52 }
 0x283   : > { %3581 = vmatpush.msra.mxu1 %v8799_v4  ;;  %v8978_v4 = vand.u32 4294901760, %v2924_v40  ;;  %12276 = vst [vmem:[#allocation65_spill] sm:$0xff] %v8981_v8  ;;  %v2180_v62 = vmul.f32 %v6610_v7, %v2179_v49  ;;  %v2932_v2 = vsub.f32 %v8971_v3, %v8981_v8  ;;  %v9015_v40 = vsub.f32 %v2738_v57, %v8998_v48 }
 0x284   : > { %2918 = vmatmul.f32.gmra.mxu0 %v8957_v14  ;;  %3115 = vmatmul.f32.gmra.mxu1 %v8866_v33  ;;  %12280 = vst [vmem:[#allocation69_spill] sm:$0xff] %v9012_v55  ;;  %v9024_v49 = vand.u32 4294901760, %v2740_v35  ;;  %v2940_v9 = vsub.f32 %v8996_v52, %v9012_v55 }
 0x285   : > { %12275 = vst [vmem:[#allocation64_spill] sm:$0xff] %v8978_v4  ;;  %v9005_v25 = vsel %vm2183_vm7, %v6610_v7, %v2180_v62  ;;  %v9009_v41 = vand.u32 4294901760, %v2932_v2  ;;  %v9022_v7 = vsub.f32 %v2739_v54, %v9003_v29  ;;  %v9031_v57 = vand.u32 4294901760, %v9015_v40  ;;  %v12285_v62 = vld [vmem:[#allocation28_spill] sm:$0xff] }
 0x286   : > { %3238 = vmatmul.f32.gmra.mxu2 %v8916_v10  ;;  %3357 = vmatmul.f32.gmra.mxu3 %v8932_v17  ;;  %12281 = vst [vmem:[#allocation70_spill] sm:$0xff] %v9015_v40  ;;  %v2216_v53 = vmul.f32 %v9005_v25, %v2162_v45  ;;  %v2741_v45 = vld [vmem:[%s11772_s6 + $0x60] sm:$0xff]  ;;  %v9043_v37 = vsub.f32 %v2740_v35, %v9024_v49  ;;  %v9047_v17 = vand.u32 4294901760, %v2940_v9 }
 0x287   : > { %12279 = vst [vmem:[#allocation68_spill] sm:$0xff] %v9009_v41  ;;  %v9037_v54 = vand.u32 4294901760, %v9022_v7  ;;  %v2160_v35 = vsub.f32 %v8769_v15, %v8864_v26  ;;  %v2156_v10 = vsub.f32 %v8745_v39, %v8864_v26 }
 0x288   : > { %12282 = vst [vmem:[#allocation71_spill] sm:$0xff] %v9022_v7  ;;  %v2328_v2 = vmul.f32 %v12285_v62, %v2216_v53  ;;  %v2948_v53 = vsub.f32 %v9015_v40, %v9031_v57  ;;  %v9064_v9 = vand.u32 4294901760, %v9043_v37 }
 0x289   : > { %12283 = vst [vmem:[#allocation72_spill] sm:$0xff] %v9024_v49 }
 0x28a   : > { %12284 = vst [vmem:[#allocation73_spill] sm:$0xff] %v9031_v57  ;;  %v9074_v15 = vand.u32 4294901760, %v2948_v53  ;;  %v12296_v53 = vld [vmem:[#allocation38_spill] sm:$0xff]  ;;  %v2964_v0 = vsub.f32 %v9043_v37, %v9064_v9 }
 0x28b   : > { %12286 = vst [vmem:[#allocation28_spill] sm:$0xff] %v9037_v54 }
 0x28c   : > { %2926 = vmatmul.f32.gmra.mxu0 %v8978_v4  ;;  %3119 = vmatmul.f32.gmra.mxu1 %v8902_v6  ;;  %12287 = vst [vmem:[#allocation74_spill] sm:$0xff] %v9043_v37  ;;  %v12303_v4 = vld [vmem:[#allocation17_spill] sm:$0xff] }
 0x28d   : > { %12289 = vst [vmem:[#allocation76_spill] sm:$0xff] %v9047_v17 }
 0x28e   : > { %3243 = vmatmul.f32.gmra.mxu2 %v8948_v1  ;;  %3363 = vmatmul.f32.gmra.mxu3 %v8960_v31  ;;  %v9045_v31 = vand.u32 4294901760, %v2741_v45  ;;  %v2956_v1 = vsub.f32 %v9022_v7, %v9037_v54  ;;  %12293 = vst [vmem:[#allocation78_spill] sm:$0xff] %v9074_v15 }
 0x290   : > { %12288 = vst [vmem:[#allocation75_spill] sm:$0xff] %v9045_v31  ;;  %v9052_v62 = vsub.f32 %v2741_v45, %v9045_v31  ;;  %v2154_v45 = vsub.f32 %v8707_v60, %v8864_v26  ;;  %v9093_v12 = vand.u32 4294901760, %v2956_v1  ;;  %v12301_v1 = vld [vmem:[#allocation30_spill] sm:$0xff] }
 0x292   : > { %12290 = vst [vmem:[#allocation77_spill] sm:$0xff] %v9052_v62  ;;  %v9083_v60 = vand.u32 4294901760, %v9052_v62  ;;  %v2208_v24 = vmul.f32 %v9005_v25, %v2154_v45 }
 0x293   : > { %12297 = vst [vmem:[#allocation10_spill] sm:$0xff] %v9093_v12 }
 0x294   : > { %2934 = vmatmul.f32.gmra.mxu0 %v9009_v41  ;;  %3123 = vmatmul.f32.gmra.mxu1 %v8934_v44  ;;  %12294 = vst [vmem:[#allocation79_spill] sm:$0xff] %v9083_v60  ;;  %v2972_v27 = vsub.f32 %v9052_v62, %v9083_v60 }
 0x296   : > { %3248 = vmatmul.f32.gmra.mxu2 %v8971_v3  ;;  %3369 = vmatmul.f32.gmra.mxu3 %v8981_v8  ;;  %v12291_v8 = vld [vmem:[#allocation15_spill] sm:$0xff] }
 0x297   : > { %v9055_v3 = vadd.f32 %v12291_v8, %v2328_v2  ;;  %12292 = vst [vmem:[#allocation15_spill] sm:$0xff] %v9064_v9  ;;  %v2152_v8 = vsub.f32 %v8676_v63, %v8864_v26  ;;  %v2214_v2 = vmul.f32 %v9005_v25, %v2160_v35  ;;  %v2742_v35 = vld [vmem:[%s11772_s6 + $0x68] sm:$0xff]  ;;  %v2212_v63 = vmul.f32 %v9005_v25, %v2158_v43 }
 0x298   : > { %v9125_v43 = vand.u32 4294901760, %v2742_v35 }
 0x299   : > { %v2472_v39 = vmul.f32 %v9055_v3, %v9055_v3  ;;  %v2326_v22 = vmul.f32 %v12302_v32, %v2214_v2  ;;  %v2206_v41 = vmul.f32 %v9005_v25, %v2152_v8  ;;  %v12304_v2 = vld [vmem:[#allocation16_spill] sm:$0xff]  ;;  %v9140_v8 = vand.u32 4294901760, %v2972_v27 }
 0x29a   : > { %v2324_v14 = vmul.f32 %v12304_v2, %v2212_v63  ;;  %12306 = vst [vmem:[#allocation38_spill] sm:$0xff] %v9125_v43 }
 0x29b   : > { %v2504_v58 = vmul.f32 %v2472_v39, %v9055_v3  ;;  %v9121_v32 = vadd.f32 %v12303_v4, %v2326_v22  ;;  %v2318_v6 = vmul.f32 %v12308_v18, %v2206_v41 }
 0x29c   : > { %2942 = vmatmul.f32.gmra.mxu0 %v9047_v17  ;;  %3127 = vmatmul.f32.gmra.mxu1 %v8962_v47  ;;  %v2210_v17 = vmul.f32 %v9005_v25, %v2156_v10  ;;  %v12305_v47 = vld [vmem:[#allocation19_spill] sm:$0xff]  ;;  %v12307_v10 = vld [vmem:[#allocation21_spill] sm:$0xff] }
 0x29d   : > { %v2536_v39 = vmul.f32 0.044715, %v2504_v58  ;;  %v2320_v44 = vmul.f32 %v12307_v10, %v2208_v24  ;;  %v9132_v58 = vand.u32 4294901760, %v2964_v0  ;;  %v2470_v4 = vmul.f32 %v9121_v32, %v9121_v32  ;;  %v12312_v24 = vld [vmem:[#allocation25_spill] sm:$0xff] }
 0x29e   : > { %3253 = vmatmul.f32.gmra.mxu2 %v8996_v52  ;;  %3375 = vmatmul.f32.gmra.mxu3 %v9012_v55  ;;  %v12300_v52 = vld [vmem:[#allocation33_spill] sm:$0xff]  ;;  %v2204_v55 = vmul.f32 %v9005_v25, %v2150_v19  ;;  %v2322_v23 = vmul.f32 %v12305_v47, %v2210_v17  ;;  %v12311_v17 = vld [vmem:[#allocation20_spill] sm:$0xff] }
 0x29f   : > { %12310 = vst [vmem:[#allocation37_spill] sm:$0xff] %v9132_v58  ;;  %v2568_v22 = vadd.f32 %v2536_v39, %v9055_v3  ;;  %v9138_v47 = vadd.f32 %v12311_v17, %v2324_v14  ;;  %v2502_v63 = vmul.f32 %v2470_v4, %v9121_v32  ;;  %v12315_v14 = vld [vmem:[#allocation22_spill] sm:$0xff] }
 0x2a0   : > { %v2316_v45 = vmul.f32 %v12309_v61, %v2204_v55  ;;  %v9143_v18 = vadd.f32 %v12312_v24, %v2322_v23  ;;  %v12313_v61 = vld [vmem:[#allocation29_spill] sm:$0xff]  ;;  %v12314_v55 = vld [vmem:[#allocation31_spill] sm:$0xff]  ;;  %v9160_v23 = vsub.f32 %v2742_v35, %v9125_v43 }
 0x2a1   : > { %v9146_v41 = vadd.f32 %v12313_v61, %v2320_v44  ;;  %v9149_v19 = vadd.f32 %v12314_v55, %v2318_v6  ;;  %v2600_v0 = vmul.f32 0.7978846, %v2568_v22  ;;  %v2468_v27 = vmul.f32 %v9138_v47, %v9138_v47 }
 0x2a2   : > { %v9157_v39 = vadd.f32 %v12315_v14, %v2316_v45  ;;  %12316 = vst [vmem:[#allocation24_spill] sm:$0xff] %v9160_v23  ;;  %v2466_v6 = vmul.f32 %v9143_v18, %v9143_v18  ;;  %v2534_v10 = vmul.f32 0.044715, %v2502_v63  ;;  %v2743_v45 = vld [vmem:[%s11772_s6 + $0x70] sm:$0xff] }
 0x2a3   : > { %v2464_v44 = vmul.f32 %v9146_v41, %v9146_v41  ;;  %v2462_v2 = vmul.f32 %v9149_v19, %v9149_v19  ;;  %6611 = vtanh.f32 %v2600_v0  ;;  %v2500_v22 = vmul.f32 %v2468_v27, %v9138_v47 }
 0x2a4   : > { %2950 = vmatmul.f32.gmra.mxu0 %v9074_v15  ;;  %3131 = vmatmul.f32.gmra.mxu1 %v8983_v11  ;;  %v2460_v35 = vmul.f32 %v9157_v39, %v9157_v39  ;;  %v2498_v4 = vmul.f32 %v2466_v6, %v9143_v18  ;;  %v9177_v61 = vand.u32 4294901760, %v2743_v45  ;;  %v2566_v55 = vadd.f32 %v2534_v10, %v9121_v32 }
 0x2a5   : > { %v2496_v17 = vmul.f32 %v2464_v44, %v9146_v41  ;;  %v2494_v24 = vmul.f32 %v2462_v2, %v9149_v19  ;;  %v2532_v0 = vmul.f32 0.044715, %v2500_v22  ;;  %v12318_v27 = vsub.f32 %v8600_v42, %v8864_v26  ;;  %v12320_v22 = vld [vmem:[#allocation34_spill] sm:$0xff] }
 0x2a6   : > { %3258 = vmatmul.f32.gmra.mxu2 %v9015_v40  ;;  %3381 = vmatmul.f32.gmra.mxu3 %v9031_v57  ;;  %12317 = vst [vmem:[#allocation33_spill] sm:$0xff] %v9177_v61  ;;  %v2492_v63 = vmul.f32 %v2460_v35, %v9157_v39  ;;  %v2530_v57 = vmul.f32 0.044715, %v2498_v4  ;;  %v9186_v6 = vsub.f32 %v2743_v45, %v9177_v61  ;;  %v2598_v44 = vmul.f32 0.7978846, %v2566_v55 }
 0x2a7   : > { %v2202_v14 = vmul.f32 %v9005_v25, %v12318_v27  ;;  %v2528_v40 = vmul.f32 0.044715, %v2496_v17  ;;  %v2526_v15 = vmul.f32 0.044715, %v2494_v24  ;;  %v2564_v2 = vadd.f32 %v2532_v0, %v9138_v47 }
 0x2a8   : > { %12319 = vst [vmem:[#allocation30_spill] sm:$0xff] %v9186_v6  ;;  %v2524_v10 = vmul.f32 0.044715, %v2492_v63  ;;  %v9193_v42 = vand.u32 4294901760, %v9160_v23  ;;  %v2562_v4 = vadd.f32 %v2530_v57, %v9143_v18  ;;  %6613 = vtanh.f32 %v2598_v44  ;;  %v12322_v63 = vld [vmem:[#allocation36_spill] sm:$0xff] }
 0x2a9   : > { %v2314_v35 = vmul.f32 %v12320_v22, %v2202_v14  ;;  %v2560_v17 = vadd.f32 %v2528_v40, %v9146_v41  ;;  %v2558_v45 = vadd.f32 %v2526_v15, %v9149_v19  ;;  %v6612_v24 = vpop.eup %6611  ;;  %v2596_v55 = vmul.f32 0.7978846, %v2564_v2 }
 0x2aa   : > { %12321 = vst [vmem:[#allocation13_spill] sm:$0xff] %v9193_v42  ;;  %v2556_v0 = vadd.f32 %v2524_v10, %v9157_v39  ;;  %v2664_v14 = vadd.f32 1.0, %v6612_v24  ;;  %v2594_v22 = vmul.f32 0.7978846, %v2562_v4  ;;  %v9205_v57 = vand.u32 4294901760, %v9186_v6 }
 0x2ab   : > { %v9202_v27 = vadd.f32 %v12322_v63, %v2314_v35  ;;  %6615 = vtanh.f32 %v2596_v55  ;;  %v2590_v40 = vmul.f32 0.7978846, %v2558_v45  ;;  %v2980_v44 = vsub.f32 %v9160_v23, %v9193_v42 }
 0x2ac   : > { %2958 = vmatmul.f32.gmra.mxu0 %v9093_v12  ;;  %3135 = vmatmul.f32.gmra.mxu1 %v8998_v48  ;;  %v2592_v12 = vmul.f32 0.7978846, %v2560_v17  ;;  %12323 = vst [vmem:[#allocation17_spill] sm:$0xff] %v9205_v57  ;;  %v2588_v15 = vmul.f32 0.7978846, %v2556_v0  ;;  %6617 = vtanh.f32 %v2594_v22  ;;  %v12324_v2 = vsub.f32 %v8507_v21, %v8864_v26  ;;  %v12327_v0 = vld [vmem:[#allocation35_spill] sm:$0xff] }
 0x2ad   : > { %v12325_v4 = vsub.f32 %v8433_v51, %v8864_v26  ;;  %v12326_v45 = vsub.f32 %v12295_v46, %v8864_v26  ;;  %v12329_v46 = vld [vmem:[#allocation8_spill] sm:$0xff] }
 0x2ae   : > { %3263 = vmatmul.f32.gmra.mxu2 %v9022_v7  ;;  %3387 = vmatmul.f32.gmra.mxu3 %v9037_v54  ;;  %v2458_v7 = vmul.f32 %v9202_v27, %v9202_v27  ;;  %v2696_v54 = vmul.f32 0.5, %v2664_v14  ;;  %v2200_v10 = vmul.f32 %v9005_v25, %v12324_v2  ;;  %6619 = vtanh.f32 %v2592_v12  ;;  %v6614_v63 = vpop.eup %6613 }
 0x2af   : > { %v2198_v17 = vmul.f32 %v9005_v25, %v12325_v4  ;;  %v2196_v24 = vmul.f32 %v9005_v25, %v12326_v45  ;;  %6621 = vtanh.f32 %v2590_v40 }
 0x2b0   : > { %v2490_v35 = vmul.f32 %v2458_v7, %v9202_v27  ;;  %v2728_v55 = vmul.f32 %v2696_v54, %v9055_v3  ;;  %v2312_v12 = vmul.f32 %v12327_v0, %v2200_v10  ;;  %6623 = vtanh.f32 %v2588_v15  ;;  %v12328_v7 = vld [vmem:[#allocation27_spill] sm:$0xff]  ;;  %v12333_v0 = vld [vmem:[#allocation42_spill] sm:$0xff] }
 0x2b1   : > { %v2310_v14 = vmul.f32 %v12328_v7, %v2198_v17  ;;  %v2308_v22 = vmul.f32 %v12329_v46, %v2196_v24  ;;  %v2662_v3 = vadd.f32 1.0, %v6614_v63  ;;  %v12330_v54 = vld [vmem:[#allocation23_spill] sm:$0xff]  ;;  %v12331_v10 = vsub.f32 %v12296_v53, %v8864_v26  ;;  %v6616_v45 = vpop.eup %6615  ;;  %v12332_v17 = vld [vmem:[#allocation12_spill] sm:$0xff] }
 0x2b2   : > { %v2522_v51 = vmul.f32 0.044715, %v2490_v35  ;;  %v9232_v2 = vand.u32 4294901760, %v2728_v55  ;;  %v9235_v40 = vadd.f32 %v12330_v54, %v2312_v12  ;;  %v9245_v15 = vand.u32 4294901760, %v2980_v44  ;;  %v6618_v63 = vpop.eup %6617 }
 0x2b3   : > { %v9241_v4 = vmul.f32 %v9005_v25, %v12331_v10  ;;  %v9249_v24 = vadd.f32 %v12332_v17, %v2310_v14  ;;  %v9252_v12 = vadd.f32 %v12333_v0, %v2308_v22  ;;  %v2694_v53 = vmul.f32 0.5, %v2662_v3 }
 0x2b4   : > { %2966 = vmatmul.f32.gmra.mxu0 %v9132_v58  ;;  %3139 = vmatmul.f32.gmra.mxu1 %v9003_v29  ;;  %v2554_v35 = vadd.f32 %v2522_v51, %v9202_v27  ;;  %v9257_v7 = vsub.f32 %v2728_v55, %v9232_v2  ;;  %v2660_v46 = vadd.f32 1.0, %v6616_v45  ;;  %v2456_v44 = vmul.f32 %v9235_v40, %v9235_v40  ;;  %v6620_v51 = vpop.eup %6619 }
 0x2b5   : > { %3648 = vmatpush.msra.mxu2 %v9232_v2  ;;  %4099 = vmatpush.msrb.mxu1 %v9232_v2  ;;  %v2658_v54 = vadd.f32 1.0, %v6618_v63  ;;  %v2454_v22 = vmul.f32 %v9249_v24, %v9249_v24  ;;  %v9265_v10 = vmul.f32 %v9252_v12, %v9252_v12  ;;  %v6622_v17 = vpop.eup %6621  ;;  %v2726_v3 = vmul.f32 %v2694_v53, %v9121_v32 }
 0x2b6   : > { %3268 = vmatmul.f32.gmra.mxu2 %v9043_v37  ;;  %3393 = vmatmul.f32.gmra.mxu3 %v9064_v9  ;;  %v2586_v14 = vmul.f32 0.7978846, %v2554_v35  ;;  %v2692_v55 = vmul.f32 0.5, %v2660_v46  ;;  %v2656_v45 = vadd.f32 1.0, %v6620_v51  ;;  %v11926_v0 = vand.u32 4294901760, %v9257_v7  ;;  %v6624_v21 = vpop.eup %6623 }
 0x2b7   : > { %3971 = vmatpush.msrb.mxu0 %v9257_v7  ;;  %v2690_v9 = vmul.f32 0.5, %v2658_v54  ;;  %v2654_v63 = vadd.f32 1.0, %v6622_v17  ;;  %v2488_v35 = vmul.f32 %v2456_v44, %v9235_v40  ;;  %v9271_v37 = vand.u32 4294901760, %v2726_v3 }
 0x2b8   : > { %6625 = vtanh.f32 %v2586_v14  ;;  %v2724_v58 = vmul.f32 %v2692_v55, %v9138_v47  ;;  %v2688_v29 = vmul.f32 0.5, %v2656_v45  ;;  %v3811_v32 = vsub.f32 %v9257_v7, %v11926_v0 }
 0x2b9   : > { %v2722_v53 = vmul.f32 %v2690_v9, %v9143_v18  ;;  %v2686_v46 = vmul.f32 0.5, %v2654_v63  ;;  %v2652_v51 = vadd.f32 1.0, %v6624_v21  ;;  %v2520_v54 = vmul.f32 0.044715, %v2488_v35  ;;  %3650 = vmatpush.msra.mxu2 %v9271_v37  ;;  %4101 = vmatpush.msrb.mxu1 %v9271_v37 }
 0x2ba   : > { %v9282_v44 = vand.u32 4294901760, %v2724_v58  ;;  %v9285_v47 = vsub.f32 %v2726_v3, %v9271_v37  ;;  %v2720_v14 = vmul.f32 %v2688_v29, %v9146_v41  ;;  %v3812_v17 = vand.u32 4294901760, %v3811_v32 }
 0x2bb   : > { %v9290_v9 = vand.u32 4294901760, %v2722_v53  ;;  %v2718_v18 = vmul.f32 %v2686_v46, %v9149_v19  ;;  %v2684_v21 = vmul.f32 0.5, %v2652_v51  ;;  %v2552_v55 = vadd.f32 %v2520_v54, %v9235_v40 }
 0x2bc   : > { %2974 = vmatmul.f32.gmra.mxu0 %v9140_v8  ;;  %3143 = vmatmul.f32.gmra.mxu1 %v9024_v49  ;;  %v9297_v3 = vsub.f32 %v2724_v58, %v9282_v44  ;;  %v9299_v29 = vand.u32 4294901760, %v2720_v14  ;;  %v11925_v41 = vand.u32 4294901760, %v9285_v47  ;;  %v2486_v45 = vmul.f32 %v2454_v22, %v9249_v24 }
 0x2bd   : > { %3652 = vmatpush.msra.mxu2 %v9282_v44  ;;  %3974 = vmatpush.msrb.mxu0 %v9285_v47  ;;  %v9305_v19 = vsub.f32 %v2722_v53, %v9290_v9  ;;  %v9307_v35 = vand.u32 4294901760, %v2718_v18  ;;  %v2716_v32 = vmul.f32 %v2684_v21, %v9157_v39  ;;  %v2584_v46 = vmul.f32 0.7978846, %v2552_v55  ;;  %v2744_v21 = vld [vmem:[%s11772_s6 + $0x78] sm:$0xff] }
 0x2be   : > { %3273 = vmatmul.f32.gmra.mxu2 %v9052_v62  ;;  %3399 = vmatmul.f32.gmra.mxu3 %v9083_v60  ;;  %v6626_v63 = vpop.eup %6625  ;;  %v3817_v58 = vsub.f32 %v9285_v47, %v11925_v41  ;;  %v9316_v22 = vsub.f32 %v2720_v14, %v9299_v29  ;;  %v11927_v51 = vand.u32 4294901760, %v9297_v3  ;;  %v2518_v0 = vmul.f32 0.044715, %v2486_v45 }
 0x2bf   : > { %4103 = vmatpush.msrb.mxu1 %v9282_v44  ;;  %3813 = vmatpush.msra.mxu3 %v3812_v17  ;;  %v2650_v53 = vadd.f32 1.0, %v6626_v63  ;;  %v9320_v54 = vand.u32 4294901760, %v2716_v32  ;;  %v9323_v39 = vsub.f32 %v2718_v18, %v9307_v35  ;;  %v11929_v17 = vand.u32 4294901760, %v9305_v19 }
 0x2c0   : > { %3654 = vmatpush.msra.mxu2 %v9290_v9  ;;  %3977 = vmatpush.msrb.mxu0 %v9297_v3  ;;  %6627 = vtanh.f32 %v2584_v46  ;;  %v3823_v14 = vsub.f32 %v9297_v3, %v11927_v51  ;;  %v11930_v63 = vand.u32 4294901760, %v9316_v22  ;;  %v2306_v18 = vmul.f32 %v8314_v50, %v9241_v4 }
 0x2c1   : > { %4105 = vmatpush.msrb.mxu1 %v9290_v9  ;;  %v2682_v55 = vmul.f32 0.5, %v2650_v53  ;;  %v3829_v46 = vsub.f32 %v9305_v19, %v11929_v17  ;;  %v9343_v41 = vsub.f32 %v2716_v32, %v9320_v54  ;;  %v3818_v53 = vand.u32 4294901760, %v3817_v58 }
 0x2c2   : > { %3656 = vmatpush.msra.mxu2 %v9299_v29  ;;  %3980 = vmatpush.msrb.mxu0 %v9305_v19  ;;  %v3835_v4 = vsub.f32 %v9316_v22, %v11930_v63  ;;  %v9352_v60 = vand.u32 4294901760, %v2744_v21  ;;  %v12335_v45 = vsub.f32 %v9186_v6, %v9205_v57  ;;  %v3824_v17 = vand.u32 4294901760, %v3823_v14 }
 0x2c3   : > { %4107 = vmatpush.msrb.mxu1 %v9299_v29  ;;  %v2714_v50 = vmul.f32 %v2682_v55, %v9202_v27  ;;  %v2550_v58 = vadd.f32 %v2518_v0, %v9249_v24  ;;  %v2484_v27 = vmul.f32 %v9265_v10, %v9252_v12  ;;  %3819 = vmatpush.msra.mxu3 %v3818_v53  ;;  %v3830_v63 = vand.u32 4294901760, %v3829_v46 }
 0x2c4   : > { %2982 = vmatmul.f32.gmra.mxu0 %v9245_v15  ;;  %3147 = vmatmul.f32.gmra.mxu1 %v9045_v31  ;;  %12334 = vst [vmem:[#allocation16_spill] sm:$0xff] %v9352_v60  ;;  %v9359_v32 = vand.u32 4294901760, %v12335_v45  ;;  %v9368_v51 = vsub.f32 %v2744_v21, %v9352_v60  ;;  %v12338_v14 = vand.u32 4294901760, %v9323_v39  ;;  %v9377_v45 = vadd.f32 %v8391_v56, %v2306_v18 }
 0x2c5   : > { %3658 = vmatpush.msra.mxu2 %v9307_v35  ;;  %3983 = vmatpush.msrb.mxu0 %v9316_v22  ;;  %v9365_v55 = vand.u32 4294901760, %v2714_v50  ;;  %v2582_v0 = vmul.f32 0.7978846, %v2550_v58  ;;  %v2516_v53 = vmul.f32 0.044715, %v2484_v27  ;;  %v3836_v46 = vand.u32 4294901760, %v3835_v4 }
 0x2c6   : > { %3278 = vmatmul.f32.gmra.mxu2 %v9160_v23  ;;  %3405 = vmatmul.f32.gmra.mxu3 %v9193_v42  ;;  %12336 = vst [vmem:[#allocation19_spill] sm:$0xff] %v9359_v32  ;;  %v6628_v23 = vpop.eup %6627  ;;  %v3841_v10 = vsub.f32 %v9323_v39, %v12338_v14  ;;  %v9384_v62 = vand.u32 4294901760, %v9368_v51  ;;  %v2450_v56 = vmul.f32 %v9377_v45, %v9377_v45  ;;  %v12341_v4 = vand.u32 4294901760, %v9343_v41 }
 0x2c7   : > { %12337 = vst [vmem:[#allocation21_spill] sm:$0xff] %v9368_v51  ;;  %4109 = vmatpush.msrb.mxu1 %v9307_v35  ;;  %3660 = vmatpush.msra.mxu2 %v9320_v54  ;;  %v2648_v21 = vadd.f32 1.0, %v6628_v23  ;;  %v9381_v42 = vsub.f32 %v2714_v50, %v9365_v55  ;;  %6629 = vtanh.f32 %v2582_v0  ;;  %v2548_v58 = vadd.f32 %v2516_v53, %v9252_v12 }
 0x2c8   : > { %3825 = vmatpush.msra.mxu3 %v3824_v17  ;;  %3986 = vmatpush.msrb.mxu0 %v9323_v39  ;;  %12339 = vst [vmem:[#allocation26_spill] sm:$0xff] %v9384_v62  ;;  %v12340_v23 = vsub.f32 %v12298_v5, %v8864_v26  ;;  %v2996_v50 = vsub.f32 %v9368_v51, %v9384_v62 }
 0x2c9   : > { %4111 = vmatpush.msrb.mxu1 %v9320_v54  ;;  %3662 = vmatpush.msra.mxu2 %v9365_v55  ;;  %v2680_v18 = vmul.f32 0.5, %v2648_v21  ;;  %v3847_v27 = vsub.f32 %v9343_v41, %v12341_v4  ;;  %v11935_v0 = vand.u32 4294901760, %v9381_v42  ;;  %v2580_v5 = vmul.f32 0.7978846, %v2548_v58 }
 0x2ca   : > { %v2192_v17 = vmul.f32 %v9005_v25, %v12340_v23  ;;  %3831 = vmatpush.msra.mxu3 %v3830_v63  ;;  %3989 = vmatpush.msrb.mxu0 %v9343_v41  ;;  %v2482_v14 = vmul.f32 %v2450_v56, %v9377_v45  ;;  %v12342_v53 = vsub.f32 %v12299_v30, %v8864_v26  ;;  %v3842_v4 = vand.u32 4294901760, %v3841_v10 }
 0x2cb   : > { %4113 = vmatpush.msrb.mxu1 %v9365_v55  ;;  %v2712_v23 = vmul.f32 %v2680_v18, %v9235_v40  ;;  %v12343_v58 = vsub.f32 %v12300_v52, %v8864_v26  ;;  %6631 = vtanh.f32 %v2580_v5  ;;  %v12344_v40 = vld [vmem:[#allocation46_spill] sm:$0xff]  ;;  %v12345_v18 = vld [vmem:[#allocation9_spill] sm:$0xff]  ;;  %v9433_v5 = vand.u32 4294901760, %v2996_v50 }
 0x2cc   : > { %2990 = vmatmul.f32.gmra.mxu0 %v9359_v32  ;;  %3151 = vmatmul.f32.gmra.mxu1 %v9125_v43  ;;  %v2304_v63 = vmul.f32 %v8447_v16, %v2192_v17  ;;  %v2190_v21 = vmul.f32 %v9005_v25, %v12342_v53  ;;  %v3853_v32 = vsub.f32 %v9381_v42, %v11935_v0  ;;  %v2514_v30 = vmul.f32 0.044715, %v2482_v14  ;;  %v12349_v50 = vld [vmem:[#allocation49_spill] sm:$0xff] }
 0x2cd   : > { %3837 = vmatpush.msra.mxu3 %v3836_v46  ;;  %v2188_v16 = vmul.f32 %v9005_v25, %v12343_v58  ;;  %3992 = vmatpush.msrb.mxu0 %v9381_v42  ;;  %v9425_v46 = vand.u32 4294901760, %v2712_v23  ;;  %v3848_v17 = vand.u32 4294901760, %v3847_v27  ;;  %v12346_v53 = vsub.f32 %v12301_v1, %v8864_v26  ;;  %v6630_v0 = vpop.eup %6629 }
 0x2ce   : > { %3283 = vmatmul.f32.gmra.mxu2 %v9186_v6  ;;  %v9422_v56 = vadd.f32 %v8522_v59, %v2304_v63  ;;  %v2302_v10 = vmul.f32 %v12344_v40, %v2190_v21  ;;  %3411 = vmatmul.f32.gmra.mxu3 %v9205_v57  ;;  %v2546_v59 = vadd.f32 %v2514_v30, %v9377_v45  ;;  %v12347_v63 = vld [vmem:[#allocation47_spill] sm:$0xff]  ;;  %v2646_v27 = vadd.f32 1.0, %v6630_v0 }
 0x2cf   : > { %v2300_v52 = vmul.f32 %v12345_v18, %v2188_v16  ;;  %v2186_v58 = vmul.f32 %v9005_v25, %v12346_v53  ;;  %3843 = vmatpush.msra.mxu3 %v3842_v4  ;;  %3664 = vmatpush.msra.mxu2 %v9425_v46  ;;  %v9444_v26 = vsub.f32 %v2712_v23, %v9425_v46  ;;  %v12348_v25 = vld [vmem:[#allocation48_spill] sm:$0xff]  ;;  %v3854_v30 = vand.u32 4294901760, %v3853_v32 }
 0x2d0   : > { %v2448_v14 = vmul.f32 %v9422_v56, %v9422_v56  ;;  %v9439_v21 = vadd.f32 %v12347_v63, %v2302_v10  ;;  %4115 = vmatpush.msrb.mxu1 %v9425_v46  ;;  %v2578_v16 = vmul.f32 0.7978846, %v2546_v59  ;;  %v2678_v18 = vmul.f32 0.5, %v2646_v27 }
 0x2d1   : > { %v9447_v1 = vadd.f32 %v12348_v25, %v2300_v52  ;;  %v2298_v4 = vmul.f32 %v12349_v50, %v2186_v58  ;;  %3849 = vmatpush.msra.mxu3 %v3848_v17  ;;  %3995 = vmatpush.msrb.mxu0 %v9444_v26  ;;  %v11937_v0 = vand.u32 4294901760, %v9444_v26  ;;  %v12350_v52 = vld [vmem:[#allocation50_spill] sm:$0xff]  ;;  %v6632_v58 = vpop.eup %6631 }
 0x2d2   : > { %v2480_v40 = vmul.f32 %v2448_v14, %v9422_v56  ;;  %v2446_v10 = vmul.f32 %v9439_v21, %v9439_v21  ;;  %6633 = vtanh.f32 %v2578_v16  ;;  %v2710_v59 = vmul.f32 %v2678_v18, %v9249_v24 }
 0x2d3   : > { %v2444_v23 = vmul.f32 %v9447_v1, %v9447_v1  ;;  %v9458_v53 = vadd.f32 %v12350_v52, %v2298_v4  ;;  %v2644_v14 = vadd.f32 1.0, %v6632_v58  ;;  %3855 = vmatpush.msra.mxu3 %v3854_v30  ;;  %v3859_v63 = vsub.f32 %v9444_v26, %v11937_v0 }
 0x2d4   : > { %2998 = vmatmul.f32.gmra.mxu0 %v9433_v5  ;;  %3155 = vmatmul.f32.gmra.mxu1 %v9177_v61  ;;  %v2512_v32 = vmul.f32 0.044715, %v2480_v40  ;;  %v2478_v17 = vmul.f32 %v2446_v10, %v9439_v21  ;;  %v9472_v16 = vand.u32 4294901760, %v2710_v59 }
 0x2d5   : > { %v2476_v27 = vmul.f32 %v2444_v23, %v9447_v1  ;;  %v2442_v4 = vmul.f32 %v9458_v53, %v9458_v53  ;;  %v2676_v40 = vmul.f32 0.5, %v2644_v14  ;;  %v3860_v10 = vand.u32 4294901760, %v3859_v63 }
 0x2d6   : > { %3288 = vmatmul.f32.gmra.mxu2 %v9368_v51  ;;  %v2544_v25 = vadd.f32 %v2512_v32, %v9422_v56  ;;  %v2510_v50 = vmul.f32 0.044715, %v2478_v17  ;;  %3417 = vmatmul.f32.gmra.mxu3 %v9384_v62  ;;  %v9481_v58 = vsub.f32 %v2710_v59, %v9472_v16 }
 0x2d7   : > { %v2508_v24 = vmul.f32 0.044715, %v2476_v27  ;;  %v2474_v23 = vmul.f32 %v2442_v4, %v9458_v53  ;;  %3666 = vmatpush.msra.mxu2 %v9472_v16  ;;  %4117 = vmatpush.msrb.mxu1 %v9472_v16  ;;  %v2708_v52 = vmul.f32 %v2676_v40, %v9252_v12 }
 0x2d8   : > { %v2576_v30 = vmul.f32 0.7978846, %v2544_v25  ;;  %v2542_v18 = vadd.f32 %v2510_v50, %v9439_v21  ;;  %v6634_v14 = vpop.eup %6633  ;;  %3861 = vmatpush.msra.mxu3 %v3860_v10  ;;  %3998 = vmatpush.msrb.mxu0 %v9481_v58  ;;  %v11936_v4 = vand.u32 4294901760, %v9481_v58 }
 0x2d9   : > { %v9483_v32 = vpop.f32.mrf.mxu0  ;;  %v2540_v17 = vadd.f32 %v2508_v24, %v9447_v1  ;;  %v2506_v27 = vmul.f32 0.044715, %v2474_v23  ;;  %v9486_v25 = vand.u32 4294901760, %v2708_v52  ;;  %v2642_v50 = vadd.f32 1.0, %v6634_v14 }
 0x2da   : > { %6635 = vtanh.f32 %v2576_v30  ;;  %v2574_v63 = vmul.f32 0.7978846, %v2542_v18  ;;  %v3865_v30 = vsub.f32 %v9481_v58, %v11936_v4 }
 0x2db   : > { %v2572_v12 = vmul.f32 0.7978846, %v2540_v17  ;;  %v2538_v59 = vadd.f32 %v2506_v27, %v9458_v53  ;;  %3668 = vmatpush.msra.mxu2 %v9486_v25  ;;  %4119 = vmatpush.msrb.mxu1 %v9486_v25  ;;  %v2674_v40 = vmul.f32 0.5, %v2642_v50  ;;  %v9496_v24 = vsub.f32 %v2708_v52, %v9486_v25 }
 0x2dc   : > { %6637 = vtanh.f32 %v2574_v63  ;;  %3159 = vmatmul.f32.gmra.mxu1 %v9352_v60  ;;  %3486 = vmatmul.f32.vlgmr.msra.gmra.mxu0 %v8692_v13  ;;  %v3866_v23 = vand.u32 4294901760, %v3865_v30 }
 0x2dd   : > { %6639 = vtanh.f32 %v2572_v12  ;;  %v2570_v10 = vmul.f32 0.7978846, %v2538_v59  ;;  %v2706_v18 = vmul.f32 %v2674_v40, %v9377_v45  ;;  %4001 = vmatpush.msrb.mxu0 %v9496_v24  ;;  %v11938_v17 = vand.u32 4294901760, %v9496_v24 }
 0x2de   : > { %3867 = vmatpush.msra.mxu3 %v3866_v23 }
 0x2df   : > { %6641 = vtanh.f32 %v2570_v10  ;;  %v9504_v63 = vpop.f32.mrf.mxu3  ;;  %v9506_v27 = vand.u32 4294901760, %v2706_v18  ;;  %v3871_v50 = vsub.f32 %v9496_v24, %v11938_v17 }
 0x2e0   : > { %v6636_v14 = vpop.eup %6635  ;;  %12351 = vst [vmem:[#allocation32_spill] sm:$0xff] %v9504_v63 }
 0x2e1   : > { %v2640_v52 = vadd.f32 1.0, %v6636_v14  ;;  %v9511_v12 = vpop.f32.mrf.mxu0  ;;  %v9513_v45 = vpop.f32.mrf.mxu1  ;;  %3670 = vmatpush.msra.mxu2 %v9506_v27  ;;  %4121 = vmatpush.msrb.mxu1 %v9506_v27  ;;  %v9520_v14 = vsub.f32 %v2706_v18, %v9506_v27  ;;  %v3872_v4 = vand.u32 4294901760, %v3871_v50 }
 0x2e2   : > { %v6638_v59 = vpop.eup %6637  ;;  %v9515_v40 = vpop.f32.mrf.mxu2 }
 0x2e3   : > { %12352 = vst [vmem:[#allocation20_spill] sm:$0xff] %v9515_v40  ;;  %v6640_v30 = vpop.eup %6639  ;;  %v2672_v10 = vmul.f32 0.5, %v2640_v52  ;;  %v2638_v23 = vadd.f32 1.0, %v6638_v59  ;;  %4004 = vmatpush.msrb.mxu0 %v9520_v14  ;;  %3873 = vmatpush.msra.mxu3 %v3872_v4  ;;  %v11943_v57 = vand.u32 4294901760, %v9520_v14 }
 0x2e4   : > { %v2636_v0 = vadd.f32 1.0, %v6640_v30  ;;  %3490 = vmatmul.f32.gmra.mxu0 %v8759_v38  ;;  %3583 = vmatmul.f32.vlgmr.msra.gmra.mxu1 %v8692_v13 }
 0x2e5   : > { %v2704_v17 = vmul.f32 %v2672_v10, %v9422_v56  ;;  %v2670_v62 = vmul.f32 0.5, %v2638_v23  ;;  %v6642_v51 = vpop.eup %6641  ;;  %v3877_v59 = vsub.f32 %v9520_v14, %v11943_v57 }
 0x2e6   : > { %v2668_v52 = vmul.f32 0.5, %v2636_v0  ;;  %v2634_v50 = vadd.f32 1.0, %v6642_v51 }
 0x2e7   : > { %v9527_v6 = vand.u32 4294901760, %v2704_v17  ;;  %v2702_v18 = vmul.f32 %v2670_v62, %v9439_v21  ;;  %v3878_v21 = vand.u32 4294901760, %v3877_v59 }
 0x2e8   : > { %v2700_v30 = vmul.f32 %v2668_v52, %v9447_v1  ;;  %v2666_v0 = vmul.f32 0.5, %v2634_v50 }
 0x2e9   : > { %3672 = vmatpush.msra.mxu2 %v9527_v6  ;;  %4123 = vmatpush.msrb.mxu1 %v9527_v6  ;;  %v9536_v56 = vand.u32 4294901760, %v2702_v18  ;;  %v9539_v4 = vsub.f32 %v2704_v17, %v9527_v6  ;;  %v9541_v10 = vpop.f32.mrf.mxu0  ;;  %v9543_v62 = vpop.f32.mrf.mxu1 }
 0x2ea   : > { %v9545_v51 = vand.u32 4294901760, %v2700_v30  ;;  %v9547_v23 = vpop.f32.mrf.mxu2  ;;  %v9549_v1 = vpop.f32.mrf.mxu3  ;;  %v2698_v17 = vmul.f32 %v2666_v0, %v9458_v53  ;;  %3879 = vmatpush.msra.mxu3 %v3878_v21 }
 0x2eb   : > { %12353 = vst [vmem:[#allocation25_spill] sm:$0xff] %v9547_v23  ;;  %3674 = vmatpush.msra.mxu2 %v9536_v56  ;;  %4007 = vmatpush.msrb.mxu0 %v9539_v4  ;;  %v9554_v52 = vsub.f32 %v2702_v18, %v9536_v56  ;;  %v11944_v50 = vand.u32 4294901760, %v9539_v4 }
 0x2ec   : > { %12354 = vst [vmem:[#allocation29_spill] sm:$0xff] %v9549_v1  ;;  %4125 = vmatpush.msrb.mxu1 %v9536_v56  ;;  %v9560_v59 = vsub.f32 %v2700_v30, %v9545_v51  ;;  %v9564_v57 = vand.u32 4294901760, %v2698_v17  ;;  %3494 = vmatmul.f32.gmra.mxu0 %v8791_v20  ;;  %v12355_v1 = vand.u32 4294901760, %v9257_v7 }
 0x2ed   : > { %3676 = vmatpush.msra.mxu2 %v9545_v51  ;;  %4010 = vmatpush.msrb.mxu0 %v9554_v52  ;;  %v3883_v18 = vsub.f32 %v9539_v4, %v11944_v50  ;;  %v11945_v53 = vand.u32 4294901760, %v9554_v52 }
 0x2ee   : > { %4127 = vmatpush.msrb.mxu1 %v9545_v51  ;;  %v11946_v0 = vand.u32 4294901760, %v9560_v59  ;;  %v9576_v21 = vsub.f32 %v2698_v17, %v9564_v57 }
 0x2ef   : > { %3678 = vmatpush.msra.mxu2 %v9564_v57  ;;  %4013 = vmatpush.msrb.mxu0 %v9560_v59  ;;  %v3884_v30 = vand.u32 4294901760, %v3883_v18  ;;  %v3889_v50 = vsub.f32 %v9554_v52, %v11945_v53 }
 0x2f0   : > { %4129 = vmatpush.msrb.mxu1 %v9564_v57  ;;  %3684 = vmatmul.f32.vlgmr.msra.gmra.mxu2 %v8789_v28  ;;  %v3895_v63 = vsub.f32 %v9560_v59, %v11946_v0  ;;  %v3900_v17 = vand.u32 4294901760, %v9576_v21  ;;  %v12357_v0 = vand.u32 4294901760, %v9285_v47  ;;  %v12360_v47 = vand.u32 4294901760, %v9316_v22  ;;  %v12364_v22 = vld [vmem:[#allocation7_spill] sm:$0xff] }
 0x2f1   : > { %4230 = vmatpush.msrb.mxu2 %v12355_v1  ;;  %3885 = vmatpush.msra.mxu3 %v3884_v30  ;;  %v3890_v18 = vand.u32 4294901760, %v3889_v50  ;;  %v9589_v40 = vpop.f32.mrf.mxu0  ;;  %v9591_v23 = vpop.f32.mrf.mxu1  ;;  %v12358_v50 = vand.u32 4294901760, %v9297_v3 }
 0x2f2   : > { %12356 = vst [vmem:[#allocation31_spill] sm:$0xff] %v9591_v23  ;;  %4016 = vmatpush.msrb.mxu0 %v9576_v21  ;;  %3587 = vmatmul.f32.gmra.mxu1 %v8759_v38  ;;  %v9595_v28 = vpop.f32.mrf.mxu2  ;;  %v9597_v53 = vpop.f32.mrf.mxu3  ;;  %v3896_v7 = vand.u32 4294901760, %v3895_v63  ;;  %v3901_v1 = vsub.f32 %v9576_v21, %v3900_v17  ;;  %v12359_v23 = vand.u32 4294901760, %v9305_v19  ;;  %v12369_v21 = vand.u32 4294901760, %v9520_v14 }
 0x2f3   : > { %4234 = vmatpush.msrb.mxu2 %v12357_v0  ;;  %3891 = vmatpush.msra.mxu3 %v3890_v18  ;;  %v12370_v18 = vld [vmem:[#allocation44_spill] sm:$0xff]  ;;  %v12372_v14 = vand.u32 4294901760, %v9554_v52 }
 0x2f4   : > { %v3902_v30 = vand.u32 4294901760, %v3901_v1  ;;  %3498 = vmatmul.f32.gmra.mxu0 %v8834_v36 }
 0x2f5   : > { %4238 = vmatpush.msrb.mxu2 %v12358_v50  ;;  %3897 = vmatpush.msra.mxu3 %v3896_v7  ;;  %v12375_v7 = vld [vmem:[#allocation56_spill] sm:$0xff] }
 0x2f7   : > { %4242 = vmatpush.msrb.mxu2 %v12359_v23  ;;  %3903 = vmatpush.msra.mxu3 %v3902_v30  ;;  %v12361_v23 = vand.u32 4294901760, %v9323_v39  ;;  %v12365_v39 = vand.u32 4294901760, %v9444_v26  ;;  %v12367_v26 = vand.u32 4294901760, %v9496_v24 }
 0x2f8   : > { %3692 = vmatmul.f32.gmra.mxu2 %v8832_v34  ;;  %3905 = vmatmul.f32.vlgmr.msra.gmra.mxu3 %v8692_v13  ;;  %v12362_v34 = vand.u32 4294901760, %v9343_v41 }
 0x2f9   : > { %4246 = vmatpush.msrb.mxu2 %v12360_v47  ;;  %4357 = vmatpush.msrb.mxu3 %v9232_v2  ;;  %v9612_v63 = vpop.f32.mrf.mxu0  ;;  %v9614_v3 = vpop.f32.mrf.mxu1  ;;  %v12363_v2 = vand.u32 4294901760, %v9381_v42  ;;  %v12366_v42 = vand.u32 4294901760, %v9481_v58 }
 0x2fa   : > { %3591 = vmatmul.f32.gmra.mxu1 %v8791_v20  ;;  %v9617_v0 = vpop.f32.mrf.mxu2  ;;  %v9619_v19 = vpop.f32.mrf.mxu3 }
 0x2fb   : > { %4250 = vmatpush.msrb.mxu2 %v12361_v23  ;;  %4359 = vmatpush.msrb.mxu3 %v9271_v37  ;;  %v12380_v23 = vld [vmem:[#allocation68_spill] sm:$0xff] }
 0x2fc   : > { %3502 = vmatmul.f32.gmra.mxu0 %v8866_v33 }
 0x2fd   : > { %4254 = vmatpush.msrb.mxu2 %v12362_v34  ;;  %4361 = vmatpush.msrb.mxu3 %v9282_v44 }
 0x2ff   : > { %4258 = vmatpush.msrb.mxu2 %v12363_v2  ;;  %4363 = vmatpush.msrb.mxu3 %v9290_v9 }
 0x300   : > { %3700 = vmatmul.f32.gmra.mxu2 %v12364_v22  ;;  %3909 = vmatmul.f32.gmra.mxu3 %v8759_v38 }
 0x301   : > { %4262 = vmatpush.msrb.mxu2 %v12365_v39  ;;  %4365 = vmatpush.msrb.mxu3 %v9299_v29  ;;  %v9636_v37 = vpop.f32.mrf.mxu0  ;;  %v9638_v41 = vpop.f32.mrf.mxu1  ;;  %v12368_v29 = vld [vmem:[#allocation55_spill] sm:$0xff] }
 0x302   : > { %3595 = vmatmul.f32.gmra.mxu1 %v8834_v36  ;;  %v9641_v44 = vpop.f32.mrf.mxu2  ;;  %v9646_v9 = vpop.f32.mrf.mxu3 }
 0x303   : > { %4266 = vmatpush.msrb.mxu2 %v12366_v42  ;;  %4367 = vmatpush.msrb.mxu3 %v9307_v35  ;;  %v12371_v35 = vand.u32 4294901760, %v9539_v4  ;;  %v12374_v4 = vld [vmem:[#allocation58_spill] sm:$0xff]  ;;  %v12384_v42 = vld [vmem:[#allocation67_spill] sm:$0xff] }
 0x304   : > { %3506 = vmatmul.f32.gmra.mxu0 %v12368_v29 }
 0x305   : > { %4270 = vmatpush.msrb.mxu2 %v12367_v26  ;;  %4369 = vmatpush.msrb.mxu3 %v9320_v54  ;;  %v12385_v26 = vld [vmem:[#allocation76_spill] sm:$0xff] }
 0x307   : > { %4274 = vmatpush.msrb.mxu2 %v12369_v21  ;;  %4371 = vmatpush.msrb.mxu3 %v9365_v55  ;;  %v12373_v55 = vand.u32 4294901760, %v9560_v59  ;;  %v12376_v59 = vld [vmem:[#allocation62_spill] sm:$0xff] }
 0x308   : > { %3708 = vmatmul.f32.gmra.mxu2 %v12370_v18  ;;  %3913 = vmatmul.f32.gmra.mxu3 %v8791_v20 }
 0x309   : > { %4278 = vmatpush.msrb.mxu2 %v12371_v35  ;;  %4373 = vmatpush.msrb.mxu3 %v9425_v46  ;;  %v9660_v58 = vpop.f32.mrf.mxu0  ;;  %v9662_v24 = vpop.f32.mrf.mxu1 }
 0x30a   : > { %3599 = vmatmul.f32.gmra.mxu1 %v8866_v33  ;;  %v9665_v54 = vpop.f32.mrf.mxu2  ;;  %v9674_v46 = vpop.f32.mrf.mxu3 }
 0x30b   : > { %4282 = vmatpush.msrb.mxu2 %v12372_v14  ;;  %4375 = vmatpush.msrb.mxu3 %v9472_v16 }
 0x30c   : > { %3510 = vmatmul.f32.gmra.mxu0 %v12374_v4 }
 0x30d   : > { %4286 = vmatpush.msrb.mxu2 %v12373_v55  ;;  %4377 = vmatpush.msrb.mxu3 %v9486_v25  ;;  %v12390_v55 = vld [vmem:[#allocation78_spill] sm:$0xff] }
 0x30f   : > { %4290 = vmatpush.msrb.mxu2 %v3900_v17  ;;  %4379 = vmatpush.msrb.mxu3 %v9506_v27  ;;  %v12377_v27 = vld [vmem:[#allocation60_spill] sm:$0xff] }
 0x310   : > { %3716 = vmatmul.f32.gmra.mxu2 %v12375_v7  ;;  %3917 = vmatmul.f32.gmra.mxu3 %v8834_v36 }
 0x311   : > { %4381 = vmatpush.msrb.mxu3 %v9527_v6  ;;  %v9680_v52 = vpop.f32.mrf.mxu0  ;;  %v9682_v16 = vpop.f32.mrf.mxu1 }
 0x312   : > { %3603 = vmatmul.f32.gmra.mxu1 %v12368_v29  ;;  %v9685_v25 = vpop.f32.mrf.mxu2  ;;  %v9693_v6 = vpop.f32.mrf.mxu3 }
 0x313   : > { %4383 = vmatpush.msrb.mxu3 %v9536_v56  ;;  %v12378_v56 = vld [vmem:[#allocation64_spill] sm:$0xff] }
 0x314   : > { %3514 = vmatmul.f32.gmra.mxu0 %v12376_v59 }
 0x315   : > { %4385 = vmatpush.msrb.mxu3 %v9545_v51 }
 0x317   : > { %4387 = vmatpush.msrb.mxu3 %v9564_v57 }
 0x318   : > { %3724 = vmatmul.f32.gmra.mxu2 %v12377_v27  ;;  %3921 = vmatmul.f32.gmra.mxu3 %v8866_v33 }
 0x319   : > { %v9695_v17 = vpop.f32.mrf.mxu0  ;;  %v9697_v1 = vpop.f32.mrf.mxu1 }
 0x31a   : > { %3607 = vmatmul.f32.gmra.mxu1 %v12374_v4  ;;  %v9700_v50 = vpop.f32.mrf.mxu2  ;;  %v9710_v30 = vpop.f32.mrf.mxu3 }
 0x31b   : > { %12379 = vst [vmem:[#allocation22_spill] sm:$0xff] %v9710_v30 }
 0x31c   : > { %3518 = vmatmul.f32.gmra.mxu0 %v8983_v11 }
 0x320   : > { %3732 = vmatmul.f32.gmra.mxu2 %v12378_v56  ;;  %3925 = vmatmul.f32.gmra.mxu3 %v12368_v29  ;;  %v12393_v56 = vld [vmem:[#allocation10_spill] sm:$0xff] }
 0x321   : > { %v9705_v57 = vpop.f32.mrf.mxu0  ;;  %v9707_v51 = vpop.f32.mrf.mxu1 }
 0x322   : > { %3611 = vmatmul.f32.gmra.mxu1 %v12376_v59  ;;  %v9712_v47 = vpop.f32.mrf.mxu2  ;;  %v9722_v22 = vpop.f32.mrf.mxu3 }
 0x323   : > { %12382 = vst [vmem:[#allocation36_spill] sm:$0xff] %v9722_v22  ;;  %v12422_v22 = vld [vmem:[#allocation41_spill] sm:$0xff] }
 0x324   : > { %3522 = vmatmul.f32.gmra.mxu0 %v8998_v48 }
 0x328   : > { %3740 = vmatmul.f32.gmra.mxu2 %v12380_v23  ;;  %3929 = vmatmul.f32.gmra.mxu3 %v12374_v4 }
 0x329   : > { %v9717_v34 = vpop.f32.mrf.mxu0  ;;  %v9719_v2 = vpop.f32.mrf.mxu1 }
 0x32a   : > { %12381 = vst [vmem:[#allocation34_spill] sm:$0xff] %v9717_v34  ;;  %3615 = vmatmul.f32.gmra.mxu1 %v8983_v11  ;;  %v9724_v39 = vpop.f32.mrf.mxu2  ;;  %v9734_v35 = vpop.f32.mrf.mxu3 }
 0x32b   : > { %12383 = vst [vmem:[#allocation35_spill] sm:$0xff] %v9724_v39 }
 0x32c   : > { %3526 = vmatmul.f32.gmra.mxu0 %v12384_v42  ;;  %12388 = vst [vmem:[#allocation23_spill] sm:$0xff] %v9734_v35  ;;  %v12398_v35 = vld [vmem:[#allocation37_spill] sm:$0xff] }
 0x330   : > { %3748 = vmatmul.f32.gmra.mxu2 %v12385_v26  ;;  %3933 = vmatmul.f32.gmra.mxu3 %v12376_v59 }
 0x331   : > { %v9729_v21 = vpop.f32.mrf.mxu0  ;;  %v9731_v18 = vpop.f32.mrf.mxu1 }
 0x332   : > { %12386 = vst [vmem:[#allocation27_spill] sm:$0xff] %v9729_v21  ;;  %3619 = vmatmul.f32.gmra.mxu1 %v8998_v48  ;;  %v9736_v14 = vpop.f32.mrf.mxu2  ;;  %v9749_v23 = vpop.f32.mrf.mxu3 }
 0x333   : > { %12387 = vst [vmem:[#allocation8_spill] sm:$0xff] %v9731_v18 }
 0x334   : > { %12389 = vst [vmem:[#allocation12_spill] sm:$0xff] %v9736_v14  ;;  %3530 = vmatmul.f32.gmra.mxu0 %v9024_v49 }
 0x335   : > { %12394 = vst [vmem:[#allocation9_spill] sm:$0xff] %v9749_v23 }
 0x338   : > { %3756 = vmatmul.f32.gmra.mxu2 %v12390_v55  ;;  %3937 = vmatmul.f32.gmra.mxu3 %v8983_v11 }
 0x339   : > { %v9741_v7 = vpop.f32.mrf.mxu0  ;;  %v9743_v27 = vpop.f32.mrf.mxu1 }
 0x33a   : > { %12391 = vst [vmem:[#allocation42_spill] sm:$0xff] %v9741_v7  ;;  %3623 = vmatmul.f32.gmra.mxu1 %v12384_v42  ;;  %v9751_v26 = vpop.f32.mrf.mxu2  ;;  %v9765_v7 = vpop.f32.mrf.mxu3 }
 0x33b   : > { %12392 = vst [vmem:[#allocation46_spill] sm:$0xff] %v9743_v27 }
 0x33c   : > { %3534 = vmatmul.f32.gmra.mxu0 %v9045_v31  ;;  %12395 = vst [vmem:[#allocation47_spill] sm:$0xff] %v9751_v26 }
 0x33d   : > { %12401 = vst [vmem:[#allocation55_spill] sm:$0xff] %v9765_v7 }
 0x340   : > { %3764 = vmatmul.f32.gmra.mxu2 %v12393_v56  ;;  %3941 = vmatmul.f32.gmra.mxu3 %v8998_v48 }
 0x341   : > { %v9753_v14 = vpop.f32.mrf.mxu0  ;;  %v9755_v55 = vpop.f32.mrf.mxu1 }
 0x342   : > { %12396 = vst [vmem:[#allocation48_spill] sm:$0xff] %v9753_v14  ;;  %3627 = vmatmul.f32.gmra.mxu1 %v9024_v49  ;;  %v9768_v23 = vpop.f32.mrf.mxu2 }
 0x343   : > { %12397 = vst [vmem:[#allocation49_spill] sm:$0xff] %v9755_v55 }
 0x344   : > { %3538 = vmatmul.f32.gmra.mxu0 %v9125_v43  ;;  %12402 = vst [vmem:[#allocation44_spill] sm:$0xff] %v9768_v23 }
 0x348   : > { %3772 = vmatmul.f32.gmra.mxu2 %v12398_v35  ;;  %3945 = vmatmul.f32.gmra.mxu3 %v12384_v42 }
 0x349   : > { %v9761_v27 = vpop.f32.mrf.mxu0  ;;  %v9763_v56 = vpop.f32.mrf.mxu1 }
 0x34a   : > { %12399 = vst [vmem:[#allocation50_spill] sm:$0xff] %v9761_v27  ;;  %3631 = vmatmul.f32.gmra.mxu1 %v9045_v31  ;;  %v9778_v27 = vpop.f32.mrf.mxu3 }
 0x34b   : > { %12400 = vst [vmem:[#allocation7_spill] sm:$0xff] %v9763_v56  ;;  %v9780_v56 = vpop.f32.mrf.mxu2 }
 0x34c   : > { %3542 = vmatmul.f32.gmra.mxu0 %v9177_v61  ;;  %12405 = vst [vmem:[#allocation62_spill] sm:$0xff] %v9778_v27  ;;  %v12411_v27 = vld [vmem:[#allocation19_spill] sm:$0xff] }
 0x34d   : > { %12406 = vst [vmem:[#allocation60_spill] sm:$0xff] %v9780_v56 }
 0x350   : > { %3780 = vmatmul.f32.gmra.mxu2 %v9140_v8  ;;  %3949 = vmatmul.f32.gmra.mxu3 %v9024_v49  ;;  %v12420_v49 = vld [vmem:[#allocation40_spill] sm:$0xff] }
 0x351   : > { %v9773_v26 = vpop.f32.mrf.mxu0  ;;  %v9775_v35 = vpop.f32.mrf.mxu1 }
 0x352   : > { %12403 = vst [vmem:[#allocation58_spill] sm:$0xff] %v9773_v26  ;;  %3635 = vmatmul.f32.gmra.mxu1 %v9125_v43  ;;  %v9790_v26 = vpop.f32.mrf.mxu3 }
 0x353   : > { %12404 = vst [vmem:[#allocation56_spill] sm:$0xff] %v9775_v35  ;;  %v12409_v35 = vld [vmem:[#allocation14_spill] sm:$0xff]  ;;  %v9793_v23 = vpop.f32.mrf.mxu2 }
 0x354   : > { %3546 = vmatmul.f32.gmra.mxu0 %v9352_v60  ;;  %12408 = vst [vmem:[#allocation68_spill] sm:$0xff] %v9790_v26  ;;  %v12415_v26 = vld [vmem:[#allocation51_spill] sm:$0xff] }
 0x355   : > { %12410 = vst [vmem:[#allocation67_spill] sm:$0xff] %v9793_v23 }
 0x358   : > { %3788 = vmatmul.f32.gmra.mxu2 %v9245_v15  ;;  %3953 = vmatmul.f32.gmra.mxu3 %v9045_v31  ;;  %v12412_v31 = vld [vmem:[#allocation52_spill] sm:$0xff] }
 0x359   : > { %v9785_v7 = vpop.f32.mrf.mxu0  ;;  %v9788_v8 = vpop.f32.mrf.mxu1 }
 0x35a   : > { %3639 = vmatmul.f32.gmra.mxu1 %v9177_v61  ;;  %12407 = vst [vmem:[#allocation64_spill] sm:$0xff] %v9788_v8  ;;  %v9803_v55 = vpop.f32.mrf.mxu3  ;;  %v9813_v8 = vpop.permute.xlu1 %2768 }
 0x35b   : > { %12413 = vst [vmem:[#allocation76_spill] sm:$0xff] %v9803_v55 }
 0x35c   : > { %4019 = vmatmul.f32.vlgmr.msrb.gmra.mxu0 %v12409_v35  ;;  %v9807_v35 = vpop.f32.mrf.mxu2 }
 0x35d   : > { %12414 = vst [vmem:[#allocation78_spill] sm:$0xff] %v9807_v35 }
 0x360   : > { %3796 = vmatmul.f32.gmra.mxu2 %v12411_v27  ;;  %3957 = vmatmul.f32.gmra.mxu3 %v9125_v43  ;;  %v12416_v43 = vld [vmem:[#allocation54_spill] sm:$0xff] }
 0x361   : > { %v9797_v56 = vpop.f32.mrf.mxu0  ;;  %v9800_v15 = vpop.f32.mrf.mxu1 }
 0x362   : > { %3643 = vmatmul.f32.gmra.mxu1 %v9352_v60 }
 0x364   : > { %4024 = vmatmul.f32.gmra.mxu0 %v12412_v31  ;;  %v9819_v31 = vpop.f32.mrf.mxu3 }
 0x365   : > { %12417 = vst [vmem:[#allocation10_spill] sm:$0xff] %v9819_v31 }
 0x368   : > { %3804 = vmatmul.f32.gmra.mxu2 %v9433_v5  ;;  %3961 = vmatmul.f32.gmra.mxu3 %v9177_v61  ;;  %v12418_v5 = vld [vmem:[#allocation53_spill] sm:$0xff] }
 0x369   : > { %v9810_v27 = vpop.f32.mrf.mxu0 }
 0x36a   : > { %4133 = vmatmul.f32.vlgmr.msrb.gmra.mxu1 %v12415_v26  ;;  %v12419_v26 = vld [vmem:[#allocation43_spill] sm:$0xff] }
 0x36c   : > { %4029 = vmatmul.f32.gmra.mxu0 %v12416_v43  ;;  %v9829_v43 = vpop.permute.xlu0 %2763 }
 0x36f   : > { %v9815_v23 = vpop.f32.mrf.mxu1 }
 0x370   : > { %3965 = vmatmul.f32.gmra.mxu3 %v9352_v60  ;;  %4292 = vmatmul.f32.vlgmr.msrb.gmra.mxu2 %v8692_v13  ;;  %v2784_v60 = vpop.permute.xlu1 %2783 }
 0x371   : > { %v9822_v35 = vpop.f32.mrf.mxu0  ;;  %v2912_v14 = vadd.f32 %v9612_v63, %v2784_v60 }
 0x372   : > { %4139 = vmatmul.f32.gmra.mxu1 %v12418_v5 }
 0x373   : > { %v3685_v61 = vpop.f32.mrf.mxu2  ;;  %v3117_v21 = vadd.f32 %v9638_v41, %v2912_v14 }
 0x374   : > { %4034 = vmatmul.f32.gmra.mxu0 %v12419_v26  ;;  %v3686_v31 = vadd.f32 %v3685_v61, %v9829_v43 }
 0x377   : > { %v9825_v55 = vpop.f32.mrf.mxu1 }
 0x378   : > { %4296 = vmatmul.f32.gmra.mxu2 %v8759_v38  ;;  %4389 = vmatmul.f32.vlgmr.msrb.gmra.mxu3 %v8692_v13  ;;  %v3235_v13 = vadd.f32 %v9641_v44, %v3117_v21  ;;  %v2774_v21 = vpop.permute.xlu2 %2773 }
 0x379   : > { %v3503_v39 = vpop.f32.mrf.mxu0 }
 0x37a   : > { %4145 = vmatmul.f32.gmra.mxu1 %v12420_v49  ;;  %v12423_v49 = vld [vmem:[#allocation39_spill] sm:$0xff]  ;;  %v3353_v41 = vadd.f32 %v9646_v9, %v3235_v13 }
 0x37b   : > { %v3693_v5 = vpop.f32.mrf.mxu2  ;;  %v3906_v18 = vpop.f32.mrf.mxu3 }
 0x37c   : > { %v9835_v26 = vadd.f32 %v3906_v18, %v3686_v31  ;;  %4039 = vmatmul.f32.gmra.mxu0 %v12422_v22  ;;  %v3694_v61 = vadd.f32 %v3693_v5, %v9813_v8  ;;  %v3504_v22 = vadd.f32 %v3503_v39, %v3353_v41  ;;  %v12425_v31 = vld [vmem:[#allocation11_spill] sm:$0xff] }
 0x37d   : > { %v12429_v39 = vld [vmem:[#allocation59_spill] sm:$0xff] }
 0x37e   : > { %12421 = vst [vmem:[#allocation37_spill] sm:$0xff] %v9835_v26 }
 0x37f   : > { %v9838_v34 = vpop.f32.mrf.mxu1 }
 0x380   : > { %4300 = vmatmul.f32.gmra.mxu2 %v8791_v20  ;;  %4393 = vmatmul.f32.gmra.mxu3 %v8759_v38 }
 0x381   : > { %v9848_v14 = vpop.f32.mrf.mxu0 }
 0x382   : > { %4151 = vmatmul.f32.gmra.mxu1 %v12423_v49  ;;  %v12427_v49 = vld [vmem:[#allocation45_spill] sm:$0xff] }
 0x383   : > { %v3701_v63 = vpop.f32.mrf.mxu2  ;;  %v3910_v30 = vpop.f32.mrf.mxu3 }
 0x384   : > { %v9846_v18 = vadd.f32 %v3910_v30, %v3694_v61  ;;  %4044 = vmatmul.f32.gmra.mxu0 %v12425_v31  ;;  %v3702_v5 = vadd.f32 %v3701_v63, %v2774_v21 }
 0x386   : > { %12424 = vst [vmem:[#allocation14_spill] sm:$0xff] %v9846_v18 }
 0x387   : > { %v3600_v44 = vpop.f32.mrf.mxu1 }
 0x388   : > { %4304 = vmatmul.f32.gmra.mxu2 %v8834_v36  ;;  %4397 = vmatmul.f32.gmra.mxu3 %v8791_v20  ;;  %v9853_v38 = vadd.f32 %v3600_v44, %v3504_v22  ;;  %v2779_v20 = vpop.permute.xlu0 %2778  ;;  %v12430_v22 = vld [vmem:[#allocation57_spill] sm:$0xff] }
 0x389   : > { %v9858_v13 = vpop.f32.mrf.mxu0 }
 0x38a   : > { %12426 = vst [vmem:[#allocation19_spill] sm:$0xff] %v9853_v38  ;;  %4157 = vmatmul.f32.gmra.mxu1 %v12427_v49  ;;  %v12432_v49 = vld [vmem:[#allocation63_spill] sm:$0xff] }
 0x38b   : > { %v3709_v26 = vpop.f32.mrf.mxu2  ;;  %v3914_v9 = vpop.f32.mrf.mxu3 }
 0x38c   : > { %v9856_v30 = vadd.f32 %v3914_v9, %v3702_v5  ;;  %4049 = vmatmul.f32.gmra.mxu0 %v12429_v39  ;;  %v3710_v41 = vadd.f32 %v3709_v26, %v2779_v20 }
 0x38e   : > { %12428 = vst [vmem:[#allocation52_spill] sm:$0xff] %v9856_v30 }
 0x38f   : > { %v9861_v61 = vpop.f32.mrf.mxu1 }
 0x390   : > { %4308 = vmatmul.f32.gmra.mxu2 %v8866_v33  ;;  %4401 = vmatmul.f32.gmra.mxu3 %v8834_v36  ;;  %v12433_v36 = vld [vmem:[#allocation61_spill] sm:$0xff] }
 0x391   : > { %v9868_v5 = vpop.f32.mrf.mxu0 }
 0x392   : > { %4163 = vmatmul.f32.gmra.mxu1 %v12430_v22 }
 0x393   : > { %v3717_v63 = vpop.f32.mrf.mxu2  ;;  %v3918_v31 = vpop.f32.mrf.mxu3 }
 0x394   : > { %v9866_v44 = vadd.f32 %v3918_v31, %v3710_v41  ;;  %4054 = vmatmul.f32.gmra.mxu0 %v12432_v49  ;;  %v3718_v39 = vadd.f32 %v3717_v63, %v2784_v60  ;;  %v12436_v41 = vld [vmem:[#allocation66_spill] sm:$0xff]  ;;  %v2789_v49 = vpop.permute.xlu2 %2788 }
 0x396   : > { %12431 = vst [vmem:[#allocation51_spill] sm:$0xff] %v9866_v44 }
 0x397   : > { %v9871_v9 = vpop.f32.mrf.mxu1 }
 0x398   : > { %4312 = vmatmul.f32.gmra.mxu2 %v12368_v29  ;;  %4405 = vmatmul.f32.gmra.mxu3 %v8866_v33  ;;  %v12438_v33 = vld [vmem:[#allocation65_spill] sm:$0xff] }
 0x399   : > { %v9878_v18 = vpop.f32.mrf.mxu0 }
 0x39a   : > { %4169 = vmatmul.f32.gmra.mxu1 %v12433_v36  ;;  %12435 = vst [vmem:[#allocation53_spill] sm:$0xff] %v9878_v18 }
 0x39b   : > { %v3725_v26 = vpop.f32.mrf.mxu2  ;;  %v3922_v30 = vpop.f32.mrf.mxu3 }
 0x39c   : > { %v9876_v22 = vadd.f32 %v3922_v30, %v3718_v39  ;;  %4059 = vmatmul.f32.gmra.mxu0 %v12436_v41  ;;  %v3726_v44 = vadd.f32 %v3725_v26, %v2789_v49  ;;  %v12441_v39 = vld [vmem:[#allocation70_spill] sm:$0xff]  ;;  %v2794_v41 = vpop.permute.xlu0 %2793 }
 0x39e   : > { %12434 = vst [vmem:[#allocation54_spill] sm:$0xff] %v9876_v22 }
 0x39f   : > { %v9881_v31 = vpop.f32.mrf.mxu1 }
 0x3a0   : > { %12437 = vst [vmem:[#allocation43_spill] sm:$0xff] %v9881_v31  ;;  %4316 = vmatmul.f32.gmra.mxu2 %v12374_v4  ;;  %4409 = vmatmul.f32.gmra.mxu3 %v12368_v29  ;;  %v12443_v31 = vld [vmem:[#allocation69_spill] sm:$0xff] }
 0x3a1   : > { %v9888_v30 = vpop.f32.mrf.mxu0 }
 0x3a2   : > { %4175 = vmatmul.f32.gmra.mxu1 %v12438_v33  ;;  %12440 = vst [vmem:[#allocation41_spill] sm:$0xff] %v9888_v30 }
 0x3a3   : > { %v3733_v60 = vpop.f32.mrf.mxu2  ;;  %v3926_v63 = vpop.f32.mrf.mxu3 }
 0x3a4   : > { %v9886_v36 = vadd.f32 %v3926_v63, %v3726_v44  ;;  %4064 = vmatmul.f32.gmra.mxu0 %v12441_v39  ;;  %v3734_v29 = vadd.f32 %v3733_v60, %v2794_v41  ;;  %v12446_v63 = vld [vmem:[#allocation71_spill] sm:$0xff]  ;;  %v2888_v39 = vadd.f32 %v9511_v12, %v9813_v8  ;;  %v2896_v60 = vadd.f32 %v9541_v10, %v2774_v21  ;;  %v12451_v10 = vld [vmem:[#allocation25_spill] sm:$0xff] }
 0x3a5   : > { %v2904_v8 = vadd.f32 %v9589_v40, %v2779_v20  ;;  %v2920_v20 = vadd.f32 %v9636_v37, %v2789_v49  ;;  %v12456_v49 = vld [vmem:[#allocation32_spill] sm:$0xff] }
 0x3a6   : > { %12439 = vst [vmem:[#allocation40_spill] sm:$0xff] %v9886_v36 }
 0x3a7   : > { %v9891_v22 = vpop.f32.mrf.mxu1 }
 0x3a8   : > { %12442 = vst [vmem:[#allocation39_spill] sm:$0xff] %v9891_v22  ;;  %4320 = vmatmul.f32.gmra.mxu2 %v12376_v59  ;;  %4413 = vmatmul.f32.gmra.mxu3 %v12374_v4  ;;  %v2799_v4 = vpop.permute.xlu1 %2798 }
 0x3a9   : > { %v9898_v44 = vpop.f32.mrf.mxu0 }
 0x3aa   : > { %4181 = vmatmul.f32.gmra.mxu1 %v12443_v31  ;;  %12445 = vst [vmem:[#allocation45_spill] sm:$0xff] %v9898_v44  ;;  %v2880_v31 = vadd.f32 %v9483_v32, %v9829_v43  ;;  %v9921_v32 = vpop.permute.xlu2 %2803  ;;  %v3113_v43 = vadd.f32 %v9614_v3, %v2904_v8 }
 0x3ab   : > { %v3741_v26 = vpop.f32.mrf.mxu2  ;;  %v3930_v33 = vpop.f32.mrf.mxu3 }
 0x3ac   : > { %v9896_v18 = vadd.f32 %v3930_v33, %v3734_v29  ;;  %4069 = vmatmul.f32.gmra.mxu0 %v12446_v63  ;;  %v3105_v29 = vadd.f32 %v9543_v62, %v2888_v39  ;;  %v3742_v33 = vadd.f32 %v3741_v26, %v2799_v4  ;;  %v3101_v12 = vadd.f32 %v9513_v45, %v2880_v31  ;;  %v12453_v26 = vld [vmem:[#allocation20_spill] sm:$0xff]  ;;  %v12454_v39 = vld [vmem:[#allocation29_spill] sm:$0xff] }
 0x3ad   : > { %v3230_v31 = vadd.f32 %v9617_v0, %v3113_v43 }
 0x3ae   : > { %12444 = vst [vmem:[#allocation11_spill] sm:$0xff] %v9896_v18  ;;  %v12448_v18 = vld [vmem:[#allocation73_spill] sm:$0xff]  ;;  %v3220_v62 = vadd.f32 %v12451_v10, %v3105_v29  ;;  %v3215_v45 = vadd.f32 %v12453_v26, %v3101_v12  ;;  %v3121_v29 = vadd.f32 %v9662_v24, %v2920_v20  ;;  %v12465_v20 = vld [vmem:[#allocation36_spill] sm:$0xff] }
 0x3af   : > { %v9901_v36 = vpop.f32.mrf.mxu1 }
 0x3b0   : > { %12447 = vst [vmem:[#allocation59_spill] sm:$0xff] %v9901_v36  ;;  %4324 = vmatmul.f32.gmra.mxu2 %v8983_v11  ;;  %4417 = vmatmul.f32.gmra.mxu3 %v12376_v59  ;;  %v12449_v36 = vld [vmem:[#allocation31_spill] sm:$0xff]  ;;  %v3335_v3 = vadd.f32 %v12454_v39, %v3220_v62  ;;  %v9962_v10 = vpop.permute.xlu1 %2813 }
 0x3b1   : > { %v3109_v59 = vadd.f32 %v12449_v36, %v2896_v60  ;;  %v9919_v30 = vpop.f32.mrf.mxu0  ;;  %v2928_v36 = vadd.f32 %v9660_v58, %v2794_v41  ;;  %v12455_v60 = vld [vmem:[#allocation28_spill] sm:$0xff]  ;;  %v3329_v41 = vadd.f32 %v12456_v49, %v3215_v45 }
 0x3b2   : > { %4187 = vmatmul.f32.gmra.mxu1 %v12448_v18  ;;  %v12452_v18 = vld [vmem:[#allocation74_spill] sm:$0xff] }
 0x3b3   : > { %v9912_v63 = vpop.f32.mrf.mxu2  ;;  %v3934_v44 = vpop.f32.mrf.mxu3  ;;  %v3225_v40 = vadd.f32 %v9595_v28, %v3109_v59  ;;  %v3125_v28 = vadd.f32 %v9682_v16, %v2928_v36  ;;  %v12458_v59 = vld [vmem:[#allocation77_spill] sm:$0xff] }
 0x3b4   : > { %v9917_v22 = vadd.f32 %v3934_v44, %v3742_v33  ;;  %4074 = vmatmul.f32.gmra.mxu0 %v12452_v18  ;;  %v2936_v44 = vadd.f32 %v9680_v52, %v2799_v4  ;;  %v2944_v33 = vadd.f32 %v9695_v17, %v9921_v32  ;;  %v9947_v52 = vpop.permute.xlu0 %2808  ;;  %v3492_v4 = vadd.f32 %v9797_v56, %v3335_v3 }
 0x3b5   : > { %v3341_v0 = vadd.f32 %v9597_v53, %v3225_v40  ;;  %v3347_v17 = vadd.f32 %v9619_v19, %v3230_v31  ;;  %v3240_v53 = vadd.f32 %v9665_v54, %v3121_v29  ;;  %v3245_v56 = vadd.f32 %v9685_v25, %v3125_v28  ;;  %v12467_v31 = vld [vmem:[#allocation27_spill] sm:$0xff]  ;;  %v12468_v29 = vld [vmem:[#allocation8_spill] sm:$0xff] }
 0x3b6   : > { %12450 = vst [vmem:[#allocation57_spill] sm:$0xff] %v9917_v22  ;;  %v3133_v16 = vadd.f32 %v9707_v51, %v2944_v33  ;;  %v9959_v8 = vadd.f32 %v9815_v23, %v3492_v4  ;;  %v2952_v19 = vadd.f32 %v9705_v57, %v9947_v52 }
 0x3b7   : > { %v9926_v21 = vpop.f32.mrf.mxu1  ;;  %v3496_v12 = vadd.f32 %v9810_v27, %v3341_v0  ;;  %v3500_v27 = vadd.f32 %v9822_v35, %v3347_v17  ;;  %v3359_v35 = vadd.f32 %v9674_v46, %v3240_v53  ;;  %v12466_v46 = vld [vmem:[#allocation35_spill] sm:$0xff]  ;;  %v12470_v0 = vld [vmem:[#allocation42_spill] sm:$0xff] }
 0x3b8   : > { %4328 = vmatmul.f32.gmra.mxu2 %v8998_v48  ;;  %4421 = vmatmul.f32.gmra.mxu3 %v8983_v11  ;;  %v3129_v11 = vadd.f32 %v9697_v1, %v2936_v44  ;;  %v3488_v1 = vadd.f32 %v9785_v7, %v3329_v41  ;;  %12457 = vst [vmem:[#allocation63_spill] sm:$0xff] %v9959_v8  ;;  %v9971_v7 = vpop.permute.xlu2 %2818  ;;  %v12469_v41 = vld [vmem:[#allocation24_spill] sm:$0xff] }
 0x3b9   : > { %v9952_v24 = vpop.f32.mrf.mxu0  ;;  %v9978_v43 = vadd.f32 %v9825_v55, %v3496_v12  ;;  %v3255_v54 = vadd.f32 %v9712_v47, %v3133_v16  ;;  %v3137_v25 = vadd.f32 %v9719_v2, %v2952_v19  ;;  %v9987_v57 = vadd.f32 %v9838_v34, %v3500_v27  ;;  %v12464_v2 = vld [vmem:[#allocation34_spill] sm:$0xff]  ;;  %v10032_v19 = vpop.permute.xlu1 %2828  ;;  %v12473_v27 = vld [vmem:[#allocation23_spill] sm:$0xff] }
 0x3ba   : > { %4193 = vmatmul.f32.gmra.mxu1 %v12455_v60  ;;  %v3250_v62 = vadd.f32 %v9700_v50, %v3129_v11  ;;  %v9974_v23 = vadd.f32 %v9800_v15, %v3488_v1  ;;  %v4531_v50 = vmul.f32 %v9959_v8, %v9959_v8  ;;  %v12462_v15 = vld [vmem:[#allocation15_spill] sm:$0xff]  ;;  %v3365_v55 = vadd.f32 %v9693_v6, %v3245_v56  ;;  %v12471_v12 = vld [vmem:[#allocation46_spill] sm:$0xff] }
 0x3bb   : > { %v9943_v37 = vpop.f32.mrf.mxu2  ;;  %v9945_v58 = vpop.f32.mrf.mxu3  ;;  %12460 = vst [vmem:[#allocation66_spill] sm:$0xff] %v9978_v43  ;;  %v2960_v45 = vadd.f32 %v12464_v2, %v9962_v10  ;;  %v4533_v34 = vmul.f32 %v9978_v43, %v9978_v43  ;;  %v3377_v36 = vadd.f32 %v12465_v20, %v3255_v54  ;;  %v3260_v44 = vadd.f32 %v12466_v46, %v3137_v25  ;;  %v12476_v2 = vld [vmem:[#allocation49_spill] sm:$0xff]  ;;  %v12479_v20 = vld [vmem:[#allocation43_spill] sm:$0xff] }
 0x3bc   : > { %4079 = vmatmul.f32.gmra.mxu0 %v12458_v59  ;;  %12459 = vst [vmem:[#allocation61_spill] sm:$0xff] %v9974_v23  ;;  %v4529_v40 = vmul.f32 %v9974_v23, %v9974_v23  ;;  %v4485_v6 = vadd.f32 %v9959_v8, %v9974_v23  ;;  %v3508_v39 = vadd.f32 %v9848_v14, %v3359_v35  ;;  %v10008_v3 = vpop.permute.xlu0 %2823 }
 0x3bd   : > { %12461 = vst [vmem:[#allocation65_spill] sm:$0xff] %v9987_v57  ;;  %v2968_v60 = vadd.f32 %v12467_v31, %v9971_v7  ;;  %v3141_v28 = vadd.f32 %v12468_v29, %v2960_v45  ;;  %v4535_v11 = vmul.f32 %v9987_v57, %v9987_v57  ;;  %v2976_v4 = vadd.f32 %v12470_v0, %v10008_v3  ;;  %v12483_v0 = vld [vmem:[#allocation41_spill] sm:$0xff] }
 0x3be   : > { %v4561_v33 = vadd.f32 %v4531_v50, %v4529_v40  ;;  %v4486_v14 = vadd.f32 %v4485_v6, %v9978_v43  ;;  %v3512_v16 = vadd.f32 %v9858_v13, %v3365_v55  ;;  %v10023_v17 = vadd.f32 %v9861_v61, %v3508_v39  ;;  %v12475_v55 = vld [vmem:[#allocation48_spill] sm:$0xff]  ;;  %v12477_v40 = vld [vmem:[#allocation79_spill] sm:$0xff] }
 0x3bf   : > { %v9969_v51 = vpop.f32.mrf.mxu1  ;;  %v3145_v59 = vadd.f32 %v12471_v12, %v2968_v60  ;;  %v4537_v56 = vmul.f32 %v9853_v38, %v9853_v38  ;;  %v3383_v54 = vadd.f32 %v12473_v27, %v3260_v44  ;;  %v12480_v39 = vld [vmem:[#allocation47_spill] sm:$0xff]  ;;  %v12481_v60 = vld [vmem:[#allocation50_spill] sm:$0xff]  ;;  %v12485_v12 = vld [vmem:[#allocation9_spill] sm:$0xff] }
 0x3c0   : > { %4332 = vmatmul.f32.gmra.mxu2 %v12384_v42  ;;  %4425 = vmatmul.f32.gmra.mxu3 %v8998_v48  ;;  %v12463_v48 = vld [vmem:[#allocation22_spill] sm:$0xff]  ;;  %v4562_v53 = vadd.f32 %v4561_v33, %v4533_v34  ;;  %v4487_v13 = vadd.f32 %v4486_v14, %v9987_v57  ;;  %v10038_v25 = vadd.f32 %v9871_v9, %v3512_v16  ;;  %v10040_v50 = vpop.permute.xlu2 %2833  ;;  %v12484_v14 = vld [vmem:[#allocation39_spill] sm:$0xff]  ;;  %v12486_v27 = vld [vmem:[#allocation44_spill] sm:$0xff] }
 0x3c1   : > { %v3371_v47 = vadd.f32 %v12463_v48, %v3250_v62  ;;  %v10015_v49 = vpop.f32.mrf.mxu0  ;;  %v12472_v62 = vld [vmem:[#allocation72_spill] sm:$0xff]  ;;  %v2984_v48 = vadd.f32 %v12475_v55, %v10032_v19  ;;  %v3270_v31 = vadd.f32 %v12480_v39, %v3145_v59  ;;  %v2992_v29 = vadd.f32 %v12481_v60, %v10040_v50  ;;  %v12493_v39 = vld [vmem:[#allocation75_spill] sm:$0xff]  ;;  %v12494_v60 = vld [vmem:[#allocation58_spill] sm:$0xff] }
 0x3c2   : > { %4199 = vmatmul.f32.gmra.mxu1 %v12462_v15  ;;  %v12474_v15 = vld [vmem:[#allocation12_spill] sm:$0xff]  ;;  %v4563_v45 = vadd.f32 %v4562_v53, %v4535_v11  ;;  %v4488_v34 = vadd.f32 %v4487_v13, %v9853_v38 }
 0x3c3   : > { %v9992_v18 = vpop.f32.mrf.mxu2  ;;  %v9994_v26 = vpop.f32.mrf.mxu3  ;;  %v3516_v61 = vadd.f32 %v9868_v5, %v3371_v47  ;;  %v3265_v35 = vadd.f32 %v12474_v15, %v3141_v28  ;;  %v4539_v5 = vmul.f32 %v10023_v17, %v10023_v17  ;;  %v12478_v47 = vld [vmem:[#allocation53_spill] sm:$0xff]  ;;  %v12482_v28 = vld [vmem:[#allocation7_spill] sm:$0xff]  ;;  %v12487_v13 = vld [vmem:[#allocation56_spill] sm:$0xff] }
 0x3c4   : > { %4084 = vmatmul.f32.gmra.mxu0 %v12469_v41  ;;  %v3520_v9 = vadd.f32 %v12478_v47, %v3377_v36  ;;  %v3153_v33 = vadd.f32 %v12482_v28, %v2984_v48  ;;  %v4564_v11 = vadd.f32 %v4563_v45, %v4537_v56  ;;  %v4489_v41 = vadd.f32 %v4488_v34, %v10023_v17  ;;  %v12488_v15 = vld [vmem:[#allocation30_spill] sm:$0xff]  ;;  %v12490_v34 = vld [vmem:[#allocation55_spill] sm:$0xff]  ;;  %v12491_v47 = vld [vmem:[#allocation60_spill] sm:$0xff] }
 0x3c5   : > { %v10052_v46 = vadd.f32 %v12479_v20, %v3516_v61  ;;  %v4541_v36 = vmul.f32 %v10038_v25, %v10038_v25  ;;  %v3389_v53 = vadd.f32 %v12485_v12, %v3265_v35  ;;  %v3157_v61 = vadd.f32 %v12487_v13, %v2992_v29 }
 0x3c6   : > { %v10067_v16 = vadd.f32 %v12484_v14, %v3520_v9  ;;  %v4565_v55 = vadd.f32 %v4564_v11, %v4539_v5  ;;  %v4490_v56 = vadd.f32 %v4489_v41, %v10038_v25  ;;  %v3395_v35 = vadd.f32 %v12490_v34, %v3270_v31  ;;  %v12492_v9 = vld [vmem:[#allocation45_spill] sm:$0xff] }
 0x3c7   : > { %v10025_v1 = vpop.f32.mrf.mxu1  ;;  %v4543_v48 = vmul.f32 %v10052_v46, %v10052_v46  ;;  %v3528_v20 = vadd.f32 %v12492_v9, %v3389_v53  ;;  %v12498_v53 = vld [vmem:[#allocation64_spill] sm:$0xff] }
 0x3c8   : > { %4336 = vmatmul.f32.gmra.mxu2 %v12472_v62  ;;  %4429 = vmatmul.f32.gmra.mxu3 %v12384_v42  ;;  %v3149_v42 = vadd.f32 %v12476_v2, %v2976_v4  ;;  %v3524_v4 = vadd.f32 %v12483_v0, %v3383_v54  ;;  %v12489_v2 = vld [vmem:[#allocation59_spill] sm:$0xff]  ;;  %v4566_v28 = vadd.f32 %v4565_v55, %v4541_v36  ;;  %v12495_v0 = vld [vmem:[#allocation62_spill] sm:$0xff] }
 0x3c9   : > { %v3543_v5 = vpop.f32.mrf.mxu0  ;;  %v4491_v11 = vadd.f32 %v4490_v56, %v10052_v46  ;;  %v4545_v41 = vmul.f32 %v10067_v16, %v10067_v16  ;;  %v3532_v14 = vadd.f32 %v9919_v30, %v3395_v35  ;;  %v10095_v12 = vadd.f32 %v9926_v21, %v3528_v20 }
 0x3ca   : > { %4205 = vmatmul.f32.gmra.mxu1 %v12477_v40  ;;  %v3275_v59 = vadd.f32 %v12486_v27, %v3149_v42  ;;  %v10077_v45 = vadd.f32 %v12489_v2, %v3524_v4  ;;  %v10079_v40 = vpop.permute.xlu0 %2838  ;;  %v3280_v42 = vadd.f32 %v12491_v47, %v3153_v33  ;;  %v12496_v4 = vld [vmem:[#allocation67_spill] sm:$0xff]  ;;  %v4567_v13 = vadd.f32 %v4566_v28, %v4543_v48  ;;  %v12500_v48 = vld [vmem:[#allocation76_spill] sm:$0xff] }
 0x3cb   : > { %v10054_v44 = vpop.f32.mrf.mxu2  ;;  %v10056_v6 = vpop.f32.mrf.mxu3  ;;  %v3000_v29 = vadd.f32 %v12494_v60, %v10079_v40  ;;  %v3285_v33 = vadd.f32 %v12496_v4, %v3157_v61  ;;  %v4492_v36 = vadd.f32 %v4491_v11, %v10067_v16  ;;  %v12499_v61 = vld [vmem:[#allocation68_spill] sm:$0xff]  ;;  %v10109_v21 = vadd.f32 %v9969_v51, %v3532_v14  ;;  %v12501_v60 = vld [vmem:[#allocation21_spill] sm:$0xff] }
 0x3cc   : > { %4089 = vmatmul.f32.gmra.mxu0 %v12488_v15  ;;  %v3401_v31 = vadd.f32 %v12495_v0, %v3275_v59  ;;  %v4547_v15 = vmul.f32 %v10077_v45, %v10077_v45  ;;  %v3407_v56 = vadd.f32 %v12499_v61, %v3280_v42  ;;  %v4568_v2 = vadd.f32 %v4567_v13, %v4545_v41  ;;  %v12502_v42 = vld [vmem:[#allocation78_spill] sm:$0xff] }
 0x3cd   : > { %v3161_v27 = vadd.f32 %v12498_v53, %v3000_v29  ;;  %v4493_v34 = vadd.f32 %v4492_v36, %v10077_v45  ;;  %v3413_v35 = vadd.f32 %v12500_v48, %v3285_v33  ;;  %v4549_v47 = vmul.f32 %v10095_v12, %v10095_v12  ;;  %v12503_v41 = vld [vmem:[#allocation38_spill] sm:$0xff]  ;;  %v12506_v48 = vld [vmem:[#allocation33_spill] sm:$0xff] }
 0x3ce   : > { %v3536_v30 = vadd.f32 %v9952_v24, %v3401_v31  ;;  %v3540_v9 = vadd.f32 %v10015_v49, %v3407_v56  ;;  %v4569_v29 = vadd.f32 %v4568_v2, %v4547_v15  ;;  %v4551_v11 = vmul.f32 %v10109_v21, %v10109_v21  ;;  %v12505_v13 = vld [vmem:[#allocation10_spill] sm:$0xff] }
 0x3cf   : > { %v3636_v54 = vpop.f32.mrf.mxu1  ;;  %v3290_v24 = vadd.f32 %v12502_v42, %v3161_v27  ;;  %v4494_v51 = vadd.f32 %v4493_v34, %v10095_v12  ;;  %v3544_v0 = vadd.f32 %v3543_v5, %v3413_v35 }
 0x3d0   : > { %4340 = vmatmul.f32.gmra.mxu2 %v12493_v39  ;;  %4433 = vmatmul.f32.gmra.mxu3 %v12472_v62  ;;  %v12497_v62 = vld [vmem:[#allocation13_spill] sm:$0xff]  ;;  %v10117_v20 = vadd.f32 %v10025_v1, %v3536_v30  ;;  %v10126_v49 = vadd.f32 %v3636_v54, %v3540_v9  ;;  %v4570_v1 = vadd.f32 %v4569_v29, %v4549_v47 }
 0x3d1   : > { %v4495_v31 = vadd.f32 %v4494_v51, %v10109_v21  ;;  %v3547_v33 = vpop.f32.mrf.mxu0 }
 0x3d2   : > { %4211 = vmatmul.f32.gmra.mxu1 %v12497_v62  ;;  %v4553_v4 = vmul.f32 %v10117_v20, %v10117_v20  ;;  %v12504_v62 = vld [vmem:[#allocation17_spill] sm:$0xff]  ;;  %v4571_v5 = vadd.f32 %v4570_v1, %v4551_v11  ;;  %v4555_v36 = vmul.f32 %v10126_v49, %v10126_v49 }
 0x3d3   : > { %v10102_v55 = vpop.f32.mrf.mxu2  ;;  %v10104_v59 = vpop.f32.mrf.mxu3  ;;  %v4496_v54 = vadd.f32 %v4495_v31, %v10117_v20 }
 0x3d4   : > { %4094 = vmatmul.f32.gmra.mxu0 %v12501_v60  ;;  %v4572_v15 = vadd.f32 %v4571_v5, %v4553_v4  ;;  %v12509_v4 = vld [vmem:[#allocation16_spill] sm:$0xff] }
 0x3d5   : > { %v4497_v61 = vadd.f32 %v4496_v54, %v10126_v49 }
 0x3d6   : > { %v4573_v34 = vadd.f32 %v4572_v15, %v4555_v36 }
 0x3d7   : > { %v3640_v28 = vpop.f32.mrf.mxu1 }
 0x3d8   : > { %4344 = vmatmul.f32.gmra.mxu2 %v12503_v41  ;;  %4437 = vmatmul.f32.gmra.mxu3 %v12493_v39  ;;  %v10131_v14 = vadd.f32 %v3640_v28, %v3544_v0  ;;  %v3419_v39 = vadd.f32 %v12505_v13, %v3290_v24  ;;  %v12507_v24 = vld [vmem:[#allocation26_spill] sm:$0xff]  ;;  %v10158_v0 = vpop.permute.xlu1 %4772 }
 0x3d9   : > { %12508 = vst [vmem:[#allocation70_spill] sm:$0xff] %v10158_v0  ;;  %v4020_v31 = vpop.f32.mrf.mxu0 }
 0x3da   : > { %4217 = vmatmul.f32.gmra.mxu1 %v12504_v62  ;;  %v3548_v56 = vadd.f32 %v3547_v33, %v3419_v39  ;;  %v4557_v30 = vmul.f32 %v10131_v14, %v10131_v14  ;;  %v4498_v35 = vadd.f32 %v4497_v61, %v10131_v14  ;;  %v10166_v61 = vpop.permute.xlu2 %4767 }
 0x3db   : > { %v10134_v53 = vpop.f32.mrf.mxu2  ;;  %v10136_v27 = vpop.f32.mrf.mxu3  ;;  %12510 = vst [vmem:[#allocation69_spill] sm:$0xff] %v10166_v61 }
 0x3dc   : > { %v4574_v9 = vadd.f32 %v4573_v34, %v4557_v30 }
 0x3df   : > { %v3644_v2 = vpop.f32.mrf.mxu1 }
 0x3e0   : > { %4348 = vmatmul.f32.gmra.mxu2 %v12506_v48  ;;  %4441 = vmatmul.f32.gmra.mxu3 %v12503_v41  ;;  %v10148_v47 = vadd.f32 %v3644_v2, %v3548_v56 }
 0x3e1   : > { %v4025_v34 = vpop.f32.mrf.mxu0 }
 0x3e2   : > { %v4499_v60 = vadd.f32 %v4498_v35, %v10148_v47  ;;  %v4559_v42 = vmul.f32 %v10148_v47, %v10148_v47  ;;  %4223 = vmatmul.f32.gmra.mxu1 %v12507_v24  ;;  %v10168_v35 = vpop.permute.xlu1 %4762 }
 0x3e3   : > { %v10154_v29 = vpop.f32.mrf.mxu2  ;;  %v10156_v51 = vpop.f32.mrf.mxu3  ;;  %12511 = vst [vmem:[#allocation71_spill] sm:$0xff] %v10168_v35 }
 0x3e4   : > { %v4500_v28 = vrot.slane %v4499_v60, 4  ;;  %v4575_v11 = vadd.f32 %v4574_v9, %v4559_v42  ;;  %v10170_v9 = vpop.permute.xlu0 %4884 }
 0x3e5   : > { %12512 = vst [vmem:[#allocation73_spill] sm:$0xff] %v10170_v9 }
 0x3e6   : > { %v4501_v41 = vadd.f32 %v4500_v28, %v4499_v60  ;;  %v4576_v1 = vrot.slane %v4575_v11, 4 }
 0x3e7   : > { %v4134_v2 = vpop.f32.mrf.mxu1 }
 0x3e8   : > { %4352 = vmatmul.f32.gmra.mxu2 %v12509_v4  ;;  %4445 = vmatmul.f32.gmra.mxu3 %v12506_v48  ;;  %v4502_v33 = vrot.slane %v4501_v41, 2  ;;  %v4577_v62 = vadd.f32 %v4576_v1, %v4575_v11  ;;  %v12513_v48 = vld [vmem:[#allocation18_spill] sm:$0xff] }
 0x3ea   : > { %v4503_v13 = vadd.f32 %v4502_v33, %v4501_v41  ;;  %v4578_v39 = vrot.slane %v4577_v62, 2 }
 0x3eb   : > { %v10162_v5 = vpop.f32.mrf.mxu2  ;;  %v10164_v54 = vpop.f32.mrf.mxu3 }
 0x3ec   : > { %v4504_v36 = vrot.slane %v4503_v13, 1  ;;  %v4579_v15 = vadd.f32 %v4578_v39, %v4577_v62  ;;  %v10179_v39 = vpop.permute.xlu2 %4879 }
 0x3ed   : > { %12514 = vst [vmem:[#allocation31_spill] sm:$0xff] %v10179_v39 }
 0x3ee   : > { %v4505_v56 = vadd.f32 %v4504_v36, %v4503_v13  ;;  %v4580_v30 = vrot.slane %v4579_v15, 1  ;;  %v4030_v13 = vpop.f32.mrf.mxu0  ;;  %v10181_v36 = vpop.permute.xlu1 %4874 }
 0x3ef   : > { %v4140_v62 = vpop.f32.mrf.mxu1  ;;  %12515 = vst [vmem:[#allocation25_spill] sm:$0xff] %v10181_v36 }
 0x3f0   : > { %v10173_v60 = vmul.f32 %v4505_v56, %v12513_v48  ;;  %v4581_v42 = vadd.f32 %v4580_v30, %v4579_v15  ;;  %4449 = vmatmul.f32.gmra.mxu3 %v12509_v4  ;;  %v10183_v56 = vpop.permute.xlu0 %4757 }
 0x3f1   : > { %12516 = vst [vmem:[#allocation74_spill] sm:$0xff] %v10183_v56  ;;  %v12522_v56 = vld [vmem:[#allocation37_spill] sm:$0xff] }
 0x3f2   : > { %v4603_v24 = vmul.f32 %v4581_v42, %v12513_v48  ;;  %v4605_v28 = vmul.f32 %v10173_v60, %v10173_v60 }
 0x3f3   : > { %v3966_v11 = vpop.f32.mrf.mxu3  ;;  %v4293_v41 = vpop.f32.mrf.mxu2 }
 0x3f4   : > { %v4607_v1 = vsub.f32 %v4603_v24, %v4605_v28  ;;  %v10187_v8 = vpop.permute.xlu2 %4752 }
 0x3f5   : > { %12518 = vst [vmem:[#allocation29_spill] sm:$0xff] %v10187_v8 }
 0x3f6   : > { %v4641_v33 = vadd.f32 1e-05, %v4607_v1  ;;  %v10185_v22 = vpop.f32.mrf.mxu0  ;;  %v10193_v43 = vpop.permute.xlu1 %4747 }
 0x3f7   : > { %v4146_v42 = vpop.f32.mrf.mxu1  ;;  %12517 = vst [vmem:[#allocation20_spill] sm:$0xff] %v10185_v22  ;;  %v4021_v22 = vadd.f32 %v4020_v31, %v12522_v56 }
 0x3f8   : > { %6643 = vrsqrt.f32 %v4641_v33  ;;  %12520 = vst [vmem:[#allocation32_spill] sm:$0xff] %v10193_v43  ;;  %v10195_v57 = vpop.permute.xlu0 %4869  ;;  %vm4649_vm9 = vweird.f32 %v4641_v33 }
 0x3f9   : > { %12521 = vst [vmem:[#allocation77_spill] sm:$0xff] %v10195_v57  ;;  %v3766_v57 = vadd.f32 %v9992_v18, %v9962_v10  ;;  %v4135_v43 = vadd.f32 %v4134_v2, %v4021_v22  ;;  %v3790_v22 = vadd.f32 %v10134_v53, %v10032_v19 }
 0x3fb   : > { %v4297_v15 = vpop.f32.mrf.mxu2  ;;  %v4390_v4 = vpop.f32.mrf.mxu3 }
 0x3fe   : > { %v6644_v30 = vpop.eup %6643 }
 0x3ff   : > { %v4644_v48 = vmul.f32 %v6644_v30, %v4641_v33  ;;  %vm4650_vm8 = vweird.f32 %v6644_v30  ;;  %v10197_v36 = vpop.f32.mrf.mxu1  ;;  %v3774_v33 = vadd.f32 %v10054_v44, %v9971_v7 }
 0x400   : > { %vm4651_vm10 = vmor %vm4649_vm9, %vm4650_vm8 }
 0x401   : > { %v4645_v23 = vmul.f32 %v6644_v30, %v4644_v48  ;;  %v10200_v48 = vpop.f32.mrf.mxu0  ;;  %v10235_v7 = vadd.f32 %v10104_v59, %v3774_v33 }
 0x403   : > { %v4646_v24 = vmul.f32 0.5, %v4645_v23  ;;  %v10189_v28 = vpop.f32.mrf.mxu2  ;;  %v10191_v1 = vpop.f32.mrf.mxu3  ;;  %v3750_v23 = vadd.f32 %v9912_v63, %v9921_v32  ;;  %v4639_v63 = vsub.f32 %v10148_v47, %v10173_v60  ;;  %v10221_v32 = vadd.f32 %v10056_v6, %v3766_v57 }
 0x404   : > { %12519 = vst [vmem:[#allocation28_spill] sm:$0xff] %v10189_v28  ;;  %v3758_v28 = vadd.f32 %v9943_v37, %v9947_v52  ;;  %v3782_v37 = vadd.f32 %v10102_v55, %v10008_v3  ;;  %v3798_v57 = vadd.f32 %v10154_v29, %v10040_v50  ;;  %v3806_v3 = vadd.f32 %v10162_v5, %v10079_v40  ;;  %v10248_v47 = vpop.permute.xlu1 %4859  ;;  %v12526_v50 = vld [vmem:[#allocation52_spill] sm:$0xff] }
 0x405   : > { %v4647_v38 = vsub.f32 1.5, %v4646_v24  ;;  %v10246_v6 = vadd.f32 %v10156_v51, %v3790_v22  ;;  %v4294_v55 = vadd.f32 %v4293_v41, %v4135_v43  ;;  %12525 = vst [vmem:[#allocation22_spill] sm:$0xff] %v10248_v47  ;;  %v4031_v29 = vadd.f32 %v4030_v13, %v12526_v50 }
 0x406   : > { %v10214_v31 = vadd.f32 %v9994_v26, %v3758_v28  ;;  %v10232_v26 = vpop.permute.xlu2 %4864  ;;  %v10243_v19 = vadd.f32 %v10136_v27, %v3782_v37  ;;  %v10251_v59 = vadd.f32 %v10164_v54, %v3798_v57  ;;  %v10253_v2 = vadd.f32 %v3966_v11, %v3806_v3  ;;  %v10260_v27 = vpop.permute.xlu0 %4742 }
 0x407   : > { %v4648_v39 = vmul.f32 %v6644_v30, %v4647_v38  ;;  %v10211_v38 = vadd.f32 %v9945_v58, %v3750_v23  ;;  %v12523_v58 = vld [vmem:[#allocation14_spill] sm:$0xff]  ;;  %12524 = vst [vmem:[#allocation15_spill] sm:$0xff] %v10232_v26  ;;  %v4637_v40 = vsub.f32 %v10131_v14, %v10173_v60  ;;  %v10262_v51 = vadd.f32 %v4390_v4, %v4294_v55 }
 0x408   : > { %v4026_v52 = vadd.f32 %v4025_v34, %v12523_v58  ;;  %v10256_v34 = vpop.f32.mrf.mxu1  ;;  %12527 = vst [vmem:[#allocation34_spill] sm:$0xff] %v10260_v27  ;;  %v4635_v5 = vsub.f32 %v10126_v49, %v10173_v60  ;;  %v4633_v54 = vsub.f32 %v10117_v20, %v10173_v60  ;;  %v4631_v11 = vsub.f32 %v10109_v21, %v10173_v60  ;;  %v12530_v58 = vld [vmem:[#allocation51_spill] sm:$0xff] }
 0x409   : > { %v10208_v24 = vsel %vm4651_vm10, %v6644_v30, %v4648_v39  ;;  %12528 = vst [vmem:[#allocation36_spill] sm:$0xff] %v10262_v51  ;;  %v10264_v43 = vpop.f32.mrf.mxu0  ;;  %v4629_v14 = vsub.f32 %v10095_v12, %v10173_v60  ;;  %v4625_v13 = vsub.f32 %v10067_v16, %v10173_v60  ;;  %v4147_v56 = vadd.f32 %v4146_v42, %v4031_v29 }
 0x40a   : > { %v4693_v44 = vmul.f32 %v10208_v24, %v4639_v63  ;;  %v4141_v53 = vadd.f32 %v4140_v62, %v4026_v52  ;;  %v4627_v62 = vsub.f32 %v10077_v45, %v10173_v60  ;;  %v4691_v21 = vmul.f32 %v10208_v24, %v4637_v40  ;;  %v12531_v52 = vld [vmem:[#allocation20_spill] sm:$0xff] }
 0x40b   : > { %v10228_v10 = vpop.f32.mrf.mxu2  ;;  %v10230_v18 = vpop.f32.mrf.mxu3  ;;  %v4689_v4 = vmul.f32 %v10208_v24, %v4635_v5  ;;  %v4687_v12 = vmul.f32 %v10208_v24, %v4633_v54  ;;  %v4685_v30 = vmul.f32 %v10208_v24, %v4631_v11  ;;  %v10289_v45 = vmul.f32 %v10262_v51, %v10262_v51  ;;  %v12535_v40 = vld [vmem:[#allocation28_spill] sm:$0xff] }
 0x40c   : > { %v4805_v41 = vmul.f32 %v10158_v0, %v4693_v44  ;;  %v4298_v39 = vadd.f32 %v4297_v15, %v4141_v53  ;;  %v4683_v42 = vmul.f32 %v10208_v24, %v4629_v14  ;;  %v4681_v28 = vmul.f32 %v10208_v24, %v4627_v62  ;;  %v12532_v44 = vld [vmem:[#allocation74_spill] sm:$0xff]  ;;  %v12533_v53 = vld [vmem:[#allocation32_spill] sm:$0xff] }
 0x40d   : > { %v4803_v37 = vmul.f32 %v10166_v61, %v4691_v21  ;;  %v4801_v22 = vmul.f32 %v10168_v35, %v4689_v4  ;;  %v4036_v57 = vadd.f32 %v12531_v52, %v12530_v58  ;;  %v4799_v3 = vmul.f32 %v12532_v44, %v4687_v12  ;;  %v12538_v21 = vld [vmem:[#allocation77_spill] sm:$0xff] }
 0x40e   : > { %v10300_v33 = vadd.f32 %v10170_v9, %v4805_v41  ;;  %v10303_v63 = vadd.f32 %v10191_v1, %v4298_v39  ;;  %v4797_v55 = vmul.f32 %v10187_v8, %v4685_v30  ;;  %v4795_v50 = vmul.f32 %v12533_v53, %v4683_v42  ;;  %v10312_v29 = vpop.permute.xlu2 %4737  ;;  %v12536_v1 = vld [vmem:[#allocation31_spill] sm:$0xff]  ;;  %v12537_v41 = vld [vmem:[#allocation25_spill] sm:$0xff] }
 0x40f   : > { %12534 = vst [vmem:[#allocation27_spill] sm:$0xff] %v10312_v29  ;;  %v4302_v5 = vadd.f32 %v12535_v40, %v4147_v56  ;;  %v10318_v11 = vadd.f32 %v12536_v1, %v4803_v37  ;;  %v10321_v14 = vadd.f32 %v12537_v41, %v4801_v22  ;;  %v4793_v62 = vmul.f32 %v10260_v27, %v4681_v28  ;;  %v12539_v30 = vld [vmem:[#allocation19_spill] sm:$0xff]  ;;  %v10337_v37 = vpop.permute.xlu1 %4732 }
 0x410   : > { %12529 = vst [vmem:[#allocation35_spill] sm:$0xff] %v10303_v63  ;;  %v10315_v54 = vpop.f32.mrf.mxu1  ;;  %v10327_v4 = vadd.f32 %v12538_v21, %v4799_v3  ;;  %v10330_v12 = vadd.f32 %v10232_v26, %v4797_v55  ;;  %v10333_v56 = vadd.f32 %v10248_v47, %v4795_v50  ;;  %v10341_v22 = vadd.f32 %v10303_v63, %v10262_v51  ;;  %v10348_v3 = vpop.permute.xlu0 %4854 }
 0x411   : > { %v10324_v39 = vpop.f32.mrf.mxu0  ;;  %12540 = vst [vmem:[#allocation8_spill] sm:$0xff] %v10337_v37  ;;  %v4153_v28 = vadd.f32 %v10197_v36, %v4036_v57  ;;  %v4949_v58 = vmul.f32 %v10300_v33, %v10300_v33  ;;  %v4947_v52 = vmul.f32 %v10318_v11, %v10318_v11  ;;  %v4945_v55 = vmul.f32 %v10321_v14, %v10321_v14 }
 0x412   : > { %12541 = vst [vmem:[#allocation24_spill] sm:$0xff] %v10348_v3  ;;  %v4943_v50 = vmul.f32 %v10327_v4, %v10327_v4  ;;  %v4941_v40 = vmul.f32 %v10330_v12, %v10330_v12  ;;  %v4679_v42 = vmul.f32 %v10208_v24, %v4625_v13  ;;  %v4939_v23 = vmul.f32 %v10333_v56, %v10333_v56 }
 0x413   : > { %v10291_v16 = vpop.f32.mrf.mxu2  ;;  %v10293_v15 = vpop.f32.mrf.mxu3  ;;  %v4981_v36 = vmul.f32 %v4949_v58, %v10300_v33  ;;  %v4979_v57 = vmul.f32 %v4947_v52, %v10318_v11  ;;  %v10362_v20 = vadd.f32 %v10348_v3, %v4793_v62  ;;  %v4532_v49 = vmul.f32 %v10303_v63, %v10303_v63  ;;  %v12542_v62 = vld [vmem:[#allocation65_spill] sm:$0xff] }
 0x414   : > { %v4977_v51 = vmul.f32 %v4945_v55, %v10321_v14  ;;  %v4975_v13 = vmul.f32 %v4943_v50, %v10327_v4  ;;  %v4973_v58 = vmul.f32 %v4941_v40, %v10330_v12  ;;  %v4306_v52 = vadd.f32 %v10228_v10, %v4153_v28 }
 0x415   : > { %v5013_v53 = vmul.f32 0.044715, %v4981_v36  ;;  %v5011_v26 = vmul.f32 0.044715, %v4979_v57  ;;  %v4937_v44 = vmul.f32 %v10362_v20, %v10362_v20  ;;  %v4971_v40 = vmul.f32 %v4939_v23, %v10333_v56 }
 0x416   : > { %v5009_v8 = vmul.f32 0.044715, %v4977_v51  ;;  %v5007_v21 = vmul.f32 0.044715, %v4975_v13  ;;  %v5005_v63 = vmul.f32 0.044715, %v4973_v58  ;;  %v4791_v10 = vmul.f32 %v10312_v29, %v4679_v42  ;;  %v10392_v58 = vpop.permute.xlu2 %4849 }
 0x417   : > { %v5045_v55 = vadd.f32 %v5013_v53, %v10300_v33  ;;  %v5043_v50 = vadd.f32 %v5011_v26, %v10318_v11  ;;  %v10385_v28 = vadd.f32 %v10230_v18, %v4302_v5  ;;  %12544 = vst [vmem:[#allocation46_spill] sm:$0xff] %v10392_v58  ;;  %v4582_v53 = vadd.f32 %v4532_v49, %v10289_v45  ;;  %v10403_v29 = vpop.permute.xlu1 %4844  ;;  %v12548_v45 = vld [vmem:[#allocation54_spill] sm:$0xff] }
 0x418   : > { %v10378_v41 = vpop.f32.mrf.mxu1  ;;  %v5041_v51 = vadd.f32 %v5009_v8, %v10321_v14  ;;  %v5039_v57 = vadd.f32 %v5007_v21, %v10327_v4  ;;  %v5037_v13 = vadd.f32 %v5005_v63, %v10330_v12  ;;  %v12545_v23 = vsub.f32 %v10052_v46, %v10173_v60  ;;  %12547 = vst [vmem:[#allocation23_spill] sm:$0xff] %v10403_v29 }
 0x419   : > { %12543 = vst [vmem:[#allocation42_spill] sm:$0xff] %v10385_v28  ;;  %v10387_v36 = vpop.f32.mrf.mxu0  ;;  %v5077_v26 = vmul.f32 0.7978846, %v5045_v55  ;;  %v5075_v3 = vmul.f32 0.7978846, %v5043_v50  ;;  %v10400_v5 = vadd.f32 %v10293_v15, %v4306_v52  ;;  %v4969_v21 = vmul.f32 %v4937_v44, %v10362_v20 }
 0x41a   : > { %v4677_v18 = vmul.f32 %v10208_v24, %v12545_v23  ;;  %v5073_v42 = vmul.f32 0.7978846, %v5041_v51  ;;  %v5071_v8 = vmul.f32 0.7978846, %v5039_v57  ;;  %v5069_v63 = vmul.f32 0.7978846, %v5037_v13 }
 0x41b   : > { %v10366_v27 = vpop.f32.mrf.mxu2  ;;  %v10368_v47 = vpop.f32.mrf.mxu3  ;;  %12546 = vst [vmem:[#allocation72_spill] sm:$0xff] %v10400_v5  ;;  %6645 = vtanh.f32 %v5077_v26  ;;  %v5003_v1 = vmul.f32 0.044715, %v4971_v40  ;;  %v10406_v49 = vadd.f32 %v10392_v58, %v4791_v10  ;;  %v4041_v46 = vadd.f32 %v10200_v48, %v12548_v45  ;;  %v12549_v10 = vld [vmem:[#allocation66_spill] sm:$0xff] }
 0x41c   : > { %v4534_v55 = vmul.f32 %v10385_v28, %v10385_v28  ;;  %6647 = vtanh.f32 %v5075_v3  ;;  %v5001_v44 = vmul.f32 0.044715, %v4969_v21  ;;  %v4789_v40 = vmul.f32 %v10337_v37, %v4677_v18  ;;  %v12550_v21 = vld [vmem:[#allocation63_spill] sm:$0xff] }
 0x41d   : > { %6649 = vtanh.f32 %v5073_v42  ;;  %v5035_v50 = vadd.f32 %v5003_v1, %v10333_v56  ;;  %v4159_v57 = vadd.f32 %v10256_v34, %v4041_v46  ;;  %v4935_v13 = vmul.f32 %v10406_v49, %v10406_v49 }
 0x41e   : > { %6651 = vtanh.f32 %v5071_v8  ;;  %v5033_v48 = vadd.f32 %v5001_v44, %v10362_v20  ;;  %v4507_v3 = vadd.f32 %v10341_v22, %v10385_v28  ;;  %v4536_v26 = vmul.f32 %v10400_v5, %v10400_v5  ;;  %v10435_v44 = vpop.permute.xlu0 %4727  ;;  %v12552_v22 = vld [vmem:[#allocation40_spill] sm:$0xff]  ;;  %v10445_v37 = vpop.permute.xlu2 %4722 }
 0x41f   : > { %6653 = vtanh.f32 %v5069_v63  ;;  %v5067_v23 = vmul.f32 0.7978846, %v5035_v50  ;;  %v4583_v18 = vadd.f32 %v4582_v53, %v4534_v55  ;;  %v4967_v8 = vmul.f32 %v4935_v13, %v10406_v49  ;;  %12551 = vst [vmem:[#allocation12_spill] sm:$0xff] %v10435_v44  ;;  %v12553_v53 = vld [vmem:[#allocation61_spill] sm:$0xff] }
 0x420   : > { %v10428_v1 = vpop.f32.mrf.mxu1  ;;  %v5065_v34 = vmul.f32 0.7978846, %v5033_v48  ;;  %v4046_v51 = vadd.f32 %v10264_v43, %v12552_v22  ;;  %v10440_v58 = vadd.f32 %v10403_v29, %v4789_v40  ;;  %v4310_v50 = vadd.f32 %v10291_v16, %v4159_v57  ;;  %12554 = vst [vmem:[#allocation48_spill] sm:$0xff] %v10445_v37  ;;  %v10459_v29 = vpop.permute.xlu1 %4717 }
 0x421   : > { %v10430_v42 = vpop.f32.mrf.mxu0  ;;  %v6646_v46 = vpop.eup %6645  ;;  %6655 = vtanh.f32 %v5067_v23  ;;  %v4999_v13 = vmul.f32 0.044715, %v4967_v8  ;;  %v4508_v28 = vadd.f32 %v4507_v3, %v10400_v5  ;;  %v10448_v35 = vadd.f32 %v4583_v18, %v4536_v26  ;;  %12556 = vst [vmem:[#allocation79_spill] sm:$0xff] %v10459_v29  ;;  %v12558_v18 = vld [vmem:[#allocation11_spill] sm:$0xff] }
 0x422   : > { %v6648_v55 = vpop.eup %6647  ;;  %v5141_v48 = vadd.f32 1.0, %v6646_v46  ;;  %6657 = vtanh.f32 %v5065_v34  ;;  %v4165_v43 = vadd.f32 %v10315_v54, %v4046_v51  ;;  %v10452_v22 = vadd.f32 %v10368_v47, %v4310_v50 }
 0x423   : > { %v10412_v15 = vpop.f32.mrf.mxu2  ;;  %v10414_v52 = vpop.f32.mrf.mxu3  ;;  %v5139_v40 = vadd.f32 1.0, %v6648_v55  ;;  %v5031_v8 = vadd.f32 %v4999_v13, %v10406_v49  ;;  %v4933_v54 = vmul.f32 %v10440_v58, %v10440_v58  ;;  %v12557_v47 = vsub.f32 %v10038_v25, %v10173_v60 }
 0x424   : > { %v6650_v45 = vpop.eup %6649  ;;  %12555 = vst [vmem:[#allocation49_spill] sm:$0xff] %v10452_v22  ;;  %v5173_v57 = vmul.f32 0.5, %v5141_v48  ;;  %v4051_v55 = vadd.f32 %v10324_v39, %v12558_v18  ;;  %v10471_v5 = vadd.f32 %v10366_v27, %v4165_v43 }
 0x425   : > { %v6652_v23 = vpop.eup %6651  ;;  %v5137_v34 = vadd.f32 1.0, %v6650_v45  ;;  %v5171_v3 = vmul.f32 0.5, %v5139_v40  ;;  %v4675_v51 = vmul.f32 %v10208_v24, %v12557_v47  ;;  %v5063_v9 = vmul.f32 0.7978846, %v5031_v8 }
 0x426   : > { %v6654_v46 = vpop.eup %6653  ;;  %v5135_v26 = vadd.f32 1.0, %v6652_v23  ;;  %v5205_v45 = vmul.f32 %v5173_v57, %v10300_v33  ;;  %v4538_v47 = vmul.f32 %v10452_v22, %v10452_v22  ;;  %v4965_v43 = vmul.f32 %v4933_v54, %v10440_v58 }
 0x427   : > { %v5169_v50 = vmul.f32 0.5, %v5137_v34  ;;  %v5133_v48 = vadd.f32 1.0, %v6654_v46  ;;  %v6656_v13 = vpop.eup %6655  ;;  %v5203_v23 = vmul.f32 %v5171_v3, %v10318_v11  ;;  %v4787_v11 = vmul.f32 %v10435_v44, %v4675_v51 }
 0x428   : > { %v10473_v40 = vpop.f32.mrf.mxu1  ;;  %v5167_v61 = vmul.f32 0.5, %v5135_v26  ;;  %v6658_v25 = vpop.eup %6657  ;;  %v10480_v39 = vand.u32 4294901760, %v5205_v45  ;;  %v5131_v3 = vadd.f32 1.0, %v6656_v13  ;;  %6659 = vtanh.f32 %v5063_v9 }
 0x429   : > { %v10478_v0 = vpop.f32.mrf.mxu0  ;;  %v5201_v33 = vmul.f32 %v5169_v50, %v10321_v14  ;;  %v5165_v57 = vmul.f32 0.5, %v5133_v48  ;;  %v10483_v34 = vand.u32 4294901760, %v5203_v23  ;;  %v10496_v26 = vpop.permute.xlu0 %4839  ;;  %v5129_v54 = vadd.f32 1.0, %v6658_v25 }
 0x42a   : > { %12559 = vst [vmem:[#allocation53_spill] sm:$0xff] %v10480_v39  ;;  %v5199_v27 = vmul.f32 %v5167_v61, %v10327_v4  ;;  %5260 = vmatpush.msra.mxu0 %v10480_v39  ;;  %5563 = vmatpush.msra.mxu3 %v10480_v39  ;;  %v10491_v8 = vsub.f32 %v5205_v45, %v10480_v39  ;;  %v5163_v48 = vmul.f32 0.5, %v5131_v3  ;;  %v10515_v13 = vpop.permute.xlu2 %4834  ;;  %v10537_v3 = vpop.permute.xlu1 %4829 }
 0x42b   : > { %v10454_v63 = vpop.f32.mrf.mxu2  ;;  %v10456_v16 = vpop.f32.mrf.mxu3  ;;  %12560 = vst [vmem:[#allocation43_spill] sm:$0xff] %v10483_v34  ;;  %v10493_v46 = vand.u32 4294901760, %v5201_v33  ;;  %v5197_v14 = vmul.f32 %v5165_v57, %v10330_v12  ;;  %v10499_v61 = vsub.f32 %v5203_v23, %v10483_v34  ;;  %v10518_v9 = vadd.f32 %v4508_v28, %v10452_v22 }
 0x42c   : > { %12562 = vst [vmem:[#allocation50_spill] sm:$0xff] %v10496_v26  ;;  %v10501_v4 = vand.u32 4294901760, %v5199_v27  ;;  %5262 = vmatpush.msra.mxu0 %v10483_v34  ;;  %5479 = vmatpush.msra.mxu2 %v10491_v8  ;;  %v11996_v50 = vand.u32 4294901760, %v10491_v8  ;;  %v10521_v23 = vadd.f32 %v10378_v41, %v4051_v55  ;;  %v5195_v41 = vmul.f32 %v5163_v48, %v10333_v56 }
 0x42d   : > { %12561 = vst [vmem:[#allocation47_spill] sm:$0xff] %v10493_v46  ;;  %v10510_v12 = vsub.f32 %v5201_v33, %v10493_v46  ;;  %v10512_v45 = vand.u32 4294901760, %v5197_v14  ;;  %5565 = vmatpush.msra.mxu3 %v10483_v34  ;;  %v11999_v25 = vand.u32 4294901760, %v10499_v61  ;;  %v10526_v33 = vadd.f32 %v10496_v26, %v4787_v11 }
 0x42e   : > { %12563 = vst [vmem:[#allocation7_spill] sm:$0xff] %v10501_v4  ;;  %5264 = vmatpush.msra.mxu0 %v10493_v46  ;;  %5482 = vmatpush.msra.mxu2 %v10499_v61  ;;  %v5355_v57 = vsub.f32 %v10491_v8, %v11996_v50  ;;  %v10534_v28 = vsub.f32 %v5199_v27, %v10501_v4  ;;  %v5161_v55 = vmul.f32 0.5, %v5129_v54  ;;  %v4997_v27 = vmul.f32 0.044715, %v4965_v43 }
 0x42f   : > { %12564 = vst [vmem:[#allocation41_spill] sm:$0xff] %v10512_v45  ;;  %5567 = vmatpush.msra.mxu3 %v10493_v46  ;;  %v5361_v26 = vsub.f32 %v10499_v61, %v11999_v25  ;;  %v10546_v44 = vsub.f32 %v5197_v14, %v10512_v45  ;;  %v12002_v50 = vand.u32 4294901760, %v10510_v12  ;;  %v10550_v22 = vadd.f32 %v10448_v35, %v4538_v47  ;;  %v6660_v46 = vpop.eup %6659  ;;  %v12568_v14 = vld [vmem:[#allocation57_spill] sm:$0xff] }
 0x430   : > { %12565 = vst [vmem:[#allocation39_spill] sm:$0xff] %v10515_v13  ;;  %v10540_v11 = vpop.f32.mrf.mxu1  ;;  %5266 = vmatpush.msra.mxu0 %v10501_v4  ;;  %5485 = vmatpush.msra.mxu2 %v10510_v12  ;;  %v5356_v54 = vand.u32 4294901760, %v5355_v57  ;;  %v10556_v48 = vand.u32 4294901760, %v5195_v41  ;;  %v5193_v25 = vmul.f32 %v5161_v55, %v10362_v20  ;;  %v4056_v34 = vadd.f32 %v10387_v36, %v12568_v14 }
 0x431   : > { %12566 = vst [vmem:[#allocation9_spill] sm:$0xff] %v10537_v3  ;;  %v10552_v56 = vpop.f32.mrf.mxu0  ;;  %5569 = vmatpush.msra.mxu3 %v10501_v4  ;;  %v5362_v43 = vand.u32 4294901760, %v5361_v26  ;;  %v5367_v35 = vsub.f32 %v10510_v12, %v12002_v50  ;;  %v12569_v47 = vsub.f32 %v10023_v17, %v10173_v60  ;;  %v5127_v36 = vadd.f32 1.0, %v6660_v46 }
 0x432   : > { %12567 = vst [vmem:[#allocation44_spill] sm:$0xff] %v10556_v48  ;;  %5268 = vmatpush.msra.mxu0 %v10512_v45  ;;  %5357 = vmatpush.msra.mxu1 %v5356_v54  ;;  %v10570_v20 = vand.u32 4294901760, %v5193_v25  ;;  %v10573_v55 = vsub.f32 %v5195_v41, %v10556_v48  ;;  %v12005_v26 = vand.u32 4294901760, %v10534_v28  ;;  %v10578_v14 = vadd.f32 %v10414_v52, %v10471_v5  ;;  %v10613_v39 = vpop.permute.xlu2 %4707 }
 0x433   : > { %v10503_v51 = vpop.f32.mrf.mxu2  ;;  %v10505_v18 = vpop.f32.mrf.mxu3  ;;  %v4673_v57 = vmul.f32 %v10208_v24, %v12569_v47  ;;  %5488 = vmatpush.msra.mxu2 %v10534_v28  ;;  %5571 = vmatpush.msra.mxu3 %v10512_v45  ;;  %v5029_v17 = vadd.f32 %v4997_v27, %v10440_v58  ;;  %v4931_v47 = vmul.f32 %v10526_v33, %v10526_v33  ;;  %v5368_v5 = vand.u32 4294901760, %v5367_v35 }
 0x434   : > { %12570 = vst [vmem:[#allocation56_spill] sm:$0xff] %v10578_v14  ;;  %5270 = vmatpush.msra.mxu0 %v10556_v48  ;;  %5363 = vmatpush.msra.mxu1 %v5362_v43  ;;  %v5159_v52 = vmul.f32 0.5, %v5127_v36  ;;  %v5373_v50 = vsub.f32 %v10534_v28, %v12005_v26  ;;  %v10598_v54 = vsub.f32 %v5193_v25, %v10570_v20  ;;  %v12571_v4 = vand.u32 4294901760, %v10546_v44  ;;  %v10604_v36 = vpop.permute.xlu0 %4712 }
 0x435   : > { %5491 = vmatpush.msra.mxu2 %v10546_v44  ;;  %5573 = vmatpush.msra.mxu3 %v10556_v48  ;;  %v5061_v45 = vmul.f32 0.7978846, %v5029_v17  ;;  %v4785_v35 = vmul.f32 %v10445_v37, %v4673_v57  ;;  %12572 = vst [vmem:[#allocation30_spill] sm:$0xff] %v10604_v36  ;;  %v4963_v48 = vmul.f32 %v4931_v47, %v10526_v33 }
 0x436   : > { %v5379_v43 = vsub.f32 %v10546_v44, %v12571_v4  ;;  %5272 = vmatpush.msra.mxu0 %v10570_v20  ;;  %5369 = vmatpush.msra.mxu1 %v5368_v5  ;;  %v5191_v26 = vmul.f32 %v5159_v52, %v10406_v49  ;;  %v5374_v27 = vand.u32 4294901760, %v5373_v50  ;;  %v12573_v25 = vsub.f32 %v12539_v30, %v10173_v60 }
 0x437   : > { %12574 = vst [vmem:[#allocation59_spill] sm:$0xff] %v10613_v39  ;;  %v4318_v4 = vadd.f32 %v10412_v15, %v10521_v23  ;;  %v4510_v57 = vadd.f32 %v10518_v9, %v10578_v14  ;;  %5494 = vmatpush.msra.mxu2 %v10573_v55  ;;  %5575 = vmatpush.msra.mxu3 %v10570_v20  ;;  %6661 = vtanh.f32 %v5061_v45  ;;  %v12575_v50 = vand.u32 4294901760, %v10573_v55  ;;  %v10631_v23 = vpop.permute.xlu1 %4702 }
 0x438   : > { %v4671_v17 = vmul.f32 %v10208_v24, %v12573_v25  ;;  %v10621_v49 = vpop.f32.mrf.mxu1  ;;  %v4540_v47 = vmul.f32 %v10578_v14, %v10578_v14  ;;  %v4177_v5 = vadd.f32 %v10428_v1, %v4056_v34  ;;  %v10629_v15 = vand.u32 4294901760, %v5191_v26  ;;  %5375 = vmatpush.msra.mxu1 %v5374_v27  ;;  %12577 = vst [vmem:[#allocation60_spill] sm:$0xff] %v10631_v23 }
 0x439   : > { %v5385_v30 = vsub.f32 %v10573_v55, %v12575_v50  ;;  %v4995_v9 = vmul.f32 0.044715, %v4963_v48  ;;  %v10634_v52 = vadd.f32 %v10456_v16, %v4318_v4  ;;  %v10636_v25 = vpop.f32.mrf.mxu0  ;;  %5497 = vmatpush.msra.mxu2 %v10598_v54  ;;  %v5380_v45 = vand.u32 4294901760, %v5379_v43 }
 0x43a   : > { %12576 = vst [vmem:[#allocation55_spill] sm:$0xff] %v10629_v15  ;;  %v10640_v50 = vadd.f32 %v10515_v13, %v4785_v35  ;;  %v12010_v37 = vand.u32 4294901760, %v10598_v54  ;;  %5274 = vmatpush.msra.mxu0 %v10629_v15  ;;  %5577 = vmatpush.msra.mxu3 %v10629_v15  ;;  %v10646_v1 = vsub.f32 %v5191_v26, %v10629_v15  ;;  %v10694_v15 = vpop.permute.xlu2 %4819 }
 0x43b   : > { %v10586_v41 = vpop.f32.mrf.mxu2  ;;  %v10588_v46 = vpop.f32.mrf.mxu3  ;;  %v5027_v16 = vadd.f32 %v4995_v9, %v10526_v33  ;;  %v4783_v34 = vmul.f32 %v10459_v29, %v4671_v17  ;;  %5381 = vmatpush.msra.mxu1 %v5380_v45  ;;  %v5386_v48 = vand.u32 4294901760, %v5385_v30  ;;  %v12578_v35 = vsub.f32 %v12542_v62, %v10173_v60  ;;  %12582 = vst [vmem:[#allocation75_spill] sm:$0xff] %v10694_v15 }
 0x43c   : > { %v4929_v27 = vmul.f32 %v10640_v50, %v10640_v50  ;;  %v5391_v43 = vsub.f32 %v10598_v54, %v12010_v37  ;;  %v4586_v26 = vadd.f32 %v10550_v22, %v4540_v47  ;;  %5500 = vmatpush.msra.mxu2 %v10646_v1  ;;  %v12015_v45 = vand.u32 4294901760, %v10646_v1 }
 0x43d   : > { %v4669_v4 = vmul.f32 %v10208_v24, %v12578_v35  ;;  %v5059_v17 = vmul.f32 0.7978846, %v5027_v16  ;;  %v10666_v30 = vadd.f32 %v10537_v3, %v4783_v34  ;;  %v6662_v37 = vpop.eup %6661  ;;  %5387 = vmatpush.msra.mxu1 %v5386_v48  ;;  %v12579_v22 = vsub.f32 %v12549_v10, %v10173_v60 }
 0x43e   : > { %v4961_v62 = vmul.f32 %v4929_v27, %v10640_v50  ;;  %v5392_v29 = vand.u32 4294901760, %v5391_v43  ;;  %v12580_v35 = vsub.f32 %v12550_v21, %v10173_v60  ;;  %v5125_v14 = vadd.f32 1.0, %v6662_v37 }
 0x43f   : > { %v4667_v47 = vmul.f32 %v10208_v24, %v12579_v22  ;;  %6663 = vtanh.f32 %v5059_v17  ;;  %v4927_v34 = vmul.f32 %v10666_v30, %v10666_v30  ;;  %v5397_v48 = vsub.f32 %v10646_v1, %v12015_v45  ;;  %v10690_v17 = vpop.permute.xlu0 %4824 }
 0x440   : > { %v4665_v16 = vmul.f32 %v10208_v24, %v12580_v35  ;;  %v4061_v27 = vadd.f32 %v10430_v42, %v10211_v38  ;;  %v4542_v10 = vmul.f32 %v10634_v52, %v10634_v52  ;;  %v4993_v43 = vmul.f32 0.044715, %v4961_v62  ;;  %5393 = vmatpush.msra.mxu1 %v5392_v29  ;;  %v10687_v21 = vpop.f32.mrf.mxu1  ;;  %12581 = vst [vmem:[#allocation45_spill] sm:$0xff] %v10690_v17 }
 0x441   : > { %v4781_v37 = vmul.f32 %v10604_v36, %v4669_v4  ;;  %v4322_v22 = vadd.f32 %v10454_v63, %v4177_v5  ;;  %v5157_v35 = vmul.f32 0.5, %v5125_v14  ;;  %v4959_v3 = vmul.f32 %v4927_v34, %v10666_v30  ;;  %v10705_v5 = vpop.permute.xlu1 %4814 }
 0x442   : > { %v5398_v45 = vand.u32 4294901760, %v5397_v48  ;;  %v4511_v38 = vadd.f32 %v4510_v57, %v10634_v52  ;;  %v4183_v42 = vadd.f32 %v10473_v40, %v4061_v27  ;;  %v5025_v29 = vadd.f32 %v4993_v43, %v10640_v50  ;;  %12583 = vst [vmem:[#allocation58_spill] sm:$0xff] %v10705_v5  ;;  %v10712_v48 = vpop.f32.mrf.mxu0 }
 0x443   : > { %v10660_v13 = vpop.f32.mrf.mxu2  ;;  %v10662_v9 = vpop.f32.mrf.mxu3  ;;  %v10700_v62 = vadd.f32 %v10690_v17, %v4781_v37  ;;  %v5189_v4 = vmul.f32 %v5157_v35, %v10440_v58  ;;  %v4991_v36 = vmul.f32 0.044715, %v4959_v3  ;;  %v4779_v63 = vmul.f32 %v10613_v39, %v4667_v47 }
 0x444   : > { %5399 = vmatpush.msra.mxu1 %v5398_v45  ;;  %v4777_v14 = vmul.f32 %v10631_v23, %v4665_v16  ;;  %v10707_v34 = vadd.f32 %v4586_v26, %v4542_v10  ;;  %v10710_v57 = vadd.f32 %v10505_v18, %v4322_v22  ;;  %v5057_v40 = vmul.f32 0.7978846, %v5025_v29 }
 0x445   : > { %v4925_v27 = vmul.f32 %v10700_v62, %v10700_v62  ;;  %v6664_v58 = vpop.eup %6663  ;;  %v10716_v3 = vand.u32 4294901760, %v5189_v4  ;;  %v5023_v45 = vadd.f32 %v4991_v36, %v10666_v30  ;;  %v10724_v26 = vadd.f32 %v10694_v15, %v4779_v63 }
 0x446   : > { %v10727_v18 = vadd.f32 %v10705_v5, %v4777_v14  ;;  %v4066_v10 = vadd.f32 %v10478_v0, %v10214_v31  ;;  %v4326_v43 = vadd.f32 %v10503_v51, %v4183_v42  ;;  %v5123_v37 = vadd.f32 1.0, %v6664_v58 }
 0x447   : > { %6665 = vtanh.f32 %v5057_v40  ;;  %5276 = vmatpush.msra.mxu0 %v10716_v3  ;;  %5579 = vmatpush.msra.mxu3 %v10716_v3  ;;  %v10735_v36 = vsub.f32 %v5189_v4, %v10716_v3  ;;  %v5055_v22 = vmul.f32 0.7978846, %v5023_v45  ;;  %v4957_v35 = vmul.f32 %v4925_v27, %v10700_v62 }
 0x448   : > { %v4923_v29 = vmul.f32 %v10724_v26, %v10724_v26  ;;  %v4512_v63 = vadd.f32 %v4511_v38, %v10710_v57  ;;  %v5155_v0 = vmul.f32 0.5, %v5123_v37  ;;  %v4921_v31 = vmul.f32 %v10727_v18, %v10727_v18  ;;  %v10743_v51 = vpop.f32.mrf.mxu1 }
 0x449   : > { %v12584_v42 = vsub.f32 %v12553_v53, %v10173_v60  ;;  %5503 = vmatpush.msra.mxu2 %v10735_v36  ;;  %6667 = vtanh.f32 %v5055_v22  ;;  %v4989_v14 = vmul.f32 0.044715, %v4957_v35  ;;  %v12019_v40 = vand.u32 4294901760, %v10735_v36  ;;  %v10757_v60 = vpop.permute.xlu0 %4697 }
 0x44a   : > { %v4955_v27 = vmul.f32 %v4923_v29, %v10724_v26  ;;  %v4544_v38 = vmul.f32 %v10710_v57, %v10710_v57  ;;  %v4189_v58 = vadd.f32 %v10540_v11, %v4066_v10  ;;  %v5187_v45 = vmul.f32 %v5155_v0, %v10526_v33  ;;  %12585 = vst [vmem:[#allocation62_spill] sm:$0xff] %v10757_v60 }
 0x44b   : > { %v10719_v47 = vpop.f32.mrf.mxu2  ;;  %v10721_v16 = vpop.f32.mrf.mxu3  ;;  %v4663_v4 = vmul.f32 %v10208_v24, %v12584_v42  ;;  %v4953_v37 = vmul.f32 %v4921_v31, %v10727_v18  ;;  %v4071_v24 = vadd.f32 %v10552_v56, %v10221_v32  ;;  %v5021_v53 = vadd.f32 %v4989_v14, %v10700_v62 }
 0x44c   : > { %v5403_v22 = vsub.f32 %v10735_v36, %v12019_v40  ;;  %v4987_v35 = vmul.f32 0.044715, %v4955_v27  ;;  %v10765_v42 = vpop.permute.xlu2 %4809  ;;  %v10768_v11 = vadd.f32 %v10588_v46, %v4326_v43  ;;  %v10770_v33 = vand.u32 4294901760, %v5187_v45  ;;  %v10784_v27 = vpop.f32.mrf.mxu0 }
 0x44d   : > { %v6666_v29 = vpop.eup %6665  ;;  %12586 = vst [vmem:[#allocation67_spill] sm:$0xff] %v10765_v42  ;;  %v4985_v10 = vmul.f32 0.044715, %v4953_v37  ;;  %v4775_v0 = vmul.f32 %v10757_v60, %v4663_v4  ;;  %v5053_v32 = vmul.f32 0.7978846, %v5021_v53  ;;  %v4330_v53 = vadd.f32 %v10586_v41, %v4189_v58 }
 0x44e   : > { %v5121_v31 = vadd.f32 1.0, %v6666_v29  ;;  %v5404_v56 = vand.u32 4294901760, %v5403_v22  ;;  %v5019_v14 = vadd.f32 %v4987_v35, %v10724_v26  ;;  %5278 = vmatpush.msra.mxu0 %v10770_v33  ;;  %5581 = vmatpush.msra.mxu3 %v10770_v33  ;;  %v10781_v46 = vsub.f32 %v5187_v45, %v10770_v33 }
 0x44f   : > { %v5017_v43 = vadd.f32 %v4985_v10, %v10727_v18  ;;  %v10787_v4 = vadd.f32 %v10765_v42, %v4775_v0  ;;  %v6668_v37 = vpop.eup %6667  ;;  %6669 = vtanh.f32 %v5053_v32  ;;  %v5207_v0 = vld [vmem:[%s11776_s10] sm:$0xff]  ;;  %v4546_v41 = vmul.f32 %v10768_v11, %v10768_v11 }
 0x450   : > { %v5153_v22 = vmul.f32 0.5, %v5121_v31  ;;  %5405 = vmatpush.msra.mxu1 %v5404_v56  ;;  %v5051_v35 = vmul.f32 0.7978846, %v5019_v14  ;;  %5506 = vmatpush.msra.mxu2 %v10781_v46  ;;  %v5119_v29 = vadd.f32 1.0, %v6668_v37  ;;  %v12023_v45 = vand.u32 4294901760, %v10781_v46  ;;  %v10801_v32 = vpop.f32.mrf.mxu1 }
 0x451   : > { %v5049_v60 = vmul.f32 0.7978846, %v5017_v43  ;;  %v4919_v10 = vmul.f32 %v10787_v4, %v10787_v4  ;;  %v4195_v58 = vadd.f32 %v10621_v49, %v4071_v24  ;;  %v4588_v37 = vadd.f32 %v10707_v34, %v4544_v38 }
 0x452   : > { %v5185_v31 = vmul.f32 %v5153_v22, %v10640_v50  ;;  %6671 = vtanh.f32 %v5051_v35  ;;  %v5151_v56 = vmul.f32 0.5, %v5119_v29  ;;  %v5409_v14 = vsub.f32 %v10781_v46, %v12023_v45 }
 0x453   : > { %v10774_v5 = vpop.f32.mrf.mxu2  ;;  %v10776_v40 = vpop.f32.mrf.mxu3  ;;  %6673 = vtanh.f32 %v5049_v60  ;;  %v4951_v43 = vmul.f32 %v4919_v10, %v10787_v4  ;;  %v10809_v42 = vadd.f32 %v10662_v9, %v4330_v53  ;;  %v10813_v49 = vand.u32 4294901760, %v5207_v0 }
 0x454   : > { %v10811_v15 = vand.u32 4294901760, %v5185_v31  ;;  %v4513_v50 = vadd.f32 %v4512_v63, %v10768_v11  ;;  %v5183_v24 = vmul.f32 %v5151_v56, %v10666_v30  ;;  %v5410_v22 = vand.u32 4294901760, %v5409_v14 }
 0x455   : > { %v4983_v35 = vmul.f32 0.044715, %v4951_v43  ;;  %v6670_v29 = vpop.eup %6669  ;;  %v4589_v45 = vadd.f32 %v4588_v37, %v4546_v41  ;;  %v4076_v60 = vadd.f32 %v10636_v25, %v10235_v7  ;;  %v4334_v30 = vadd.f32 %v10660_v13, %v4195_v58 }
 0x456   : > { %5280 = vmatpush.msra.mxu0 %v10811_v15  ;;  %5583 = vmatpush.msra.mxu3 %v10811_v15  ;;  %v10822_v9 = vsub.f32 %v5185_v31, %v10811_v15  ;;  %v10829_v63 = vand.u32 4294901760, %v5183_v24  ;;  %v5117_v53 = vadd.f32 1.0, %v6670_v29  ;;  %v4514_v25 = vadd.f32 %v4513_v50, %v10809_v42  ;;  %v4090_v50 = vpop.f32.mrf.mxu0 }
 0x457   : > { %5411 = vmatpush.msra.mxu1 %v5410_v22  ;;  %v5015_v10 = vadd.f32 %v4983_v35, %v10787_v4  ;;  %v4548_v41 = vmul.f32 %v10809_v42, %v10809_v42  ;;  %v10838_v56 = vsub.f32 %v5207_v0, %v10813_v49  ;;  %v4201_v22 = vadd.f32 %v10687_v21, %v4076_v60  ;;  %v5208_v21 = vld [vmem:[%s11776_s10 + $0x8] sm:$0xff] }
 0x458   : > { %v6672_v7 = vpop.eup %6671  ;;  %5509 = vmatpush.msra.mxu2 %v10822_v9  ;;  %v12027_v31 = vand.u32 4294901760, %v10822_v9  ;;  %5282 = vmatpush.msra.mxu0 %v10829_v63  ;;  %v5149_v58 = vmul.f32 0.5, %v5117_v53  ;;  %v10843_v14 = vsub.f32 %v5183_v24, %v10829_v63  ;;  %v10847_v35 = vadd.f32 %v10721_v16, %v4334_v30 }
 0x459   : > { %v6674_v13 = vpop.eup %6673  ;;  %5585 = vmatpush.msra.mxu3 %v10829_v63  ;;  %v5115_v43 = vadd.f32 1.0, %v6672_v7  ;;  %v5047_v37 = vmul.f32 0.7978846, %v5015_v10  ;;  %v4081_v16 = vadd.f32 %v10712_v48, %v10243_v19  ;;  %v10861_v10 = vand.u32 4294901760, %v10838_v56  ;;  %v4218_v7 = vpop.f32.mrf.mxu1 }
 0x45a   : > { %v5113_v29 = vadd.f32 1.0, %v6674_v13  ;;  %v5415_v0 = vsub.f32 %v10822_v9, %v12027_v31  ;;  %v5181_v23 = vmul.f32 %v5149_v58, %v10700_v62  ;;  %5512 = vmatpush.msra.mxu2 %v10843_v14  ;;  %v12026_v24 = vand.u32 4294901760, %v10843_v14 }
 0x45b   : > { %v10824_v34 = vpop.f32.mrf.mxu2  ;;  %v10826_v38 = vpop.f32.mrf.mxu3  ;;  %v5147_v53 = vmul.f32 0.5, %v5115_v43  ;;  %6675 = vtanh.f32 %v5047_v37  ;;  %v10863_v62 = vadd.f32 %v4589_v45, %v4548_v41  ;;  %v4338_v37 = vadd.f32 %v10719_v47, %v4201_v22 }
 0x45c   : > { %v5145_v60 = vmul.f32 0.5, %v5113_v29  ;;  %v5416_v30 = vand.u32 4294901760, %v5415_v0  ;;  %v10865_v13 = vand.u32 4294901760, %v5181_v23  ;;  %v5421_v43 = vsub.f32 %v10843_v14, %v12026_v24 }
 0x45d   : > { %v5179_v58 = vmul.f32 %v5147_v53, %v10724_v26  ;;  %v4207_v48 = vadd.f32 %v10743_v51, %v4081_v16  ;;  %v10874_v29 = vand.u32 4294901760, %v5208_v21  ;;  %v4515_v45 = vadd.f32 %v4514_v25, %v10847_v35 }
 0x45e   : > { %v5177_v19 = vmul.f32 %v5145_v60, %v10727_v18  ;;  %5417 = vmatpush.msra.mxu1 %v5416_v30  ;;  %5284 = vmatpush.msra.mxu0 %v10865_v13  ;;  %v10882_v41 = vsub.f32 %v5181_v23, %v10865_v13  ;;  %v4086_v47 = vadd.f32 %v10784_v27, %v10246_v6  ;;  %v5422_v51 = vand.u32 4294901760, %v5421_v43 }
 0x45f   : > { %5587 = vmatpush.msra.mxu3 %v10865_v13  ;;  %v10879_v26 = vand.u32 4294901760, %v5179_v58  ;;  %v5294_v22 = vsub.f32 %v10838_v56, %v10861_v10  ;;  %v10891_v25 = vadd.f32 %v10776_v40, %v4338_v37  ;;  %v4091_v27 = vadd.f32 %v4090_v50, %v10251_v59  ;;  %v4095_v50 = vpop.f32.mrf.mxu0 }
 0x460   : > { %v10886_v18 = vand.u32 4294901760, %v5177_v19  ;;  %5515 = vmatpush.msra.mxu2 %v10882_v41  ;;  %v12025_v6 = vand.u32 4294901760, %v10882_v41  ;;  %v4213_v60 = vadd.f32 %v10801_v32, %v4086_v47  ;;  %5423 = vmatpush.msra.mxu1 %v5422_v51  ;;  %v4342_v43 = vadd.f32 %v10774_v5, %v4207_v48  ;;  %v5209_v51 = vld [vmem:[%s11776_s10 + $0x10] sm:$0xff] }
 0x461   : > { %v6676_v16 = vpop.eup %6675  ;;  %5286 = vmatpush.msra.mxu0 %v10879_v26  ;;  %v10896_v23 = vsub.f32 %v5179_v58, %v10879_v26  ;;  %5589 = vmatpush.msra.mxu3 %v10879_v26  ;;  %v10907_v37 = vsub.f32 %v5208_v21, %v10874_v29  ;;  %v4550_v58 = vmul.f32 %v10847_v35, %v10847_v35  ;;  %v10918_v21 = vand.u32 4294901760, %v5294_v22  ;;  %v4224_v24 = vpop.f32.mrf.mxu1 }
 0x462   : > { %v5111_v30 = vadd.f32 1.0, %v6676_v16  ;;  %v10903_v40 = vsub.f32 %v5177_v19, %v10886_v18  ;;  %v5427_v59 = vsub.f32 %v10882_v41, %v12025_v6  ;;  %v4219_v19 = vadd.f32 %v4218_v7, %v4091_v27 }
 0x463   : > { %v4442_v0 = vpop.f32.mrf.mxu3  ;;  %v4349_v53 = vpop.f32.mrf.mxu2  ;;  %5288 = vmatpush.msra.mxu0 %v10886_v18  ;;  %5518 = vmatpush.msra.mxu2 %v10896_v23  ;;  %v12029_v32 = vand.u32 4294901760, %v10896_v23  ;;  %v10922_v47 = vadd.f32 %v10826_v38, %v4342_v43  ;;  %v4552_v16 = vmul.f32 %v10891_v25, %v10891_v25  ;;  %v4346_v27 = vadd.f32 %v10824_v34, %v4213_v60 }
 0x464   : > { %5591 = vmatpush.msra.mxu3 %v10886_v18  ;;  %v5143_v5 = vmul.f32 0.5, %v5111_v30  ;;  %v12031_v48 = vand.u32 4294901760, %v10903_v40  ;;  %v5428_v7 = vand.u32 4294901760, %v5427_v59  ;;  %v10939_v43 = vand.u32 4294901760, %v10907_v37 }
 0x465   : > { %5521 = vmatpush.msra.mxu2 %v10903_v40  ;;  %v5433_v22 = vsub.f32 %v10896_v23, %v12029_v32  ;;  %v4096_v6 = vadd.f32 %v4095_v50, %v10253_v2  ;;  %v10942_v39 = vand.u32 4294901760, %v5209_v51  ;;  %v4350_v32 = vadd.f32 %v4349_v53, %v4219_v19 }
 0x466   : > { %v5175_v30 = vmul.f32 %v5143_v5, %v10787_v4  ;;  %v5439_v38 = vsub.f32 %v10903_v40, %v12031_v48  ;;  %5429 = vmatpush.msra.mxu1 %v5428_v7  ;;  %v10944_v17 = vadd.f32 %v4442_v0, %v4346_v27  ;;  %v4591_v4 = vadd.f32 %v10863_v62, %v4550_v58 }
 0x467   : > { %v5434_v59 = vand.u32 4294901760, %v5433_v22  ;;  %v4554_v60 = vmul.f32 %v10922_v47, %v10922_v47  ;;  %v4516_v5 = vadd.f32 %v4515_v45, %v10891_v25  ;;  %v4225_v50 = vadd.f32 %v4224_v24, %v4096_v6  ;;  %v5210_v6 = vld [vmem:[%s11776_s10 + $0x18] sm:$0xff] }
 0x468   : > { %v10947_v34 = vand.u32 4294901760, %v5175_v30  ;;  %v5440_v2 = vand.u32 4294901760, %v5439_v38  ;;  %v4592_v0 = vadd.f32 %v4591_v4, %v4552_v16  ;;  %v5302_v62 = vsub.f32 %v10907_v37, %v10939_v43 }
 0x469   : > { %5435 = vmatpush.msra.mxu1 %v5434_v59  ;;  %v4517_v45 = vadd.f32 %v4516_v5, %v10922_v47  ;;  %v4556_v24 = vmul.f32 %v10944_v17, %v10944_v17  ;;  %v12588_v27 = vand.u32 4294901760, %v10499_v61  ;;  %v10987_v38 = vand.u32 4294901760, %v5210_v6 }
 0x46a   : > { %5290 = vmatpush.msra.mxu0 %v10947_v34  ;;  %5593 = vmatpush.msra.mxu3 %v10947_v34  ;;  %v10957_v53 = vsub.f32 %v5175_v30, %v10947_v34  ;;  %v4593_v16 = vadd.f32 %v4592_v0, %v4554_v60  ;;  %v10985_v30 = vand.u32 4294901760, %v5302_v62  ;;  %v12590_v61 = vand.u32 4294901760, %v10510_v12 }
 0x46b   : > { %v4446_v31 = vpop.f32.mrf.mxu3  ;;  %v4353_v58 = vpop.f32.mrf.mxu2  ;;  %5296 = vmatmul.f32.vlgmr.msra.gmra.mxu0 %v10918_v21  ;;  %5441 = vmatpush.msra.mxu1 %v5440_v2  ;;  %12589 = vst [vmem:[#allocation13_spill] sm:$0xff] %v10987_v38 }
 0x46c   : > { %v10952_v48 = vadd.f32 %v4446_v31, %v4350_v32  ;;  %v10964_v31 = vsub.f32 %v5209_v51, %v10942_v39  ;;  %v12587_v32 = vand.u32 4294901760, %v10491_v8  ;;  %5524 = vmatpush.msra.mxu2 %v10957_v53  ;;  %v5444_v19 = vand.u32 4294901760, %v10957_v53  ;;  %5597 = vmatmul.f32.vlgmr.msra.gmra.mxu3 %v10861_v10 }
 0x46d   : > { %5527 = vmatmul.f32.vlgmr.msra.gmra.mxu2 %v10838_v56  ;;  %v4518_v51 = vadd.f32 %v4517_v45, %v10944_v17  ;;  %v4354_v7 = vadd.f32 %v4353_v58, %v4225_v50  ;;  %v4594_v60 = vadd.f32 %v4593_v16, %v4556_v24  ;;  %v12591_v45 = vand.u32 4294901760, %v10534_v28  ;;  %v5211_v28 = vld [vmem:[%s11776_s10 + $0x20] sm:$0xff] }
 0x46e   : > { %5642 = vmatpush.msrb.mxu0 %v12587_v32  ;;  %v4558_v22 = vmul.f32 %v10952_v48, %v10952_v48  ;;  %v5445_v8 = vsub.f32 %v10957_v53, %v5444_v19  ;;  %v10990_v4 = vand.u32 4294901760, %v10964_v31  ;;  %v11003_v24 = vsub.f32 %v5210_v6, %v10987_v38 }
 0x46f   : > { %v4519_v5 = vadd.f32 %v4518_v51, %v10952_v48  ;;  %v12592_v51 = vand.u32 4294901760, %v10546_v44 }
 0x470   : > { %5646 = vmatpush.msrb.mxu0 %v12588_v27  ;;  %v5446_v50 = vand.u32 4294901760, %v5445_v8  ;;  %v4595_v0 = vadd.f32 %v4594_v60, %v4558_v22  ;;  %v5310_v12 = vsub.f32 %v10964_v31, %v10990_v4  ;;  %v12594_v27 = vand.u32 4294901760, %v10573_v55  ;;  %v12595_v8 = vld [vmem:[#allocation43_spill] sm:$0xff] }
 0x471   : > { %v11021_v44 = vand.u32 4294901760, %v11003_v24  ;;  %v11025_v60 = vand.u32 4294901760, %v5211_v28  ;;  %v12599_v55 = vand.u32 4294901760, %v10646_v1 }
 0x472   : > { %5650 = vmatpush.msrb.mxu0 %v12590_v61  ;;  %5447 = vmatpush.msra.mxu1 %v5446_v50  ;;  %v12597_v50 = vand.u32 4294901760, %v10598_v54 }
 0x473   : > { %v4450_v59 = vpop.f32.mrf.mxu3  ;;  %5304 = vmatmul.f32.gmra.mxu0 %v10985_v30  ;;  %5449 = vmatmul.f32.vlgmr.msra.gmra.mxu1 %v10813_v49  ;;  %12596 = vst [vmem:[#allocation64_spill] sm:$0xff] %v11025_v60 }
 0x474   : > { %v10993_v2 = vadd.f32 %v4450_v59, %v4354_v7  ;;  %5654 = vmatpush.msrb.mxu0 %v12591_v45  ;;  %v12593_v7 = vld [vmem:[#allocation53_spill] sm:$0xff]  ;;  %5603 = vmatmul.f32.gmra.mxu3 %v10939_v43  ;;  %v11023_v59 = vand.u32 4294901760, %v5310_v12  ;;  %v12600_v45 = vld [vmem:[#allocation7_spill] sm:$0xff]  ;;  %v5318_v12 = vsub.f32 %v11003_v24, %v11021_v44 }
 0x475   : > { %5733 = vmatpush.msrb.mxu1 %v12593_v7  ;;  %5532 = vmatmul.f32.gmra.mxu2 %v10907_v37  ;;  %v12603_v7 = vld [vmem:[#allocation41_spill] sm:$0xff] }
 0x476   : > { %v4520_v58 = vadd.f32 %v4519_v5, %v10993_v2  ;;  %v4560_v62 = vmul.f32 %v10993_v2, %v10993_v2  ;;  %5658 = vmatpush.msrb.mxu0 %v12592_v51  ;;  %v12602_v51 = vand.u32 4294901760, %v10735_v36 }
 0x477   : > { %5735 = vmatpush.msrb.mxu1 %v12595_v8  ;;  %v11051_v8 = vand.u32 4294901760, %v5318_v12 }
 0x478   : > { %v4521_v32 = vrot.slane %v4520_v58, 4  ;;  %v4596_v16 = vadd.f32 %v4595_v0, %v4560_v62  ;;  %5662 = vmatpush.msrb.mxu0 %v12594_v27  ;;  %v12598_v0 = vld [vmem:[#allocation47_spill] sm:$0xff]  ;;  %v12605_v27 = vld [vmem:[#allocation44_spill] sm:$0xff] }
 0x479   : > { %5737 = vmatpush.msrb.mxu1 %v12598_v0 }
 0x47a   : > { %v4522_v6 = vadd.f32 %v4521_v32, %v4520_v58  ;;  %v4597_v22 = vrot.slane %v4596_v16, 4  ;;  %5666 = vmatpush.msrb.mxu0 %v12597_v50  ;;  %v11038_v32 = vsub.f32 %v5211_v28, %v11025_v60  ;;  %v12604_v28 = vand.u32 4294901760, %v10781_v46 }
 0x47b   : > { %5739 = vmatpush.msrb.mxu1 %v12600_v45  ;;  %5312 = vmatmul.f32.gmra.mxu0 %v11023_v59  ;;  %v12611_v45 = vld [vmem:[#allocation55_spill] sm:$0xff] }
 0x47c   : > { %v4523_v5 = vrot.slane %v4522_v6, 2  ;;  %v4598_v61 = vadd.f32 %v4597_v22, %v4596_v16  ;;  %5670 = vmatpush.msrb.mxu0 %v12599_v55  ;;  %5453 = vmatmul.f32.gmra.mxu1 %v10874_v29  ;;  %12601 = vst [vmem:[#allocation68_spill] sm:$0xff] %v11038_v32  ;;  %v5212_v22 = vld [vmem:[%s11776_s10 + $0x28] sm:$0xff]  ;;  %v11054_v36 = vand.u32 4294901760, %v11038_v32  ;;  %v12610_v55 = vand.u32 4294901760, %v10843_v14  ;;  %v5213_v14 = vld [vmem:[%s11776_s10 + $0x30] sm:$0xff] }
 0x47d   : > { %5741 = vmatpush.msrb.mxu1 %v12603_v7  ;;  %5537 = vmatmul.f32.gmra.mxu2 %v10964_v31  ;;  %v11059_v0 = vand.u32 4294901760, %v5212_v22 }
 0x47e   : > { %v4524_v58 = vadd.f32 %v4523_v5, %v4522_v6  ;;  %v4599_v62 = vrot.slane %v4598_v61, 2  ;;  %5674 = vmatpush.msrb.mxu0 %v12602_v51  ;;  %5609 = vmatmul.f32.gmra.mxu3 %v10990_v4  ;;  %12606 = vst [vmem:[#allocation76_spill] sm:$0xff] %v11054_v36  ;;  %v12607_v5 = vld [vmem:[#allocation18_spill] sm:$0xff]  ;;  %v12614_v51 = vand.u32 4294901760, %v10896_v23 }
 0x47f   : > { %5743 = vmatpush.msrb.mxu1 %v12605_v27  ;;  %12608 = vst [vmem:[#allocation21_spill] sm:$0xff] %v11059_v0 }
 0x480   : > { %v4525_v54 = vrot.slane %v4524_v58, 1  ;;  %v4600_v16 = vadd.f32 %v4599_v62, %v4598_v61  ;;  %5678 = vmatpush.msrb.mxu0 %v12604_v28 }
 0x481   : > { %5745 = vmatpush.msrb.mxu1 %v10570_v20  ;;  %v11075_v20 = vsub.f32 %v5212_v22, %v11059_v0 }
 0x482   : > { %v4526_v1 = vadd.f32 %v4525_v54, %v4524_v58  ;;  %v4601_v6 = vrot.slane %v4600_v16, 1  ;;  %v12609_v58 = vand.u32 4294901760, %v10822_v9  ;;  %v5326_v9 = vsub.f32 %v11038_v32, %v11054_v36 }
 0x483   : > { %5747 = vmatpush.msrb.mxu1 %v12611_v45  ;;  %5320 = vmatmul.f32.gmra.mxu0 %v11051_v8  ;;  %12612 = vst [vmem:[#allocation78_spill] sm:$0xff] %v11075_v20  ;;  %v12613_v54 = vand.u32 4294901760, %v10882_v41  ;;  %v11091_v41 = vand.u32 4294901760, %v11075_v20  ;;  %v12625_v45 = vld [vmem:[#allocation70_spill] sm:$0xff] }
 0x484   : > { %v11057_v61 = vmul.f32 %v4526_v1, %v12607_v5  ;;  %v4602_v50 = vadd.f32 %v4601_v6, %v4600_v16  ;;  %5682 = vmatpush.msrb.mxu0 %v12609_v58  ;;  %5457 = vmatmul.f32.gmra.mxu1 %v10942_v39  ;;  %v11088_v7 = vand.u32 4294901760, %v5326_v9  ;;  %v12617_v1 = vand.u32 4294901760, %v10903_v40 }
 0x485   : > { %5749 = vmatpush.msrb.mxu1 %v10716_v3  ;;  %5542 = vmatmul.f32.gmra.mxu2 %v11003_v24  ;;  %12615 = vst [vmem:[#allocation38_spill] sm:$0xff] %v11091_v41  ;;  %v11093_v3 = vand.u32 4294901760, %v5213_v14 }
 0x486   : > { %v4604_v46 = vmul.f32 %v4602_v50, %v12607_v5  ;;  %v4606_v62 = vmul.f32 %v11057_v61, %v11057_v61  ;;  %5686 = vmatpush.msrb.mxu0 %v12610_v55  ;;  %5615 = vmatmul.f32.gmra.mxu3 %v11021_v44 }
 0x487   : > { %5751 = vmatpush.msrb.mxu1 %v10770_v33  ;;  %12616 = vst [vmem:[#allocation17_spill] sm:$0xff] %v11093_v3  ;;  %v5333_v33 = vsub.f32 %v11075_v20, %v11091_v41  ;;  %v11106_v23 = vsub.f32 %v5213_v14, %v11093_v3  ;;  %v4636_v14 = vsub.f32 %v10944_v17, %v11057_v61 }
 0x488   : > { %v4608_v12 = vsub.f32 %v4604_v46, %v4606_v62  ;;  %5690 = vmatpush.msrb.mxu0 %v12613_v54  ;;  %v4640_v46 = vsub.f32 %v10993_v2, %v11057_v61  ;;  %v4638_v54 = vsub.f32 %v10952_v48, %v11057_v61  ;;  %v4632_v48 = vsub.f32 %v10891_v25, %v11057_v61 }
 0x489   : > { %5753 = vmatpush.msrb.mxu1 %v10811_v15  ;;  %12618 = vst [vmem:[#allocation10_spill] sm:$0xff] %v11106_v23  ;;  %v5214_v15 = vld [vmem:[%s11776_s10 + $0x38] sm:$0xff]  ;;  %v11115_v53 = vand.u32 4294901760, %v5333_v33  ;;  %v4630_v17 = vsub.f32 %v10847_v35, %v11057_v61  ;;  %v4624_v25 = vsub.f32 %v10710_v57, %v11057_v61  ;;  %v4622_v35 = vsub.f32 %v10634_v52, %v11057_v61 }
 0x48a   : > { %v4642_v16 = vadd.f32 1e-05, %v4608_v12  ;;  %5694 = vmatpush.msrb.mxu0 %v12614_v51  ;;  %v11120_v6 = vand.u32 4294901760, %v5214_v15  ;;  %v12626_v12 = vld [vmem:[#allocation73_spill] sm:$0xff] }
 0x48b   : > { %5755 = vmatpush.msrb.mxu1 %v10829_v63  ;;  %5328 = vmatmul.f32.gmra.mxu0 %v11088_v7  ;;  %12619 = vst [vmem:[#allocation33_spill] sm:$0xff] %v11115_v53 }
 0x48c   : > { %6677 = vrsqrt.f32 %v4642_v16  ;;  %5698 = vmatpush.msrb.mxu0 %v12617_v1  ;;  %5461 = vmatmul.f32.gmra.mxu1 %v10987_v38  ;;  %v11129_v28 = vsub.f32 %v5214_v15, %v11120_v6  ;;  %vm4659_vm12 = vweird.f32 %v4642_v16 }
 0x48d   : > { %5757 = vmatpush.msrb.mxu1 %v10865_v13  ;;  %5547 = vmatmul.f32.gmra.mxu2 %v11038_v32 }
 0x48e   : > { %5702 = vmatpush.msrb.mxu0 %v5444_v19  ;;  %5621 = vmatmul.f32.gmra.mxu3 %v11054_v36  ;;  %v11118_v19 = vand.u32 4294901760, %v11106_v23  ;;  %12621 = vst [vmem:[#allocation16_spill] sm:$0xff] %v11129_v28 }
 0x48f   : > { %5759 = vmatpush.msrb.mxu1 %v10879_v26 }
 0x490   : > { %12620 = vst [vmem:[#allocation26_spill] sm:$0xff] %v11118_v19  ;;  %v5340_v26 = vsub.f32 %v11106_v23, %v11118_v19 }
 0x491   : > { %5761 = vmatpush.msrb.mxu1 %v10886_v18  ;;  %v11136_v18 = vand.u32 4294901760, %v11129_v28 }
 0x492   : > { %v6678_v40 = vpop.eup %6677  ;;  %v11133_v5 = vand.u32 4294901760, %v5340_v26  ;;  %v4628_v26 = vsub.f32 %v10809_v42, %v11057_v61 }
 0x493   : > { %v4654_v63 = vmul.f32 %v6678_v40, %v4642_v16  ;;  %5763 = vmatpush.msrb.mxu1 %v10947_v34  ;;  %5335 = vmatmul.f32.gmra.mxu0 %v11115_v53  ;;  %12623 = vst [vmem:[#allocation14_spill] sm:$0xff] %v11136_v18  ;;  %vm4660_vm11 = vweird.f32 %v6678_v40  ;;  %v5347_v50 = vsub.f32 %v11129_v28, %v11136_v18 }
 0x494   : > { %5465 = vmatmul.f32.gmra.mxu1 %v11025_v60  ;;  %12622 = vst [vmem:[#allocation37_spill] sm:$0xff] %v11133_v5  ;;  %vm4661_vm13 = vmor %vm4659_vm12, %vm4660_vm11  ;;  %v4634_v16 = vsub.f32 %v10922_v47, %v11057_v61  ;;  %v12627_v47 = vld [vmem:[#allocation69_spill] sm:$0xff] }
 0x495   : > { %v4655_v13 = vmul.f32 %v6678_v40, %v4654_v63  ;;  %5551 = vmatmul.f32.gmra.mxu2 %v11075_v20  ;;  %v11149_v55 = vand.u32 4294901760, %v5347_v50  ;;  %v12628_v63 = vld [vmem:[#allocation71_spill] sm:$0xff] }
 0x496   : > { %5626 = vmatmul.f32.gmra.mxu3 %v11091_v41  ;;  %v12629_v50 = vld [vmem:[#allocation31_spill] sm:$0xff] }
 0x497   : > { %v4656_v22 = vmul.f32 0.5, %v4655_v13  ;;  %12624 = vst [vmem:[#allocation52_spill] sm:$0xff] %v11149_v55 }
 0x499   : > { %v4657_v27 = vsub.f32 1.5, %v4656_v22 }
 0x49b   : > { %v4658_v34 = vmul.f32 %v6678_v40, %v4657_v27  ;;  %5342 = vmatmul.f32.gmra.mxu0 %v11133_v5  ;;  %v4626_v27 = vsub.f32 %v10768_v11, %v11057_v61 }
 0x49c   : > { %5468 = vmatmul.f32.gmra.mxu1 %v11059_v0 }
 0x49d   : > { %v11142_v58 = vsel %vm4661_vm13, %v6678_v40, %v4658_v34  ;;  %5555 = vmatmul.f32.gmra.mxu2 %v11106_v23 }
 0x49e   : > { %5631 = vmatmul.f32.gmra.mxu3 %v11118_v19  ;;  %v4694_v62 = vmul.f32 %v11142_v58, %v4640_v46  ;;  %v4692_v1 = vmul.f32 %v11142_v58, %v4638_v54  ;;  %v4690_v33 = vmul.f32 %v11142_v58, %v4636_v14  ;;  %v4688_v22 = vmul.f32 %v11142_v58, %v4634_v16  ;;  %v12632_v54 = vld [vmem:[#allocation56_spill] sm:$0xff]  ;;  %v12633_v14 = vld [vmem:[#allocation49_spill] sm:$0xff] }
 0x49f   : > { %v4686_v42 = vmul.f32 %v11142_v58, %v4632_v48  ;;  %v12634_v16 = vld [vmem:[#allocation72_spill] sm:$0xff]  ;;  %v12636_v48 = vld [vmem:[#allocation29_spill] sm:$0xff]  ;;  %v4682_v52 = vmul.f32 %v11142_v58, %v4628_v26 }
 0x4a0   : > { %v4806_v9 = vmul.f32 %v12625_v45, %v4694_v62  ;;  %v4804_v40 = vmul.f32 %v12627_v47, %v4692_v1  ;;  %v4802_v13 = vmul.f32 %v12628_v63, %v4690_v33  ;;  %v12630_v62 = vld [vmem:[#allocation25_spill] sm:$0xff]  ;;  %v4684_v63 = vmul.f32 %v11142_v58, %v4630_v17 }
 0x4a2   : > { %v11157_v2 = vadd.f32 %v12626_v12, %v4806_v9  ;;  %v11188_v46 = vadd.f32 %v12629_v50, %v4804_v40  ;;  %v11191_v45 = vadd.f32 %v12630_v62, %v4802_v13  ;;  %v12631_v9 = vld [vmem:[#allocation74_spill] sm:$0xff]  ;;  %v4798_v40 = vmul.f32 %v12636_v48, %v4686_v42  ;;  %v12638_v50 = vld [vmem:[#allocation35_spill] sm:$0xff]  ;;  %v12640_v48 = vld [vmem:[#allocation32_spill] sm:$0xff] }
 0x4a3   : > { %5349 = vmatmul.f32.gmra.mxu0 %v11149_v55  ;;  %v4800_v12 = vmul.f32 %v12631_v9, %v4688_v22  ;;  %v12637_v13 = vld [vmem:[#allocation42_spill] sm:$0xff]  ;;  %v4796_v22 = vmul.f32 %v12640_v48, %v4684_v63  ;;  %v12641_v62 = vld [vmem:[#allocation36_spill] sm:$0xff]  ;;  %v4680_v63 = vmul.f32 %v11142_v58, %v4626_v27 }
 0x4a4   : > { %5471 = vmatmul.f32.gmra.mxu1 %v11093_v3  ;;  %v4950_v51 = vmul.f32 %v11157_v2, %v11157_v2  ;;  %v4948_v1 = vmul.f32 %v11188_v46, %v11188_v46  ;;  %v4946_v33 = vmul.f32 %v11191_v45, %v11191_v45 }
 0x4a5   : > { %5559 = vmatmul.f32.gmra.mxu2 %v11129_v28  ;;  %v12642_v28 = vld [vmem:[#allocation22_spill] sm:$0xff] }
 0x4a6   : > { %5636 = vmatmul.f32.gmra.mxu3 %v11136_v18  ;;  %v4982_v15 = vmul.f32 %v4950_v51, %v11157_v2  ;;  %v4980_v9 = vmul.f32 %v4948_v1, %v11188_v46  ;;  %v11232_v18 = vadd.f32 %v12642_v28, %v4796_v22  ;;  %v12645_v28 = vld [vmem:[#allocation27_spill] sm:$0xff] }
 0x4a7   : > { %v4792_v22 = vmul.f32 %v12645_v28, %v4680_v63  ;;  %v12648_v63 = vld [vmem:[#allocation23_spill] sm:$0xff] }
 0x4a8   : > { %v5014_v34 = vmul.f32 0.044715, %v4982_v15  ;;  %v12635_v15 = vld [vmem:[#allocation77_spill] sm:$0xff]  ;;  %v5012_v11 = vmul.f32 0.044715, %v4980_v9 }
 0x4a9   : > { %v11207_v47 = vadd.f32 %v12635_v15, %v4800_v12  ;;  %v4978_v12 = vmul.f32 %v4946_v33, %v11191_v45  ;;  %v12639_v15 = vld [vmem:[#allocation15_spill] sm:$0xff] }
 0x4aa   : > { %v5046_v51 = vadd.f32 %v5014_v34, %v11157_v2  ;;  %v11222_v17 = vadd.f32 %v12639_v15, %v4798_v40  ;;  %v12643_v40 = vld [vmem:[#allocation34_spill] sm:$0xff]  ;;  %v5044_v26 = vadd.f32 %v5012_v11, %v11188_v46  ;;  %v12646_v11 = vld [vmem:[#allocation8_spill] sm:$0xff] }
 0x4ab   : > { %5704 = vmatmul.f32.vlgmr.msrb.gmra.mxu0 %v10813_v49  ;;  %v4944_v42 = vmul.f32 %v11207_v47, %v11207_v47  ;;  %v4794_v15 = vmul.f32 %v12643_v40, %v4682_v52 }
 0x4ac   : > { %5474 = vmatmul.f32.gmra.mxu1 %v11120_v6  ;;  %v5078_v34 = vmul.f32 0.7978846, %v5046_v51  ;;  %v5010_v51 = vmul.f32 0.044715, %v4978_v12  ;;  %v4942_v33 = vmul.f32 %v11222_v17, %v11222_v17  ;;  %v4940_v12 = vmul.f32 %v11232_v18, %v11232_v18 }
 0x4ad   : > { %v4976_v1 = vmul.f32 %v4944_v42, %v11207_v47  ;;  %v12644_v42 = vld [vmem:[#allocation24_spill] sm:$0xff]  ;;  %v5076_v52 = vmul.f32 0.7978846, %v5044_v26  ;;  %v4676_v26 = vmul.f32 %v11142_v58, %v4622_v35 }
 0x4ae   : > { %6679 = vtanh.f32 %v5078_v34  ;;  %v5042_v48 = vadd.f32 %v5010_v51, %v11191_v45  ;;  %v4678_v34 = vmul.f32 %v11142_v58, %v4624_v25  ;;  %v4974_v9 = vmul.f32 %v4942_v33, %v11222_v17  ;;  %v12647_v33 = vld [vmem:[#allocation46_spill] sm:$0xff] }
 0x4af   : > { %v5008_v57 = vmul.f32 0.044715, %v4976_v1  ;;  %v11243_v55 = vadd.f32 %v12644_v42, %v4794_v15  ;;  %v4972_v1 = vmul.f32 %v4940_v12, %v11232_v18  ;;  %v11252_v19 = vadd.f32 %v12647_v33, %v4792_v22 }
 0x4b0   : > { %v5074_v40 = vmul.f32 0.7978846, %v5042_v48  ;;  %v4790_v23 = vmul.f32 %v12646_v11, %v4678_v34  ;;  %v5006_v51 = vmul.f32 0.044715, %v4974_v9  ;;  %6681 = vtanh.f32 %v5076_v52 }
 0x4b1   : > { %v5040_v27 = vadd.f32 %v5008_v57, %v11207_v47  ;;  %v4938_v25 = vmul.f32 %v11243_v55, %v11243_v55  ;;  %v5004_v9 = vmul.f32 0.044715, %v4972_v1  ;;  %v4936_v42 = vmul.f32 %v11252_v19, %v11252_v19 }
 0x4b2   : > { %v11257_v57 = vadd.f32 %v12648_v63, %v4790_v23  ;;  %6683 = vtanh.f32 %v5074_v40  ;;  %v5038_v34 = vadd.f32 %v5006_v51, %v11222_v17  ;;  %v12650_v51 = vsub.f32 %v12632_v54, %v11057_v61 }
 0x4b3   : > { %5708 = vmatmul.f32.gmra.mxu0 %v10874_v29  ;;  %v5072_v15 = vmul.f32 0.7978846, %v5040_v27  ;;  %v4970_v12 = vmul.f32 %v4938_v25, %v11243_v55  ;;  %v5036_v23 = vadd.f32 %v5004_v9, %v11232_v18  ;;  %v12649_v27 = vld [vmem:[#allocation12_spill] sm:$0xff]  ;;  %v4968_v40 = vmul.f32 %v4936_v42, %v11252_v19 }
 0x4b4   : > { %5765 = vmatmul.f32.vlgmr.msrb.gmra.mxu1 %v10813_v49  ;;  %v6680_v5 = vpop.eup %6679  ;;  %v4934_v28 = vmul.f32 %v11257_v57, %v11257_v57  ;;  %v5070_v52 = vmul.f32 0.7978846, %v5038_v34  ;;  %v4788_v35 = vmul.f32 %v12649_v27, %v4676_v26  ;;  %v4674_v1 = vmul.f32 %v11142_v58, %v12650_v51 }
 0x4b5   : > { %v5142_v48 = vadd.f32 1.0, %v6680_v5  ;;  %6685 = vtanh.f32 %v5072_v15  ;;  %v5002_v5 = vmul.f32 0.044715, %v4970_v12  ;;  %v5068_v33 = vmul.f32 0.7978846, %v5036_v23  ;;  %v12651_v15 = vld [vmem:[#allocation50_spill] sm:$0xff] }
 0x4b6   : > { %v4966_v11 = vmul.f32 %v4934_v28, %v11257_v57  ;;  %6687 = vtanh.f32 %v5070_v52  ;;  %v11276_v63 = vadd.f32 %v12651_v15, %v4788_v35  ;;  %v5000_v34 = vmul.f32 0.044715, %v4968_v40  ;;  %v12652_v12 = vld [vmem:[#allocation48_spill] sm:$0xff] }
 0x4b7   : > { %v5174_v22 = vmul.f32 0.5, %v5142_v48  ;;  %v6682_v48 = vpop.eup %6681  ;;  %v5034_v26 = vadd.f32 %v5002_v5, %v11243_v55  ;;  %v4786_v42 = vmul.f32 %v12652_v12, %v4674_v1  ;;  %6689 = vtanh.f32 %v5068_v33 }
 0x4b8   : > { %v4998_v9 = vmul.f32 0.044715, %v4966_v11  ;;  %v6684_v28 = vpop.eup %6683  ;;  %v5140_v54 = vadd.f32 1.0, %v6682_v48  ;;  %v5032_v35 = vadd.f32 %v5000_v34, %v11252_v19 }
 0x4b9   : > { %v5206_v25 = vmul.f32 %v5174_v22, %v11157_v2  ;;  %v4932_v2 = vmul.f32 %v11276_v63, %v11276_v63  ;;  %v5138_v52 = vadd.f32 1.0, %v6684_v28  ;;  %v5066_v23 = vmul.f32 0.7978846, %v5034_v26 }
 0x4ba   : > { %v5030_v5 = vadd.f32 %v4998_v9, %v11257_v57  ;;  %v5172_v40 = vmul.f32 0.5, %v5140_v54  ;;  %v5064_v15 = vmul.f32 0.7978846, %v5032_v35 }
 0x4bb   : > { %5712 = vmatmul.f32.gmra.mxu0 %v10942_v39  ;;  %v11280_v27 = vand.u32 4294901760, %v5206_v25  ;;  %v6686_v22 = vpop.eup %6685  ;;  %v4964_v1 = vmul.f32 %v4932_v2, %v11276_v63  ;;  %v5170_v33 = vmul.f32 0.5, %v5138_v52  ;;  %6691 = vtanh.f32 %v5066_v23 }
 0x4bc   : > { %5769 = vmatmul.f32.gmra.mxu1 %v10874_v29  ;;  %v5136_v51 = vadd.f32 1.0, %v6686_v22  ;;  %v5062_v48 = vmul.f32 0.7978846, %v5030_v5  ;;  %v6688_v26 = vpop.eup %6687  ;;  %v5204_v34 = vmul.f32 %v5172_v40, %v11188_v46  ;;  %6693 = vtanh.f32 %v5064_v15  ;;  %v12653_v22 = vld [vmem:[#allocation39_spill] sm:$0xff] }
 0x4bd   : > { %5794 = vmatpush.msrb.mxu2 %v11280_v27  ;;  %6097 = vmatpush.msra.mxu1 %v11280_v27  ;;  %v11291_v11 = vsub.f32 %v5206_v25, %v11280_v27  ;;  %v4996_v28 = vmul.f32 0.044715, %v4964_v1  ;;  %v5202_v54 = vmul.f32 %v5170_v33, %v11191_v45  ;;  %v5134_v25 = vadd.f32 1.0, %v6688_v26  ;;  %v6690_v2 = vpop.eup %6689 }
 0x4be   : > { %v5168_v9 = vmul.f32 0.5, %v5136_v51  ;;  %v11299_v20 = vadd.f32 %v12653_v22, %v4786_v42  ;;  %v11301_v52 = vand.u32 4294901760, %v5204_v34  ;;  %6695 = vtanh.f32 %v5062_v48 }
 0x4bf   : > { %6013 = vmatpush.msra.mxu0 %v11291_v11  ;;  %v12040_v12 = vand.u32 4294901760, %v11291_v11  ;;  %v11307_v35 = vand.u32 4294901760, %v5202_v54  ;;  %v5166_v5 = vmul.f32 0.5, %v5134_v25  ;;  %v5132_v40 = vadd.f32 1.0, %v6690_v2 }
 0x4c0   : > { %v5200_v23 = vmul.f32 %v5168_v9, %v11207_v47  ;;  %v5028_v45 = vadd.f32 %v4996_v28, %v11276_v63  ;;  %5796 = vmatpush.msrb.mxu2 %v11301_v52  ;;  %6099 = vmatpush.msra.mxu1 %v11301_v52  ;;  %v11313_v42 = vsub.f32 %v5204_v34, %v11301_v52 }
 0x4c1   : > { %v5889_v46 = vsub.f32 %v11291_v11, %v12040_v12  ;;  %v4930_v1 = vmul.f32 %v11299_v20, %v11299_v20  ;;  %v6692_v33 = vpop.eup %6691  ;;  %v11321_v15 = vsub.f32 %v5202_v54, %v11307_v35  ;;  %v5198_v48 = vmul.f32 %v5166_v5, %v11222_v17 }
 0x4c2   : > { %v11315_v51 = vand.u32 4294901760, %v5200_v23  ;;  %v5164_v26 = vmul.f32 0.5, %v5132_v40  ;;  %v5060_v9 = vmul.f32 0.7978846, %v5028_v45  ;;  %5798 = vmatpush.msrb.mxu2 %v11307_v35  ;;  %6016 = vmatpush.msra.mxu0 %v11313_v42  ;;  %v12039_v28 = vand.u32 4294901760, %v11313_v42  ;;  %v6694_v54 = vpop.eup %6693 }
 0x4c3   : > { %5716 = vmatmul.f32.gmra.mxu0 %v10987_v38  ;;  %v5890_v47 = vand.u32 4294901760, %v5889_v46  ;;  %v5130_v25 = vadd.f32 1.0, %v6692_v33  ;;  %v4962_v22 = vmul.f32 %v4930_v1, %v11299_v20  ;;  %6101 = vmatpush.msra.mxu1 %v11307_v35  ;;  %v11333_v17 = vand.u32 4294901760, %v5198_v48 }
 0x4c4   : > { %5773 = vmatmul.f32.gmra.mxu1 %v10942_v39  ;;  %v11328_v34 = vsub.f32 %v5200_v23, %v11315_v51  ;;  %v5196_v2 = vmul.f32 %v5164_v26, %v11232_v18  ;;  %v12041_v46 = vand.u32 4294901760, %v11321_v15  ;;  %6697 = vtanh.f32 %v5060_v9  ;;  %v6696_v5 = vpop.eup %6695  ;;  %5800 = vmatpush.msrb.mxu2 %v11315_v51 }
 0x4c5   : > { %5891 = vmatpush.msrb.mxu3 %v5890_v47  ;;  %6019 = vmatpush.msra.mxu0 %v11321_v15  ;;  %v5895_v23 = vsub.f32 %v11313_v42, %v12039_v28  ;;  %v5162_v40 = vmul.f32 0.5, %v5130_v25  ;;  %v5128_v45 = vadd.f32 1.0, %v6694_v54  ;;  %v11347_v18 = vsub.f32 %v5198_v48, %v11333_v17 }
 0x4c6   : > { %v12044_v1 = vand.u32 4294901760, %v11328_v34  ;;  %6103 = vmatpush.msra.mxu1 %v11315_v51  ;;  %v11344_v47 = vand.u32 4294901760, %v5196_v2  ;;  %v5901_v33 = vsub.f32 %v11321_v15, %v12041_v46  ;;  %v5126_v26 = vadd.f32 1.0, %v6696_v5  ;;  %5802 = vmatpush.msrb.mxu2 %v11333_v17 }
 0x4c7   : > { %6022 = vmatpush.msra.mxu0 %v11328_v34  ;;  %v5896_v9 = vand.u32 4294901760, %v5895_v23  ;;  %v5194_v25 = vmul.f32 %v5162_v40, %v11243_v55  ;;  %v5160_v54 = vmul.f32 0.5, %v5128_v45  ;;  %v12043_v5 = vand.u32 4294901760, %v11347_v18 }
 0x4c8   : > { %v5907_v28 = vsub.f32 %v11328_v34, %v12044_v1  ;;  %6105 = vmatpush.msra.mxu1 %v11333_v17  ;;  %v5902_v48 = vand.u32 4294901760, %v5901_v33  ;;  %v11360_v12 = vsub.f32 %v5196_v2, %v11344_v47  ;;  %v5158_v46 = vmul.f32 0.5, %v5126_v26  ;;  %5804 = vmatpush.msrb.mxu2 %v11344_v47 }
 0x4c9   : > { %5897 = vmatpush.msrb.mxu3 %v5896_v9  ;;  %v11364_v23 = vand.u32 4294901760, %v5194_v25  ;;  %v5192_v55 = vmul.f32 %v5160_v54, %v11252_v19  ;;  %v4994_v45 = vmul.f32 0.044715, %v4962_v22  ;;  %6025 = vmatpush.msra.mxu0 %v11347_v18  ;;  %v5913_v33 = vsub.f32 %v11347_v18, %v12043_v5 }
 0x4ca   : > { %v5908_v40 = vand.u32 4294901760, %v5907_v28  ;;  %v6698_v41 = vpop.eup %6697  ;;  %6107 = vmatpush.msra.mxu1 %v11344_v47  ;;  %v5190_v2 = vmul.f32 %v5158_v46, %v11257_v57  ;;  %v12046_v26 = vand.u32 4294901760, %v11360_v12  ;;  %v12654_v9 = vsub.f32 %v12633_v14, %v11057_v61 }
 0x4cb   : > { %5720 = vmatmul.f32.gmra.mxu0 %v11025_v60  ;;  %5806 = vmatpush.msrb.mxu2 %v11364_v23  ;;  %v11379_v28 = vand.u32 4294901760, %v5192_v55  ;;  %v11382_v22 = vsub.f32 %v5194_v25, %v11364_v23  ;;  %v5124_v57 = vadd.f32 1.0, %v6698_v41  ;;  %v5026_v46 = vadd.f32 %v4994_v45, %v11299_v20 }
 0x4cc   : > { %5777 = vmatmul.f32.gmra.mxu1 %v10987_v38  ;;  %v4672_v19 = vmul.f32 %v11142_v58, %v12654_v9  ;;  %5903 = vmatpush.msrb.mxu3 %v5902_v48  ;;  %v11387_v54 = vand.u32 4294901760, %v5190_v2  ;;  %v5914_v14 = vand.u32 4294901760, %v5913_v33  ;;  %v5919_v9 = vsub.f32 %v11360_v12, %v12046_v26  ;;  %v12655_v48 = vld [vmem:[#allocation79_spill] sm:$0xff]  ;;  %v12656_v26 = vld [vmem:[#allocation9_spill] sm:$0xff] }
 0x4cd   : > { %6028 = vmatpush.msra.mxu0 %v11360_v12  ;;  %6109 = vmatpush.msra.mxu1 %v11364_v23  ;;  %v11395_v41 = vsub.f32 %v5192_v55, %v11379_v28  ;;  %v5156_v25 = vmul.f32 0.5, %v5124_v57  ;;  %v5058_v45 = vmul.f32 0.7978846, %v5026_v46  ;;  %v12047_v1 = vand.u32 4294901760, %v11382_v22 }
 0x4ce   : > { %v4784_v5 = vmul.f32 %v12655_v48, %v4672_v19  ;;  %5808 = vmatpush.msrb.mxu2 %v11379_v28  ;;  %5909 = vmatpush.msrb.mxu3 %v5908_v40  ;;  %v5920_v33 = vand.u32 4294901760, %v5919_v9  ;;  %v11401_v53 = vsub.f32 %v5190_v2, %v11387_v54  ;;  %v12657_v40 = vsub.f32 %v12634_v16, %v11057_v61 }
 0x4cf   : > { %6031 = vmatpush.msra.mxu0 %v11382_v22  ;;  %6111 = vmatpush.msra.mxu1 %v11379_v28  ;;  %v5188_v57 = vmul.f32 %v5156_v25, %v11276_v63  ;;  %6699 = vtanh.f32 %v5058_v45  ;;  %v5925_v46 = vsub.f32 %v11382_v22, %v12047_v1  ;;  %v12048_v2 = vand.u32 4294901760, %v11395_v41 }
 0x4d0   : > { %v11404_v19 = vadd.f32 %v12656_v26, %v4784_v5  ;;  %v4670_v55 = vmul.f32 %v11142_v58, %v12657_v40  ;;  %5810 = vmatpush.msrb.mxu2 %v11387_v54  ;;  %5915 = vmatpush.msrb.mxu3 %v5914_v14  ;;  %v12658_v5 = vld [vmem:[#allocation30_spill] sm:$0xff]  ;;  %v12051_v14 = vand.u32 4294901760, %v11401_v53  ;;  %v12659_v63 = vsub.f32 %v12637_v13, %v11057_v61 }
 0x4d1   : > { %6034 = vmatpush.msra.mxu0 %v11395_v41  ;;  %6113 = vmatpush.msra.mxu1 %v11387_v54  ;;  %v11427_v48 = vand.u32 4294901760, %v5188_v57  ;;  %v5926_v25 = vand.u32 4294901760, %v5925_v46  ;;  %v5931_v45 = vsub.f32 %v11395_v41, %v12048_v2  ;;  %v12660_v40 = vsub.f32 %v12638_v50, %v11057_v61  ;;  %v12662_v46 = vld [vmem:[#allocation59_spill] sm:$0xff] }
 0x4d2   : > { %v4928_v16 = vmul.f32 %v11404_v19, %v11404_v19  ;;  %v4782_v26 = vmul.f32 %v12658_v5, %v4670_v55  ;;  %v4668_v9 = vmul.f32 %v11142_v58, %v12659_v63  ;;  %5921 = vmatpush.msrb.mxu3 %v5920_v33  ;;  %v12661_v5 = vld [vmem:[#allocation45_spill] sm:$0xff]  ;;  %v5937_v33 = vsub.f32 %v11401_v53, %v12051_v14 }
 0x4d3   : > { %v4666_v55 = vmul.f32 %v11142_v58, %v12660_v40  ;;  %6037 = vmatpush.msra.mxu0 %v11401_v53  ;;  %5812 = vmatpush.msrb.mxu2 %v11427_v48  ;;  %v11448_v50 = vsub.f32 %v5188_v57, %v11427_v48  ;;  %v12663_v40 = vld [vmem:[#allocation60_spill] sm:$0xff] }
 0x4d4   : > { %5781 = vmatmul.f32.gmra.mxu1 %v11025_v60  ;;  %v4960_v13 = vmul.f32 %v4928_v16, %v11404_v19  ;;  %v11439_v63 = vadd.f32 %v12661_v5, %v4782_v26  ;;  %v4780_v1 = vmul.f32 %v12662_v46, %v4668_v9  ;;  %v12664_v16 = vsub.f32 %v12641_v62, %v11057_v61  ;;  %v12665_v46 = vld [vmem:[#allocation75_spill] sm:$0xff]  ;;  %v12666_v61 = vld [vmem:[#allocation58_spill] sm:$0xff] }
 0x4d5   : > { %6115 = vmatpush.msra.mxu1 %v11427_v48  ;;  %v4778_v2 = vmul.f32 %v12663_v40, %v4666_v55  ;;  %5927 = vmatpush.msrb.mxu3 %v5926_v25  ;;  %v5932_v60 = vand.u32 4294901760, %v5931_v45  ;;  %v6700_v57 = vpop.eup %6699  ;;  %v5938_v55 = vand.u32 4294901760, %v5937_v33  ;;  %v12052_v40 = vand.u32 4294901760, %v11448_v50 }
 0x4d6   : > { %v4664_v26 = vmul.f32 %v11142_v58, %v12664_v16  ;;  %v4992_v5 = vmul.f32 0.044715, %v4960_v13  ;;  %5723 = vmatmul.f32.gmra.mxu0 %v11059_v0  ;;  %v4926_v9 = vmul.f32 %v11439_v63, %v11439_v63  ;;  %v11459_v14 = vadd.f32 %v12665_v46, %v4780_v1  ;;  %v12667_v58 = vld [vmem:[#allocation62_spill] sm:$0xff] }
 0x4d7   : > { %6040 = vmatpush.msra.mxu0 %v11448_v50  ;;  %v11464_v62 = vadd.f32 %v12666_v61, %v4778_v2  ;;  %v5122_v45 = vadd.f32 1.0, %v6700_v57  ;;  %5933 = vmatpush.msrb.mxu3 %v5932_v60  ;;  %v5943_v33 = vsub.f32 %v11448_v50, %v12052_v40  ;;  %v12668_v2 = vld [vmem:[#allocation67_spill] sm:$0xff] }
 0x4d8   : > { %v4776_v25 = vmul.f32 %v12667_v58, %v4664_v26  ;;  %v5024_v13 = vadd.f32 %v4992_v5, %v11404_v19  ;;  %v4958_v16 = vmul.f32 %v4926_v9, %v11439_v63  ;;  %v4924_v1 = vmul.f32 %v11459_v14, %v11459_v14 }
 0x4d9   : > { %v4922_v46 = vmul.f32 %v11464_v62, %v11464_v62  ;;  %v5154_v26 = vmul.f32 0.5, %v5122_v45  ;;  %5939 = vmatpush.msrb.mxu3 %v5938_v55  ;;  %v5944_v5 = vand.u32 4294901760, %v5943_v33 }
 0x4da   : > { %v11477_v61 = vadd.f32 %v12668_v2, %v4776_v25  ;;  %v5056_v57 = vmul.f32 0.7978846, %v5024_v13  ;;  %v4990_v58 = vmul.f32 0.044715, %v4958_v16  ;;  %v4956_v60 = vmul.f32 %v4924_v1, %v11459_v14 }
 0x4db   : > { %v4954_v9 = vmul.f32 %v4922_v46, %v11464_v62  ;;  %v5186_v32 = vmul.f32 %v5154_v26, %v11299_v20  ;;  %5945 = vmatpush.msrb.mxu3 %v5944_v5 }
 0x4dc   : > { %5784 = vmatmul.f32.gmra.mxu1 %v11059_v0  ;;  %v4920_v40 = vmul.f32 %v11477_v61, %v11477_v61  ;;  %6701 = vtanh.f32 %v5056_v57  ;;  %v5022_v25 = vadd.f32 %v4990_v58, %v11439_v63  ;;  %v4988_v2 = vmul.f32 0.044715, %v4956_v60 }
 0x4dd   : > { %v4986_v45 = vmul.f32 0.044715, %v4954_v9  ;;  %v11487_v13 = vand.u32 4294901760, %v5186_v32 }
 0x4de   : > { %v4952_v55 = vmul.f32 %v4920_v40, %v11477_v61  ;;  %v5054_v16 = vmul.f32 0.7978846, %v5022_v25  ;;  %v5020_v1 = vadd.f32 %v4988_v2, %v11459_v14  ;;  %5726 = vmatmul.f32.gmra.mxu0 %v11093_v3 }
 0x4df   : > { %v5018_v33 = vadd.f32 %v4986_v45, %v11464_v62  ;;  %5814 = vmatpush.msrb.mxu2 %v11487_v13  ;;  %6117 = vmatpush.msra.mxu1 %v11487_v13  ;;  %v11495_v20 = vsub.f32 %v5186_v32, %v11487_v13 }
 0x4e0   : > { %v4984_v46 = vmul.f32 0.044715, %v4952_v55  ;;  %6703 = vtanh.f32 %v5054_v16  ;;  %v5052_v26 = vmul.f32 0.7978846, %v5020_v1  ;;  %v11505_v16 = vpop.permute.xlu0 %5225 }
 0x4e1   : > { %v5050_v57 = vmul.f32 0.7978846, %v5018_v33  ;;  %6043 = vmatpush.msra.mxu0 %v11495_v20  ;;  %v12054_v5 = vand.u32 4294901760, %v11495_v20 }
 0x4e2   : > { %v5016_v58 = vadd.f32 %v4984_v46, %v11477_v61  ;;  %v6702_v60 = vpop.eup %6701  ;;  %6705 = vtanh.f32 %v5052_v26 }
 0x4e3   : > { %v5120_v9 = vadd.f32 1.0, %v6702_v60  ;;  %6707 = vtanh.f32 %v5050_v57  ;;  %v5949_v32 = vsub.f32 %v11495_v20, %v12054_v5 }
 0x4e4   : > { %v5048_v25 = vmul.f32 0.7978846, %v5016_v58  ;;  %5787 = vmatmul.f32.gmra.mxu1 %v11093_v3 }
 0x4e5   : > { %v5152_v2 = vmul.f32 0.5, %v5120_v9  ;;  %v5950_v55 = vand.u32 4294901760, %v5949_v32 }
 0x4e6   : > { %6709 = vtanh.f32 %v5048_v25  ;;  %v6704_v45 = vpop.eup %6703  ;;  %5729 = vmatmul.f32.gmra.mxu0 %v11120_v6 }
 0x4e7   : > { %v5184_v1 = vmul.f32 %v5152_v2, %v11404_v19  ;;  %v5118_v33 = vadd.f32 1.0, %v6704_v45  ;;  %5951 = vmatpush.msrb.mxu3 %v5950_v55 }
 0x4e8   : > { %v5297_v40 = vpop.f32.mrf.mxu0  ;;  %v6706_v46 = vpop.eup %6705 }
 0x4e9   : > { %v5298_v26 = vadd.f32 %v5297_v40, %v11505_v16  ;;  %v6708_v57 = vpop.eup %6707  ;;  %v11509_v58 = vand.u32 4294901760, %v5184_v1  ;;  %v5150_v60 = vmul.f32 0.5, %v5118_v33  ;;  %v5116_v25 = vadd.f32 1.0, %v6706_v46 }
 0x4ea   : > { %v5114_v0 = vadd.f32 1.0, %v6708_v57 }
 0x4eb   : > { %5816 = vmatpush.msrb.mxu2 %v11509_v58  ;;  %6119 = vmatpush.msra.mxu1 %v11509_v58  ;;  %v5182_v19 = vmul.f32 %v5150_v60, %v11439_v63  ;;  %v11515_v40 = vsub.f32 %v5184_v1, %v11509_v58  ;;  %v5148_v2 = vmul.f32 0.5, %v5116_v25  ;;  %v11526_v60 = vpop.permute.xlu1 %5230 }
 0x4ec   : > { %v6710_v38 = vpop.eup %6709  ;;  %v5146_v55 = vmul.f32 0.5, %v5114_v0  ;;  %5790 = vmatmul.f32.gmra.mxu1 %v11120_v6  ;;  %12669 = vst [vmem:[#allocation51_spill] sm:$0xff] %v11526_v60 }
 0x4ed   : > { %v5112_v33 = vadd.f32 1.0, %v6710_v38  ;;  %v11518_v46 = vand.u32 4294901760, %v5182_v19  ;;  %6046 = vmatpush.msra.mxu0 %v11515_v40  ;;  %v12062_v57 = vand.u32 4294901760, %v11515_v40 }
 0x4ef   : > { %v5598_v36 = vpop.f32.mrf.mxu3  ;;  %v5144_v1 = vmul.f32 0.5, %v5112_v33  ;;  %5818 = vmatpush.msrb.mxu2 %v11518_v46  ;;  %6121 = vmatpush.msra.mxu1 %v11518_v46  ;;  %v11533_v0 = vsub.f32 %v5182_v19, %v11518_v46 }
 0x4f0   : > { %v5305_v5 = vpop.f32.mrf.mxu0  ;;  %v5450_v9 = vpop.f32.mrf.mxu1 }
 0x4f1   : > { %v5451_v3 = vadd.f32 %v5450_v9, %v5298_v26  ;;  %v5528_v32 = vpop.f32.mrf.mxu2  ;;  %v5180_v26 = vmul.f32 %v5148_v2, %v11459_v14  ;;  %v5178_v9 = vmul.f32 %v5146_v55, %v11464_v62  ;;  %v5306_v14 = vadd.f32 %v5305_v5, %v11526_v60  ;;  %6049 = vmatpush.msra.mxu0 %v11533_v0 }
 0x4f2   : > { %v5176_v62 = vmul.f32 %v5144_v1, %v11477_v61 }
 0x4f3   : > { %v5529_v45 = vadd.f32 %v5528_v32, %v5451_v3  ;;  %v11530_v38 = vand.u32 4294901760, %v5180_v26  ;;  %v5955_v3 = vsub.f32 %v11515_v40, %v12062_v57  ;;  %v12063_v32 = vand.u32 4294901760, %v11533_v0 }
 0x4f5   : > { %v11524_v63 = vadd.f32 %v5598_v36, %v5529_v45  ;;  %v11539_v36 = vand.u32 4294901760, %v5178_v9  ;;  %5820 = vmatpush.msrb.mxu2 %v11530_v38  ;;  %v11545_v25 = vsub.f32 %v5180_v26, %v11530_v38  ;;  %6123 = vmatpush.msra.mxu1 %v11530_v38  ;;  %v11549_v45 = vand.u32 4294901760, %v5176_v62 }
 0x4f6   : > { %v5956_v5 = vand.u32 4294901760, %v5955_v3  ;;  %v5961_v26 = vsub.f32 %v11533_v0, %v12063_v32 }
 0x4f7   : > { %v11552_v55 = vsub.f32 %v5178_v9, %v11539_v36  ;;  %v5604_v1 = vpop.f32.mrf.mxu3  ;;  %5822 = vmatpush.msrb.mxu2 %v11539_v36  ;;  %6052 = vmatpush.msra.mxu0 %v11545_v25  ;;  %v12065_v57 = vand.u32 4294901760, %v11545_v25  ;;  %v11562_v3 = vsub.f32 %v5176_v62, %v11549_v45 }
 0x4f8   : > { %v5313_v19 = vpop.f32.mrf.mxu0  ;;  %6125 = vmatpush.msra.mxu1 %v11539_v36  ;;  %5957 = vmatpush.msrb.mxu3 %v5956_v5 }
 0x4f9   : > { %v5454_v2 = vpop.f32.mrf.mxu1  ;;  %v5533_v33 = vpop.f32.mrf.mxu2  ;;  %5824 = vmatpush.msrb.mxu2 %v11549_v45  ;;  %6055 = vmatpush.msra.mxu0 %v11552_v55  ;;  %v5967_v32 = vsub.f32 %v11545_v25, %v12065_v57 }
 0x4fa   : > { %v5455_v61 = vadd.f32 %v5454_v2, %v5306_v14  ;;  %v12066_v14 = vand.u32 4294901760, %v11552_v55  ;;  %v5962_v2 = vand.u32 4294901760, %v5961_v26  ;;  %6127 = vmatpush.msra.mxu1 %v11549_v45  ;;  %5830 = vmatmul.f32.vlgmr.msrb.gmra.mxu2 %v10918_v21  ;;  %v12671_v26 = vand.u32 4294901760, %v11291_v11 }
 0x4fb   : > { %v5968_v60 = vand.u32 4294901760, %v5967_v32  ;;  %6058 = vmatpush.msra.mxu0 %v11562_v3  ;;  %6131 = vmatmul.f32.vlgmr.msra.gmra.mxu1 %v10861_v10  ;;  %v12674_v10 = vand.u32 4294901760, %v11328_v34 }
 0x4fc   : > { %v5534_v9 = vadd.f32 %v5533_v33, %v5455_v61  ;;  %v5973_v62 = vsub.f32 %v11552_v55, %v12066_v14  ;;  %v12067_v61 = vand.u32 4294901760, %v11562_v3  ;;  %v11578_v33 = vpop.permute.xlu2 %5235  ;;  %6176 = vmatpush.msra.mxu2 %v12671_v26  ;;  %5963 = vmatpush.msrb.mxu3 %v5962_v2 }
 0x4fd   : > { %12670 = vst [vmem:[#allocation20_spill] sm:$0xff] %v11578_v33  ;;  %v5314_v57 = vadd.f32 %v5313_v19, %v11578_v33  ;;  %6061 = vmatmul.f32.vlgmr.msra.gmra.mxu0 %v10838_v56  ;;  %v12673_v19 = vand.u32 4294901760, %v11321_v15  ;;  %v12676_v56 = vand.u32 4294901760, %v11360_v12 }
 0x4fe   : > { %v11575_v5 = vadd.f32 %v5604_v1, %v5534_v9  ;;  %v5979_v21 = vsub.f32 %v11562_v3, %v12067_v61  ;;  %v12672_v1 = vand.u32 4294901760, %v11313_v42  ;;  %5969 = vmatpush.msrb.mxu3 %v5968_v60  ;;  %v5974_v9 = vand.u32 4294901760, %v5973_v62 }
 0x500   : > { %6180 = vmatpush.msra.mxu2 %v12672_v1  ;;  %v11590_v14 = vpop.f32.mrf.mxu0  ;;  %5975 = vmatpush.msrb.mxu3 %v5974_v9  ;;  %v5980_v61 = vand.u32 4294901760, %v5979_v21  ;;  %v6329_v21 = vld [vmem:[%s11672_s13 + $0x10] sm:$0xff]  ;;  %v6331_v1 = vld [vmem:[%s11672_s13 + $0x20] sm:$0xff] }
 0x501   : > { %v5458_v11 = vpop.f32.mrf.mxu1  ;;  %v5538_v32 = vpop.f32.mrf.mxu2 }
 0x502   : > { %v5459_v2 = vadd.f32 %v5458_v11, %v5314_v57  ;;  %v5610_v26 = vpop.f32.mrf.mxu3  ;;  %6184 = vmatpush.msra.mxu2 %v12673_v19  ;;  %5981 = vmatpush.msrb.mxu3 %v5980_v61  ;;  %v12675_v57 = vand.u32 4294901760, %v11347_v18  ;;  %v12677_v18 = vand.u32 4294901760, %v11382_v22  ;;  %v12686_v22 = vand.u32 4294901760, %v11562_v3  ;;  %v12695_v3 = vld [vmem:[#allocation21_spill] sm:$0xff]  ;;  %v12697_v61 = vld [vmem:[#allocation10_spill] sm:$0xff]  ;;  %v12698_v11 = vld [vmem:[#allocation52_spill] sm:$0xff] }
 0x503   : > { %5838 = vmatmul.f32.gmra.mxu2 %v10985_v30  ;;  %5983 = vmatmul.f32.vlgmr.msrb.gmra.mxu3 %v10813_v49  ;;  %v6357_v19 = vperm.slane %v6329_v21, 0 }
 0x504   : > { %v5539_v33 = vadd.f32 %v5538_v32, %v5459_v2  ;;  %6188 = vmatpush.msra.mxu2 %v12674_v10  ;;  %6267 = vmatpush.msra.mxu3 %v11280_v27  ;;  %v12679_v27 = vand.u32 4294901760, %v11401_v53  ;;  %v12682_v53 = vand.u32 4294901760, %v11515_v40  ;;  %v12699_v2 = vld [vmem:[#allocation17_spill] sm:$0xff]  ;;  %v6381_v10 = vperm.slane %v6331_v1, 0 }
 0x505   : > { %6137 = vmatmul.f32.gmra.mxu1 %v10939_v43  ;;  %6066 = vmatmul.f32.gmra.mxu0 %v10907_v37  ;;  %v12678_v43 = vand.u32 4294901760, %v11395_v41  ;;  %v12680_v37 = vand.u32 4294901760, %v11448_v50 }
 0x506   : > { %v11599_v42 = vadd.f32 %v5610_v26, %v5539_v33  ;;  %6192 = vmatpush.msra.mxu2 %v12675_v57  ;;  %6269 = vmatpush.msra.mxu3 %v11301_v52  ;;  %v6327_v33 = vld [vmem:[%s11672_s13] sm:$0xff] }
 0x507   : > { %v6333_v26 = vperm.slane %v6327_v33, 0 }
 0x508   : > { %6196 = vmatpush.msra.mxu2 %v12676_v56  ;;  %v5329_v15 = vpop.f32.mrf.mxu0  ;;  %6271 = vmatpush.msra.mxu3 %v11307_v35  ;;  %v6337_v56 = vperm.slane %v6327_v33, 1 }
 0x509   : > { %v11608_v34 = vpop.f32.mrf.mxu1  ;;  %v11610_v30 = vpop.f32.mrf.mxu2  ;;  %v6361_v15 = vperm.slane %v6329_v21, 1 }
 0x50a   : > { %v11612_v60 = vpop.f32.mrf.mxu3  ;;  %6200 = vmatpush.msra.mxu2 %v12677_v18  ;;  %6273 = vmatpush.msra.mxu3 %v11315_v51  ;;  %v12681_v51 = vand.u32 4294901760, %v11495_v20  ;;  %v12691_v20 = vld [vmem:[#allocation64_spill] sm:$0xff]  ;;  %v6385_v18 = vperm.slane %v6331_v1, 1 }
 0x50b   : > { %5846 = vmatmul.f32.gmra.mxu2 %v11023_v59  ;;  %5987 = vmatmul.f32.gmra.mxu3 %v10874_v29 }
 0x50c   : > { %6204 = vmatpush.msra.mxu2 %v12678_v43  ;;  %6275 = vmatpush.msra.mxu3 %v11333_v17  ;;  %v12700_v43 = vld [vmem:[#allocation14_spill] sm:$0xff] }
 0x50d   : > { %6143 = vmatmul.f32.gmra.mxu1 %v10990_v4  ;;  %6071 = vmatmul.f32.gmra.mxu0 %v10964_v31  ;;  %v12683_v4 = vand.u32 4294901760, %v11533_v0  ;;  %v12684_v31 = vand.u32 4294901760, %v11545_v25  ;;  %v12693_v25 = vld [vmem:[#allocation78_spill] sm:$0xff] }
 0x50e   : > { %6208 = vmatpush.msra.mxu2 %v12679_v27  ;;  %6277 = vmatpush.msra.mxu3 %v11344_v47 }
 0x510   : > { %6212 = vmatpush.msra.mxu2 %v12680_v37  ;;  %v5336_v12 = vpop.f32.mrf.mxu0  ;;  %6279 = vmatpush.msra.mxu3 %v11364_v23 }
 0x511   : > { %v5466_v52 = vpop.f32.mrf.mxu1  ;;  %v5548_v35 = vpop.f32.mrf.mxu2 }
 0x512   : > { %v5622_v59 = vpop.f32.mrf.mxu3  ;;  %6216 = vmatpush.msra.mxu2 %v12681_v51  ;;  %6281 = vmatpush.msra.mxu3 %v11379_v28  ;;  %v12685_v28 = vand.u32 4294901760, %v11552_v55  ;;  %v12694_v55 = vld [vmem:[#allocation37_spill] sm:$0xff]  ;;  %v11682_v12 = vpop.permute.xlu0 %5240  ;;  %v12701_v52 = vld [vmem:[#allocation16_spill] sm:$0xff] }
 0x513   : > { %5854 = vmatmul.f32.gmra.mxu2 %v11051_v8  ;;  %5991 = vmatmul.f32.gmra.mxu3 %v10942_v39  ;;  %v5322_v35 = vadd.f32 %v11590_v14, %v11682_v12  ;;  %v6391_v14 = vperm.slane %v6331_v1, 2 }
 0x514   : > { %6220 = vmatpush.msra.mxu2 %v12682_v53  ;;  %6283 = vmatpush.msra.mxu3 %v11387_v54  ;;  %v12688_v54 = vld [vmem:[#allocation76_spill] sm:$0xff] }
 0x515   : > { %6149 = vmatmul.f32.gmra.mxu1 %v11021_v44  ;;  %6076 = vmatmul.f32.gmra.mxu0 %v11003_v24  ;;  %v12687_v44 = vld [vmem:[#allocation13_spill] sm:$0xff] }
 0x516   : > { %6224 = vmatpush.msra.mxu2 %v12683_v4  ;;  %6285 = vmatpush.msra.mxu3 %v11427_v48 }
 0x518   : > { %6228 = vmatpush.msra.mxu2 %v12684_v31  ;;  %v5343_v17 = vpop.f32.mrf.mxu0  ;;  %6287 = vmatpush.msra.mxu3 %v11487_v13  ;;  %v12689_v13 = vld [vmem:[#allocation68_spill] sm:$0xff] }
 0x519   : > { %v5469_v47 = vpop.f32.mrf.mxu1  ;;  %v5552_v23 = vpop.f32.mrf.mxu2  ;;  %v5463_v17 = vadd.f32 %v11608_v34, %v5322_v35 }
 0x51a   : > { %v5627_v8 = vpop.f32.mrf.mxu3  ;;  %6232 = vmatpush.msra.mxu2 %v12685_v28  ;;  %6289 = vmatpush.msra.mxu3 %v11509_v58  ;;  %v12692_v58 = vld [vmem:[#allocation38_spill] sm:$0xff] }
 0x51b   : > { %5862 = vmatmul.f32.gmra.mxu2 %v11088_v7  ;;  %5995 = vmatmul.f32.gmra.mxu3 %v12687_v44  ;;  %v12690_v7 = vld [vmem:[#allocation33_spill] sm:$0xff] }
 0x51c   : > { %6236 = vmatpush.msra.mxu2 %v12686_v22  ;;  %6291 = vmatpush.msra.mxu3 %v11518_v46  ;;  %v6343_v22 = vperm.slane %v6327_v33, 2 }
 0x51d   : > { %6155 = vmatmul.f32.gmra.mxu1 %v12688_v54  ;;  %6081 = vmatmul.f32.gmra.mxu0 %v12689_v13  ;;  %v6367_v54 = vperm.slane %v6329_v21, 2 }
 0x51e   : > { %6293 = vmatpush.msra.mxu3 %v11530_v38 }
 0x520   : > { %v5350_v24 = vpop.f32.mrf.mxu0  ;;  %6295 = vmatpush.msra.mxu3 %v11539_v36  ;;  %v12696_v36 = vld [vmem:[#allocation26_spill] sm:$0xff] }
 0x521   : > { %v5472_v41 = vpop.f32.mrf.mxu1  ;;  %v5556_v48 = vpop.f32.mrf.mxu2  ;;  %v5544_v24 = vadd.f32 %v11610_v30, %v5463_v17  ;;  %v6397_v30 = vperm.slane %v6331_v1, 3 }
 0x522   : > { %v5632_v50 = vpop.f32.mrf.mxu3  ;;  %6297 = vmatpush.msra.mxu3 %v11549_v45 }
 0x523   : > { %5869 = vmatmul.f32.gmra.mxu2 %v12690_v7  ;;  %5999 = vmatmul.f32.gmra.mxu3 %v12691_v20 }
 0x525   : > { %6160 = vmatmul.f32.gmra.mxu1 %v12692_v58  ;;  %6085 = vmatmul.f32.gmra.mxu0 %v12693_v25  ;;  %v5617_v58 = vadd.f32 %v11612_v60, %v5544_v24  ;;  %v6373_v25 = vperm.slane %v6329_v21, 3 }
 0x528   : > { %v5705_v46 = vpop.f32.mrf.mxu0 }
 0x529   : > { %v5475_v40 = vpop.f32.mrf.mxu1  ;;  %v5560_v38 = vpop.f32.mrf.mxu2  ;;  %v5706_v9 = vadd.f32 %v5705_v46, %v11524_v63 }
 0x52a   : > { %v5637_v0 = vpop.f32.mrf.mxu3 }
 0x52b   : > { %5876 = vmatmul.f32.gmra.mxu2 %v12694_v55  ;;  %6002 = vmatmul.f32.gmra.mxu3 %v12695_v3  ;;  %v6349_v0 = vperm.slane %v6327_v33, 3 }
 0x52d   : > { %6165 = vmatmul.f32.gmra.mxu1 %v12696_v36  ;;  %6089 = vmatmul.f32.gmra.mxu0 %v12697_v61 }
 0x530   : > { %v5709_v45 = vpop.f32.mrf.mxu0 }
 0x531   : > { %v5766_v62 = vpop.f32.mrf.mxu1  ;;  %v5710_v57 = vadd.f32 %v5709_v45, %v11575_v5 }
 0x532   : > { %v5767_v32 = vadd.f32 %v5766_v62, %v5706_v9 }
 0x533   : > { %5883 = vmatmul.f32.gmra.mxu2 %v12698_v11  ;;  %6005 = vmatmul.f32.gmra.mxu3 %v12699_v2 }
 0x534   : > { %v6335_v59 = vmul.f32 %v6333_v26, %v5767_v32  ;;  %v6359_v51 = vmul.f32 %v6357_v19, %v5767_v32  ;;  %v6383_v53 = vmul.f32 %v6381_v10, %v5767_v32 }
 0x535   : > { %6170 = vmatmul.f32.gmra.mxu1 %v12700_v43  ;;  %6093 = vmatmul.f32.gmra.mxu0 %v12701_v52  ;;  %v12702_v52 = vld [vmem:[#allocation51_spill] sm:$0xff] }
 0x538   : > { %v5713_v27 = vpop.f32.mrf.mxu0 }
 0x539   : > { %v5770_v37 = vpop.f32.mrf.mxu1  ;;  %v5714_v28 = vadd.f32 %v5713_v27, %v11599_v42 }
 0x53a   : > { %v5771_v63 = vadd.f32 %v5770_v37, %v5710_v57 }
 0x53b   : > { %6008 = vmatmul.f32.gmra.mxu3 %v11120_v6  ;;  %6238 = vmatmul.f32.vlgmr.msra.gmra.mxu2 %v10813_v49 }
 0x53c   : > { %v6339_v4 = vmul.f32 %v6337_v56, %v5771_v63  ;;  %v6363_v5 = vmul.f32 %v6361_v15, %v5771_v63  ;;  %v6387_v31 = vmul.f32 %v6385_v18, %v5771_v63 }
 0x53e   : > { %v6341_v47 = vadd.f32 %v6339_v4, %v6335_v59  ;;  %v6365_v23 = vadd.f32 %v6363_v5, %v6359_v51  ;;  %v6389_v8 = vadd.f32 %v6387_v31, %v6383_v53  ;;  %v12703_v31 = vld [vmem:[#allocation20_spill] sm:$0xff] }
 0x540   : > { %v5717_v41 = vpop.f32.mrf.mxu0 }
 0x541   : > { %v5774_v48 = vpop.f32.mrf.mxu1  ;;  %v5718_v38 = vadd.f32 %v5717_v41, %v5617_v58 }
 0x542   : > { %v5775_v50 = vadd.f32 %v5774_v48, %v5714_v28 }
 0x543   : > { %6242 = vmatmul.f32.gmra.mxu2 %v10874_v29  ;;  %6299 = vmatmul.f32.vlgmr.msra.gmra.mxu3 %v10813_v49 }
 0x544   : > { %v6345_v13 = vmul.f32 %v6343_v22, %v5775_v50  ;;  %v6369_v7 = vmul.f32 %v6367_v54, %v5775_v50  ;;  %v6393_v34 = vmul.f32 %v6391_v14, %v5775_v50 }
 0x546   : > { %v6347_v40 = vadd.f32 %v6345_v13, %v6341_v47  ;;  %v6371_v46 = vadd.f32 %v6369_v7, %v6365_v23  ;;  %v6395_v42 = vadd.f32 %v6393_v34, %v6389_v8 }
 0x548   : > { %v5721_v36 = vpop.f32.mrf.mxu0 }
 0x549   : > { %v5778_v55 = vpop.f32.mrf.mxu1 }
 0x54a   : > { %v5779_v45 = vadd.f32 %v5778_v55, %v5718_v38 }
 0x54b   : > { %6246 = vmatmul.f32.gmra.mxu2 %v10942_v39  ;;  %6303 = vmatmul.f32.gmra.mxu3 %v10874_v29 }
 0x54c   : > { %v6351_v62 = vmul.f32 %v6349_v0, %v5779_v45  ;;  %v6375_v61 = vmul.f32 %v6373_v25, %v5779_v45  ;;  %v6399_v9 = vmul.f32 %v6397_v30, %v5779_v45 }
 0x54e   : > { %v6353_v60 = vadd.f32 %v6351_v62, %v6347_v40  ;;  %v6377_v49 = vadd.f32 %v6375_v61, %v6371_v46  ;;  %v6401_v11 = vadd.f32 %v6399_v9, %v6395_v42  ;;  %v6328_v9 = vld [vmem:[%s11672_s13 + $0x8] sm:$0xff] }
 0x550   : > { %6355 = vst [vmem:[%s11699_s29] sm:$0xff] %v6353_v60  ;;  %v6330_v60 = vld [vmem:[%s11672_s13 + $0x18] sm:$0xff] }
 0x551   : > { %6379 = vst [vmem:[%s11699_s29 + $0x10] sm:$0xff] %v6377_v49  ;;  %v5782_v33 = vpop.f32.mrf.mxu1  ;;  %v6332_v49 = vld [vmem:[%s11672_s13 + $0x28] sm:$0xff]  ;;  %s6725_s13 = sshra.s32 %s6421_s25, 4  ;;  %s6726_s13 = int_to_ptr.hbm [resolvable:$true] %s6725_s13 }
 0x552   : > { %6403 = vst [vmem:[%s11699_s29 + $0x20] sm:$0xff] %v6401_v11  ;;  %s6727_s16 = scalar_lea.hbm %s6726_s13, 48  ;;  %p6732_p2 = scmp.lt.s32.totalorder %s6726_s13, %s11778_s12 }
 0x553   : > { %6250 = vmatmul.f32.gmra.mxu2 %v12687_v44  ;;  %6307 = vmatmul.f32.gmra.mxu3 %v10942_v39  ;;  %v5724_v21 = vpop.f32.mrf.mxu0  ;;  %p6728_p13 = scmp.ne.s32.totalorder %s6726_s13, %s6727_s16  ;;  %p6733_p3 = scmp.lt.s32.totalorder %s6731_s20, %s6727_s16 }
 0x554   : > { %v6334_v21 = vperm.slane %v6328_v9, 0 }
 0x555   : > { %p6729_p0 = pnand %p6728_p13, %p6887_p6  ;;  %p6734_p4 = por %p6733_p3, %p6732_p2 }
 0x557   : > { %p6730_p1 = pneg %p6729_p0 }
 0x559   : > { %v5785_v29 = vpop.f32.mrf.mxu1  ;;  %p6735_p5 = pnand %p6734_p4, %p6730_p1 }
 0x55a   : > { %v6358_v29 = vperm.slane %v6330_v60, 0 }
 0x55b   : > { %6311 = vmatmul.f32.gmra.mxu3 %v12687_v44  ;;  %6254 = vmatmul.f32.gmra.mxu2 %v12691_v20  ;;  %v5727_v1 = vpop.f32.mrf.mxu0 }
 0x55c   : > { %v6382_v1 = vperm.slane %v6332_v49, 0 }
 0x561   : > { %v5788_v32 = vpop.f32.mrf.mxu1 }
 0x563   : > { %6315 = vmatmul.f32.gmra.mxu3 %v12691_v20  ;;  %6257 = vmatmul.f32.gmra.mxu2 %v12695_v3  ;;  %v5730_v26 = vpop.f32.mrf.mxu0 }
 0x564   : > { %v6338_v26 = vperm.slane %v6328_v9, 1 }
 0x569   : > { %v5791_v19 = vpop.f32.mrf.mxu1 }
 0x56a   : > { %v6362_v19 = vperm.slane %v6330_v60, 1 }
 0x56b   : > { %6318 = vmatmul.f32.gmra.mxu3 %v12695_v3  ;;  %6260 = vmatmul.f32.gmra.mxu2 %v12699_v2 }
 0x573   : > { %6321 = vmatmul.f32.gmra.mxu3 %v12699_v2  ;;  %6263 = vmatmul.f32.gmra.mxu2 %v11120_v6 }
 0x578   : > { %v6132_v39 = vpop.f32.mrf.mxu1 }
 0x57a   : > { %v6062_v44 = vpop.f32.mrf.mxu0 }
 0x57b   : > { %6324 = vmatmul.f32.gmra.mxu3 %v11120_v6 }
 0x57d   : > { %v5831_v10 = vpop.f32.mrf.mxu2 }
 0x57e   : > { %v5832_v56 = vadd.f32 %v5831_v10, %v11505_v16 }
 0x582   : > { %v6138_v57 = vpop.f32.mrf.mxu1  ;;  %v6067_v20 = vpop.f32.mrf.mxu0 }
 0x586   : > { %v5839_v15 = vpop.f32.mrf.mxu2  ;;  %v5984_v18 = vpop.f32.mrf.mxu3 }
 0x587   : > { %v5985_v43 = vadd.f32 %v5984_v18, %v5832_v56  ;;  %v5840_v2 = vadd.f32 %v5839_v15, %v12702_v52 }
 0x589   : > { %v6063_v3 = vadd.f32 %v6062_v44, %v5985_v43 }
 0x58a   : > { %v6144_v27 = vpop.f32.mrf.mxu1  ;;  %v6072_v63 = vpop.f32.mrf.mxu0 }
 0x58b   : > { %v6133_v37 = vadd.f32 %v6132_v39, %v6063_v3  ;;  %v6386_v39 = vperm.slane %v6332_v49, 1 }
 0x58e   : > { %v5847_v35 = vpop.f32.mrf.mxu2  ;;  %v5988_v59 = vpop.f32.mrf.mxu3 }
 0x58f   : > { %v5989_v51 = vadd.f32 %v5988_v59, %v5840_v2  ;;  %v5848_v17 = vadd.f32 %v5847_v35, %v12703_v31  ;;  %v6344_v2 = vperm.slane %v6328_v9, 2  ;;  %v6368_v35 = vperm.slane %v6330_v60, 2 }
 0x590   : > { %v6392_v59 = vperm.slane %v6332_v49, 2 }
 0x591   : > { %v6068_v53 = vadd.f32 %v6067_v20, %v5989_v51 }
 0x592   : > { %v6150_v6 = vpop.f32.mrf.mxu1  ;;  %v6077_v5 = vpop.f32.mrf.mxu0 }
 0x593   : > { %v6139_v4 = vadd.f32 %v6138_v57, %v6068_v53 }
 0x596   : > { %v5855_v47 = vpop.f32.mrf.mxu2  ;;  %v5992_v16 = vpop.f32.mrf.mxu3 }
 0x597   : > { %v5993_v23 = vadd.f32 %v5992_v16, %v5848_v17  ;;  %v5856_v14 = vadd.f32 %v5855_v47, %v11682_v12 }
 0x599   : > { %v6073_v8 = vadd.f32 %v6072_v63, %v5993_v23 }
 0x59a   : > { %v6156_v28 = vpop.f32.mrf.mxu1  ;;  %v6082_v54 = vpop.f32.mrf.mxu0 }
 0x59b   : > { %v6145_v22 = vadd.f32 %v6144_v27, %v6073_v8  ;;  %v6350_v8 = vperm.slane %v6328_v9, 3  ;;  %v6374_v28 = vperm.slane %v6330_v60, 3 }
 0x59e   : > { %v5863_v24 = vpop.f32.mrf.mxu2  ;;  %v5996_v41 = vpop.f32.mrf.mxu3 }
 0x59f   : > { %v5997_v48 = vadd.f32 %v5996_v41, %v5856_v14 }
 0x5a1   : > { %v6078_v50 = vadd.f32 %v6077_v5, %v5997_v48 }
 0x5a2   : > { %v6161_v13 = vpop.f32.mrf.mxu1  ;;  %v6086_v34 = vpop.f32.mrf.mxu0 }
 0x5a3   : > { %v6151_v7 = vadd.f32 %v6150_v6, %v6078_v50 }
 0x5a6   : > { %v5870_v58 = vpop.f32.mrf.mxu2  ;;  %v6000_v40 = vpop.f32.mrf.mxu3 }
 0x5aa   : > { %v6166_v46 = vpop.f32.mrf.mxu1  ;;  %v6090_v42 = vpop.f32.mrf.mxu0 }
 0x5ae   : > { %v5877_v38 = vpop.f32.mrf.mxu2  ;;  %v6003_v0 = vpop.f32.mrf.mxu3 }
 0x5b2   : > { %v6171_v25 = vpop.f32.mrf.mxu1  ;;  %v6094_v30 = vpop.f32.mrf.mxu0 }
 0x5b6   : > { %v5884_v55 = vpop.f32.mrf.mxu2  ;;  %v6006_v12 = vpop.f32.mrf.mxu3 }
 0x5be   : > { %v6009_v36 = vpop.f32.mrf.mxu3  ;;  %v6239_v45 = vpop.f32.mrf.mxu2 }
 0x5bf   : > { %v6240_v11 = vadd.f32 %v6239_v45, %v6133_v37 }
 0x5c6   : > { %v6243_v62 = vpop.f32.mrf.mxu2  ;;  %v6300_v61 = vpop.f32.mrf.mxu3 }
 0x5c7   : > { %v6301_v33 = vadd.f32 %v6300_v61, %v6240_v11  ;;  %v6244_v32 = vadd.f32 %v6243_v62, %v6139_v4 }
 0x5c9   : > { %v6336_v20 = vmul.f32 %v6334_v21, %v6301_v33  ;;  %v6360_v56 = vmul.f32 %v6358_v29, %v6301_v33  ;;  %v6384_v15 = vmul.f32 %v6382_v1, %v6301_v33 }
 0x5ce   : > { %v6247_v44 = vpop.f32.mrf.mxu2  ;;  %v6304_v10 = vpop.f32.mrf.mxu3 }
 0x5cf   : > { %v6305_v57 = vadd.f32 %v6304_v10, %v6244_v32  ;;  %v6248_v52 = vadd.f32 %v6247_v44, %v6145_v22  ;;  %v6398_v22 = vperm.slane %v6332_v49, 3 }
 0x5d1   : > { %v6340_v18 = vmul.f32 %v6338_v26, %v6305_v57  ;;  %v6364_v43 = vmul.f32 %v6362_v19, %v6305_v57  ;;  %v6388_v3 = vmul.f32 %v6386_v39, %v6305_v57 }
 0x5d3   : > { %v6342_v27 = vadd.f32 %v6340_v18, %v6336_v20  ;;  %v6366_v37 = vadd.f32 %v6364_v43, %v6360_v56  ;;  %v6390_v63 = vadd.f32 %v6388_v3, %v6384_v15 }
 0x5d6   : > { %v6251_v51 = vpop.f32.mrf.mxu2  ;;  %v6308_v53 = vpop.f32.mrf.mxu3 }
 0x5d7   : > { %v6309_v6 = vadd.f32 %v6308_v53, %v6248_v52  ;;  %v6252_v23 = vadd.f32 %v6251_v51, %v6151_v7 }
 0x5d9   : > { %v6346_v4 = vmul.f32 %v6344_v2, %v6309_v6  ;;  %v6370_v5 = vmul.f32 %v6368_v35, %v6309_v6  ;;  %v6394_v31 = vmul.f32 %v6392_v59, %v6309_v6 }
 0x5db   : > { %v6348_v17 = vadd.f32 %v6346_v4, %v6342_v27  ;;  %v6372_v47 = vadd.f32 %v6370_v5, %v6366_v37  ;;  %v6396_v16 = vadd.f32 %v6394_v31, %v6390_v63 }
 0x5de   : > { %v6312_v54 = vpop.f32.mrf.mxu3  ;;  %v6255_v14 = vpop.f32.mrf.mxu2 }
 0x5df   : > { %v6313_v24 = vadd.f32 %v6312_v54, %v6252_v23 }
 0x5e1   : > { %v6352_v41 = vmul.f32 %v6350_v8, %v6313_v24  ;;  %v6376_v48 = vmul.f32 %v6374_v28, %v6313_v24  ;;  %v6400_v50 = vmul.f32 %v6398_v22, %v6313_v24 }
 0x5e3   : > { %v6354_v13 = vadd.f32 %v6352_v41, %v6348_v17  ;;  %v6378_v7 = vadd.f32 %v6376_v48, %v6372_v47  ;;  %v6402_v34 = vadd.f32 %v6400_v50, %v6396_v16 }
 0x5e5   : > { %6356 = vst [vmem:[%s11699_s29 + $0x8] sm:$0xff] %v6354_v13 }
 0x5e6   : > { %6380 = vst [vmem:[%s11699_s29 + $0x18] sm:$0xff] %v6378_v7  ;;  %v6316_v58 = vpop.f32.mrf.mxu3  ;;  %v6258_v40 = vpop.f32.mrf.mxu2 }
 0x5e7   : > { %6404 = vst [vmem:[%s11699_s29 + $0x28] sm:$0xff] %v6402_v34 }
 0x5e8   : > { %6738 = shalt.err (!%p6735_p5)
}
 0x5e9   : > { %s6777_s17 = smov 256   ;;  %s6778_s29 = smov 512  }
 0x5ea   : > { %s6779_s2 = smov 16  }
 0x5eb   : > { %6526 = dma.vmem_to_hbm [thread:$0]  (%p6887_p6), %s11730_s26, 768, %s6421_s25, %s6406_s28, %s6777_s17, %s6778_s29, %s6779_s2  }
 0x5ee   : > { %v6319_v46 = vpop.f32.mrf.mxu3  ;;  %v6261_v42 = vpop.f32.mrf.mxu2 }
 0x5f6   : > { %v6322_v38 = vpop.f32.mrf.mxu3  ;;  %v6264_v0 = vpop.f32.mrf.mxu2 }
 0x5fe   : > { %v6325_v25 = vpop.f32.mrf.mxu3 }
 0x5ff PF: > { %s6435_s0 = sand.u32 1, %s6761_s21   ;;  %p6529_p7 = pnand %p6509_p9, %p6891_p8 }
 0x600   : > { %s6436_s1 = scalar_lea.sflag [#allocation5], %s6435_s0 }
 0x601   : > { %p6530_p10 = pneg %p6529_p7 }
 0x603   : > { %6756 = dma.done.wait (%p6530_p10), %s6436_s1, 768  }
 0x604   : > { %6758 = vsyncadd (%p6530_p10), %s6436_s1, 4294966528  ;;  %p22_p6 = scmp.ge.s32.totalorder %s6868_s27, 4   ;;  %s12704_s21 = smov %s6765_s22 }
 0x605   : > { %s12705_s22 = smov %s6769_s23  ;;  %s12706_s23 = smov %s6881_s30 }
 0x606   : > { %s12707_s24 = smov %s6868_s27  ;;  %24 = sbr.rel (!%p22_p6) target bundleno = 7 (0x7), region = 162 }
 0x60b   :  { %6442 = vsyncpa [#allocation5], 1 }
 0x60c   :  { %6444 = vsyncpa [#allocation5 + $0x1], 1 }

</bundles_post_ra>
